<compile_context>
chip_gen: v5e
topology: v5e:2x2
jax: 0.10.0
libtpu: 0.0.40
codegen_flags: <defaults>
</compile_context>

<pallas_src>
import functools

import jax
import jax.numpy as jnp
from jax.experimental import pallas as pl
from jax.experimental.pallas import tpu as pltpu

_VMEM = pltpu.MemorySpace.VMEM
HEAD_DIMS = (5, 3, 2, 3, 3, 3, 3, 2)
STAGE_STRIDES = (1, 2, 2, 2)


def _round_up(x, m):
    return (x + m - 1) // m * m


# ----------------------------------------------------------------------------
# Fused gridded matmul kernel:  out = act((x @ w) * scale + bias [+ res])
# ----------------------------------------------------------------------------
def _mm_fused_kernel(*refs, relu, has_res):
    if has_res:
        x_ref, w_ref, s_ref, b_ref, r_ref, o_ref, acc_ref = refs
    else:
        x_ref, w_ref, s_ref, b_ref, o_ref, acc_ref = refs
        r_ref = None
    k = pl.program_id(2)

    @pl.when(k == 0)
    def _():
        acc_ref[...] = jnp.zeros_like(acc_ref)

    acc_ref[...] += jnp.dot(x_ref[...], w_ref[...],
                            preferred_element_type=jnp.float32)

    @pl.when(k == pl.num_programs(2) - 1)
    def _():
        y = acc_ref[...] * s_ref[...] + b_ref[...]     # f32 epilogue
        if has_res:
            y = y + r_ref[...]
        if relu:
            y = jnp.maximum(y, 0.0)
        o_ref[...] = y.astype(o_ref.dtype)


def matmul_fused(x, w, scale, bias, *, relu, residual=None):
    """x:(M,K) w:(K,N) scale/bias:(N,) residual:(M,N) or None -> (M,N) f32."""
    m, k = x.shape
    n = w.shape[1]

    # Adaptive, VMEM-friendly tile sizes (multiples of (8,128); N/K prefer 256+).
    mp = _round_up(m, 8)
    if mp > 256:
        mp = _round_up(mp, 256)
        tm = 256
    else:
        tm = mp
    np_ = _round_up(n, 128)
    tn = 256 if np_ % 256 == 0 else 128
    kp = _round_up(k, 128)
    if kp % 512 == 0:
        tk = 512
    elif kp % 256 == 0:
        tk = 256
    else:
        tk = 128

    # bf16 MXU feeds; zero padding is harmless for matmul / scale / bias.
    xp = jnp.pad(x.astype(jnp.bfloat16), ((0, mp - m), (0, kp - k)))
    wp = jnp.pad(w.astype(jnp.bfloat16), ((0, kp - k), (0, np_ - n)))
    sp = jnp.pad(scale.reshape(1, n).astype(jnp.float32), ((0, 0), (0, np_ - n)))
    bp = jnp.pad(bias.reshape(1, n).astype(jnp.float32), ((0, 0), (0, np_ - n)))

    has_res = residual is not None
    ins = [xp, wp, sp, bp]
    in_specs = [
        pl.BlockSpec((tm, tk), lambda i, j, kk: (i, kk)),
        pl.BlockSpec((tk, tn), lambda i, j, kk: (kk, j)),
        pl.BlockSpec((1, tn), lambda i, j, kk: (0, j)),
        pl.BlockSpec((1, tn), lambda i, j, kk: (0, j)),
    ]
    if has_res:
        rp = jnp.pad(residual.astype(jnp.float32),
                     ((0, mp - m), (0, np_ - n)))
        ins.append(rp)
        in_specs.append(pl.BlockSpec((tm, tn), lambda i, j, kk: (i, j)))

    grid = (mp // tm, np_ // tn, kp // tk)
    bytes_accessed = (mp * kp + kp * np_) * 2 + mp * np_ * 4 * (2 if has_res else 1)
    kern = functools.partial(_mm_fused_kernel, relu=relu, has_res=has_res)

    out = pl.pallas_call(
        kern,
        out_shape=jax.ShapeDtypeStruct((mp, np_), jnp.float32),
        grid_spec=pltpu.PrefetchScalarGridSpec(
            num_scalar_prefetch=0,
            grid=grid,
            in_specs=in_specs,
            out_specs=pl.BlockSpec((tm, tn), lambda i, j, kk: (i, j)),
            scratch_shapes=[pltpu.VMEM((tm, tn), jnp.float32)],
        ),
        compiler_params=pltpu.CompilerParams(
            dimension_semantics=("parallel", "parallel", "arbitrary"),
            vmem_limit_bytes=32 * 1024 * 1024,
        ),
        cost_estimate=pl.CostEstimate(
            flops=2 * mp * np_ * kp,
            transcendentals=0,
            bytes_accessed=int(bytes_accessed),
        ),
    )(*ins)
    return out[:m, :n]


# ----------------------------------------------------------------------------
# Maxpool 3x3 / stride 2 / pad 1 — single Pallas kernel, no im2col blow-up.
# The padded input is split (in JAX, no size increase) into 4 stride-2 phases;
# the kernel takes unstrided slices of the phases and reduces with jnp.maximum.
# ----------------------------------------------------------------------------
def _maxpool_kernel(p00_ref, p01_ref, p10_ref, p11_ref, o_ref):
    _, ho, wo, _ = o_ref.shape
    phases = ((p00_ref, p01_ref), (p10_ref, p11_ref))
    acc = None
    for i in range(3):
        for j in range(3):
            ph = phases[i % 2][j % 2]
            oi, oj = i // 2, j // 2
            v = ph[:, oi:oi + ho, oj:oj + wo, :]
            acc = v if acc is None else jnp.maximum(acc, v)
    o_ref[...] = acc


def maxpool(x):
    n, h, w, c = x.shape
    k, stride, pad = 3, 2, 1
    ho = (h + 2 * pad - k) // stride + 1
    wo = (w + 2 * pad - k) // stride + 1
    hp = _round_up(h + 2 * pad, 2)
    wp = _round_up(w + 2 * pad, 2)
    xp = jnp.pad(x, ((0, 0), (pad, hp - h - pad), (pad, wp - w - pad), (0, 0)),
                 constant_values=-jnp.inf)
    phases = [xp[:, di::2, dj::2, :] for di in (0, 1) for dj in (0, 1)]
    return pl.pallas_call(
        _maxpool_kernel,
        out_shape=jax.ShapeDtypeStruct((n, ho, wo, c), jnp.float32),
        in_specs=[pl.BlockSpec(memory_space=_VMEM)] * 4,
        out_specs=pl.BlockSpec(memory_space=_VMEM),
    )(*phases)


# ----------------------------------------------------------------------------
# Global average pool + all 8 linear heads fused into one kernel.
# Head output is padded to a 128-lane slab (lane-dense store), sliced outside.
# ----------------------------------------------------------------------------
def _pool_heads_kernel(x_ref, w_ref, b_ref, o_ref):
    feats = jnp.mean(x_ref[...], axis=1)                       # (N, C) f32
    y = jnp.dot(feats.astype(jnp.bfloat16), w_ref[...],
                preferred_element_type=jnp.float32)
    o_ref[...] = y + b_ref[...]


def avgpool_heads(x, head_w, head_b):
    n, h, w, c = x.shape
    nh = head_w.shape[1]
    np_ = _round_up(nh, 128)
    wpad = jnp.pad(head_w, ((0, 0), (0, np_ - nh))).astype(jnp.bfloat16)
    bpad = jnp.pad(head_b, (0, np_ - nh)).reshape(1, np_).astype(jnp.float32)
    xr = x.reshape(n, h * w, c)
    out = pl.pallas_call(
        _pool_heads_kernel,
        out_shape=jax.ShapeDtypeStruct((n, np_), jnp.float32),
        in_specs=[pl.BlockSpec(memory_space=_VMEM)] * 3,
        out_specs=pl.BlockSpec(memory_space=_VMEM),
    )(xr, wpad, bpad)
    return out[:, :nh]


# ----------------------------------------------------------------------------
# Convolution (im2col glue for k>1, direct matmul for 1x1) + folded BN.
# ----------------------------------------------------------------------------
def _im2col(x, kh, kw, stride, pad):
    n, h, w, c = x.shape
    xp = jnp.pad(x, ((0, 0), (pad, pad), (pad, pad), (0, 0)))
    ho = (h + 2 * pad - kh) // stride + 1
    wo = (w + 2 * pad - kw) // stride + 1
    cols = []
    for i in range(kh):
        for j in range(kw):
            cols.append(xp[:, i:i + ho * stride:stride,
                           j:j + wo * stride:stride, :])
    patches = jnp.stack(cols, axis=3)           # (N, Ho, Wo, kh*kw, C)
    return patches, ho, wo


def conv_bn(x, w, scale, bias, *, stride, pad, relu, residual=None):
    """x:(N,H,W,Cin), w:(kh,kw,Cin,Cout). Conv + folded BN (+res, +ReLU)."""
    kh, kw, cin, cout = w.shape
    n = x.shape[0]
    if kh == 1 and kw == 1:
        xs = x[:, ::stride, ::stride, :] if stride > 1 else x
        ho, wo = xs.shape[1], xs.shape[2]
        xm = xs.reshape(n * ho * wo, cin)
        wm = w.reshape(cin, cout)
    else:
        patches, ho, wo = _im2col(x, kh, kw, stride, pad)
        xm = patches.reshape(n * ho * wo, kh * kw * cin)
        wm = w.reshape(kh * kw * cin, cout)
    res2 = residual.reshape(n * ho * wo, cout) if residual is not None else None
    y = matmul_fused(xm, wm, scale, bias, relu=relu, residual=res2)
    return y.reshape(n, ho, wo, cout)


# ----------------------------------------------------------------------------
# ResNet18 structure
# ----------------------------------------------------------------------------
def basic_block(x, blk, stride):
    if "down_w" in blk:
        identity = conv_bn(x, blk["down_w"], blk["dbn_s"], blk["dbn_b"],
                           stride=stride, pad=0, relu=False)
    else:
        identity = x
    out = conv_bn(x, blk["conv1_w"], blk["bn1_s"], blk["bn1_b"],
                  stride=stride, pad=1, relu=True)
    # residual add + ReLU fused into conv2's matmul epilogue
    out = conv_bn(out, blk["conv2_w"], blk["bn2_s"], blk["bn2_b"],
                  stride=1, pad=1, relu=True, residual=identity)
    return out


def single_baseline_forward(x_nchw, params):
    """Returns 8 logit arrays: (N,5),(N,3),(N,2),(N,3)x4,(N,2)."""
    x = jnp.transpose(x_nchw, (0, 2, 3, 1)).astype(jnp.float32)   # NCHW -> NHWC

    x = conv_bn(x, params["conv1_w"], params["bn1_s"], params["bn1_b"],
                stride=2, pad=3, relu=True)
    x = maxpool(x)

    for stage_idx, blocks in enumerate(params["layers"]):
        for b_idx, blk in enumerate(blocks):
            s = STAGE_STRIDES[stage_idx] if b_idx == 0 else 1
            x = basic_block(x, blk, s)

    logits = avgpool_heads(x, params["head_w"], params["head_b"])
    outs, off = [], 0
    for d in HEAD_DIMS:
        outs.append(logits[:, off:off + d])
        off += d
    return outs


# ----------------------------------------------------------------------------
# Deterministic parameter construction
# ----------------------------------------------------------------------------
def _normal(key, shape, std):
    return (jax.random.normal(key, shape, jnp.float32) * std).astype(jnp.float32)


def _make_bn(key, c, eps=1e-5):
    k1, k2, k3, k4 = jax.random.split(key, 4)
    gamma = 1.0 + 0.1 * jax.random.normal(k1, (c,), jnp.float32)
    beta = 0.1 * jax.random.normal(k2, (c,), jnp.float32)
    mean = 0.1 * jax.random.normal(k3, (c,), jnp.float32)
    var = 1.0 + 0.1 * jnp.abs(jax.random.normal(k4, (c,), jnp.float32))
    scale = gamma / jnp.sqrt(var + eps)
    bias = beta - mean * scale
    return scale.astype(jnp.float32), bias.astype(jnp.float32)


def make_params(key):
    keys = iter(jax.random.split(key, 256))
    p = {}
    p["conv1_w"] = _normal(next(keys), (7, 7, 3, 64), 0.05)
    p["bn1_s"], p["bn1_b"] = _make_bn(next(keys), 64)

    stages = [(64, 64, 1), (64, 128, 2), (128, 256, 2), (256, 512, 2)]
    p["layers"] = []
    for cin, cout, stride in stages:
        blocks = []
        for b in range(2):
            s = stride if b == 0 else 1
            ci = cin if b == 0 else cout
            blk = {}
            blk["conv1_w"] = _normal(next(keys), (3, 3, ci, cout), 0.05)
            blk["bn1_s"], blk["bn1_b"] = _make_bn(next(keys), cout)
            blk["conv2_w"] = _normal(next(keys), (3, 3, cout, cout), 0.05)
            blk["bn2_s"], blk["bn2_b"] = _make_bn(next(keys), cout)
            if s != 1 or ci != cout:
                blk["down_w"] = _normal(next(keys), (1, 1, ci, cout), 0.05)
                blk["dbn_s"], blk["dbn_b"] = _make_bn(next(keys), cout)
            blocks.append(blk)
        p["layers"].append(blocks)

    # classifier heads: Linear(512, d), weight ~ N(0, 0.01), bias = 0 (concat)
    head_ws = [_normal(next(keys), (512, d), 0.01) for d in HEAD_DIMS]
    p["head_w"] = jnp.concatenate(head_ws, axis=1)               # (512, 24)
    p["head_b"] = jnp.zeros((sum(HEAD_DIMS),), jnp.float32)
    return p


# ----------------------------------------------------------------------------
if __name__ == "__main__":
    root = jax.random.PRNGKey(0)
    kparams, kx = jax.random.split(root)
    params = make_params(kparams)

    # NCHW input, 3 channels (ImageNet-style), small spatial size
    x = jax.random.normal(kx, (2, 3, 16, 16), jnp.float32)

    fwd = jax.jit(single_baseline_forward)
    outs = fwd(x, params)
    outs = [jax.block_until_ready(o) for o in outs]

    expected = [(2, 5), (2, 3), (2, 2), (2, 3), (2, 3), (2, 3), (2, 3), (2, 2)]
    assert [tuple(o.shape) for o in outs] == expected, \
        f"bad shapes: {[o.shape for o in outs]}"
    assert all(bool(jnp.all(jnp.isfinite(o))) for o in outs)

    print("KERNEL_OK")
</pallas_src>

<mosaic_0001>
module attributes {stable_mosaic.version = 11 : i64} {
  func.func @_mm_fused_kernel(%arg0: i32, %arg1: i32, %arg2: i32, %arg3: memref<128x256xbf16, #tpu.memory_space<vmem>>, %arg4: memref<256x128xbf16, #tpu.memory_space<vmem>>, %arg5: memref<1x128xf32, #tpu.memory_space<vmem>>, %arg6: memref<1x128xf32, #tpu.memory_space<vmem>>, %arg7: memref<128x128xf32, #tpu.memory_space<vmem>>, %arg8: memref<128x128xf32, #tpu.memory_space<vmem>>) attributes {dimension_semantics = [#tpu.dimension_semantics<parallel>, #tpu.dimension_semantics<parallel>, #tpu.dimension_semantics<arbitrary>], iteration_bounds = array<i64: 1, 1, 1>, scalar_prefetch = 0 : i64, scratch_operands = 1 : i64, tpu.core_type = #tpu.core_type<tc>, window_params = [{transform_indices = @transform_0, window_bounds = array<i64: 128, 256>}, {transform_indices = @transform_1, window_bounds = array<i64: 256, 128>}, {transform_indices = @transform_2, window_bounds = array<i64: 1, 128>}, {transform_indices = @transform_3, window_bounds = array<i64: 1, 128>}, {transform_indices = @transform_4, window_bounds = array<i64: 128, 128>}]} {
    %c0_i32 = arith.constant 0 : i32
    %0 = arith.cmpi eq, %arg2, %c0_i32 : i32
    %1 = arith.extui %0 : i1 to i32
    %c0_i32_0 = arith.constant 0 : i32
    %2 = arith.cmpi ne, %1, %c0_i32_0 : i32
    scf.if %2 {
      %cst_10 = arith.constant 0.000000e+00 : f32
      %12 = vector.broadcast %cst_10 : f32 to vector<128x128xf32>
      %c0_11 = arith.constant 0 : index
      %c0_12 = arith.constant 0 : index
      %13 = vector.load %arg8[%c0_11, %c0_12] : memref<128x128xf32, #tpu.memory_space<vmem>>, vector<128x128xf32>
      tpu.vector_store %arg8[%c0_11, %c0_12], %12 {strides = array<i32>} : memref<128x128xf32, #tpu.memory_space<vmem>>, vector<128x128xf32>,
    } else {
    }
    %c0 = arith.constant 0 : index
    %c0_1 = arith.constant 0 : index
    %3 = vector.load %arg8[%c0, %c0_1] : memref<128x128xf32, #tpu.memory_space<vmem>>, vector<128x128xf32>
    %c0_2 = arith.constant 0 : index
    %c0_3 = arith.constant 0 : index
    %4 = vector.load %arg3[%c0_2, %c0_3] : memref<128x256xbf16, #tpu.memory_space<vmem>>, vector<128x256xbf16>
    %c0_4 = arith.constant 0 : index
    %c0_5 = arith.constant 0 : index
    %5 = vector.load %arg4[%c0_4, %c0_5] : memref<256x128xbf16, #tpu.memory_space<vmem>>, vector<256x128xbf16>
    %cst = arith.constant dense<0.000000e+00> : vector<128x128xf32>
    %6 = tpu.matmul %4, %5, %cst {dimension_numbers = #tpu.dot_dimension_numbers<[1], [0], [0], [1], [0, 0, 1, 1], [], []>} : vector<128x256xbf16>, vector<256x128xbf16>, vector<128x128xf32> -> vector<128x128xf32>
    %7 = arith.addf %3, %6 : vector<128x128xf32>
    %c0_6 = arith.constant 0 : index
    %c0_7 = arith.constant 0 : index
    %8 = vector.load %arg8[%c0_6, %c0_7] : memref<128x128xf32, #tpu.memory_space<vmem>>, vector<128x128xf32>
    tpu.vector_store %arg8[%c0_6, %c0_7], %7 {strides = array<i32>} : memref<128x128xf32, #tpu.memory_space<vmem>>, vector<128x128xf32>,
    %c0_i32_8 = arith.constant 0 : i32
    %9 = arith.cmpi eq, %arg2, %c0_i32_8 : i32
    %10 = arith.extui %9 : i1 to i32
    %c0_i32_9 = arith.constant 0 : i32
    %11 = arith.cmpi ne, %10, %c0_i32_9 : i32
    scf.if %11 {
      %c0_10 = arith.constant 0 : index
      %c0_11 = arith.constant 0 : index
      %12 = vector.load %arg8[%c0_10, %c0_11] : memref<128x128xf32, #tpu.memory_space<vmem>>, vector<128x128xf32>
      %c0_12 = arith.constant 0 : index
      %c0_13 = arith.constant 0 : index
      %13 = vector.load %arg5[%c0_12, %c0_13] : memref<1x128xf32, #tpu.memory_space<vmem>>, vector<1x128xf32>
      %14 = vector.broadcast %13 : vector<1x128xf32> to vector<128x128xf32>
      %15 = arith.mulf %12, %14 : vector<128x128xf32>
      %c0_14 = arith.constant 0 : index
      %c0_15 = arith.constant 0 : index
      %16 = vector.load %arg6[%c0_14, %c0_15] : memref<1x128xf32, #tpu.memory_space<vmem>>, vector<1x128xf32>
      %17 = vector.broadcast %16 : vector<1x128xf32> to vector<128x128xf32>
      %18 = arith.addf %15, %17 : vector<128x128xf32>
      %cst_16 = arith.constant 0.000000e+00 : f32
      %19 = vector.broadcast %cst_16 : f32 to vector<128x128xf32>
      %20 = arith.maximumf %18, %19 : vector<128x128xf32>
      %c0_17 = arith.constant 0 : index
      %c0_18 = arith.constant 0 : index
      %21 = vector.load %arg7[%c0_17, %c0_18] : memref<128x128xf32, #tpu.memory_space<vmem>>, vector<128x128xf32>
      tpu.vector_store %arg7[%c0_17, %c0_18], %20 {strides = array<i32>} : memref<128x128xf32, #tpu.memory_space<vmem>>, vector<128x128xf32>,
    } else {
    }
    return
  }
  func.func @transform_0(%arg0: i32, %arg1: i32, %arg2: i32) -> (i32, i32) {
    %c0_i32 = arith.constant 0 : i32
    return %arg0, %arg2 : i32, i32
  }
  func.func @transform_1(%arg0: i32, %arg1: i32, %arg2: i32) -> (i32, i32) {
    %c0_i32 = arith.constant 0 : i32
    return %arg2, %arg1 : i32, i32
  }
  func.func @transform_2(%arg0: i32, %arg1: i32, %arg2: i32) -> (i32, i32) {
    %c0_i32 = arith.constant 0 : i32
    %c0_i32_0 = arith.constant 0 : i32
    return %c0_i32, %arg1 : i32, i32
  }
  func.func @transform_3(%arg0: i32, %arg1: i32, %arg2: i32) -> (i32, i32) {
    %c0_i32 = arith.constant 0 : i32
    %c0_i32_0 = arith.constant 0 : i32
    return %c0_i32, %arg1 : i32, i32
  }
  func.func @transform_4(%arg0: i32, %arg1: i32, %arg2: i32) -> (i32, i32) {
    %c0_i32 = arith.constant 0 : i32
    return %arg0, %arg1 : i32, i32
  }
}

module attributes {stable_mosaic.version = 11 : i64} {
  func.func @_maxpool_kernel(%arg0: memref<2x5x5x64xf32, #tpu.memory_space<vmem>>, %arg1: memref<2x5x5x64xf32, #tpu.memory_space<vmem>>, %arg2: memref<2x5x5x64xf32, #tpu.memory_space<vmem>>, %arg3: memref<2x5x5x64xf32, #tpu.memory_space<vmem>>, %arg4: memref<2x4x4x64xf32, #tpu.memory_space<vmem>>) attributes {dimension_semantics = [], scalar_prefetch = 0 : i64, scratch_operands = 0 : i64, tpu.core_type = #tpu.core_type<tc>} {
    %c0 = arith.constant 0 : index
    %c0_0 = arith.constant 0 : index
    %c0_1 = arith.constant 0 : index
    %c0_2 = arith.constant 0 : index
    %0 = vector.load %arg0[%c0, %c0_0, %c0_1, %c0_2] : memref<2x5x5x64xf32, #tpu.memory_space<vmem>>, vector<2x4x4x64xf32>
    %c0_3 = arith.constant 0 : index
    %c0_4 = arith.constant 0 : index
    %c0_5 = arith.constant 0 : index
    %c0_6 = arith.constant 0 : index
    %1 = vector.load %arg1[%c0_3, %c0_4, %c0_5, %c0_6] : memref<2x5x5x64xf32, #tpu.memory_space<vmem>>, vector<2x4x4x64xf32>
    %2 = arith.maximumf %0, %1 : vector<2x4x4x64xf32>
    %c0_7 = arith.constant 0 : index
    %c0_8 = arith.constant 0 : index
    %c1 = arith.constant 1 : index
    %c0_9 = arith.constant 0 : index
    %3 = vector.load %arg0[%c0_7, %c0_8, %c1, %c0_9] : memref<2x5x5x64xf32, #tpu.memory_space<vmem>>, vector<2x4x4x64xf32>
    %4 = arith.maximumf %2, %3 : vector<2x4x4x64xf32>
    %c0_10 = arith.constant 0 : index
    %c0_11 = arith.constant 0 : index
    %c0_12 = arith.constant 0 : index
    %c0_13 = arith.constant 0 : index
    %5 = vector.load %arg2[%c0_10, %c0_11, %c0_12, %c0_13] : memref<2x5x5x64xf32, #tpu.memory_space<vmem>>, vector<2x4x4x64xf32>
    %6 = arith.maximumf %4, %5 : vector<2x4x4x64xf32>
    %c0_14 = arith.constant 0 : index
    %c0_15 = arith.constant 0 : index
    %c0_16 = arith.constant 0 : index
    %c0_17 = arith.constant 0 : index
    %7 = vector.load %arg3[%c0_14, %c0_15, %c0_16, %c0_17] : memref<2x5x5x64xf32, #tpu.memory_space<vmem>>, vector<2x4x4x64xf32>
    %8 = arith.maximumf %6, %7 : vector<2x4x4x64xf32>
    %c0_18 = arith.constant 0 : index
    %c0_19 = arith.constant 0 : index
    %c1_20 = arith.constant 1 : index
    %c0_21 = arith.constant 0 : index
    %9 = vector.load %arg2[%c0_18, %c0_19, %c1_20, %c0_21] : memref<2x5x5x64xf32, #tpu.memory_space<vmem>>, vector<2x4x4x64xf32>
    %10 = arith.maximumf %8, %9 : vector<2x4x4x64xf32>
    %c0_22 = arith.constant 0 : index
    %c1_23 = arith.constant 1 : index
    %c0_24 = arith.constant 0 : index
    %c0_25 = arith.constant 0 : index
    %11 = vector.load %arg0[%c0_22, %c1_23, %c0_24, %c0_25] : memref<2x5x5x64xf32, #tpu.memory_space<vmem>>, vector<2x4x4x64xf32>
    %12 = arith.maximumf %10, %11 : vector<2x4x4x64xf32>
    %c0_26 = arith.constant 0 : index
    %c1_27 = arith.constant 1 : index
    %c0_28 = arith.constant 0 : index
    %c0_29 = arith.constant 0 : index
    %13 = vector.load %arg1[%c0_26, %c1_27, %c0_28, %c0_29] : memref<2x5x5x64xf32, #tpu.memory_space<vmem>>, vector<2x4x4x64xf32>
    %14 = arith.maximumf %12, %13 : vector<2x4x4x64xf32>
    %c0_30 = arith.constant 0 : index
    %c1_31 = arith.constant 1 : index
    %c1_32 = arith.constant 1 : index
    %c0_33 = arith.constant 0 : index
    %15 = vector.load %arg0[%c0_30, %c1_31, %c1_32, %c0_33] : memref<2x5x5x64xf32, #tpu.memory_space<vmem>>, vector<2x4x4x64xf32>
    %16 = arith.maximumf %14, %15 : vector<2x4x4x64xf32>
    %c0_34 = arith.constant 0 : index
    %c0_35 = arith.constant 0 : index
    %c0_36 = arith.constant 0 : index
    %c0_37 = arith.constant 0 : index
    %17 = vector.load %arg4[%c0_34, %c0_35, %c0_36, %c0_37] : memref<2x4x4x64xf32, #tpu.memory_space<vmem>>, vector<2x4x4x64xf32>
    tpu.vector_store %arg4[%c0_34, %c0_35, %c0_36, %c0_37], %16 {strides = array<i32>} : memref<2x4x4x64xf32, #tpu.memory_space<vmem>>, vector<2x4x4x64xf32>,
    return
  }
}

module attributes {stable_mosaic.version = 11 : i64} {
  func.func @_mm_fused_kernel(%arg0: i32, %arg1: i32, %arg2: i32, %arg3: memref<32x128xbf16, #tpu.memory_space<vmem>>, %arg4: memref<128x128xbf16, #tpu.memory_space<vmem>>, %arg5: memref<1x128xf32, #tpu.memory_space<vmem>>, %arg6: memref<1x128xf32, #tpu.memory_space<vmem>>, %arg7: memref<32x128xf32, #tpu.memory_space<vmem>>, %arg8: memref<32x128xf32, #tpu.memory_space<vmem>>) attributes {dimension_semantics = [#tpu.dimension_semantics<parallel>, #tpu.dimension_semantics<parallel>, #tpu.dimension_semantics<arbitrary>], iteration_bounds = array<i64: 1, 1, 5>, scalar_prefetch = 0 : i64, scratch_operands = 1 : i64, tpu.core_type = #tpu.core_type<tc>, window_params = [{transform_indices = @transform_0, window_bounds = array<i64: 32, 128>}, {transform_indices = @transform_1, window_bounds = array<i64: 128, 128>}, {transform_indices = @transform_2, window_bounds = array<i64: 1, 128>}, {transform_indices = @transform_3, window_bounds = array<i64: 1, 128>}, {transform_indices = @transform_4, window_bounds = array<i64: 32, 128>}]} {
    %c0_i32 = arith.constant 0 : i32
    %0 = arith.cmpi eq, %arg2, %c0_i32 : i32
    %1 = arith.extui %0 : i1 to i32
    %c0_i32_0 = arith.constant 0 : i32
    %2 = arith.cmpi ne, %1, %c0_i32_0 : i32
    scf.if %2 {
      %cst_9 = arith.constant 0.000000e+00 : f32
      %12 = vector.broadcast %cst_9 : f32 to vector<32x128xf32>
      %c0_10 = arith.constant 0 : index
      %c0_11 = arith.constant 0 : index
      %13 = vector.load %arg8[%c0_10, %c0_11] : memref<32x128xf32, #tpu.memory_space<vmem>>, vector<32x128xf32>
      tpu.vector_store %arg8[%c0_10, %c0_11], %12 {strides = array<i32>} : memref<32x128xf32, #tpu.memory_space<vmem>>, vector<32x128xf32>,
    } else {
    }
    %c0 = arith.constant 0 : index
    %c0_1 = arith.constant 0 : index
    %3 = vector.load %arg8[%c0, %c0_1] : memref<32x128xf32, #tpu.memory_space<vmem>>, vector<32x128xf32>
    %c0_2 = arith.constant 0 : index
    %c0_3 = arith.constant 0 : index
    %4 = vector.load %arg3[%c0_2, %c0_3] : memref<32x128xbf16, #tpu.memory_space<vmem>>, vector<32x128xbf16>
    %c0_4 = arith.constant 0 : index
    %c0_5 = arith.constant 0 : index
    %5 = vector.load %arg4[%c0_4, %c0_5] : memref<128x128xbf16, #tpu.memory_space<vmem>>, vector<128x128xbf16>
    %cst = arith.constant dense<0.000000e+00> : vector<32x128xf32>
    %6 = tpu.matmul %4, %5, %cst {dimension_numbers = #tpu.dot_dimension_numbers<[1], [0], [0], [1], [0, 0, 1, 1], [], []>} : vector<32x128xbf16>, vector<128x128xbf16>, vector<32x128xf32> -> vector<32x128xf32>
    %7 = arith.addf %3, %6 : vector<32x128xf32>
    %c0_6 = arith.constant 0 : index
    %c0_7 = arith.constant 0 : index
    %8 = vector.load %arg8[%c0_6, %c0_7] : memref<32x128xf32, #tpu.memory_space<vmem>>, vector<32x128xf32>
    tpu.vector_store %arg8[%c0_6, %c0_7], %7 {strides = array<i32>} : memref<32x128xf32, #tpu.memory_space<vmem>>, vector<32x128xf32>,
    %c4_i32 = arith.constant 4 : i32
    %9 = arith.cmpi eq, %arg2, %c4_i32 : i32
    %10 = arith.extui %9 : i1 to i32
    %c0_i32_8 = arith.constant 0 : i32
    %11 = arith.cmpi ne, %10, %c0_i32_8 : i32
    scf.if %11 {
      %c0_9 = arith.constant 0 : index
      %c0_10 = arith.constant 0 : index
      %12 = vector.load %arg8[%c0_9, %c0_10] : memref<32x128xf32, #tpu.memory_space<vmem>>, vector<32x128xf32>
      %c0_11 = arith.constant 0 : index
      %c0_12 = arith.constant 0 : index
      %13 = vector.load %arg5[%c0_11, %c0_12] : memref<1x128xf32, #tpu.memory_space<vmem>>, vector<1x128xf32>
      %14 = vector.broadcast %13 : vector<1x128xf32> to vector<32x128xf32>
      %15 = arith.mulf %12, %14 : vector<32x128xf32>
      %c0_13 = arith.constant 0 : index
      %c0_14 = arith.constant 0 : index
      %16 = vector.load %arg6[%c0_13, %c0_14] : memref<1x128xf32, #tpu.memory_space<vmem>>, vector<1x128xf32>
      %17 = vector.broadcast %16 : vector<1x128xf32> to vector<32x128xf32>
      %18 = arith.addf %15, %17 : vector<32x128xf32>
      %cst_15 = arith.constant 0.000000e+00 : f32
      %19 = vector.broadcast %cst_15 : f32 to vector<32x128xf32>
      %20 = arith.maximumf %18, %19 : vector<32x128xf32>
      %c0_16 = arith.constant 0 : index
      %c0_17 = arith.constant 0 : index
      %21 = vector.load %arg7[%c0_16, %c0_17] : memref<32x128xf32, #tpu.memory_space<vmem>>, vector<32x128xf32>
      tpu.vector_store %arg7[%c0_16, %c0_17], %20 {strides = array<i32>} : memref<32x128xf32, #tpu.memory_space<vmem>>, vector<32x128xf32>,
    } else {
    }
    return
  }
  func.func @transform_0(%arg0: i32, %arg1: i32, %arg2: i32) -> (i32, i32) {
    %c0_i32 = arith.constant 0 : i32
    return %arg0, %arg2 : i32, i32
  }
  func.func @transform_1(%arg0: i32, %arg1: i32, %arg2: i32) -> (i32, i32) {
    %c0_i32 = arith.constant 0 : i32
    return %arg2, %arg1 : i32, i32
  }
  func.func @transform_2(%arg0: i32, %arg1: i32, %arg2: i32) -> (i32, i32) {
    %c0_i32 = arith.constant 0 : i32
    %c0_i32_0 = arith.constant 0 : i32
    return %c0_i32, %arg1 : i32, i32
  }
  func.func @transform_3(%arg0: i32, %arg1: i32, %arg2: i32) -> (i32, i32) {
    %c0_i32 = arith.constant 0 : i32
    %c0_i32_0 = arith.constant 0 : i32
    return %c0_i32, %arg1 : i32, i32
  }
  func.func @transform_4(%arg0: i32, %arg1: i32, %arg2: i32) -> (i32, i32) {
    %c0_i32 = arith.constant 0 : i32
    return %arg0, %arg1 : i32, i32
  }
}

module attributes {stable_mosaic.version = 11 : i64} {
  func.func @_mm_fused_kernel(%arg0: i32, %arg1: i32, %arg2: i32, %arg3: memref<32x128xbf16, #tpu.memory_space<vmem>>, %arg4: memref<128x128xbf16, #tpu.memory_space<vmem>>, %arg5: memref<1x128xf32, #tpu.memory_space<vmem>>, %arg6: memref<1x128xf32, #tpu.memory_space<vmem>>, %arg7: memref<32x128xf32, #tpu.memory_space<vmem>>, %arg8: memref<32x128xf32, #tpu.memory_space<vmem>>, %arg9: memref<32x128xf32, #tpu.memory_space<vmem>>) attributes {dimension_semantics = [#tpu.dimension_semantics<parallel>, #tpu.dimension_semantics<parallel>, #tpu.dimension_semantics<arbitrary>], iteration_bounds = array<i64: 1, 1, 5>, scalar_prefetch = 0 : i64, scratch_operands = 1 : i64, tpu.core_type = #tpu.core_type<tc>, window_params = [{transform_indices = @transform_0, window_bounds = array<i64: 32, 128>}, {transform_indices = @transform_1, window_bounds = array<i64: 128, 128>}, {transform_indices = @transform_2, window_bounds = array<i64: 1, 128>}, {transform_indices = @transform_3, window_bounds = array<i64: 1, 128>}, {transform_indices = @transform_4, window_bounds = array<i64: 32, 128>}, {transform_indices = @transform_5, window_bounds = array<i64: 32, 128>}]} {
    %c0_i32 = arith.constant 0 : i32
    %0 = arith.cmpi eq, %arg2, %c0_i32 : i32
    %1 = arith.extui %0 : i1 to i32
    %c0_i32_0 = arith.constant 0 : i32
    %2 = arith.cmpi ne, %1, %c0_i32_0 : i32
    scf.if %2 {
      %cst_9 = arith.constant 0.000000e+00 : f32
      %12 = vector.broadcast %cst_9 : f32 to vector<32x128xf32>
      %c0_10 = arith.constant 0 : index
      %c0_11 = arith.constant 0 : index
      %13 = vector.load %arg9[%c0_10, %c0_11] : memref<32x128xf32, #tpu.memory_space<vmem>>, vector<32x128xf32>
      tpu.vector_store %arg9[%c0_10, %c0_11], %12 {strides = array<i32>} : memref<32x128xf32, #tpu.memory_space<vmem>>, vector<32x128xf32>,
    } else {
    }
    %c0 = arith.constant 0 : index
    %c0_1 = arith.constant 0 : index
    %3 = vector.load %arg9[%c0, %c0_1] : memref<32x128xf32, #tpu.memory_space<vmem>>, vector<32x128xf32>
    %c0_2 = arith.constant 0 : index
    %c0_3 = arith.constant 0 : index
    %4 = vector.load %arg3[%c0_2, %c0_3] : memref<32x128xbf16, #tpu.memory_space<vmem>>, vector<32x128xbf16>
    %c0_4 = arith.constant 0 : index
    %c0_5 = arith.constant 0 : index
    %5 = vector.load %arg4[%c0_4, %c0_5] : memref<128x128xbf16, #tpu.memory_space<vmem>>, vector<128x128xbf16>
    %cst = arith.constant dense<0.000000e+00> : vector<32x128xf32>
    %6 = tpu.matmul %4, %5, %cst {dimension_numbers = #tpu.dot_dimension_numbers<[1], [0], [0], [1], [0, 0, 1, 1], [], []>} : vector<32x128xbf16>, vector<128x128xbf16>, vector<32x128xf32> -> vector<32x128xf32>
    %7 = arith.addf %3, %6 : vector<32x128xf32>
    %c0_6 = arith.constant 0 : index
    %c0_7 = arith.constant 0 : index
    %8 = vector.load %arg9[%c0_6, %c0_7] : memref<32x128xf32, #tpu.memory_space<vmem>>, vector<32x128xf32>
    tpu.vector_store %arg9[%c0_6, %c0_7], %7 {strides = array<i32>} : memref<32x128xf32, #tpu.memory_space<vmem>>, vector<32x128xf32>,
    %c4_i32 = arith.constant 4 : i32
    %9 = arith.cmpi eq, %arg2, %c4_i32 : i32
    %10 = arith.extui %9 : i1 to i32
    %c0_i32_8 = arith.constant 0 : i32
    %11 = arith.cmpi ne, %10, %c0_i32_8 : i32
    scf.if %11 {
      %c0_9 = arith.constant 0 : index
      %c0_10 = arith.constant 0 : index
      %12 = vector.load %arg9[%c0_9, %c0_10] : memref<32x128xf32, #tpu.memory_space<vmem>>, vector<32x128xf32>
      %c0_11 = arith.constant 0 : index
      %c0_12 = arith.constant 0 : index
      %13 = vector.load %arg5[%c0_11, %c0_12] : memref<1x128xf32, #tpu.memory_space<vmem>>, vector<1x128xf32>
      %14 = vector.broadcast %13 : vector<1x128xf32> to vector<32x128xf32>
      %15 = arith.mulf %12, %14 : vector<32x128xf32>
      %c0_13 = arith.constant 0 : index
      %c0_14 = arith.constant 0 : index
      %16 = vector.load %arg6[%c0_13, %c0_14] : memref<1x128xf32, #tpu.memory_space<vmem>>, vector<1x128xf32>
      %17 = vector.broadcast %16 : vector<1x128xf32> to vector<32x128xf32>
      %18 = arith.addf %15, %17 : vector<32x128xf32>
      %c0_15 = arith.constant 0 : index
      %c0_16 = arith.constant 0 : index
      %19 = vector.load %arg7[%c0_15, %c0_16] : memref<32x128xf32, #tpu.memory_space<vmem>>, vector<32x128xf32>
      %20 = arith.addf %18, %19 : vector<32x128xf32>
      %cst_17 = arith.constant 0.000000e+00 : f32
      %21 = vector.broadcast %cst_17 : f32 to vector<32x128xf32>
      %22 = arith.maximumf %20, %21 : vector<32x128xf32>
      %c0_18 = arith.constant 0 : index
      %c0_19 = arith.constant 0 : index
      %23 = vector.load %arg8[%c0_18, %c0_19] : memref<32x128xf32, #tpu.memory_space<vmem>>, vector<32x128xf32>
      tpu.vector_store %arg8[%c0_18, %c0_19], %22 {strides = array<i32>} : memref<32x128xf32, #tpu.memory_space<vmem>>, vector<32x128xf32>,
    } else {
    }
    return
  }
  func.func @transform_0(%arg0: i32, %arg1: i32, %arg2: i32) -> (i32, i32) {
    %c0_i32 = arith.constant 0 : i32
    return %arg0, %arg2 : i32, i32
  }
  func.func @transform_1(%arg0: i32, %arg1: i32, %arg2: i32) -> (i32, i32) {
    %c0_i32 = arith.constant 0 : i32
    return %arg2, %arg1 : i32, i32
  }
  func.func @transform_2(%arg0: i32, %arg1: i32, %arg2: i32) -> (i32, i32) {
    %c0_i32 = arith.constant 0 : i32
    %c0_i32_0 = arith.constant 0 : i32
    return %c0_i32, %arg1 : i32, i32
  }
  func.func @transform_3(%arg0: i32, %arg1: i32, %arg2: i32) -> (i32, i32) {
    %c0_i32 = arith.constant 0 : i32
    %c0_i32_0 = arith.constant 0 : i32
    return %c0_i32, %arg1 : i32, i32
  }
  func.func @transform_4(%arg0: i32, %arg1: i32, %arg2: i32) -> (i32, i32) {
    %c0_i32 = arith.constant 0 : i32
    return %arg0, %arg1 : i32, i32
  }
  func.func @transform_5(%arg0: i32, %arg1: i32, %arg2: i32) -> (i32, i32) {
    %c0_i32 = arith.constant 0 : i32
    return %arg0, %arg1 : i32, i32
  }
}

module attributes {stable_mosaic.version = 11 : i64} {
  func.func @_mm_fused_kernel(%arg0: i32, %arg1: i32, %arg2: i32, %arg3: memref<8x128xbf16, #tpu.memory_space<vmem>>, %arg4: memref<128x128xbf16, #tpu.memory_space<vmem>>, %arg5: memref<1x128xf32, #tpu.memory_space<vmem>>, %arg6: memref<1x128xf32, #tpu.memory_space<vmem>>, %arg7: memref<8x128xf32, #tpu.memory_space<vmem>>, %arg8: memref<8x128xf32, #tpu.memory_space<vmem>>) attributes {dimension_semantics = [#tpu.dimension_semantics<parallel>, #tpu.dimension_semantics<parallel>, #tpu.dimension_semantics<arbitrary>], iteration_bounds = array<i64: 1, 1, 5>, scalar_prefetch = 0 : i64, scratch_operands = 1 : i64, tpu.core_type = #tpu.core_type<tc>, window_params = [{transform_indices = @transform_0, window_bounds = array<i64: 8, 128>}, {transform_indices = @transform_1, window_bounds = array<i64: 128, 128>}, {transform_indices = @transform_2, window_bounds = array<i64: 1, 128>}, {transform_indices = @transform_3, window_bounds = array<i64: 1, 128>}, {transform_indices = @transform_4, window_bounds = array<i64: 8, 128>}]} {
    %c0_i32 = arith.constant 0 : i32
    %0 = arith.cmpi eq, %arg2, %c0_i32 : i32
    %1 = arith.extui %0 : i1 to i32
    %c0_i32_0 = arith.constant 0 : i32
    %2 = arith.cmpi ne, %1, %c0_i32_0 : i32
    scf.if %2 {
      %cst_9 = arith.constant 0.000000e+00 : f32
      %12 = vector.broadcast %cst_9 : f32 to vector<8x128xf32>
      %c0_10 = arith.constant 0 : index
      %c0_11 = arith.constant 0 : index
      %13 = vector.load %arg8[%c0_10, %c0_11] : memref<8x128xf32, #tpu.memory_space<vmem>>, vector<8x128xf32>
      tpu.vector_store %arg8[%c0_10, %c0_11], %12 {strides = array<i32>} : memref<8x128xf32, #tpu.memory_space<vmem>>, vector<8x128xf32>,
    } else {
    }
    %c0 = arith.constant 0 : index
    %c0_1 = arith.constant 0 : index
    %3 = vector.load %arg8[%c0, %c0_1] : memref<8x128xf32, #tpu.memory_space<vmem>>, vector<8x128xf32>
    %c0_2 = arith.constant 0 : index
    %c0_3 = arith.constant 0 : index
    %4 = vector.load %arg3[%c0_2, %c0_3] : memref<8x128xbf16, #tpu.memory_space<vmem>>, vector<8x128xbf16>
    %c0_4 = arith.constant 0 : index
    %c0_5 = arith.constant 0 : index
    %5 = vector.load %arg4[%c0_4, %c0_5] : memref<128x128xbf16, #tpu.memory_space<vmem>>, vector<128x128xbf16>
    %cst = arith.constant dense<0.000000e+00> : vector<8x128xf32>
    %6 = tpu.matmul %4, %5, %cst {dimension_numbers = #tpu.dot_dimension_numbers<[1], [0], [0], [1], [0, 0, 1, 1], [], []>} : vector<8x128xbf16>, vector<128x128xbf16>, vector<8x128xf32> -> vector<8x128xf32>
    %7 = arith.addf %3, %6 : vector<8x128xf32>
    %c0_6 = arith.constant 0 : index
    %c0_7 = arith.constant 0 : index
    %8 = vector.load %arg8[%c0_6, %c0_7] : memref<8x128xf32, #tpu.memory_space<vmem>>, vector<8x128xf32>
    tpu.vector_store %arg8[%c0_6, %c0_7], %7 {strides = array<i32>} : memref<8x128xf32, #tpu.memory_space<vmem>>, vector<8x128xf32>,
    %c4_i32 = arith.constant 4 : i32
    %9 = arith.cmpi eq, %arg2, %c4_i32 : i32
    %10 = arith.extui %9 : i1 to i32
    %c0_i32_8 = arith.constant 0 : i32
    %11 = arith.cmpi ne, %10, %c0_i32_8 : i32
    scf.if %11 {
      %c0_9 = arith.constant 0 : index
      %c0_10 = arith.constant 0 : index
      %12 = vector.load %arg8[%c0_9, %c0_10] : memref<8x128xf32, #tpu.memory_space<vmem>>, vector<8x128xf32>
      %c0_11 = arith.constant 0 : index
      %c0_12 = arith.constant 0 : index
      %13 = vector.load %arg5[%c0_11, %c0_12] : memref<1x128xf32, #tpu.memory_space<vmem>>, vector<1x128xf32>
      %14 = vector.broadcast %13 : vector<1x128xf32> to vector<8x128xf32>
      %15 = arith.mulf %12, %14 : vector<8x128xf32>
      %c0_13 = arith.constant 0 : index
      %c0_14 = arith.constant 0 : index
      %16 = vector.load %arg6[%c0_13, %c0_14] : memref<1x128xf32, #tpu.memory_space<vmem>>, vector<1x128xf32>
      %17 = vector.broadcast %16 : vector<1x128xf32> to vector<8x128xf32>
      %18 = arith.addf %15, %17 : vector<8x128xf32>
      %cst_15 = arith.constant 0.000000e+00 : f32
      %19 = vector.broadcast %cst_15 : f32 to vector<8x128xf32>
      %20 = arith.maximumf %18, %19 : vector<8x128xf32>
      %c0_16 = arith.constant 0 : index
      %c0_17 = arith.constant 0 : index
      %21 = vector.load %arg7[%c0_16, %c0_17] : memref<8x128xf32, #tpu.memory_space<vmem>>, vector<8x128xf32>
      tpu.vector_store %arg7[%c0_16, %c0_17], %20 {strides = array<i32>} : memref<8x128xf32, #tpu.memory_space<vmem>>, vector<8x128xf32>,
    } else {
    }
    return
  }
  func.func @transform_0(%arg0: i32, %arg1: i32, %arg2: i32) -> (i32, i32) {
    %c0_i32 = arith.constant 0 : i32
    return %arg0, %arg2 : i32, i32
  }
  func.func @transform_1(%arg0: i32, %arg1: i32, %arg2: i32) -> (i32, i32) {
    %c0_i32 = arith.constant 0 : i32
    return %arg2, %arg1 : i32, i32
  }
  func.func @transform_2(%arg0: i32, %arg1: i32, %arg2: i32) -> (i32, i32) {
    %c0_i32 = arith.constant 0 : i32
    %c0_i32_0 = arith.constant 0 : i32
    return %c0_i32, %arg1 : i32, i32
  }
  func.func @transform_3(%arg0: i32, %arg1: i32, %arg2: i32) -> (i32, i32) {
    %c0_i32 = arith.constant 0 : i32
    %c0_i32_0 = arith.constant 0 : i32
    return %c0_i32, %arg1 : i32, i32
  }
  func.func @transform_4(%arg0: i32, %arg1: i32, %arg2: i32) -> (i32, i32) {
    %c0_i32 = arith.constant 0 : i32
    return %arg0, %arg1 : i32, i32
  }
}

module attributes {stable_mosaic.version = 11 : i64} {
  func.func @_mm_fused_kernel(%arg0: i32, %arg1: i32, %arg2: i32, %arg3: memref<8x128xbf16, #tpu.memory_space<vmem>>, %arg4: memref<128x128xbf16, #tpu.memory_space<vmem>>, %arg5: memref<1x128xf32, #tpu.memory_space<vmem>>, %arg6: memref<1x128xf32, #tpu.memory_space<vmem>>, %arg7: memref<8x128xf32, #tpu.memory_space<vmem>>, %arg8: memref<8x128xf32, #tpu.memory_space<vmem>>) attributes {dimension_semantics = [#tpu.dimension_semantics<parallel>, #tpu.dimension_semantics<parallel>, #tpu.dimension_semantics<arbitrary>], iteration_bounds = array<i64: 1, 1, 1>, scalar_prefetch = 0 : i64, scratch_operands = 1 : i64, tpu.core_type = #tpu.core_type<tc>, window_params = [{transform_indices = @transform_0, window_bounds = array<i64: 8, 128>}, {transform_indices = @transform_1, window_bounds = array<i64: 128, 128>}, {transform_indices = @transform_2, window_bounds = array<i64: 1, 128>}, {transform_indices = @transform_3, window_bounds = array<i64: 1, 128>}, {transform_indices = @transform_4, window_bounds = array<i64: 8, 128>}]} {
    %c0_i32 = arith.constant 0 : i32
    %0 = arith.cmpi eq, %arg2, %c0_i32 : i32
    %1 = arith.extui %0 : i1 to i32
    %c0_i32_0 = arith.constant 0 : i32
    %2 = arith.cmpi ne, %1, %c0_i32_0 : i32
    scf.if %2 {
      %cst_10 = arith.constant 0.000000e+00 : f32
      %12 = vector.broadcast %cst_10 : f32 to vector<8x128xf32>
      %c0_11 = arith.constant 0 : index
      %c0_12 = arith.constant 0 : index
      %13 = vector.load %arg8[%c0_11, %c0_12] : memref<8x128xf32, #tpu.memory_space<vmem>>, vector<8x128xf32>
      tpu.vector_store %arg8[%c0_11, %c0_12], %12 {strides = array<i32>} : memref<8x128xf32, #tpu.memory_space<vmem>>, vector<8x128xf32>,
    } else {
    }
    %c0 = arith.constant 0 : index
    %c0_1 = arith.constant 0 : index
    %3 = vector.load %arg8[%c0, %c0_1] : memref<8x128xf32, #tpu.memory_space<vmem>>, vector<8x128xf32>
    %c0_2 = arith.constant 0 : index
    %c0_3 = arith.constant 0 : index
    %4 = vector.load %arg3[%c0_2, %c0_3] : memref<8x128xbf16, #tpu.memory_space<vmem>>, vector<8x128xbf16>
    %c0_4 = arith.constant 0 : index
    %c0_5 = arith.constant 0 : index
    %5 = vector.load %arg4[%c0_4, %c0_5] : memref<128x128xbf16, #tpu.memory_space<vmem>>, vector<128x128xbf16>
    %cst = arith.constant dense<0.000000e+00> : vector<8x128xf32>
    %6 = tpu.matmul %4, %5, %cst {dimension_numbers = #tpu.dot_dimension_numbers<[1], [0], [0], [1], [0, 0, 1, 1], [], []>} : vector<8x128xbf16>, vector<128x128xbf16>, vector<8x128xf32> -> vector<8x128xf32>
    %7 = arith.addf %3, %6 : vector<8x128xf32>
    %c0_6 = arith.constant 0 : index
    %c0_7 = arith.constant 0 : index
    %8 = vector.load %arg8[%c0_6, %c0_7] : memref<8x128xf32, #tpu.memory_space<vmem>>, vector<8x128xf32>
    tpu.vector_store %arg8[%c0_6, %c0_7], %7 {strides = array<i32>} : memref<8x128xf32, #tpu.memory_space<vmem>>, vector<8x128xf32>,
    %c0_i32_8 = arith.constant 0 : i32
    %9 = arith.cmpi eq, %arg2, %c0_i32_8 : i32
    %10 = arith.extui %9 : i1 to i32
    %c0_i32_9 = arith.constant 0 : i32
    %11 = arith.cmpi ne, %10, %c0_i32_9 : i32
    scf.if %11 {
      %c0_10 = arith.constant 0 : index
      %c0_11 = arith.constant 0 : index
      %12 = vector.load %arg8[%c0_10, %c0_11] : memref<8x128xf32, #tpu.memory_space<vmem>>, vector<8x128xf32>
      %c0_12 = arith.constant 0 : index
      %c0_13 = arith.constant 0 : index
      %13 = vector.load %arg5[%c0_12, %c0_13] : memref<1x128xf32, #tpu.memory_space<vmem>>, vector<1x128xf32>
      %14 = vector.broadcast %13 : vector<1x128xf32> to vector<8x128xf32>
      %15 = arith.mulf %12, %14 : vector<8x128xf32>
      %c0_14 = arith.constant 0 : index
      %c0_15 = arith.constant 0 : index
      %16 = vector.load %arg6[%c0_14, %c0_15] : memref<1x128xf32, #tpu.memory_space<vmem>>, vector<1x128xf32>
      %17 = vector.broadcast %16 : vector<1x128xf32> to vector<8x128xf32>
      %18 = arith.addf %15, %17 : vector<8x128xf32>
      %c0_16 = arith.constant 0 : index
      %c0_17 = arith.constant 0 : index
      %19 = vector.load %arg7[%c0_16, %c0_17] : memref<8x128xf32, #tpu.memory_space<vmem>>, vector<8x128xf32>
      tpu.vector_store %arg7[%c0_16, %c0_17], %18 {strides = array<i32>} : memref<8x128xf32, #tpu.memory_space<vmem>>, vector<8x128xf32>,
    } else {
    }
    return
  }
  func.func @transform_0(%arg0: i32, %arg1: i32, %arg2: i32) -> (i32, i32) {
    %c0_i32 = arith.constant 0 : i32
    return %arg0, %arg2 : i32, i32
  }
  func.func @transform_1(%arg0: i32, %arg1: i32, %arg2: i32) -> (i32, i32) {
    %c0_i32 = arith.constant 0 : i32
    return %arg2, %arg1 : i32, i32
  }
  func.func @transform_2(%arg0: i32, %arg1: i32, %arg2: i32) -> (i32, i32) {
    %c0_i32 = arith.constant 0 : i32
    %c0_i32_0 = arith.constant 0 : i32
    return %c0_i32, %arg1 : i32, i32
  }
  func.func @transform_3(%arg0: i32, %arg1: i32, %arg2: i32) -> (i32, i32) {
    %c0_i32 = arith.constant 0 : i32
    %c0_i32_0 = arith.constant 0 : i32
    return %c0_i32, %arg1 : i32, i32
  }
  func.func @transform_4(%arg0: i32, %arg1: i32, %arg2: i32) -> (i32, i32) {
    %c0_i32 = arith.constant 0 : i32
    return %arg0, %arg1 : i32, i32
  }
}

module attributes {stable_mosaic.version = 11 : i64} {
  func.func @_mm_fused_kernel(%arg0: i32, %arg1: i32, %arg2: i32, %arg3: memref<8x128xbf16, #tpu.memory_space<vmem>>, %arg4: memref<128x128xbf16, #tpu.memory_space<vmem>>, %arg5: memref<1x128xf32, #tpu.memory_space<vmem>>, %arg6: memref<1x128xf32, #tpu.memory_space<vmem>>, %arg7: memref<8x128xf32, #tpu.memory_space<vmem>>, %arg8: memref<8x128xf32, #tpu.memory_space<vmem>>, %arg9: memref<8x128xf32, #tpu.memory_space<vmem>>) attributes {dimension_semantics = [#tpu.dimension_semantics<parallel>, #tpu.dimension_semantics<parallel>, #tpu.dimension_semantics<arbitrary>], iteration_bounds = array<i64: 1, 1, 9>, scalar_prefetch = 0 : i64, scratch_operands = 1 : i64, tpu.core_type = #tpu.core_type<tc>, window_params = [{transform_indices = @transform_0, window_bounds = array<i64: 8, 128>}, {transform_indices = @transform_1, window_bounds = array<i64: 128, 128>}, {transform_indices = @transform_2, window_bounds = array<i64: 1, 128>}, {transform_indices = @transform_3, window_bounds = array<i64: 1, 128>}, {transform_indices = @transform_4, window_bounds = array<i64: 8, 128>}, {transform_indices = @transform_5, window_bounds = array<i64: 8, 128>}]} {
    %c0_i32 = arith.constant 0 : i32
    %0 = arith.cmpi eq, %arg2, %c0_i32 : i32
    %1 = arith.extui %0 : i1 to i32
    %c0_i32_0 = arith.constant 0 : i32
    %2 = arith.cmpi ne, %1, %c0_i32_0 : i32
    scf.if %2 {
      %cst_9 = arith.constant 0.000000e+00 : f32
      %12 = vector.broadcast %cst_9 : f32 to vector<8x128xf32>
      %c0_10 = arith.constant 0 : index
      %c0_11 = arith.constant 0 : index
      %13 = vector.load %arg9[%c0_10, %c0_11] : memref<8x128xf32, #tpu.memory_space<vmem>>, vector<8x128xf32>
      tpu.vector_store %arg9[%c0_10, %c0_11], %12 {strides = array<i32>} : memref<8x128xf32, #tpu.memory_space<vmem>>, vector<8x128xf32>,
    } else {
    }
    %c0 = arith.constant 0 : index
    %c0_1 = arith.constant 0 : index
    %3 = vector.load %arg9[%c0, %c0_1] : memref<8x128xf32, #tpu.memory_space<vmem>>, vector<8x128xf32>
    %c0_2 = arith.constant 0 : index
    %c0_3 = arith.constant 0 : index
    %4 = vector.load %arg3[%c0_2, %c0_3] : memref<8x128xbf16, #tpu.memory_space<vmem>>, vector<8x128xbf16>
    %c0_4 = arith.constant 0 : index
    %c0_5 = arith.constant 0 : index
    %5 = vector.load %arg4[%c0_4, %c0_5] : memref<128x128xbf16, #tpu.memory_space<vmem>>, vector<128x128xbf16>
    %cst = arith.constant dense<0.000000e+00> : vector<8x128xf32>
    %6 = tpu.matmul %4, %5, %cst {dimension_numbers = #tpu.dot_dimension_numbers<[1], [0], [0], [1], [0, 0, 1, 1], [], []>} : vector<8x128xbf16>, vector<128x128xbf16>, vector<8x128xf32> -> vector<8x128xf32>
    %7 = arith.addf %3, %6 : vector<8x128xf32>
    %c0_6 = arith.constant 0 : index
    %c0_7 = arith.constant 0 : index
    %8 = vector.load %arg9[%c0_6, %c0_7] : memref<8x128xf32, #tpu.memory_space<vmem>>, vector<8x128xf32>
    tpu.vector_store %arg9[%c0_6, %c0_7], %7 {strides = array<i32>} : memref<8x128xf32, #tpu.memory_space<vmem>>, vector<8x128xf32>,
    %c8_i32 = arith.constant 8 : i32
    %9 = arith.cmpi eq, %arg2, %c8_i32 : i32
    %10 = arith.extui %9 : i1 to i32
    %c0_i32_8 = arith.constant 0 : i32
    %11 = arith.cmpi ne, %10, %c0_i32_8 : i32
    scf.if %11 {
      %c0_9 = arith.constant 0 : index
      %c0_10 = arith.constant 0 : index
      %12 = vector.load %arg9[%c0_9, %c0_10] : memref<8x128xf32, #tpu.memory_space<vmem>>, vector<8x128xf32>
      %c0_11 = arith.constant 0 : index
      %c0_12 = arith.constant 0 : index
      %13 = vector.load %arg5[%c0_11, %c0_12] : memref<1x128xf32, #tpu.memory_space<vmem>>, vector<1x128xf32>
      %14 = vector.broadcast %13 : vector<1x128xf32> to vector<8x128xf32>
      %15 = arith.mulf %12, %14 : vector<8x128xf32>
      %c0_13 = arith.constant 0 : index
      %c0_14 = arith.constant 0 : index
      %16 = vector.load %arg6[%c0_13, %c0_14] : memref<1x128xf32, #tpu.memory_space<vmem>>, vector<1x128xf32>
      %17 = vector.broadcast %16 : vector<1x128xf32> to vector<8x128xf32>
      %18 = arith.addf %15, %17 : vector<8x128xf32>
      %c0_15 = arith.constant 0 : index
      %c0_16 = arith.constant 0 : index
      %19 = vector.load %arg7[%c0_15, %c0_16] : memref<8x128xf32, #tpu.memory_space<vmem>>, vector<8x128xf32>
      %20 = arith.addf %18, %19 : vector<8x128xf32>
      %cst_17 = arith.constant 0.000000e+00 : f32
      %21 = vector.broadcast %cst_17 : f32 to vector<8x128xf32>
      %22 = arith.maximumf %20, %21 : vector<8x128xf32>
      %c0_18 = arith.constant 0 : index
      %c0_19 = arith.constant 0 : index
      %23 = vector.load %arg8[%c0_18, %c0_19] : memref<8x128xf32, #tpu.memory_space<vmem>>, vector<8x128xf32>
      tpu.vector_store %arg8[%c0_18, %c0_19], %22 {strides = array<i32>} : memref<8x128xf32, #tpu.memory_space<vmem>>, vector<8x128xf32>,
    } else {
    }
    return
  }
  func.func @transform_0(%arg0: i32, %arg1: i32, %arg2: i32) -> (i32, i32) {
    %c0_i32 = arith.constant 0 : i32
    return %arg0, %arg2 : i32, i32
  }
  func.func @transform_1(%arg0: i32, %arg1: i32, %arg2: i32) -> (i32, i32) {
    %c0_i32 = arith.constant 0 : i32
    return %arg2, %arg1 : i32, i32
  }
  func.func @transform_2(%arg0: i32, %arg1: i32, %arg2: i32) -> (i32, i32) {
    %c0_i32 = arith.constant 0 : i32
    %c0_i32_0 = arith.constant 0 : i32
    return %c0_i32, %arg1 : i32, i32
  }
  func.func @transform_3(%arg0: i32, %arg1: i32, %arg2: i32) -> (i32, i32) {
    %c0_i32 = arith.constant 0 : i32
    %c0_i32_0 = arith.constant 0 : i32
    return %c0_i32, %arg1 : i32, i32
  }
  func.func @transform_4(%arg0: i32, %arg1: i32, %arg2: i32) -> (i32, i32) {
    %c0_i32 = arith.constant 0 : i32
    return %arg0, %arg1 : i32, i32
  }
  func.func @transform_5(%arg0: i32, %arg1: i32, %arg2: i32) -> (i32, i32) {
    %c0_i32 = arith.constant 0 : i32
    return %arg0, %arg1 : i32, i32
  }
}

module attributes {stable_mosaic.version = 11 : i64} {
  func.func @_mm_fused_kernel(%arg0: i32, %arg1: i32, %arg2: i32, %arg3: memref<8x128xbf16, #tpu.memory_space<vmem>>, %arg4: memref<128x128xbf16, #tpu.memory_space<vmem>>, %arg5: memref<1x128xf32, #tpu.memory_space<vmem>>, %arg6: memref<1x128xf32, #tpu.memory_space<vmem>>, %arg7: memref<8x128xf32, #tpu.memory_space<vmem>>, %arg8: memref<8x128xf32, #tpu.memory_space<vmem>>) attributes {dimension_semantics = [#tpu.dimension_semantics<parallel>, #tpu.dimension_semantics<parallel>, #tpu.dimension_semantics<arbitrary>], iteration_bounds = array<i64: 1, 1, 9>, scalar_prefetch = 0 : i64, scratch_operands = 1 : i64, tpu.core_type = #tpu.core_type<tc>, window_params = [{transform_indices = @transform_0, window_bounds = array<i64: 8, 128>}, {transform_indices = @transform_1, window_bounds = array<i64: 128, 128>}, {transform_indices = @transform_2, window_bounds = array<i64: 1, 128>}, {transform_indices = @transform_3, window_bounds = array<i64: 1, 128>}, {transform_indices = @transform_4, window_bounds = array<i64: 8, 128>}]} {
    %c0_i32 = arith.constant 0 : i32
    %0 = arith.cmpi eq, %arg2, %c0_i32 : i32
    %1 = arith.extui %0 : i1 to i32
    %c0_i32_0 = arith.constant 0 : i32
    %2 = arith.cmpi ne, %1, %c0_i32_0 : i32
    scf.if %2 {
      %cst_9 = arith.constant 0.000000e+00 : f32
      %12 = vector.broadcast %cst_9 : f32 to vector<8x128xf32>
      %c0_10 = arith.constant 0 : index
      %c0_11 = arith.constant 0 : index
      %13 = vector.load %arg8[%c0_10, %c0_11] : memref<8x128xf32, #tpu.memory_space<vmem>>, vector<8x128xf32>
      tpu.vector_store %arg8[%c0_10, %c0_11], %12 {strides = array<i32>} : memref<8x128xf32, #tpu.memory_space<vmem>>, vector<8x128xf32>,
    } else {
    }
    %c0 = arith.constant 0 : index
    %c0_1 = arith.constant 0 : index
    %3 = vector.load %arg8[%c0, %c0_1] : memref<8x128xf32, #tpu.memory_space<vmem>>, vector<8x128xf32>
    %c0_2 = arith.constant 0 : index
    %c0_3 = arith.constant 0 : index
    %4 = vector.load %arg3[%c0_2, %c0_3] : memref<8x128xbf16, #tpu.memory_space<vmem>>, vector<8x128xbf16>
    %c0_4 = arith.constant 0 : index
    %c0_5 = arith.constant 0 : index
    %5 = vector.load %arg4[%c0_4, %c0_5] : memref<128x128xbf16, #tpu.memory_space<vmem>>, vector<128x128xbf16>
    %cst = arith.constant dense<0.000000e+00> : vector<8x128xf32>
    %6 = tpu.matmul %4, %5, %cst {dimension_numbers = #tpu.dot_dimension_numbers<[1], [0], [0], [1], [0, 0, 1, 1], [], []>} : vector<8x128xbf16>, vector<128x128xbf16>, vector<8x128xf32> -> vector<8x128xf32>
    %7 = arith.addf %3, %6 : vector<8x128xf32>
    %c0_6 = arith.constant 0 : index
    %c0_7 = arith.constant 0 : index
    %8 = vector.load %arg8[%c0_6, %c0_7] : memref<8x128xf32, #tpu.memory_space<vmem>>, vector<8x128xf32>
    tpu.vector_store %arg8[%c0_6, %c0_7], %7 {strides = array<i32>} : memref<8x128xf32, #tpu.memory_space<vmem>>, vector<8x128xf32>,
    %c8_i32 = arith.constant 8 : i32
    %9 = arith.cmpi eq, %arg2, %c8_i32 : i32
    %10 = arith.extui %9 : i1 to i32
    %c0_i32_8 = arith.constant 0 : i32
    %11 = arith.cmpi ne, %10, %c0_i32_8 : i32
    scf.if %11 {
      %c0_9 = arith.constant 0 : index
      %c0_10 = arith.constant 0 : index
      %12 = vector.load %arg8[%c0_9, %c0_10] : memref<8x128xf32, #tpu.memory_space<vmem>>, vector<8x128xf32>
      %c0_11 = arith.constant 0 : index
      %c0_12 = arith.constant 0 : index
      %13 = vector.load %arg5[%c0_11, %c0_12] : memref<1x128xf32, #tpu.memory_space<vmem>>, vector<1x128xf32>
      %14 = vector.broadcast %13 : vector<1x128xf32> to vector<8x128xf32>
      %15 = arith.mulf %12, %14 : vector<8x128xf32>
      %c0_13 = arith.constant 0 : index
      %c0_14 = arith.constant 0 : index
      %16 = vector.load %arg6[%c0_13, %c0_14] : memref<1x128xf32, #tpu.memory_space<vmem>>, vector<1x128xf32>
      %17 = vector.broadcast %16 : vector<1x128xf32> to vector<8x128xf32>
      %18 = arith.addf %15, %17 : vector<8x128xf32>
      %cst_15 = arith.constant 0.000000e+00 : f32
      %19 = vector.broadcast %cst_15 : f32 to vector<8x128xf32>
      %20 = arith.maximumf %18, %19 : vector<8x128xf32>
      %c0_16 = arith.constant 0 : index
      %c0_17 = arith.constant 0 : index
      %21 = vector.load %arg7[%c0_16, %c0_17] : memref<8x128xf32, #tpu.memory_space<vmem>>, vector<8x128xf32>
      tpu.vector_store %arg7[%c0_16, %c0_17], %20 {strides = array<i32>} : memref<8x128xf32, #tpu.memory_space<vmem>>, vector<8x128xf32>,
    } else {
    }
    return
  }
  func.func @transform_0(%arg0: i32, %arg1: i32, %arg2: i32) -> (i32, i32) {
    %c0_i32 = arith.constant 0 : i32
    return %arg0, %arg2 : i32, i32
  }
  func.func @transform_1(%arg0: i32, %arg1: i32, %arg2: i32) -> (i32, i32) {
    %c0_i32 = arith.constant 0 : i32
    return %arg2, %arg1 : i32, i32
  }
  func.func @transform_2(%arg0: i32, %arg1: i32, %arg2: i32) -> (i32, i32) {
    %c0_i32 = arith.constant 0 : i32
    %c0_i32_0 = arith.constant 0 : i32
    return %c0_i32, %arg1 : i32, i32
  }
  func.func @transform_3(%arg0: i32, %arg1: i32, %arg2: i32) -> (i32, i32) {
    %c0_i32 = arith.constant 0 : i32
    %c0_i32_0 = arith.constant 0 : i32
    return %c0_i32, %arg1 : i32, i32
  }
  func.func @transform_4(%arg0: i32, %arg1: i32, %arg2: i32) -> (i32, i32) {
    %c0_i32 = arith.constant 0 : i32
    return %arg0, %arg1 : i32, i32
  }
}

module attributes {stable_mosaic.version = 11 : i64} {
  func.func @_mm_fused_kernel(%arg0: i32, %arg1: i32, %arg2: i32, %arg3: memref<8x128xbf16, #tpu.memory_space<vmem>>, %arg4: memref<128x256xbf16, #tpu.memory_space<vmem>>, %arg5: memref<1x256xf32, #tpu.memory_space<vmem>>, %arg6: memref<1x256xf32, #tpu.memory_space<vmem>>, %arg7: memref<8x256xf32, #tpu.memory_space<vmem>>, %arg8: memref<8x256xf32, #tpu.memory_space<vmem>>) attributes {dimension_semantics = [#tpu.dimension_semantics<parallel>, #tpu.dimension_semantics<parallel>, #tpu.dimension_semantics<arbitrary>], iteration_bounds = array<i64: 1, 1, 9>, scalar_prefetch = 0 : i64, scratch_operands = 1 : i64, tpu.core_type = #tpu.core_type<tc>, window_params = [{transform_indices = @transform_0, window_bounds = array<i64: 8, 128>}, {transform_indices = @transform_1, window_bounds = array<i64: 128, 256>}, {transform_indices = @transform_2, window_bounds = array<i64: 1, 256>}, {transform_indices = @transform_3, window_bounds = array<i64: 1, 256>}, {transform_indices = @transform_4, window_bounds = array<i64: 8, 256>}]} {
    %c0_i32 = arith.constant 0 : i32
    %0 = arith.cmpi eq, %arg2, %c0_i32 : i32
    %1 = arith.extui %0 : i1 to i32
    %c0_i32_0 = arith.constant 0 : i32
    %2 = arith.cmpi ne, %1, %c0_i32_0 : i32
    scf.if %2 {
      %cst_9 = arith.constant 0.000000e+00 : f32
      %12 = vector.broadcast %cst_9 : f32 to vector<8x256xf32>
      %c0_10 = arith.constant 0 : index
      %c0_11 = arith.constant 0 : index
      %13 = vector.load %arg8[%c0_10, %c0_11] : memref<8x256xf32, #tpu.memory_space<vmem>>, vector<8x256xf32>
      tpu.vector_store %arg8[%c0_10, %c0_11], %12 {strides = array<i32>} : memref<8x256xf32, #tpu.memory_space<vmem>>, vector<8x256xf32>,
    } else {
    }
    %c0 = arith.constant 0 : index
    %c0_1 = arith.constant 0 : index
    %3 = vector.load %arg8[%c0, %c0_1] : memref<8x256xf32, #tpu.memory_space<vmem>>, vector<8x256xf32>
    %c0_2 = arith.constant 0 : index
    %c0_3 = arith.constant 0 : index
    %4 = vector.load %arg3[%c0_2, %c0_3] : memref<8x128xbf16, #tpu.memory_space<vmem>>, vector<8x128xbf16>
    %c0_4 = arith.constant 0 : index
    %c0_5 = arith.constant 0 : index
    %5 = vector.load %arg4[%c0_4, %c0_5] : memref<128x256xbf16, #tpu.memory_space<vmem>>, vector<128x256xbf16>
    %cst = arith.constant dense<0.000000e+00> : vector<8x256xf32>
    %6 = tpu.matmul %4, %5, %cst {dimension_numbers = #tpu.dot_dimension_numbers<[1], [0], [0], [1], [0, 0, 1, 1], [], []>} : vector<8x128xbf16>, vector<128x256xbf16>, vector<8x256xf32> -> vector<8x256xf32>
    %7 = arith.addf %3, %6 : vector<8x256xf32>
    %c0_6 = arith.constant 0 : index
    %c0_7 = arith.constant 0 : index
    %8 = vector.load %arg8[%c0_6, %c0_7] : memref<8x256xf32, #tpu.memory_space<vmem>>, vector<8x256xf32>
    tpu.vector_store %arg8[%c0_6, %c0_7], %7 {strides = array<i32>} : memref<8x256xf32, #tpu.memory_space<vmem>>, vector<8x256xf32>,
    %c8_i32 = arith.constant 8 : i32
    %9 = arith.cmpi eq, %arg2, %c8_i32 : i32
    %10 = arith.extui %9 : i1 to i32
    %c0_i32_8 = arith.constant 0 : i32
    %11 = arith.cmpi ne, %10, %c0_i32_8 : i32
    scf.if %11 {
      %c0_9 = arith.constant 0 : index
      %c0_10 = arith.constant 0 : index
      %12 = vector.load %arg8[%c0_9, %c0_10] : memref<8x256xf32, #tpu.memory_space<vmem>>, vector<8x256xf32>
      %c0_11 = arith.constant 0 : index
      %c0_12 = arith.constant 0 : index
      %13 = vector.load %arg5[%c0_11, %c0_12] : memref<1x256xf32, #tpu.memory_space<vmem>>, vector<1x256xf32>
      %14 = vector.broadcast %13 : vector<1x256xf32> to vector<8x256xf32>
      %15 = arith.mulf %12, %14 : vector<8x256xf32>
      %c0_13 = arith.constant 0 : index
      %c0_14 = arith.constant 0 : index
      %16 = vector.load %arg6[%c0_13, %c0_14] : memref<1x256xf32, #tpu.memory_space<vmem>>, vector<1x256xf32>
      %17 = vector.broadcast %16 : vector<1x256xf32> to vector<8x256xf32>
      %18 = arith.addf %15, %17 : vector<8x256xf32>
      %cst_15 = arith.constant 0.000000e+00 : f32
      %19 = vector.broadcast %cst_15 : f32 to vector<8x256xf32>
      %20 = arith.maximumf %18, %19 : vector<8x256xf32>
      %c0_16 = arith.constant 0 : index
      %c0_17 = arith.constant 0 : index
      %21 = vector.load %arg7[%c0_16, %c0_17] : memref<8x256xf32, #tpu.memory_space<vmem>>, vector<8x256xf32>
      tpu.vector_store %arg7[%c0_16, %c0_17], %20 {strides = array<i32>} : memref<8x256xf32, #tpu.memory_space<vmem>>, vector<8x256xf32>,
    } else {
    }
    return
  }
  func.func @transform_0(%arg0: i32, %arg1: i32, %arg2: i32) -> (i32, i32) {
    %c0_i32 = arith.constant 0 : i32
    return %arg0, %arg2 : i32, i32
  }
  func.func @transform_1(%arg0: i32, %arg1: i32, %arg2: i32) -> (i32, i32) {
    %c0_i32 = arith.constant 0 : i32
    return %arg2, %arg1 : i32, i32
  }
  func.func @transform_2(%arg0: i32, %arg1: i32, %arg2: i32) -> (i32, i32) {
    %c0_i32 = arith.constant 0 : i32
    %c0_i32_0 = arith.constant 0 : i32
    return %c0_i32, %arg1 : i32, i32
  }
  func.func @transform_3(%arg0: i32, %arg1: i32, %arg2: i32) -> (i32, i32) {
    %c0_i32 = arith.constant 0 : i32
    %c0_i32_0 = arith.constant 0 : i32
    return %c0_i32, %arg1 : i32, i32
  }
  func.func @transform_4(%arg0: i32, %arg1: i32, %arg2: i32) -> (i32, i32) {
    %c0_i32 = arith.constant 0 : i32
    return %arg0, %arg1 : i32, i32
  }
}

module attributes {stable_mosaic.version = 11 : i64} {
  func.func @_mm_fused_kernel(%arg0: i32, %arg1: i32, %arg2: i32, %arg3: memref<8x256xbf16, #tpu.memory_space<vmem>>, %arg4: memref<256x256xbf16, #tpu.memory_space<vmem>>, %arg5: memref<1x256xf32, #tpu.memory_space<vmem>>, %arg6: memref<1x256xf32, #tpu.memory_space<vmem>>, %arg7: memref<8x256xf32, #tpu.memory_space<vmem>>, %arg8: memref<8x256xf32, #tpu.memory_space<vmem>>, %arg9: memref<8x256xf32, #tpu.memory_space<vmem>>) attributes {dimension_semantics = [#tpu.dimension_semantics<parallel>, #tpu.dimension_semantics<parallel>, #tpu.dimension_semantics<arbitrary>], iteration_bounds = array<i64: 1, 1, 9>, scalar_prefetch = 0 : i64, scratch_operands = 1 : i64, tpu.core_type = #tpu.core_type<tc>, window_params = [{transform_indices = @transform_0, window_bounds = array<i64: 8, 256>}, {transform_indices = @transform_1, window_bounds = array<i64: 256, 256>}, {transform_indices = @transform_2, window_bounds = array<i64: 1, 256>}, {transform_indices = @transform_3, window_bounds = array<i64: 1, 256>}, {transform_indices = @transform_4, window_bounds = array<i64: 8, 256>}, {transform_indices = @transform_5, window_bounds = array<i64: 8, 256>}]} {
    %c0_i32 = arith.constant 0 : i32
    %0 = arith.cmpi eq, %arg2, %c0_i32 : i32
    %1 = arith.extui %0 : i1 to i32
    %c0_i32_0 = arith.constant 0 : i32
    %2 = arith.cmpi ne, %1, %c0_i32_0 : i32
    scf.if %2 {
      %cst_9 = arith.constant 0.000000e+00 : f32
      %12 = vector.broadcast %cst_9 : f32 to vector<8x256xf32>
      %c0_10 = arith.constant 0 : index
      %c0_11 = arith.constant 0 : index
      %13 = vector.load %arg9[%c0_10, %c0_11] : memref<8x256xf32, #tpu.memory_space<vmem>>, vector<8x256xf32>
      tpu.vector_store %arg9[%c0_10, %c0_11], %12 {strides = array<i32>} : memref<8x256xf32, #tpu.memory_space<vmem>>, vector<8x256xf32>,
    } else {
    }
    %c0 = arith.constant 0 : index
    %c0_1 = arith.constant 0 : index
    %3 = vector.load %arg9[%c0, %c0_1] : memref<8x256xf32, #tpu.memory_space<vmem>>, vector<8x256xf32>
    %c0_2 = arith.constant 0 : index
    %c0_3 = arith.constant 0 : index
    %4 = vector.load %arg3[%c0_2, %c0_3] : memref<8x256xbf16, #tpu.memory_space<vmem>>, vector<8x256xbf16>
    %c0_4 = arith.constant 0 : index
    %c0_5 = arith.constant 0 : index
    %5 = vector.load %arg4[%c0_4, %c0_5] : memref<256x256xbf16, #tpu.memory_space<vmem>>, vector<256x256xbf16>
    %cst = arith.constant dense<0.000000e+00> : vector<8x256xf32>
    %6 = tpu.matmul %4, %5, %cst {dimension_numbers = #tpu.dot_dimension_numbers<[1], [0], [0], [1], [0, 0, 1, 1], [], []>} : vector<8x256xbf16>, vector<256x256xbf16>, vector<8x256xf32> -> vector<8x256xf32>
    %7 = arith.addf %3, %6 : vector<8x256xf32>
    %c0_6 = arith.constant 0 : index
    %c0_7 = arith.constant 0 : index
    %8 = vector.load %arg9[%c0_6, %c0_7] : memref<8x256xf32, #tpu.memory_space<vmem>>, vector<8x256xf32>
    tpu.vector_store %arg9[%c0_6, %c0_7], %7 {strides = array<i32>} : memref<8x256xf32, #tpu.memory_space<vmem>>, vector<8x256xf32>,
    %c8_i32 = arith.constant 8 : i32
    %9 = arith.cmpi eq, %arg2, %c8_i32 : i32
    %10 = arith.extui %9 : i1 to i32
    %c0_i32_8 = arith.constant 0 : i32
    %11 = arith.cmpi ne, %10, %c0_i32_8 : i32
    scf.if %11 {
      %c0_9 = arith.constant 0 : index
      %c0_10 = arith.constant 0 : index
      %12 = vector.load %arg9[%c0_9, %c0_10] : memref<8x256xf32, #tpu.memory_space<vmem>>, vector<8x256xf32>
      %c0_11 = arith.constant 0 : index
      %c0_12 = arith.constant 0 : index
      %13 = vector.load %arg5[%c0_11, %c0_12] : memref<1x256xf32, #tpu.memory_space<vmem>>, vector<1x256xf32>
      %14 = vector.broadcast %13 : vector<1x256xf32> to vector<8x256xf32>
      %15 = arith.mulf %12, %14 : vector<8x256xf32>
      %c0_13 = arith.constant 0 : index
      %c0_14 = arith.constant 0 : index
      %16 = vector.load %arg6[%c0_13, %c0_14] : memref<1x256xf32, #tpu.memory_space<vmem>>, vector<1x256xf32>
      %17 = vector.broadcast %16 : vector<1x256xf32> to vector<8x256xf32>
      %18 = arith.addf %15, %17 : vector<8x256xf32>
      %c0_15 = arith.constant 0 : index
      %c0_16 = arith.constant 0 : index
      %19 = vector.load %arg7[%c0_15, %c0_16] : memref<8x256xf32, #tpu.memory_space<vmem>>, vector<8x256xf32>
      %20 = arith.addf %18, %19 : vector<8x256xf32>
      %cst_17 = arith.constant 0.000000e+00 : f32
      %21 = vector.broadcast %cst_17 : f32 to vector<8x256xf32>
      %22 = arith.maximumf %20, %21 : vector<8x256xf32>
      %c0_18 = arith.constant 0 : index
      %c0_19 = arith.constant 0 : index
      %23 = vector.load %arg8[%c0_18, %c0_19] : memref<8x256xf32, #tpu.memory_space<vmem>>, vector<8x256xf32>
      tpu.vector_store %arg8[%c0_18, %c0_19], %22 {strides = array<i32>} : memref<8x256xf32, #tpu.memory_space<vmem>>, vector<8x256xf32>,
    } else {
    }
    return
  }
  func.func @transform_0(%arg0: i32, %arg1: i32, %arg2: i32) -> (i32, i32) {
    %c0_i32 = arith.constant 0 : i32
    return %arg0, %arg2 : i32, i32
  }
  func.func @transform_1(%arg0: i32, %arg1: i32, %arg2: i32) -> (i32, i32) {
    %c0_i32 = arith.constant 0 : i32
    return %arg2, %arg1 : i32, i32
  }
  func.func @transform_2(%arg0: i32, %arg1: i32, %arg2: i32) -> (i32, i32) {
    %c0_i32 = arith.constant 0 : i32
    %c0_i32_0 = arith.constant 0 : i32
    return %c0_i32, %arg1 : i32, i32
  }
  func.func @transform_3(%arg0: i32, %arg1: i32, %arg2: i32) -> (i32, i32) {
    %c0_i32 = arith.constant 0 : i32
    %c0_i32_0 = arith.constant 0 : i32
    return %c0_i32, %arg1 : i32, i32
  }
  func.func @transform_4(%arg0: i32, %arg1: i32, %arg2: i32) -> (i32, i32) {
    %c0_i32 = arith.constant 0 : i32
    return %arg0, %arg1 : i32, i32
  }
  func.func @transform_5(%arg0: i32, %arg1: i32, %arg2: i32) -> (i32, i32) {
    %c0_i32 = arith.constant 0 : i32
    return %arg0, %arg1 : i32, i32
  }
}

module attributes {stable_mosaic.version = 11 : i64} {
  func.func @_mm_fused_kernel(%arg0: i32, %arg1: i32, %arg2: i32, %arg3: memref<8x128xbf16, #tpu.memory_space<vmem>>, %arg4: memref<128x256xbf16, #tpu.memory_space<vmem>>, %arg5: memref<1x256xf32, #tpu.memory_space<vmem>>, %arg6: memref<1x256xf32, #tpu.memory_space<vmem>>, %arg7: memref<8x256xf32, #tpu.memory_space<vmem>>, %arg8: memref<8x256xf32, #tpu.memory_space<vmem>>) attributes {dimension_semantics = [#tpu.dimension_semantics<parallel>, #tpu.dimension_semantics<parallel>, #tpu.dimension_semantics<arbitrary>], iteration_bounds = array<i64: 1, 1, 1>, scalar_prefetch = 0 : i64, scratch_operands = 1 : i64, tpu.core_type = #tpu.core_type<tc>, window_params = [{transform_indices = @transform_0, window_bounds = array<i64: 8, 128>}, {transform_indices = @transform_1, window_bounds = array<i64: 128, 256>}, {transform_indices = @transform_2, window_bounds = array<i64: 1, 256>}, {transform_indices = @transform_3, window_bounds = array<i64: 1, 256>}, {transform_indices = @transform_4, window_bounds = array<i64: 8, 256>}]} {
    %c0_i32 = arith.constant 0 : i32
    %0 = arith.cmpi eq, %arg2, %c0_i32 : i32
    %1 = arith.extui %0 : i1 to i32
    %c0_i32_0 = arith.constant 0 : i32
    %2 = arith.cmpi ne, %1, %c0_i32_0 : i32
    scf.if %2 {
      %cst_10 = arith.constant 0.000000e+00 : f32
      %12 = vector.broadcast %cst_10 : f32 to vector<8x256xf32>
      %c0_11 = arith.constant 0 : index
      %c0_12 = arith.constant 0 : index
      %13 = vector.load %arg8[%c0_11, %c0_12] : memref<8x256xf32, #tpu.memory_space<vmem>>, vector<8x256xf32>
      tpu.vector_store %arg8[%c0_11, %c0_12], %12 {strides = array<i32>} : memref<8x256xf32, #tpu.memory_space<vmem>>, vector<8x256xf32>,
    } else {
    }
    %c0 = arith.constant 0 : index
    %c0_1 = arith.constant 0 : index
    %3 = vector.load %arg8[%c0, %c0_1] : memref<8x256xf32, #tpu.memory_space<vmem>>, vector<8x256xf32>
    %c0_2 = arith.constant 0 : index
    %c0_3 = arith.constant 0 : index
    %4 = vector.load %arg3[%c0_2, %c0_3] : memref<8x128xbf16, #tpu.memory_space<vmem>>, vector<8x128xbf16>
    %c0_4 = arith.constant 0 : index
    %c0_5 = arith.constant 0 : index
    %5 = vector.load %arg4[%c0_4, %c0_5] : memref<128x256xbf16, #tpu.memory_space<vmem>>, vector<128x256xbf16>
    %cst = arith.constant dense<0.000000e+00> : vector<8x256xf32>
    %6 = tpu.matmul %4, %5, %cst {dimension_numbers = #tpu.dot_dimension_numbers<[1], [0], [0], [1], [0, 0, 1, 1], [], []>} : vector<8x128xbf16>, vector<128x256xbf16>, vector<8x256xf32> -> vector<8x256xf32>
    %7 = arith.addf %3, %6 : vector<8x256xf32>
    %c0_6 = arith.constant 0 : index
    %c0_7 = arith.constant 0 : index
    %8 = vector.load %arg8[%c0_6, %c0_7] : memref<8x256xf32, #tpu.memory_space<vmem>>, vector<8x256xf32>
    tpu.vector_store %arg8[%c0_6, %c0_7], %7 {strides = array<i32>} : memref<8x256xf32, #tpu.memory_space<vmem>>, vector<8x256xf32>,
    %c0_i32_8 = arith.constant 0 : i32
    %9 = arith.cmpi eq, %arg2, %c0_i32_8 : i32
    %10 = arith.extui %9 : i1 to i32
    %c0_i32_9 = arith.constant 0 : i32
    %11 = arith.cmpi ne, %10, %c0_i32_9 : i32
    scf.if %11 {
      %c0_10 = arith.constant 0 : index
      %c0_11 = arith.constant 0 : index
      %12 = vector.load %arg8[%c0_10, %c0_11] : memref<8x256xf32, #tpu.memory_space<vmem>>, vector<8x256xf32>
      %c0_12 = arith.constant 0 : index
      %c0_13 = arith.constant 0 : index
      %13 = vector.load %arg5[%c0_12, %c0_13] : memref<1x256xf32, #tpu.memory_space<vmem>>, vector<1x256xf32>
      %14 = vector.broadcast %13 : vector<1x256xf32> to vector<8x256xf32>
      %15 = arith.mulf %12, %14 : vector<8x256xf32>
      %c0_14 = arith.constant 0 : index
      %c0_15 = arith.constant 0 : index
      %16 = vector.load %arg6[%c0_14, %c0_15] : memref<1x256xf32, #tpu.memory_space<vmem>>, vector<1x256xf32>
      %17 = vector.broadcast %16 : vector<1x256xf32> to vector<8x256xf32>
      %18 = arith.addf %15, %17 : vector<8x256xf32>
      %c0_16 = arith.constant 0 : index
      %c0_17 = arith.constant 0 : index
      %19 = vector.load %arg7[%c0_16, %c0_17] : memref<8x256xf32, #tpu.memory_space<vmem>>, vector<8x256xf32>
      tpu.vector_store %arg7[%c0_16, %c0_17], %18 {strides = array<i32>} : memref<8x256xf32, #tpu.memory_space<vmem>>, vector<8x256xf32>,
    } else {
    }
    return
  }
  func.func @transform_0(%arg0: i32, %arg1: i32, %arg2: i32) -> (i32, i32) {
    %c0_i32 = arith.constant 0 : i32
    return %arg0, %arg2 : i32, i32
  }
  func.func @transform_1(%arg0: i32, %arg1: i32, %arg2: i32) -> (i32, i32) {
    %c0_i32 = arith.constant 0 : i32
    return %arg2, %arg1 : i32, i32
  }
  func.func @transform_2(%arg0: i32, %arg1: i32, %arg2: i32) -> (i32, i32) {
    %c0_i32 = arith.constant 0 : i32
    %c0_i32_0 = arith.constant 0 : i32
    return %c0_i32, %arg1 : i32, i32
  }
  func.func @transform_3(%arg0: i32, %arg1: i32, %arg2: i32) -> (i32, i32) {
    %c0_i32 = arith.constant 0 : i32
    %c0_i32_0 = arith.constant 0 : i32
    return %c0_i32, %arg1 : i32, i32
  }
  func.func @transform_4(%arg0: i32, %arg1: i32, %arg2: i32) -> (i32, i32) {
    %c0_i32 = arith.constant 0 : i32
    return %arg0, %arg1 : i32, i32
  }
}

module attributes {stable_mosaic.version = 11 : i64} {
  func.func @_mm_fused_kernel(%arg0: i32, %arg1: i32, %arg2: i32, %arg3: memref<8x256xbf16, #tpu.memory_space<vmem>>, %arg4: memref<256x256xbf16, #tpu.memory_space<vmem>>, %arg5: memref<1x256xf32, #tpu.memory_space<vmem>>, %arg6: memref<1x256xf32, #tpu.memory_space<vmem>>, %arg7: memref<8x256xf32, #tpu.memory_space<vmem>>, %arg8: memref<8x256xf32, #tpu.memory_space<vmem>>) attributes {dimension_semantics = [#tpu.dimension_semantics<parallel>, #tpu.dimension_semantics<parallel>, #tpu.dimension_semantics<arbitrary>], iteration_bounds = array<i64: 1, 1, 9>, scalar_prefetch = 0 : i64, scratch_operands = 1 : i64, tpu.core_type = #tpu.core_type<tc>, window_params = [{transform_indices = @transform_0, window_bounds = array<i64: 8, 256>}, {transform_indices = @transform_1, window_bounds = array<i64: 256, 256>}, {transform_indices = @transform_2, window_bounds = array<i64: 1, 256>}, {transform_indices = @transform_3, window_bounds = array<i64: 1, 256>}, {transform_indices = @transform_4, window_bounds = array<i64: 8, 256>}]} {
    %c0_i32 = arith.constant 0 : i32
    %0 = arith.cmpi eq, %arg2, %c0_i32 : i32
    %1 = arith.extui %0 : i1 to i32
    %c0_i32_0 = arith.constant 0 : i32
    %2 = arith.cmpi ne, %1, %c0_i32_0 : i32
    scf.if %2 {
      %cst_9 = arith.constant 0.000000e+00 : f32
      %12 = vector.broadcast %cst_9 : f32 to vector<8x256xf32>
      %c0_10 = arith.constant 0 : index
      %c0_11 = arith.constant 0 : index
      %13 = vector.load %arg8[%c0_10, %c0_11] : memref<8x256xf32, #tpu.memory_space<vmem>>, vector<8x256xf32>
      tpu.vector_store %arg8[%c0_10, %c0_11], %12 {strides = array<i32>} : memref<8x256xf32, #tpu.memory_space<vmem>>, vector<8x256xf32>,
    } else {
    }
    %c0 = arith.constant 0 : index
    %c0_1 = arith.constant 0 : index
    %3 = vector.load %arg8[%c0, %c0_1] : memref<8x256xf32, #tpu.memory_space<vmem>>, vector<8x256xf32>
    %c0_2 = arith.constant 0 : index
    %c0_3 = arith.constant 0 : index
    %4 = vector.load %arg3[%c0_2, %c0_3] : memref<8x256xbf16, #tpu.memory_space<vmem>>, vector<8x256xbf16>
    %c0_4 = arith.constant 0 : index
    %c0_5 = arith.constant 0 : index
    %5 = vector.load %arg4[%c0_4, %c0_5] : memref<256x256xbf16, #tpu.memory_space<vmem>>, vector<256x256xbf16>
    %cst = arith.constant dense<0.000000e+00> : vector<8x256xf32>
    %6 = tpu.matmul %4, %5, %cst {dimension_numbers = #tpu.dot_dimension_numbers<[1], [0], [0], [1], [0, 0, 1, 1], [], []>} : vector<8x256xbf16>, vector<256x256xbf16>, vector<8x256xf32> -> vector<8x256xf32>
    %7 = arith.addf %3, %6 : vector<8x256xf32>
    %c0_6 = arith.constant 0 : index
    %c0_7 = arith.constant 0 : index
    %8 = vector.load %arg8[%c0_6, %c0_7] : memref<8x256xf32, #tpu.memory_space<vmem>>, vector<8x256xf32>
    tpu.vector_store %arg8[%c0_6, %c0_7], %7 {strides = array<i32>} : memref<8x256xf32, #tpu.memory_space<vmem>>, vector<8x256xf32>,
    %c8_i32 = arith.constant 8 : i32
    %9 = arith.cmpi eq, %arg2, %c8_i32 : i32
    %10 = arith.extui %9 : i1 to i32
    %c0_i32_8 = arith.constant 0 : i32
    %11 = arith.cmpi ne, %10, %c0_i32_8 : i32
    scf.if %11 {
      %c0_9 = arith.constant 0 : index
      %c0_10 = arith.constant 0 : index
      %12 = vector.load %arg8[%c0_9, %c0_10] : memref<8x256xf32, #tpu.memory_space<vmem>>, vector<8x256xf32>
      %c0_11 = arith.constant 0 : index
      %c0_12 = arith.constant 0 : index
      %13 = vector.load %arg5[%c0_11, %c0_12] : memref<1x256xf32, #tpu.memory_space<vmem>>, vector<1x256xf32>
      %14 = vector.broadcast %13 : vector<1x256xf32> to vector<8x256xf32>
      %15 = arith.mulf %12, %14 : vector<8x256xf32>
      %c0_13 = arith.constant 0 : index
      %c0_14 = arith.constant 0 : index
      %16 = vector.load %arg6[%c0_13, %c0_14] : memref<1x256xf32, #tpu.memory_space<vmem>>, vector<1x256xf32>
      %17 = vector.broadcast %16 : vector<1x256xf32> to vector<8x256xf32>
      %18 = arith.addf %15, %17 : vector<8x256xf32>
      %cst_15 = arith.constant 0.000000e+00 : f32
      %19 = vector.broadcast %cst_15 : f32 to vector<8x256xf32>
      %20 = arith.maximumf %18, %19 : vector<8x256xf32>
      %c0_16 = arith.constant 0 : index
      %c0_17 = arith.constant 0 : index
      %21 = vector.load %arg7[%c0_16, %c0_17] : memref<8x256xf32, #tpu.memory_space<vmem>>, vector<8x256xf32>
      tpu.vector_store %arg7[%c0_16, %c0_17], %20 {strides = array<i32>} : memref<8x256xf32, #tpu.memory_space<vmem>>, vector<8x256xf32>,
    } else {
    }
    return
  }
  func.func @transform_0(%arg0: i32, %arg1: i32, %arg2: i32) -> (i32, i32) {
    %c0_i32 = arith.constant 0 : i32
    return %arg0, %arg2 : i32, i32
  }
  func.func @transform_1(%arg0: i32, %arg1: i32, %arg2: i32) -> (i32, i32) {
    %c0_i32 = arith.constant 0 : i32
    return %arg2, %arg1 : i32, i32
  }
  func.func @transform_2(%arg0: i32, %arg1: i32, %arg2: i32) -> (i32, i32) {
    %c0_i32 = arith.constant 0 : i32
    %c0_i32_0 = arith.constant 0 : i32
    return %c0_i32, %arg1 : i32, i32
  }
  func.func @transform_3(%arg0: i32, %arg1: i32, %arg2: i32) -> (i32, i32) {
    %c0_i32 = arith.constant 0 : i32
    %c0_i32_0 = arith.constant 0 : i32
    return %c0_i32, %arg1 : i32, i32
  }
  func.func @transform_4(%arg0: i32, %arg1: i32, %arg2: i32) -> (i32, i32) {
    %c0_i32 = arith.constant 0 : i32
    return %arg0, %arg1 : i32, i32
  }
}

module attributes {stable_mosaic.version = 11 : i64} {
  func.func @_mm_fused_kernel(%arg0: i32, %arg1: i32, %arg2: i32, %arg3: memref<8x256xbf16, #tpu.memory_space<vmem>>, %arg4: memref<256x256xbf16, #tpu.memory_space<vmem>>, %arg5: memref<1x256xf32, #tpu.memory_space<vmem>>, %arg6: memref<1x256xf32, #tpu.memory_space<vmem>>, %arg7: memref<8x256xf32, #tpu.memory_space<vmem>>, %arg8: memref<8x256xf32, #tpu.memory_space<vmem>>) attributes {dimension_semantics = [#tpu.dimension_semantics<parallel>, #tpu.dimension_semantics<parallel>, #tpu.dimension_semantics<arbitrary>], iteration_bounds = array<i64: 1, 2, 9>, scalar_prefetch = 0 : i64, scratch_operands = 1 : i64, tpu.core_type = #tpu.core_type<tc>, window_params = [{transform_indices = @transform_0, window_bounds = array<i64: 8, 256>}, {transform_indices = @transform_1, window_bounds = array<i64: 256, 256>}, {transform_indices = @transform_2, window_bounds = array<i64: 1, 256>}, {transform_indices = @transform_3, window_bounds = array<i64: 1, 256>}, {transform_indices = @transform_4, window_bounds = array<i64: 8, 256>}]} {
    %c0_i32 = arith.constant 0 : i32
    %0 = arith.cmpi eq, %arg2, %c0_i32 : i32
    %1 = arith.extui %0 : i1 to i32
    %c0_i32_0 = arith.constant 0 : i32
    %2 = arith.cmpi ne, %1, %c0_i32_0 : i32
    scf.if %2 {
      %cst_9 = arith.constant 0.000000e+00 : f32
      %12 = vector.broadcast %cst_9 : f32 to vector<8x256xf32>
      %c0_10 = arith.constant 0 : index
      %c0_11 = arith.constant 0 : index
      %13 = vector.load %arg8[%c0_10, %c0_11] : memref<8x256xf32, #tpu.memory_space<vmem>>, vector<8x256xf32>
      tpu.vector_store %arg8[%c0_10, %c0_11], %12 {strides = array<i32>} : memref<8x256xf32, #tpu.memory_space<vmem>>, vector<8x256xf32>,
    } else {
    }
    %c0 = arith.constant 0 : index
    %c0_1 = arith.constant 0 : index
    %3 = vector.load %arg8[%c0, %c0_1] : memref<8x256xf32, #tpu.memory_space<vmem>>, vector<8x256xf32>
    %c0_2 = arith.constant 0 : index
    %c0_3 = arith.constant 0 : index
    %4 = vector.load %arg3[%c0_2, %c0_3] : memref<8x256xbf16, #tpu.memory_space<vmem>>, vector<8x256xbf16>
    %c0_4 = arith.constant 0 : index
    %c0_5 = arith.constant 0 : index
    %5 = vector.load %arg4[%c0_4, %c0_5] : memref<256x256xbf16, #tpu.memory_space<vmem>>, vector<256x256xbf16>
    %cst = arith.constant dense<0.000000e+00> : vector<8x256xf32>
    %6 = tpu.matmul %4, %5, %cst {dimension_numbers = #tpu.dot_dimension_numbers<[1], [0], [0], [1], [0, 0, 1, 1], [], []>} : vector<8x256xbf16>, vector<256x256xbf16>, vector<8x256xf32> -> vector<8x256xf32>
    %7 = arith.addf %3, %6 : vector<8x256xf32>
    %c0_6 = arith.constant 0 : index
    %c0_7 = arith.constant 0 : index
    %8 = vector.load %arg8[%c0_6, %c0_7] : memref<8x256xf32, #tpu.memory_space<vmem>>, vector<8x256xf32>
    tpu.vector_store %arg8[%c0_6, %c0_7], %7 {strides = array<i32>} : memref<8x256xf32, #tpu.memory_space<vmem>>, vector<8x256xf32>,
    %c8_i32 = arith.constant 8 : i32
    %9 = arith.cmpi eq, %arg2, %c8_i32 : i32
    %10 = arith.extui %9 : i1 to i32
    %c0_i32_8 = arith.constant 0 : i32
    %11 = arith.cmpi ne, %10, %c0_i32_8 : i32
    scf.if %11 {
      %c0_9 = arith.constant 0 : index
      %c0_10 = arith.constant 0 : index
      %12 = vector.load %arg8[%c0_9, %c0_10] : memref<8x256xf32, #tpu.memory_space<vmem>>, vector<8x256xf32>
      %c0_11 = arith.constant 0 : index
      %c0_12 = arith.constant 0 : index
      %13 = vector.load %arg5[%c0_11, %c0_12] : memref<1x256xf32, #tpu.memory_space<vmem>>, vector<1x256xf32>
      %14 = vector.broadcast %13 : vector<1x256xf32> to vector<8x256xf32>
      %15 = arith.mulf %12, %14 : vector<8x256xf32>
      %c0_13 = arith.constant 0 : index
      %c0_14 = arith.constant 0 : index
      %16 = vector.load %arg6[%c0_13, %c0_14] : memref<1x256xf32, #tpu.memory_space<vmem>>, vector<1x256xf32>
      %17 = vector.broadcast %16 : vector<1x256xf32> to vector<8x256xf32>
      %18 = arith.addf %15, %17 : vector<8x256xf32>
      %cst_15 = arith.constant 0.000000e+00 : f32
      %19 = vector.broadcast %cst_15 : f32 to vector<8x256xf32>
      %20 = arith.maximumf %18, %19 : vector<8x256xf32>
      %c0_16 = arith.constant 0 : index
      %c0_17 = arith.constant 0 : index
      %21 = vector.load %arg7[%c0_16, %c0_17] : memref<8x256xf32, #tpu.memory_space<vmem>>, vector<8x256xf32>
      tpu.vector_store %arg7[%c0_16, %c0_17], %20 {strides = array<i32>} : memref<8x256xf32, #tpu.memory_space<vmem>>, vector<8x256xf32>,
    } else {
    }
    return
  }
  func.func @transform_0(%arg0: i32, %arg1: i32, %arg2: i32) -> (i32, i32) {
    %c0_i32 = arith.constant 0 : i32
    return %arg0, %arg2 : i32, i32
  }
  func.func @transform_1(%arg0: i32, %arg1: i32, %arg2: i32) -> (i32, i32) {
    %c0_i32 = arith.constant 0 : i32
    return %arg2, %arg1 : i32, i32
  }
  func.func @transform_2(%arg0: i32, %arg1: i32, %arg2: i32) -> (i32, i32) {
    %c0_i32 = arith.constant 0 : i32
    %c0_i32_0 = arith.constant 0 : i32
    return %c0_i32, %arg1 : i32, i32
  }
  func.func @transform_3(%arg0: i32, %arg1: i32, %arg2: i32) -> (i32, i32) {
    %c0_i32 = arith.constant 0 : i32
    %c0_i32_0 = arith.constant 0 : i32
    return %c0_i32, %arg1 : i32, i32
  }
  func.func @transform_4(%arg0: i32, %arg1: i32, %arg2: i32) -> (i32, i32) {
    %c0_i32 = arith.constant 0 : i32
    return %arg0, %arg1 : i32, i32
  }
}

module attributes {stable_mosaic.version = 11 : i64} {
  func.func @_mm_fused_kernel(%arg0: i32, %arg1: i32, %arg2: i32, %arg3: memref<8x256xbf16, #tpu.memory_space<vmem>>, %arg4: memref<256x256xbf16, #tpu.memory_space<vmem>>, %arg5: memref<1x256xf32, #tpu.memory_space<vmem>>, %arg6: memref<1x256xf32, #tpu.memory_space<vmem>>, %arg7: memref<8x256xf32, #tpu.memory_space<vmem>>, %arg8: memref<8x256xf32, #tpu.memory_space<vmem>>) attributes {dimension_semantics = [#tpu.dimension_semantics<parallel>, #tpu.dimension_semantics<parallel>, #tpu.dimension_semantics<arbitrary>], iteration_bounds = array<i64: 1, 2, 1>, scalar_prefetch = 0 : i64, scratch_operands = 1 : i64, tpu.core_type = #tpu.core_type<tc>, window_params = [{transform_indices = @transform_0, window_bounds = array<i64: 8, 256>}, {transform_indices = @transform_1, window_bounds = array<i64: 256, 256>}, {transform_indices = @transform_2, window_bounds = array<i64: 1, 256>}, {transform_indices = @transform_3, window_bounds = array<i64: 1, 256>}, {transform_indices = @transform_4, window_bounds = array<i64: 8, 256>}]} {
    %c0_i32 = arith.constant 0 : i32
    %0 = arith.cmpi eq, %arg2, %c0_i32 : i32
    %1 = arith.extui %0 : i1 to i32
    %c0_i32_0 = arith.constant 0 : i32
    %2 = arith.cmpi ne, %1, %c0_i32_0 : i32
    scf.if %2 {
      %cst_10 = arith.constant 0.000000e+00 : f32
      %12 = vector.broadcast %cst_10 : f32 to vector<8x256xf32>
      %c0_11 = arith.constant 0 : index
      %c0_12 = arith.constant 0 : index
      %13 = vector.load %arg8[%c0_11, %c0_12] : memref<8x256xf32, #tpu.memory_space<vmem>>, vector<8x256xf32>
      tpu.vector_store %arg8[%c0_11, %c0_12], %12 {strides = array<i32>} : memref<8x256xf32, #tpu.memory_space<vmem>>, vector<8x256xf32>,
    } else {
    }
    %c0 = arith.constant 0 : index
    %c0_1 = arith.constant 0 : index
    %3 = vector.load %arg8[%c0, %c0_1] : memref<8x256xf32, #tpu.memory_space<vmem>>, vector<8x256xf32>
    %c0_2 = arith.constant 0 : index
    %c0_3 = arith.constant 0 : index
    %4 = vector.load %arg3[%c0_2, %c0_3] : memref<8x256xbf16, #tpu.memory_space<vmem>>, vector<8x256xbf16>
    %c0_4 = arith.constant 0 : index
    %c0_5 = arith.constant 0 : index
    %5 = vector.load %arg4[%c0_4, %c0_5] : memref<256x256xbf16, #tpu.memory_space<vmem>>, vector<256x256xbf16>
    %cst = arith.constant dense<0.000000e+00> : vector<8x256xf32>
    %6 = tpu.matmul %4, %5, %cst {dimension_numbers = #tpu.dot_dimension_numbers<[1], [0], [0], [1], [0, 0, 1, 1], [], []>} : vector<8x256xbf16>, vector<256x256xbf16>, vector<8x256xf32> -> vector<8x256xf32>
    %7 = arith.addf %3, %6 : vector<8x256xf32>
    %c0_6 = arith.constant 0 : index
    %c0_7 = arith.constant 0 : index
    %8 = vector.load %arg8[%c0_6, %c0_7] : memref<8x256xf32, #tpu.memory_space<vmem>>, vector<8x256xf32>
    tpu.vector_store %arg8[%c0_6, %c0_7], %7 {strides = array<i32>} : memref<8x256xf32, #tpu.memory_space<vmem>>, vector<8x256xf32>,
    %c0_i32_8 = arith.constant 0 : i32
    %9 = arith.cmpi eq, %arg2, %c0_i32_8 : i32
    %10 = arith.extui %9 : i1 to i32
    %c0_i32_9 = arith.constant 0 : i32
    %11 = arith.cmpi ne, %10, %c0_i32_9 : i32
    scf.if %11 {
      %c0_10 = arith.constant 0 : index
      %c0_11 = arith.constant 0 : index
      %12 = vector.load %arg8[%c0_10, %c0_11] : memref<8x256xf32, #tpu.memory_space<vmem>>, vector<8x256xf32>
      %c0_12 = arith.constant 0 : index
      %c0_13 = arith.constant 0 : index
      %13 = vector.load %arg5[%c0_12, %c0_13] : memref<1x256xf32, #tpu.memory_space<vmem>>, vector<1x256xf32>
      %14 = vector.broadcast %13 : vector<1x256xf32> to vector<8x256xf32>
      %15 = arith.mulf %12, %14 : vector<8x256xf32>
      %c0_14 = arith.constant 0 : index
      %c0_15 = arith.constant 0 : index
      %16 = vector.load %arg6[%c0_14, %c0_15] : memref<1x256xf32, #tpu.memory_space<vmem>>, vector<1x256xf32>
      %17 = vector.broadcast %16 : vector<1x256xf32> to vector<8x256xf32>
      %18 = arith.addf %15, %17 : vector<8x256xf32>
      %c0_16 = arith.constant 0 : index
      %c0_17 = arith.constant 0 : index
      %19 = vector.load %arg7[%c0_16, %c0_17] : memref<8x256xf32, #tpu.memory_space<vmem>>, vector<8x256xf32>
      tpu.vector_store %arg7[%c0_16, %c0_17], %18 {strides = array<i32>} : memref<8x256xf32, #tpu.memory_space<vmem>>, vector<8x256xf32>,
    } else {
    }
    return
  }
  func.func @transform_0(%arg0: i32, %arg1: i32, %arg2: i32) -> (i32, i32) {
    %c0_i32 = arith.constant 0 : i32
    return %arg0, %arg2 : i32, i32
  }
  func.func @transform_1(%arg0: i32, %arg1: i32, %arg2: i32) -> (i32, i32) {
    %c0_i32 = arith.constant 0 : i32
    return %arg2, %arg1 : i32, i32
  }
  func.func @transform_2(%arg0: i32, %arg1: i32, %arg2: i32) -> (i32, i32) {
    %c0_i32 = arith.constant 0 : i32
    %c0_i32_0 = arith.constant 0 : i32
    return %c0_i32, %arg1 : i32, i32
  }
  func.func @transform_3(%arg0: i32, %arg1: i32, %arg2: i32) -> (i32, i32) {
    %c0_i32 = arith.constant 0 : i32
    %c0_i32_0 = arith.constant 0 : i32
    return %c0_i32, %arg1 : i32, i32
  }
  func.func @transform_4(%arg0: i32, %arg1: i32, %arg2: i32) -> (i32, i32) {
    %c0_i32 = arith.constant 0 : i32
    return %arg0, %arg1 : i32, i32
  }
}

module attributes {stable_mosaic.version = 11 : i64} {
  func.func @_mm_fused_kernel(%arg0: i32, %arg1: i32, %arg2: i32, %arg3: memref<8x512xbf16, #tpu.memory_space<vmem>>, %arg4: memref<512x256xbf16, #tpu.memory_space<vmem>>, %arg5: memref<1x256xf32, #tpu.memory_space<vmem>>, %arg6: memref<1x256xf32, #tpu.memory_space<vmem>>, %arg7: memref<8x256xf32, #tpu.memory_space<vmem>>, %arg8: memref<8x256xf32, #tpu.memory_space<vmem>>, %arg9: memref<8x256xf32, #tpu.memory_space<vmem>>) attributes {dimension_semantics = [#tpu.dimension_semantics<parallel>, #tpu.dimension_semantics<parallel>, #tpu.dimension_semantics<arbitrary>], iteration_bounds = array<i64: 1, 2, 9>, scalar_prefetch = 0 : i64, scratch_operands = 1 : i64, tpu.core_type = #tpu.core_type<tc>, window_params = [{transform_indices = @transform_0, window_bounds = array<i64: 8, 512>}, {transform_indices = @transform_1, window_bounds = array<i64: 512, 256>}, {transform_indices = @transform_2, window_bounds = array<i64: 1, 256>}, {transform_indices = @transform_3, window_bounds = array<i64: 1, 256>}, {transform_indices = @transform_4, window_bounds = array<i64: 8, 256>}, {transform_indices = @transform_5, window_bounds = array<i64: 8, 256>}]} {
    %c0_i32 = arith.constant 0 : i32
    %0 = arith.cmpi eq, %arg2, %c0_i32 : i32
    %1 = arith.extui %0 : i1 to i32
    %c0_i32_0 = arith.constant 0 : i32
    %2 = arith.cmpi ne, %1, %c0_i32_0 : i32
    scf.if %2 {
      %cst_9 = arith.constant 0.000000e+00 : f32
      %12 = vector.broadcast %cst_9 : f32 to vector<8x256xf32>
      %c0_10 = arith.constant 0 : index
      %c0_11 = arith.constant 0 : index
      %13 = vector.load %arg9[%c0_10, %c0_11] : memref<8x256xf32, #tpu.memory_space<vmem>>, vector<8x256xf32>
      tpu.vector_store %arg9[%c0_10, %c0_11], %12 {strides = array<i32>} : memref<8x256xf32, #tpu.memory_space<vmem>>, vector<8x256xf32>,
    } else {
    }
    %c0 = arith.constant 0 : index
    %c0_1 = arith.constant 0 : index
    %3 = vector.load %arg9[%c0, %c0_1] : memref<8x256xf32, #tpu.memory_space<vmem>>, vector<8x256xf32>
    %c0_2 = arith.constant 0 : index
    %c0_3 = arith.constant 0 : index
    %4 = vector.load %arg3[%c0_2, %c0_3] : memref<8x512xbf16, #tpu.memory_space<vmem>>, vector<8x512xbf16>
    %c0_4 = arith.constant 0 : index
    %c0_5 = arith.constant 0 : index
    %5 = vector.load %arg4[%c0_4, %c0_5] : memref<512x256xbf16, #tpu.memory_space<vmem>>, vector<512x256xbf16>
    %cst = arith.constant dense<0.000000e+00> : vector<8x256xf32>
    %6 = tpu.matmul %4, %5, %cst {dimension_numbers = #tpu.dot_dimension_numbers<[1], [0], [0], [1], [0, 0, 1, 1], [], []>} : vector<8x512xbf16>, vector<512x256xbf16>, vector<8x256xf32> -> vector<8x256xf32>
    %7 = arith.addf %3, %6 : vector<8x256xf32>
    %c0_6 = arith.constant 0 : index
    %c0_7 = arith.constant 0 : index
    %8 = vector.load %arg9[%c0_6, %c0_7] : memref<8x256xf32, #tpu.memory_space<vmem>>, vector<8x256xf32>
    tpu.vector_store %arg9[%c0_6, %c0_7], %7 {strides = array<i32>} : memref<8x256xf32, #tpu.memory_space<vmem>>, vector<8x256xf32>,
    %c8_i32 = arith.constant 8 : i32
    %9 = arith.cmpi eq, %arg2, %c8_i32 : i32
    %10 = arith.extui %9 : i1 to i32
    %c0_i32_8 = arith.constant 0 : i32
    %11 = arith.cmpi ne, %10, %c0_i32_8 : i32
    scf.if %11 {
      %c0_9 = arith.constant 0 : index
      %c0_10 = arith.constant 0 : index
      %12 = vector.load %arg9[%c0_9, %c0_10] : memref<8x256xf32, #tpu.memory_space<vmem>>, vector<8x256xf32>
      %c0_11 = arith.constant 0 : index
      %c0_12 = arith.constant 0 : index
      %13 = vector.load %arg5[%c0_11, %c0_12] : memref<1x256xf32, #tpu.memory_space<vmem>>, vector<1x256xf32>
      %14 = vector.broadcast %13 : vector<1x256xf32> to vector<8x256xf32>
      %15 = arith.mulf %12, %14 : vector<8x256xf32>
      %c0_13 = arith.constant 0 : index
      %c0_14 = arith.constant 0 : index
      %16 = vector.load %arg6[%c0_13, %c0_14] : memref<1x256xf32, #tpu.memory_space<vmem>>, vector<1x256xf32>
      %17 = vector.broadcast %16 : vector<1x256xf32> to vector<8x256xf32>
      %18 = arith.addf %15, %17 : vector<8x256xf32>
      %c0_15 = arith.constant 0 : index
      %c0_16 = arith.constant 0 : index
      %19 = vector.load %arg7[%c0_15, %c0_16] : memref<8x256xf32, #tpu.memory_space<vmem>>, vector<8x256xf32>
      %20 = arith.addf %18, %19 : vector<8x256xf32>
      %cst_17 = arith.constant 0.000000e+00 : f32
      %21 = vector.broadcast %cst_17 : f32 to vector<8x256xf32>
      %22 = arith.maximumf %20, %21 : vector<8x256xf32>
      %c0_18 = arith.constant 0 : index
      %c0_19 = arith.constant 0 : index
      %23 = vector.load %arg8[%c0_18, %c0_19] : memref<8x256xf32, #tpu.memory_space<vmem>>, vector<8x256xf32>
      tpu.vector_store %arg8[%c0_18, %c0_19], %22 {strides = array<i32>} : memref<8x256xf32, #tpu.memory_space<vmem>>, vector<8x256xf32>,
    } else {
    }
    return
  }
  func.func @transform_0(%arg0: i32, %arg1: i32, %arg2: i32) -> (i32, i32) {
    %c0_i32 = arith.constant 0 : i32
    return %arg0, %arg2 : i32, i32
  }
  func.func @transform_1(%arg0: i32, %arg1: i32, %arg2: i32) -> (i32, i32) {
    %c0_i32 = arith.constant 0 : i32
    return %arg2, %arg1 : i32, i32
  }
  func.func @transform_2(%arg0: i32, %arg1: i32, %arg2: i32) -> (i32, i32) {
    %c0_i32 = arith.constant 0 : i32
    %c0_i32_0 = arith.constant 0 : i32
    return %c0_i32, %arg1 : i32, i32
  }
  func.func @transform_3(%arg0: i32, %arg1: i32, %arg2: i32) -> (i32, i32) {
    %c0_i32 = arith.constant 0 : i32
    %c0_i32_0 = arith.constant 0 : i32
    return %c0_i32, %arg1 : i32, i32
  }
  func.func @transform_4(%arg0: i32, %arg1: i32, %arg2: i32) -> (i32, i32) {
    %c0_i32 = arith.constant 0 : i32
    return %arg0, %arg1 : i32, i32
  }
  func.func @transform_5(%arg0: i32, %arg1: i32, %arg2: i32) -> (i32, i32) {
    %c0_i32 = arith.constant 0 : i32
    return %arg0, %arg1 : i32, i32
  }
}

module attributes {stable_mosaic.version = 11 : i64} {
  func.func @_mm_fused_kernel(%arg0: i32, %arg1: i32, %arg2: i32, %arg3: memref<8x512xbf16, #tpu.memory_space<vmem>>, %arg4: memref<512x256xbf16, #tpu.memory_space<vmem>>, %arg5: memref<1x256xf32, #tpu.memory_space<vmem>>, %arg6: memref<1x256xf32, #tpu.memory_space<vmem>>, %arg7: memref<8x256xf32, #tpu.memory_space<vmem>>, %arg8: memref<8x256xf32, #tpu.memory_space<vmem>>) attributes {dimension_semantics = [#tpu.dimension_semantics<parallel>, #tpu.dimension_semantics<parallel>, #tpu.dimension_semantics<arbitrary>], iteration_bounds = array<i64: 1, 2, 9>, scalar_prefetch = 0 : i64, scratch_operands = 1 : i64, tpu.core_type = #tpu.core_type<tc>, window_params = [{transform_indices = @transform_0, window_bounds = array<i64: 8, 512>}, {transform_indices = @transform_1, window_bounds = array<i64: 512, 256>}, {transform_indices = @transform_2, window_bounds = array<i64: 1, 256>}, {transform_indices = @transform_3, window_bounds = array<i64: 1, 256>}, {transform_indices = @transform_4, window_bounds = array<i64: 8, 256>}]} {
    %c0_i32 = arith.constant 0 : i32
    %0 = arith.cmpi eq, %arg2, %c0_i32 : i32
    %1 = arith.extui %0 : i1 to i32
    %c0_i32_0 = arith.constant 0 : i32
    %2 = arith.cmpi ne, %1, %c0_i32_0 : i32
    scf.if %2 {
      %cst_9 = arith.constant 0.000000e+00 : f32
      %12 = vector.broadcast %cst_9 : f32 to vector<8x256xf32>
      %c0_10 = arith.constant 0 : index
      %c0_11 = arith.constant 0 : index
      %13 = vector.load %arg8[%c0_10, %c0_11] : memref<8x256xf32, #tpu.memory_space<vmem>>, vector<8x256xf32>
      tpu.vector_store %arg8[%c0_10, %c0_11], %12 {strides = array<i32>} : memref<8x256xf32, #tpu.memory_space<vmem>>, vector<8x256xf32>,
    } else {
    }
    %c0 = arith.constant 0 : index
    %c0_1 = arith.constant 0 : index
    %3 = vector.load %arg8[%c0, %c0_1] : memref<8x256xf32, #tpu.memory_space<vmem>>, vector<8x256xf32>
    %c0_2 = arith.constant 0 : index
    %c0_3 = arith.constant 0 : index
    %4 = vector.load %arg3[%c0_2, %c0_3] : memref<8x512xbf16, #tpu.memory_space<vmem>>, vector<8x512xbf16>
    %c0_4 = arith.constant 0 : index
    %c0_5 = arith.constant 0 : index
    %5 = vector.load %arg4[%c0_4, %c0_5] : memref<512x256xbf16, #tpu.memory_space<vmem>>, vector<512x256xbf16>
    %cst = arith.constant dense<0.000000e+00> : vector<8x256xf32>
    %6 = tpu.matmul %4, %5, %cst {dimension_numbers = #tpu.dot_dimension_numbers<[1], [0], [0], [1], [0, 0, 1, 1], [], []>} : vector<8x512xbf16>, vector<512x256xbf16>, vector<8x256xf32> -> vector<8x256xf32>
    %7 = arith.addf %3, %6 : vector<8x256xf32>
    %c0_6 = arith.constant 0 : index
    %c0_7 = arith.constant 0 : index
    %8 = vector.load %arg8[%c0_6, %c0_7] : memref<8x256xf32, #tpu.memory_space<vmem>>, vector<8x256xf32>
    tpu.vector_store %arg8[%c0_6, %c0_7], %7 {strides = array<i32>} : memref<8x256xf32, #tpu.memory_space<vmem>>, vector<8x256xf32>,
    %c8_i32 = arith.constant 8 : i32
    %9 = arith.cmpi eq, %arg2, %c8_i32 : i32
    %10 = arith.extui %9 : i1 to i32
    %c0_i32_8 = arith.constant 0 : i32
    %11 = arith.cmpi ne, %10, %c0_i32_8 : i32
    scf.if %11 {
      %c0_9 = arith.constant 0 : index
      %c0_10 = arith.constant 0 : index
      %12 = vector.load %arg8[%c0_9, %c0_10] : memref<8x256xf32, #tpu.memory_space<vmem>>, vector<8x256xf32>
      %c0_11 = arith.constant 0 : index
      %c0_12 = arith.constant 0 : index
      %13 = vector.load %arg5[%c0_11, %c0_12] : memref<1x256xf32, #tpu.memory_space<vmem>>, vector<1x256xf32>
      %14 = vector.broadcast %13 : vector<1x256xf32> to vector<8x256xf32>
      %15 = arith.mulf %12, %14 : vector<8x256xf32>
      %c0_13 = arith.constant 0 : index
      %c0_14 = arith.constant 0 : index
      %16 = vector.load %arg6[%c0_13, %c0_14] : memref<1x256xf32, #tpu.memory_space<vmem>>, vector<1x256xf32>
      %17 = vector.broadcast %16 : vector<1x256xf32> to vector<8x256xf32>
      %18 = arith.addf %15, %17 : vector<8x256xf32>
      %cst_15 = arith.constant 0.000000e+00 : f32
      %19 = vector.broadcast %cst_15 : f32 to vector<8x256xf32>
      %20 = arith.maximumf %18, %19 : vector<8x256xf32>
      %c0_16 = arith.constant 0 : index
      %c0_17 = arith.constant 0 : index
      %21 = vector.load %arg7[%c0_16, %c0_17] : memref<8x256xf32, #tpu.memory_space<vmem>>, vector<8x256xf32>
      tpu.vector_store %arg7[%c0_16, %c0_17], %20 {strides = array<i32>} : memref<8x256xf32, #tpu.memory_space<vmem>>, vector<8x256xf32>,
    } else {
    }
    return
  }
  func.func @transform_0(%arg0: i32, %arg1: i32, %arg2: i32) -> (i32, i32) {
    %c0_i32 = arith.constant 0 : i32
    return %arg0, %arg2 : i32, i32
  }
  func.func @transform_1(%arg0: i32, %arg1: i32, %arg2: i32) -> (i32, i32) {
    %c0_i32 = arith.constant 0 : i32
    return %arg2, %arg1 : i32, i32
  }
  func.func @transform_2(%arg0: i32, %arg1: i32, %arg2: i32) -> (i32, i32) {
    %c0_i32 = arith.constant 0 : i32
    %c0_i32_0 = arith.constant 0 : i32
    return %c0_i32, %arg1 : i32, i32
  }
  func.func @transform_3(%arg0: i32, %arg1: i32, %arg2: i32) -> (i32, i32) {
    %c0_i32 = arith.constant 0 : i32
    %c0_i32_0 = arith.constant 0 : i32
    return %c0_i32, %arg1 : i32, i32
  }
  func.func @transform_4(%arg0: i32, %arg1: i32, %arg2: i32) -> (i32, i32) {
    %c0_i32 = arith.constant 0 : i32
    return %arg0, %arg1 : i32, i32
  }
}

module attributes {stable_mosaic.version = 11 : i64} {
  func.func @_pool_heads_kernel(%arg0: memref<2x1x512xf32, #tpu.memory_space<vmem>>, %arg1: memref<512x128xbf16, #tpu.memory_space<vmem>>, %arg2: memref<1x128xf32, #tpu.memory_space<vmem>>, %arg3: memref<2x128xf32, #tpu.memory_space<vmem>>) attributes {dimension_semantics = [], scalar_prefetch = 0 : i64, scratch_operands = 0 : i64, tpu.core_type = #tpu.core_type<tc>} {
    %c0 = arith.constant 0 : index
    %c0_0 = arith.constant 0 : index
    %c0_1 = arith.constant 0 : index
    %0 = vector.load %arg0[%c0, %c0_0, %c0_1] : memref<2x1x512xf32, #tpu.memory_space<vmem>>, vector<2x1x512xf32>
    %cst = arith.constant dense<0.000000e+00> : vector<2x512xf32>
    %1 = vector.multi_reduction <add>, %0, %cst [1] : vector<2x1x512xf32> to vector<2x512xf32>
    %cst_2 = arith.constant 1.000000e+00 : f32
    %2 = vector.broadcast %cst_2 : f32 to vector<2x512xf32>
    %3 = arith.divf %1, %2 : vector<2x512xf32>
    %4 = arith.truncf %3 : vector<2x512xf32> to vector<2x512xbf16>
    %c0_3 = arith.constant 0 : index
    %c0_4 = arith.constant 0 : index
    %5 = vector.load %arg1[%c0_3, %c0_4] : memref<512x128xbf16, #tpu.memory_space<vmem>>, vector<512x128xbf16>
    %cst_5 = arith.constant dense<0.000000e+00> : vector<2x128xf32>
    %6 = tpu.matmul %4, %5, %cst_5 {dimension_numbers = #tpu.dot_dimension_numbers<[1], [0], [0], [1], [0, 0, 1, 1], [], []>} : vector<2x512xbf16>, vector<512x128xbf16>, vector<2x128xf32> -> vector<2x128xf32>
    %c0_6 = arith.constant 0 : index
    %c0_7 = arith.constant 0 : index
    %7 = vector.load %arg2[%c0_6, %c0_7] : memref<1x128xf32, #tpu.memory_space<vmem>>, vector<1x128xf32>
    %8 = vector.broadcast %7 : vector<1x128xf32> to vector<2x128xf32>
    %9 = arith.addf %6, %8 : vector<2x128xf32>
    %c0_8 = arith.constant 0 : index
    %c0_9 = arith.constant 0 : index
    %10 = vector.load %arg3[%c0_8, %c0_9] : memref<2x128xf32, #tpu.memory_space<vmem>>, vector<2x128xf32>
    tpu.vector_store %arg3[%c0_8, %c0_9], %9 {strides = array<i32>} : memref<2x128xf32, #tpu.memory_space<vmem>>, vector<2x128xf32>,
    return
  }
}

</mosaic_0001>

<bundles_post_ra>
// kernel: single_baseline_forward.22
= control target key start
LH: loop header
LB: loop body
LE: loop exit
PB: predicated region body
PF: predicated region fallthrough
CT: control target
= control target key end

     0   :  { %s939_s1 = inlined_call_operand.vmem [shape: bf16[256,128], index: 1, kind: input, shape index: {}]   ;;  %s940_s0 = inlined_call_operand.vmem [shape: bf16[128,256], index: 0, kind: input, shape index: {}]   ;;  %s941_s2 = inlined_call_operand.vmem [shape: f32[1,128], index: 2, kind: input, shape index: {}]   ;;  %s942_s3 = inlined_call_operand.vmem [shape: f32[1,128], index: 3, kind: input, shape index: {}]   ;;  %s943_s4 = inlined_call_operand.vmem [shape: f32[128,128], index: 4, kind: output, shape index: {}]  }
   0x1   :  { %v653_v0 = vld [vmem:[%s939_s1 + $0x38] sm:$0xff]  ;;  %v652_v2 = vld [vmem:[%s939_s1 + $0x30] sm:$0xff]  ;;  %v651_v4 = vld [vmem:[%s939_s1 + $0x28] sm:$0xff] }
   0x2   :  { %v661_v1 = vld [vmem:[%s939_s1 + $0x78] sm:$0xff]  ;;  %277 = vmatpush.bf16.msra.mxu0 %v653_v0  ;;  %662 = vmatpush.bf16.msra.mxu2 %v653_v0  ;;  %v660_v3 = vld [vmem:[%s939_s1 + $0x70] sm:$0xff]  ;;  %v659_v5 = vld [vmem:[%s939_s1 + $0x68] sm:$0xff] }
   0x3   :  { %326 = vmatpush.bf16.msra.mxu1 %v661_v1  ;;  %670 = vmatpush.bf16.msra.mxu3 %v661_v1  ;;  %v650_v6 = vld [vmem:[%s939_s1 + $0x20] sm:$0xff]  ;;  %v649_v8 = vld [vmem:[%s939_s1 + $0x18] sm:$0xff]  ;;  %v648_v10 = vld [vmem:[%s939_s1 + $0x10] sm:$0xff] }
   0x4   :  { %v658_v7 = vld [vmem:[%s939_s1 + $0x60] sm:$0xff]  ;;  %v657_v9 = vld [vmem:[%s939_s1 + $0x58] sm:$0xff]  ;;  %v656_v11 = vld [vmem:[%s939_s1 + $0x50] sm:$0xff] }
   0x5   :  { %v647_v12 = vld [vmem:[%s939_s1 + $0x8] sm:$0xff]  ;;  %v646_v14 = vld [vmem:[%s939_s1] sm:$0xff]  ;;  %v512_v28 = vld [vmem:[%s940_s0 + $0x10] sm:$0xf] }
   0x6   :  { %278 = vmatpush.bf16.msra.mxu0 %v652_v2  ;;  %663 = vmatpush.bf16.msra.mxu2 %v652_v2  ;;  %v655_v13 = vld [vmem:[%s939_s1 + $0x48] sm:$0xff]  ;;  %v654_v15 = vld [vmem:[%s939_s1 + $0x40] sm:$0xff]  ;;  %v633_v29 = vld [vmem:[%s940_s0 + $0x14] sm:$0xf0] }
   0x7   :  { %327 = vmatpush.bf16.msra.mxu1 %v660_v3  ;;  %671 = vmatpush.bf16.msra.mxu3 %v660_v3  ;;  %v504_v16 = vld [vmem:[%s940_s0] sm:$0xf]  ;;  %v631_v17 = vld [vmem:[%s940_s0 + $0x4] sm:$0xf0]  ;;  %v630_v20 = vld [vmem:[%s940_s0 + $0x4] sm:$0xf]  ;;  %v513_v36 = vor.u32 %v633_v29, %v512_v28 }
   0x8   :  { %v536_v18 = vld [vmem:[%s940_s0 + $0x40] sm:$0xf]  ;;  %v639_v19 = vld [vmem:[%s940_s0 + $0x44] sm:$0xf0]  ;;  %v506_v21 = vld [vmem:[%s940_s0 + $0x8] sm:$0xf0]  ;;  %v505_v24 = vor.u32 %v631_v17, %v504_v16 }
   0x9   :  { %v638_v22 = vld [vmem:[%s940_s0 + $0x44] sm:$0xf]  ;;  %v538_v23 = vld [vmem:[%s940_s0 + $0x48] sm:$0xf0]  ;;  %v537_v25 = vor.u32 %v639_v19, %v536_v18  ;;  %v509_v26 = vor.u32 %v630_v20, %v506_v21  ;;  %v544_v30 = vld [vmem:[%s940_s0 + $0x50] sm:$0xf] }
   0xa   :  { %279 = vmatpush.bf16.msra.mxu0 %v651_v4  ;;  %664 = vmatpush.bf16.msra.mxu2 %v651_v4  ;;  %v541_v27 = vor.u32 %v638_v22, %v538_v23  ;;  %v641_v31 = vld [vmem:[%s940_s0 + $0x54] sm:$0xf0]  ;;  %v632_v32 = vld [vmem:[%s940_s0 + $0x14] sm:$0xf]  ;;  %v514_v33 = vld [vmem:[%s940_s0 + $0x18] sm:$0xf0] }
   0xb   :  { %328 = vmatpush.bf16.msra.mxu1 %v659_v5  ;;  %672 = vmatpush.bf16.msra.mxu3 %v659_v5  ;;  %v640_v34 = vld [vmem:[%s940_s0 + $0x54] sm:$0xf]  ;;  %v546_v35 = vld [vmem:[%s940_s0 + $0x58] sm:$0xf0]  ;;  %v545_v37 = vor.u32 %v641_v31, %v544_v30  ;;  %v517_v38 = vor.u32 %v632_v32, %v514_v33  ;;  %v520_v40 = vld [vmem:[%s940_s0 + $0x20] sm:$0xf] }
   0xc   :  { %v549_v39 = vor.u32 %v640_v34, %v546_v35  ;;  %v635_v41 = vld [vmem:[%s940_s0 + $0x24] sm:$0xf0]  ;;  %v552_v42 = vld [vmem:[%s940_s0 + $0x60] sm:$0xf]  ;;  %v634_v44 = vld [vmem:[%s940_s0 + $0x24] sm:$0xf] }
   0xd   :  { %v643_v43 = vld [vmem:[%s940_s0 + $0x64] sm:$0xf0]  ;;  %v522_v45 = vld [vmem:[%s940_s0 + $0x28] sm:$0xf0]  ;;  %v642_v46 = vld [vmem:[%s940_s0 + $0x64] sm:$0xf]  ;;  %v521_v48 = vor.u32 %v635_v41, %v520_v40 }
   0xe   :  { %280 = vmatpush.bf16.msra.mxu0 %v650_v6  ;;  %665 = vmatpush.bf16.msra.mxu2 %v650_v6  ;;  %v554_v47 = vld [vmem:[%s940_s0 + $0x68] sm:$0xf0]  ;;  %v553_v49 = vor.u32 %v643_v43, %v552_v42  ;;  %v525_v50 = vor.u32 %v634_v44, %v522_v45  ;;  %v528_v52 = vld [vmem:[%s940_s0 + $0x30] sm:$0xf]  ;;  %v637_v53 = vld [vmem:[%s940_s0 + $0x34] sm:$0xf0] }
   0xf   :  { %329 = vmatpush.bf16.msra.mxu1 %v658_v7  ;;  %673 = vmatpush.bf16.msra.mxu3 %v658_v7  ;;  %v557_v51 = vor.u32 %v642_v46, %v554_v47  ;;  %v560_v54 = vld [vmem:[%s940_s0 + $0x70] sm:$0xf]  ;;  %v645_v55 = vld [vmem:[%s940_s0 + $0x74] sm:$0xf0]  ;;  %v636_v56 = vld [vmem:[%s940_s0 + $0x34] sm:$0xf]  ;;  %v529_v60 = vor.u32 %v637_v53, %v528_v52 }
  0x10   :  { %v530_v57 = vld [vmem:[%s940_s0 + $0x38] sm:$0xf0]  ;;  %v644_v58 = vld [vmem:[%s940_s0 + $0x74] sm:$0xf]  ;;  %v561_v61 = vor.u32 %v645_v55, %v560_v54  ;;  %v852_v1 = vld [vmem:[%s941_s2] ss:$0 sm:$0xff] }
  0x11   :  { %v562_v59 = vld [vmem:[%s940_s0 + $0x78] sm:$0xf0]  ;;  %v533_v62 = vor.u32 %v636_v56, %v530_v57  ;;  %v857_v4 = vld [vmem:[%s942_s3] ss:$0 sm:$0xff] }
  0x12   :  { %281 = vmatpush.bf16.msra.mxu0 %v649_v8  ;;  %666 = vmatpush.bf16.msra.mxu2 %v649_v8  ;;  %v565_v63 = vor.u32 %v644_v58, %v562_v59 }
  0x13   :  { %330 = vmatpush.bf16.msra.mxu1 %v657_v9  ;;  %674 = vmatpush.bf16.msra.mxu3 %v657_v9 }
  0x16   :  { %282 = vmatpush.bf16.msra.mxu0 %v648_v10  ;;  %667 = vmatpush.bf16.msra.mxu2 %v648_v10 }
  0x17   :  { %331 = vmatpush.bf16.msra.mxu1 %v656_v11  ;;  %675 = vmatpush.bf16.msra.mxu3 %v656_v11 }
  0x1a   :  { %283 = vmatpush.bf16.msra.mxu0 %v647_v12  ;;  %668 = vmatpush.bf16.msra.mxu2 %v647_v12 }
  0x1b   :  { %332 = vmatpush.bf16.msra.mxu1 %v655_v13  ;;  %676 = vmatpush.bf16.msra.mxu3 %v655_v13 }
  0x1e   :  { %284 = vmatpush.bf16.msra.mxu0 %v646_v14  ;;  %669 = vmatpush.bf16.msra.mxu2 %v646_v14 }
  0x1f   :  { %333 = vmatpush.bf16.msra.mxu1 %v654_v15  ;;  %677 = vmatpush.bf16.msra.mxu3 %v654_v15 }
  0x21   :  { %285 = vmatmul.bf16.vlgmr.msra.gmra.mxu0 %v505_v24  ;;  %305 = vmatmul.bf16.vlgmr.msra.gmra.mxu2 %v537_v25 }
  0x22   :  { %334 = vmatmul.bf16.vlgmr.msra.gmra.mxu1 %v509_v26  ;;  %354 = vmatmul.bf16.vlgmr.msra.gmra.mxu3 %v541_v27 }
  0x31   :  { %290 = vmatmul.bf16.gmra.mxu0 %v513_v36  ;;  %310 = vmatmul.bf16.gmra.mxu2 %v545_v37 }
  0x32   :  { %339 = vmatmul.bf16.gmra.mxu1 %v517_v38  ;;  %359 = vmatmul.bf16.gmra.mxu3 %v549_v39 }
  0x41   :  { %295 = vmatmul.bf16.gmra.mxu0 %v521_v48  ;;  %315 = vmatmul.bf16.gmra.mxu2 %v553_v49 }
  0x42   :  { %344 = vmatmul.bf16.gmra.mxu1 %v525_v50  ;;  %364 = vmatmul.bf16.gmra.mxu3 %v557_v51 }
  0x51   :  { %300 = vmatmul.bf16.gmra.mxu0 %v529_v60  ;;  %320 = vmatmul.bf16.gmra.mxu2 %v561_v61 }
  0x52   :  { %349 = vmatmul.bf16.gmra.mxu1 %v533_v62  ;;  %369 = vmatmul.bf16.gmra.mxu3 %v565_v63 }
  0x9e   :  { %v286_v0 = vpop.f32.mrf.mxu0 }
  0x9f   :  { %v335_v2 = vpop.f32.mrf.mxu1 }
  0xa0   :  { %v336_v3 = vadd.f32 %v335_v2, %v286_v0 }
  0xa2   :  { %v430_v5 = vmul.f32 %v852_v1, %v336_v3 }
  0xa4   :  { %v450_v6 = vadd.f32 %v857_v4, %v430_v5  ;;  %v306_v7 = vpop.f32.mrf.mxu2 }
  0xa5   :  { %v355_v8 = vpop.f32.mrf.mxu3 }
  0xa6   :  { %v466_v9 = vmax.f32 %v450_v6, 0.0  ;;  %v356_v10 = vadd.f32 %v355_v8, %v306_v7  ;;  %v288_v11 = vpop.f32.mrf.mxu0 }
  0xa7   :  { %v337_v12 = vpop.f32.mrf.mxu1 }
  0xa8   :  { %482 = vst [vmem:[%s943_s4] sm:$0xff] %v466_v9  ;;  %v438_v13 = vmul.f32 %v852_v1, %v356_v10  ;;  %v338_v14 = vadd.f32 %v337_v12, %v288_v11 }
  0xaa   :  { %v458_v15 = vadd.f32 %v857_v4, %v438_v13  ;;  %v431_v16 = vmul.f32 %v852_v1, %v338_v14 }
  0xac   :  { %v474_v17 = vmax.f32 %v458_v15, 0.0  ;;  %v451_v18 = vadd.f32 %v857_v4, %v431_v16  ;;  %v308_v19 = vpop.f32.mrf.mxu2 }
  0xad   :  { %v357_v20 = vpop.f32.mrf.mxu3 }
  0xae   :  { %490 = vst [vmem:[%s943_s4 + $0x40] sm:$0xff] %v474_v17  ;;  %v467_v21 = vmax.f32 %v451_v18, 0.0  ;;  %v358_v22 = vadd.f32 %v357_v20, %v308_v19  ;;  %v291_v23 = vpop.f32.mrf.mxu0 }
  0xaf   :  { %v340_v24 = vpop.f32.mrf.mxu1 }
  0xb0   :  { %483 = vst [vmem:[%s943_s4 + $0x8] sm:$0xff] %v467_v21  ;;  %v439_v25 = vmul.f32 %v852_v1, %v358_v22  ;;  %v341_v26 = vadd.f32 %v340_v24, %v291_v23 }
  0xb2   :  { %v459_v27 = vadd.f32 %v857_v4, %v439_v25  ;;  %v432_v28 = vmul.f32 %v852_v1, %v341_v26 }
  0xb4   :  { %v475_v29 = vmax.f32 %v459_v27, 0.0  ;;  %v452_v30 = vadd.f32 %v857_v4, %v432_v28  ;;  %v311_v31 = vpop.f32.mrf.mxu2 }
  0xb5   :  { %v360_v32 = vpop.f32.mrf.mxu3 }
  0xb6   :  { %491 = vst [vmem:[%s943_s4 + $0x48] sm:$0xff] %v475_v29  ;;  %v468_v33 = vmax.f32 %v452_v30, 0.0  ;;  %v361_v34 = vadd.f32 %v360_v32, %v311_v31  ;;  %v293_v35 = vpop.f32.mrf.mxu0 }
  0xb7   :  { %v342_v36 = vpop.f32.mrf.mxu1 }
  0xb8   :  { %484 = vst [vmem:[%s943_s4 + $0x10] sm:$0xff] %v468_v33  ;;  %v440_v37 = vmul.f32 %v852_v1, %v361_v34  ;;  %v343_v38 = vadd.f32 %v342_v36, %v293_v35 }
  0xba   :  { %v460_v39 = vadd.f32 %v857_v4, %v440_v37  ;;  %v433_v40 = vmul.f32 %v852_v1, %v343_v38 }
  0xbc   :  { %v476_v41 = vmax.f32 %v460_v39, 0.0  ;;  %v453_v42 = vadd.f32 %v857_v4, %v433_v40  ;;  %v313_v43 = vpop.f32.mrf.mxu2 }
  0xbd   :  { %v362_v44 = vpop.f32.mrf.mxu3 }
  0xbe   :  { %492 = vst [vmem:[%s943_s4 + $0x50] sm:$0xff] %v476_v41  ;;  %v469_v45 = vmax.f32 %v453_v42, 0.0  ;;  %v363_v46 = vadd.f32 %v362_v44, %v313_v43  ;;  %v296_v47 = vpop.f32.mrf.mxu0 }
  0xbf   :  { %v345_v48 = vpop.f32.mrf.mxu1 }
  0xc0   :  { %485 = vst [vmem:[%s943_s4 + $0x18] sm:$0xff] %v469_v45  ;;  %v441_v49 = vmul.f32 %v852_v1, %v363_v46  ;;  %v346_v50 = vadd.f32 %v345_v48, %v296_v47 }
  0xc2   :  { %v461_v51 = vadd.f32 %v857_v4, %v441_v49  ;;  %v434_v52 = vmul.f32 %v852_v1, %v346_v50 }
  0xc4   :  { %v477_v53 = vmax.f32 %v461_v51, 0.0  ;;  %v454_v54 = vadd.f32 %v857_v4, %v434_v52  ;;  %v316_v55 = vpop.f32.mrf.mxu2 }
  0xc5   :  { %v365_v56 = vpop.f32.mrf.mxu3 }
  0xc6   :  { %493 = vst [vmem:[%s943_s4 + $0x58] sm:$0xff] %v477_v53  ;;  %v470_v57 = vmax.f32 %v454_v54, 0.0  ;;  %v366_v58 = vadd.f32 %v365_v56, %v316_v55  ;;  %v298_v59 = vpop.f32.mrf.mxu0 }
  0xc7   :  { %v347_v60 = vpop.f32.mrf.mxu1 }
  0xc8   :  { %486 = vst [vmem:[%s943_s4 + $0x20] sm:$0xff] %v470_v57  ;;  %v442_v61 = vmul.f32 %v852_v1, %v366_v58  ;;  %v348_v62 = vadd.f32 %v347_v60, %v298_v59 }
  0xca   :  { %v462_v63 = vadd.f32 %v857_v4, %v442_v61  ;;  %v435_v0 = vmul.f32 %v852_v1, %v348_v62 }
  0xcc   :  { %v478_v2 = vmax.f32 %v462_v63, 0.0  ;;  %v455_v3 = vadd.f32 %v857_v4, %v435_v0  ;;  %v318_v5 = vpop.f32.mrf.mxu2 }
  0xcd   :  { %v367_v6 = vpop.f32.mrf.mxu3 }
  0xce   :  { %494 = vst [vmem:[%s943_s4 + $0x60] sm:$0xff] %v478_v2  ;;  %v471_v7 = vmax.f32 %v455_v3, 0.0  ;;  %v368_v8 = vadd.f32 %v367_v6, %v318_v5  ;;  %v301_v9 = vpop.f32.mrf.mxu0 }
  0xcf   :  { %v350_v10 = vpop.f32.mrf.mxu1 }
  0xd0   :  { %487 = vst [vmem:[%s943_s4 + $0x28] sm:$0xff] %v471_v7  ;;  %v443_v11 = vmul.f32 %v852_v1, %v368_v8  ;;  %v351_v12 = vadd.f32 %v350_v10, %v301_v9 }
  0xd2   :  { %v463_v13 = vadd.f32 %v857_v4, %v443_v11  ;;  %v436_v14 = vmul.f32 %v852_v1, %v351_v12 }
  0xd4   :  { %v479_v15 = vmax.f32 %v463_v13, 0.0  ;;  %v456_v16 = vadd.f32 %v857_v4, %v436_v14  ;;  %v321_v17 = vpop.f32.mrf.mxu2 }
  0xd5   :  { %v370_v18 = vpop.f32.mrf.mxu3 }
  0xd6   :  { %495 = vst [vmem:[%s943_s4 + $0x68] sm:$0xff] %v479_v15  ;;  %v472_v19 = vmax.f32 %v456_v16, 0.0  ;;  %v371_v20 = vadd.f32 %v370_v18, %v321_v17  ;;  %v303_v21 = vpop.f32.mrf.mxu0 }
  0xd7   :  { %v352_v22 = vpop.f32.mrf.mxu1 }
  0xd8   :  { %488 = vst [vmem:[%s943_s4 + $0x30] sm:$0xff] %v472_v19  ;;  %v444_v23 = vmul.f32 %v852_v1, %v371_v20  ;;  %v353_v24 = vadd.f32 %v352_v22, %v303_v21 }
  0xda   :  { %v464_v25 = vadd.f32 %v857_v4, %v444_v23  ;;  %v437_v26 = vmul.f32 %v852_v1, %v353_v24 }
  0xdc   :  { %v480_v27 = vmax.f32 %v464_v25, 0.0  ;;  %v457_v28 = vadd.f32 %v857_v4, %v437_v26  ;;  %v323_v29 = vpop.f32.mrf.mxu2 }
  0xdd   :  { %v372_v30 = vpop.f32.mrf.mxu3 }
  0xde   :  { %496 = vst [vmem:[%s943_s4 + $0x70] sm:$0xff] %v480_v27  ;;  %v473_v31 = vmax.f32 %v457_v28, 0.0  ;;  %v373_v32 = vadd.f32 %v372_v30, %v323_v29 }
  0xe0   :  { %489 = vst [vmem:[%s943_s4 + $0x38] sm:$0xff] %v473_v31  ;;  %v445_v33 = vmul.f32 %v852_v1, %v373_v32 }
  0xe2   :  { %v465_v34 = vadd.f32 %v857_v4, %v445_v33 }
  0xe4   :  { %v481_v35 = vmax.f32 %v465_v34, 0.0 }
  0xe6   :  { %497 = vst [vmem:[%s943_s4 + $0x78] sm:$0xff] %v481_v35 }

// kernel: single_baseline_forward.23
= control target key start
LH: loop header
LB: loop body
LE: loop exit
PB: predicated region body
PF: predicated region fallthrough
CT: control target
= control target key end

     0   :  { %vm155_vm0 = vcmask 519168   ;;  %s465_s0 = inlined_call_operand.vmem [shape: f32[2,5,5,64], index: 0, kind: input, shape index: {}]   ;;  %s466_s1 = inlined_call_operand.vmem [shape: f32[2,5,5,64], index: 1, kind: input, shape index: {}]   ;;  %s467_s2 = inlined_call_operand.vmem [shape: f32[2,5,5,64], index: 2, kind: input, shape index: {}]   ;;  %s468_s3 = inlined_call_operand.vmem [shape: f32[2,5,5,64], index: 3, kind: input, shape index: {}]   ;;  %s469_s4 = inlined_call_operand.vmem [shape: f32[2,4,4,64], index: 4, kind: output, shape index: {}]  }
   0x1   :  { %v17_v0 = vld [vmem:[%s465_s0] sm:$0xf]  ;;  %v18_v6 = vld [vmem:[%s465_s0 + $0x8] sm:$0xf]  ;;  %v19_v15 = vld [vmem:[%s465_s0 + $0x10] sm:$0xf] }
   0x2   :  { %v25_v1 = vld [vmem:[%s466_s1] sm:$0xf]  ;;  %v26_v7 = vld [vmem:[%s466_s1 + $0x8] sm:$0xf]  ;;  %v27_v16 = vld [vmem:[%s466_s1 + $0x10] sm:$0xf] }
   0x3   :  { %v41_v2 = vld [vmem:[%s465_s0 + $0x1] sm:$0xf]  ;;  %v33_v3 = vmax.f32 %v17_v0, %v25_v1  ;;  %v42_v8 = vld [vmem:[%s465_s0 + $0x9] sm:$0xf]  ;;  %v34_v10 = vmax.f32 %v18_v6, %v26_v7  ;;  %v43_v17 = vld [vmem:[%s465_s0 + $0x11] sm:$0xf]  ;;  %v35_v21 = vmax.f32 %v19_v15, %v27_v16 }
   0x4   :  { %v57_v4 = vld [vmem:[%s467_s2] sm:$0xf]  ;;  %v58_v13 = vld [vmem:[%s467_s2 + $0x8] sm:$0xf]  ;;  %v59_v25 = vld [vmem:[%s467_s2 + $0x10] sm:$0xf] }
   0x5   :  { %v49_v5 = vmax.f32 %v33_v3, %v41_v2  ;;  %v73_v9 = vld [vmem:[%s468_s3] sm:$0xf]  ;;  %v50_v14 = vmax.f32 %v34_v10, %v42_v8  ;;  %v168_v19 = vld [vmem:[%s465_s0 + $0x8] sm:$0xf]  ;;  %v51_v27 = vmax.f32 %v35_v21, %v43_v17  ;;  %v20_v28 = vld [vmem:[%s465_s0 + $0x18] sm:$0xf] }
   0x6   :  { %v89_v12 = vld [vmem:[%s467_s2 + $0x1] sm:$0xf]  ;;  %v74_v20 = vld [vmem:[%s468_s3 + $0x8] sm:$0xf]  ;;  %v28_v29 = vld [vmem:[%s466_s1 + $0x18] sm:$0xf] }
   0x7   :  { %v65_v11 = vmax.f32 %v49_v5, %v57_v4  ;;  %v176_v22 = vld [vmem:[%s466_s1 + $0x8] sm:$0xf]  ;;  %v66_v23 = vmax.f32 %v50_v14, %v58_v13  ;;  %v44_v30 = vld [vmem:[%s465_s0 + $0x19] sm:$0xf]  ;;  %v169_v33 = vld [vmem:[%s465_s0 + $0x10] sm:$0xf]  ;;  %v36_v35 = vmax.f32 %v20_v28, %v28_v29  ;;  %v67_v38 = vmax.f32 %v51_v27, %v59_v25 }
   0x8   :  { %v90_v24 = vld [vmem:[%s467_s2 + $0x9] sm:$0xf]  ;;  %v75_v34 = vld [vmem:[%s468_s3 + $0x10] sm:$0xf]  ;;  %v60_v40 = vld [vmem:[%s467_s2 + $0x18] sm:$0xf] }
   0x9   :  { %v81_v18 = vmax.f32 %v65_v11, %v73_v9  ;;  %v184_v31 = vld [vmem:[%s465_s0 + $0x9] sm:$0xf]  ;;  %v82_v32 = vmax.f32 %v66_v23, %v74_v20  ;;  %v177_v37 = vld [vmem:[%s466_s1 + $0x10] sm:$0xf]  ;;  %v52_v42 = vmax.f32 %v36_v35, %v44_v30  ;;  %v83_v48 = vmax.f32 %v67_v38, %v75_v34  ;;  %v170_v49 = vld [vmem:[%s465_s0 + $0x18] sm:$0xf] }
   0xa   :  { %v91_v39 = vld [vmem:[%s467_s2 + $0x11] sm:$0xf]  ;;  %v21_v43 = vld [vmem:[%s465_s0 + $0x28] sm:$0xf]  ;;  %v76_v50 = vld [vmem:[%s468_s3 + $0x18] sm:$0xf] }
   0xb   :  { %v97_v26 = vmax.f32 %v81_v18, %v89_v12  ;;  %v98_v41 = vmax.f32 %v82_v32, %v90_v24  ;;  %v29_v44 = vld [vmem:[%s466_s1 + $0x28] sm:$0xf]  ;;  %v185_v47 = vld [vmem:[%s465_s0 + $0x11] sm:$0xf]  ;;  %v178_v53 = vld [vmem:[%s466_s1 + $0x18] sm:$0xf]  ;;  %v68_v54 = vmax.f32 %v52_v42, %v60_v40  ;;  %v99_v58 = vmax.f32 %v83_v48, %v91_v39 }
   0xc   :  { %v45_v45 = vld [vmem:[%s465_s0 + $0x29] sm:$0xf]  ;;  %v37_v51 = vmax.f32 %v21_v43, %v29_v44  ;;  %v92_v55 = vld [vmem:[%s467_s2 + $0x19] sm:$0xf]  ;;  %v22_v60 = vld [vmem:[%s465_s0 + $0x30] sm:$0xf] }
   0xd   :  { %v114_v36 = vmax.f32 %v97_v26, %v168_v19  ;;  %v115_v52 = vmax.f32 %v98_v41, %v169_v33  ;;  %v61_v56 = vld [vmem:[%s467_s2 + $0x28] sm:$0xf]  ;;  %v30_v61 = vld [vmem:[%s466_s1 + $0x30] sm:$0xf]  ;;  %v186_v0 = vld [vmem:[%s465_s0 + $0x19] sm:$0xf]  ;;  %v84_v1 = vmax.f32 %v68_v54, %v76_v50  ;;  %v116_v5 = vmax.f32 %v99_v58, %v170_v49 }
   0xe   :  { %v53_v59 = vmax.f32 %v37_v51, %v45_v45  ;;  %v46_v62 = vld [vmem:[%s465_s0 + $0x31] sm:$0xf]  ;;  %v171_v2 = vld [vmem:[%s465_s0 + $0x20] sm:$0xf]  ;;  %v77_v3 = vld [vmem:[%s468_s3 + $0x28] sm:$0xf]  ;;  %v38_v4 = vmax.f32 %v22_v60, %v30_v61 }
   0xf   :  { %v131_v46 = vmax.f32 %v114_v36, %v176_v22  ;;  %v132_v63 = vmax.f32 %v115_v52, %v177_v37  ;;  %v179_v6 = vld [vmem:[%s466_s1 + $0x20] sm:$0xf]  ;;  %v62_v8 = vld [vmem:[%s467_s2 + $0x30] sm:$0xf]  ;;  %v100_v10 = vmax.f32 %v84_v1, %v92_v55  ;;  %v93_v11 = vld [vmem:[%s467_s2 + $0x29] sm:$0xf]  ;;  %v133_v15 = vmax.f32 %v116_v5, %v178_v53 }
  0x10   :  { %v69_v7 = vmax.f32 %v53_v59, %v61_v56  ;;  %v54_v12 = vmax.f32 %v38_v4, %v46_v62  ;;  %v23_v13 = vld [vmem:[%s465_s0 + $0x38] sm:$0xf]  ;;  %v187_v16 = vld [vmem:[%s465_s0 + $0x21] sm:$0xf]  ;;  %v78_v18 = vld [vmem:[%s468_s3 + $0x30] sm:$0xf] }
  0x11   :  { %v147_v57 = vmax.f32 %v131_v46, %v184_v31  ;;  %v148_v9 = vmax.f32 %v132_v63, %v185_v47  ;;  %v31_v14 = vld [vmem:[%s466_s1 + $0x38] sm:$0xf]  ;;  %v117_v21 = vmax.f32 %v100_v10, %v171_v2  ;;  %v172_v22 = vld [vmem:[%s465_s0 + $0x30] sm:$0xf]  ;;  %v149_v25 = vmax.f32 %v133_v15, %v186_v0  ;;  %v24_v30 = vld [vmem:[%s465_s0 + $0x40] sm:$0xf] }
  0x12   :  { %v85_v17 = vmax.f32 %v69_v7, %v77_v3  ;;  %v39_v19 = vmax.f32 %v23_v13, %v31_v14  ;;  %v47_v20 = vld [vmem:[%s465_s0 + $0x39] sm:$0xf]  ;;  %v70_v23 = vmax.f32 %v54_v12, %v62_v8  ;;  %v180_v27 = vld [vmem:[%s466_s1 + $0x30] sm:$0xf]  ;;  %v32_v34 = vld [vmem:[%s466_s1 + $0x40] sm:$0xf] }
  0x13   :  { %156 = vst.msk [vmem:[%s469_s4] sm:$0xf] %vm155_vm0, %v147_v57  ;;  %v63_v24 = vld [vmem:[%s467_s2 + $0x38] sm:$0xf]  ;;  %v94_v28 = vld [vmem:[%s467_s2 + $0x31] sm:$0xf]  ;;  %v134_v31 = vmax.f32 %v117_v21, %v179_v6  ;;  %v40_v39 = vmax.f32 %v24_v30, %v32_v34 }
  0x14   :  { %157 = vst.msk [vmem:[%s469_s4 + $0x4] sm:$0xf] %vm155_vm0, %v148_v9  ;;  %v101_v26 = vmax.f32 %v85_v17, %v93_v11  ;;  %v55_v29 = vmax.f32 %v39_v19, %v47_v20  ;;  %v86_v32 = vmax.f32 %v70_v23, %v78_v18  ;;  %v79_v33 = vld [vmem:[%s468_s3 + $0x38] sm:$0xf]  ;;  %v48_v35 = vld [vmem:[%s465_s0 + $0x41] sm:$0xf] }
  0x15   :  { %158 = vst.msk [vmem:[%s469_s4 + $0x8] sm:$0xf] %vm155_vm0, %v149_v25  ;;  %v173_v37 = vld [vmem:[%s465_s0 + $0x38] sm:$0xf]  ;;  %v150_v40 = vmax.f32 %v134_v31, %v187_v16  ;;  %v188_v41 = vld [vmem:[%s465_s0 + $0x31] sm:$0xf]  ;;  %v56_v48 = vmax.f32 %v40_v39, %v48_v35 }
  0x16   :  { %v118_v36 = vmax.f32 %v101_v26, %v172_v22  ;;  %v71_v38 = vmax.f32 %v55_v29, %v63_v24  ;;  %v102_v42 = vmax.f32 %v86_v32, %v94_v28  ;;  %v95_v43 = vld [vmem:[%s467_s2 + $0x39] sm:$0xf]  ;;  %v64_v44 = vld [vmem:[%s467_s2 + $0x40] sm:$0xf]  ;;  %v175_v63 = vld [vmem:[%s465_s0 + $0x48] sm:$0xf] }
  0x17   :  { %v181_v46 = vld [vmem:[%s466_s1 + $0x38] sm:$0xf]  ;;  %159 = vst.msk [vmem:[%s469_s4 + $0xc] sm:$0xf] %vm155_vm0, %v150_v40  ;;  %v174_v50 = vld [vmem:[%s465_s0 + $0x40] sm:$0xf]  ;;  %v72_v55 = vmax.f32 %v56_v48, %v64_v44 }
  0x18   :  { %v135_v45 = vmax.f32 %v118_v36, %v180_v27  ;;  %v87_v47 = vmax.f32 %v71_v38, %v79_v33  ;;  %v119_v49 = vmax.f32 %v102_v42, %v173_v37  ;;  %v80_v51 = vld [vmem:[%s468_s3 + $0x40] sm:$0xf]  ;;  %v189_v53 = vld [vmem:[%s465_s0 + $0x39] sm:$0xf]  ;;  %v183_v2 = vld [vmem:[%s466_s1 + $0x48] sm:$0xf] }
  0x19   :  { %v182_v57 = vld [vmem:[%s466_s1 + $0x40] sm:$0xf]  ;;  %v88_v60 = vmax.f32 %v72_v55, %v80_v51  ;;  %v191_v5 = vld [vmem:[%s465_s0 + $0x49] sm:$0xf] }
  0x1a   :  { %v151_v52 = vmax.f32 %v135_v45, %v188_v41  ;;  %v103_v54 = vmax.f32 %v87_v47, %v95_v43  ;;  %v136_v56 = vmax.f32 %v119_v49, %v181_v46  ;;  %v96_v58 = vld [vmem:[%s467_s2 + $0x41] sm:$0xf] }
  0x1b   :  { %v190_v62 = vld [vmem:[%s465_s0 + $0x41] sm:$0xf]  ;;  %v104_v1 = vmax.f32 %v88_v60, %v96_v58 }
  0x1c   :  { %160 = vst.msk [vmem:[%s469_s4 + $0x10] sm:$0xf] %vm155_vm0, %v151_v52  ;;  %v120_v59 = vmax.f32 %v103_v54, %v174_v50  ;;  %v152_v61 = vmax.f32 %v136_v56, %v189_v53 }
  0x1d   :  { %v121_v4 = vmax.f32 %v104_v1, %v175_v63 }
  0x1e   :  { %v137_v0 = vmax.f32 %v120_v59, %v182_v57  ;;  %161 = vst.msk [vmem:[%s469_s4 + $0x14] sm:$0xf] %vm155_vm0, %v152_v61 }
  0x1f   :  { %v138_v6 = vmax.f32 %v121_v4, %v183_v2 }
  0x20   :  { %v153_v3 = vmax.f32 %v137_v0, %v190_v62 }
  0x21   :  { %v154_v7 = vmax.f32 %v138_v6, %v191_v5 }
  0x22   :  { %162 = vst.msk [vmem:[%s469_s4 + $0x18] sm:$0xf] %vm155_vm0, %v153_v3 }
  0x23   :  { %163 = vst.msk [vmem:[%s469_s4 + $0x1c] sm:$0xf] %vm155_vm0, %v154_v7 }

// kernel: single_baseline_forward.24
= control target key start
LH: loop header
LB: loop body
LE: loop exit
PB: predicated region body
PF: predicated region fallthrough
CT: control target
= control target key end

     0   :  { %s805_s15 = smov 0   ;;  %s807_s16 = smov 0   ;;  %s907_s0 = inlined_call_operand.vmem [shape: bf16[32,640], index: 0, kind: input, shape index: {}]   ;;  %s908_s1 = inlined_call_operand.vmem [shape: bf16[640,128], index: 1, kind: input, shape index: {}]   ;;  %s909_s2 = inlined_call_operand.vmem [shape: f32[1,128], index: 2, kind: input, shape index: {}]   ;;  %s910_s3 = inlined_call_operand.vmem [shape: f32[1,128], index: 3, kind: input, shape index: {}]   ;;  %s911_s4 = inlined_call_operand.vmem [shape: f32[32,128], index: 4, kind: output, shape index: {}]  }
   0x1   :  { %s809_s17 = smov 0   ;;  %s811_s18 = smov 0  }
   0x2   :  { %s813_s19 = smov 0  }
   0x3 LB: > { %s26_s20 = sadd.s32 1, %s773_s18  ;;  %p49_p1 = scmp.ne.s32.totalorder %s765_s16, %s761_s15  ;;  %s777_s19 = sphi %s813_s19, %s14_s19   ;;  %s773_s18 = sphi %s811_s18, %s915_s18   ;;  %s769_s17 = sphi %s809_s17, %s914_s17   ;;  %s765_s16 = sphi %s807_s16, %s913_s16   ;;  %s761_s15 = sphi %s805_s15, %s912_s15  }
   0x4   : > { %p27_p0 = scmp.ge.s32.totalorder %s26_s20, 5  ;;  %p50_p2 = scmp.eq.s32.totalorder %s777_s19, 0 }
   0x5   : > { %s42_s22 = sadd.s32 1, %s765_s16  ;;  %p625_p5 = scmp.ge.s32.totalorder %s777_s19, 5 }
   0x6   : > { %s917_s20 = smov (%p27_p0, %s26_s20), 0  ;;  %p51_p3 = por %p50_p2, %p49_p1 }
   0x7   : > { %s38_s21 = ssub.s32 %s773_s18, %s917_s20  ;;  %195 = sbr.rel (%p625_p5) target bundleno = 20 (0x14), region = 24 }
   0x8   : > { %p40_p4 = scmp.eq.s32.totalorder %s38_s21, 0 }
   0xa   : > { %s840_s23 = scalar_select %p40_p4, %s765_s16, %s42_s22  }
   0xc   : > { %198 = sbr.rel (!%p51_p3) target bundleno = 20 (0x14), region = 28  ;;  %s200_s24 = sand.u32 (%p51_p3), 1, %s765_s16  }
   0xd   : > { %s627_s25 = sshll.u32 (%p51_p3), %s773_s18, 2  ;;  %s626_s26 = sshll.u32 (%p51_p3), %s200_s24, 4 }
   0xe   : > { %s207_s29 = scalar_lea.vmem (%p51_p3), %s907_s0, %s627_s25  ;;  %s202_s30 = scalar_lea.vmem (%p51_p3), [#allocation3], %s626_s26 }
   0xf   : > { %v224_v0 = vld [vmem:[%s207_s29] sm:$0xf] (%p51_p3)  ;;  %v226_v1 = vld [vmem:[%s207_s29 + $0x14] sm:$0xf] (%p51_p3)  ;;  %v228_v2 = vld [vmem:[%s207_s29 + $0x28] sm:$0xf] (%p51_p3) }
  0x10   : > { %225 = vst [vmem:[%s202_s30] sm:$0xf] (%p51_p3), %v224_v0  ;;  %v230_v3 = vld [vmem:[%s207_s29 + $0x3c] sm:$0xf] (%p51_p3) }
  0x11   : > { %227 = vst [vmem:[%s202_s30 + $0x4] sm:$0xf] %v226_v1 }
  0x12   : > { %229 = vst [vmem:[%s202_s30 + $0x8] sm:$0xf] %v228_v2 }
  0x13   : > { %231 = vst [vmem:[%s202_s30 + $0xc] sm:$0xf] %v230_v3 }
  0x14 PF: > { %p628_p6 = scmp.ge.s32.totalorder %s777_s19, 1  ;;  %p274_p7 = scmp.lt.s32.totalorder %s777_s19, 6 }
  0x16   : > { %p275_p8 = pnand %p628_p6, %p274_p7 }
  0x17   : > { %s281_s5 = sand.u32 (!%p275_p8), 1, %s761_s15   ;;  %s630_s6 = sshll.u32 (!%p275_p8), %s769_s17, 4 }
  0x18   : > { %278 = sbr.rel (%p275_p8) target bundleno = 223 (0xdf), region = 73  ;;  %s852_s7 = sshll.u32 (!%p275_p8), %s281_s5, 4 }
  0x19   : > { %p325_p9 = scmp.lt.s32.totalorder (!%p275_p8), %s630_s6, 79  ;;  %s283_s12 = scalar_lea.vmem (!%p275_p8), [#allocation3], %s852_s7 }
  0x1a   : > { %p632_p10 = scmp.ne.s32.totalorder (!%p275_p8), %s769_s17, 0 }
  0x1d   : > { %s919_s6 = smov (!%p325_p9, %s630_s6), 79  ;;  %351 = sbr.rel (%p632_p10) target bundleno = 39 (0x27), region = 81 }
  0x1e   : > { %s631_s8 = sshll.u32 %s919_s6, 2 }
  0x1f   : > { %s857_s11 = scalar_lea.vmem %s908_s1, %s631_s8 }
  0x22   : > { %v779_v4 = vmov 0.0  }
  0x23   : > { %352 = vst [vmem:[#allocation2 + $0x10] sm:$0xff] %v779_v4 }
  0x24   : > { %353 = vst [vmem:[#allocation2] sm:$0xff] %v779_v4 }
  0x25   : > { %354 = vst [vmem:[#allocation2 + $0x18] sm:$0xff] %v779_v4 }
  0x26   : > { %355 = vst [vmem:[#allocation2 + $0x8] sm:$0xff] %v779_v4 }
  0x27 PF: > { %v687_v5 = vld [vmem:[%s857_s11 + $0x38] sm:$0xff]  ;;  %v686_v6 = vld [vmem:[%s857_s11 + $0x30] sm:$0xff]  ;;  %v685_v7 = vld [vmem:[%s857_s11 + $0x28] sm:$0xff]  ;;  %p673_p11 = scmp.ne.s32.totalorder %s769_s17, 4 }
  0x28   : > { %440 = vmatpush.bf16.msra.mxu0 %v687_v5  ;;  %688 = vmatpush.bf16.msra.mxu1 %v687_v5  ;;  %v684_v8 = vld [vmem:[%s857_s11 + $0x20] sm:$0xff]  ;;  %v683_v9 = vld [vmem:[%s857_s11 + $0x18] sm:$0xff]  ;;  %v682_v10 = vld [vmem:[%s857_s11 + $0x10] sm:$0xff] }
  0x29   : > { %v681_v11 = vld [vmem:[%s857_s11 + $0x8] sm:$0xff]  ;;  %v680_v12 = vld [vmem:[%s857_s11] sm:$0xff] }
  0x2a   : > { %v678_v13 = vld [vmem:[%s283_s12] sm:$0xff]  ;;  %v679_v14 = vld [vmem:[%s283_s12 + $0x8] sm:$0xff] }
  0x2b   : > { %v356_v15 = vld [vmem:[#allocation2 + $0x10] sm:$0xff]  ;;  %v357_v21 = vld [vmem:[#allocation2] sm:$0xff] }
  0x2c   : > { %441 = vmatpush.bf16.msra.mxu0 %v686_v6  ;;  %689 = vmatpush.bf16.msra.mxu1 %v686_v6  ;;  %v358_v16 = vld [vmem:[#allocation2 + $0x18] sm:$0xff] }
  0x2d   : > { %v359_v22 = vld [vmem:[#allocation2 + $0x8] sm:$0xff] }
  0x30   : > { %442 = vmatpush.bf16.msra.mxu0 %v685_v7  ;;  %690 = vmatpush.bf16.msra.mxu1 %v685_v7 }
  0x34   : > { %443 = vmatpush.bf16.msra.mxu0 %v684_v8  ;;  %691 = vmatpush.bf16.msra.mxu1 %v684_v8 }
  0x38   : > { %444 = vmatpush.bf16.msra.mxu0 %v683_v9  ;;  %692 = vmatpush.bf16.msra.mxu1 %v683_v9 }
  0x3c   : > { %445 = vmatpush.bf16.msra.mxu0 %v682_v10  ;;  %693 = vmatpush.bf16.msra.mxu1 %v682_v10 }
  0x40   : > { %446 = vmatpush.bf16.msra.mxu0 %v681_v11  ;;  %694 = vmatpush.bf16.msra.mxu1 %v681_v11 }
  0x44   : > { %447 = vmatpush.bf16.msra.mxu0 %v680_v12  ;;  %695 = vmatpush.bf16.msra.mxu1 %v680_v12 }
  0x47   : > { %448 = vmatmul.bf16.vlgmr.msra.gmra.mxu0 %v678_v13  ;;  %453 = vmatmul.bf16.vlgmr.msra.gmra.mxu1 %v679_v14 }
  0xc4   : > { %v449_v17 = vpop.f32.mrf.mxu0  ;;  %v454_v18 = vpop.f32.mrf.mxu1 }
  0xc5   : > { %v459_v19 = vadd.f32 %v449_v17, %v356_v15  ;;  %v461_v20 = vadd.f32 %v454_v18, %v358_v16 }
  0xc7   : > { %463 = vst [vmem:[#allocation2 + $0x10] sm:$0xff] %v459_v19 }
  0xc8   : > { %465 = vst [vmem:[#allocation2 + $0x18] sm:$0xff] %v461_v20 }
  0xcc   : > { %v451_v23 = vpop.f32.mrf.mxu0  ;;  %v456_v24 = vpop.f32.mrf.mxu1  ;;  %470 = sbr.rel (%p673_p11) target bundleno = 223 (0xdf), region = 85 }
  0xcd   : > { %v460_v25 = vadd.f32 %v451_v23, %v357_v21  ;;  %v462_v26 = vadd.f32 %v456_v24, %v359_v22 }
  0xcf   : > { %464 = vst [vmem:[#allocation2] sm:$0xff] %v460_v25 }
  0xd0   : > { %466 = vst [vmem:[#allocation2 + $0x8] sm:$0xff] %v462_v26 }
  0xd1   : > { %v471_v27 = vld [vmem:[#allocation2 + $0x10] sm:$0xff]  ;;  %v737_v28 = vld [vmem:[%s909_s2] ss:$0 sm:$0xff]  ;;  %v473_v33 = vld [vmem:[#allocation2 + $0x18] sm:$0xff] }
  0xd2   : > { %v738_v29 = vld [vmem:[%s910_s3] ss:$0 sm:$0xff]  ;;  %v479_v31 = vmul.f32 %v737_v28, %v471_v27  ;;  %v481_v35 = vmul.f32 %v737_v28, %v473_v33 }
  0xd4   : > { %v487_v37 = vadd.f32 %v738_v29, %v479_v31  ;;  %v489_v39 = vadd.f32 %v738_v29, %v481_v35 }
  0xd6   : > { %v472_v30 = vld [vmem:[#allocation2] sm:$0xff]  ;;  %v491_v41 = vmax.f32 %v487_v37, 0.0  ;;  %v493_v43 = vmax.f32 %v489_v39, 0.0 }
  0xd7   : > { %v480_v32 = vmul.f32 %v737_v28, %v472_v30  ;;  %v474_v34 = vld [vmem:[#allocation2 + $0x8] sm:$0xff] }
  0xd8   : > { %v482_v36 = vmul.f32 %v737_v28, %v474_v34  ;;  %495 = vst [vmem:[%s911_s4] sm:$0xff] %v491_v41 }
  0xd9   : > { %v488_v38 = vadd.f32 %v738_v29, %v480_v32  ;;  %497 = vst [vmem:[%s911_s4 + $0x10] sm:$0xff] %v493_v43 }
  0xda   : > { %v490_v40 = vadd.f32 %v738_v29, %v482_v36 }
  0xdb   : > { %v492_v42 = vmax.f32 %v488_v38, 0.0 }
  0xdc   : > { %v494_v44 = vmax.f32 %v490_v40, 0.0 }
  0xdd   : > { %496 = vst [vmem:[%s911_s4 + $0x8] sm:$0xff] %v492_v42 }
  0xde   : > { %498 = vst [vmem:[%s911_s4 + $0x18] sm:$0xff] %v494_v44 }
  0xdf PF: > { %s14_s19 = sadd.s32 1, %s777_s19   ;;  %s912_s15 = smov %s765_s16 }
  0xe0   : > { %p11_p12 = scmp.ge.s32.totalorder %s14_s19, 7   ;;  %s913_s16 = smov %s840_s23 }
  0xe1   : > { %s914_s17 = smov %s773_s18  ;;  %s915_s18 = smov %s917_s20 }
  0xe2   :  { %13 = sbr.rel (!%p11_p12) target bundleno = 3 (0x3), region = 129 }

// kernel: single_baseline_forward.25
= control target key start
LH: loop header
LB: loop body
LE: loop exit
PB: predicated region body
PF: predicated region fallthrough
CT: control target
= control target key end

     0   :  { %s897_s18 = smov 0   ;;  %s899_s19 = smov 0   ;;  %s1011_s0 = inlined_call_operand.vmem [shape: bf16[32,640], index: 0, kind: input, shape index: {}]   ;;  %s1012_s1 = inlined_call_operand.vmem [shape: bf16[640,128], index: 1, kind: input, shape index: {}]   ;;  %s1013_s2 = inlined_call_operand.vmem [shape: f32[1,128], index: 2, kind: input, shape index: {}]   ;;  %s1014_s3 = inlined_call_operand.vmem [shape: f32[1,128], index: 3, kind: input, shape index: {}]   ;;  %s1015_s4 = inlined_call_operand.vmem [shape: f32[32,128], index: 4, kind: input, shape index: {}]   ;;  %s1016_s5 = inlined_call_operand.vmem [shape: f32[32,128], index: 5, kind: output, shape index: {}]  }
   0x1   :  { %s901_s20 = smov 0   ;;  %s903_s21 = smov 0  }
   0x2   :  { %s905_s22 = smov 0  }
   0x3 LB: > { %s27_s23 = sadd.s32 1, %s860_s21  ;;  %p50_p1 = scmp.ne.s32.totalorder %s852_s19, %s848_s18  ;;  %s864_s22 = sphi %s905_s22, %s15_s22   ;;  %s860_s21 = sphi %s903_s21, %s1020_s21   ;;  %s856_s20 = sphi %s901_s20, %s1019_s20   ;;  %s852_s19 = sphi %s899_s19, %s1018_s19   ;;  %s848_s18 = sphi %s897_s18, %s1017_s18  }
   0x4   : > { %p28_p0 = scmp.ge.s32.totalorder %s27_s23, 5  ;;  %p51_p2 = scmp.eq.s32.totalorder %s864_s22, 0 }
   0x5   : > { %s43_s25 = sadd.s32 1, %s852_s19  ;;  %p712_p5 = scmp.ge.s32.totalorder %s864_s22, 5 }
   0x6   : > { %s1022_s23 = smov (%p28_p0, %s27_s23), 0  ;;  %p52_p3 = por %p51_p2, %p50_p1 }
   0x7   : > { %s39_s24 = ssub.s32 %s860_s21, %s1022_s23  ;;  %236 = sbr.rel (%p712_p5) target bundleno = 20 (0x14), region = 28 }
   0x8   : > { %p41_p4 = scmp.eq.s32.totalorder %s39_s24, 0 }
   0xa   : > { %s932_s26 = scalar_select %p41_p4, %s852_s19, %s43_s25  }
   0xc   : > { %239 = sbr.rel (!%p52_p3) target bundleno = 20 (0x14), region = 32  ;;  %s241_s27 = sand.u32 (%p52_p3), 1, %s852_s19  }
   0xd   : > { %s714_s28 = sshll.u32 (%p52_p3), %s860_s21, 2  ;;  %s713_s29 = sshll.u32 (%p52_p3), %s241_s27, 4 }
   0xe   : > { %s248_s7 = scalar_lea.vmem (%p52_p3), %s1011_s0, %s714_s28  ;;  %s243_s8 = scalar_lea.vmem (%p52_p3), [#allocation3], %s713_s29 }
   0xf   : > { %v265_v0 = vld [vmem:[%s248_s7] sm:$0xf] (%p52_p3)  ;;  %v267_v1 = vld [vmem:[%s248_s7 + $0x14] sm:$0xf] (%p52_p3)  ;;  %v269_v2 = vld [vmem:[%s248_s7 + $0x28] sm:$0xf] (%p52_p3) }
  0x10   : > { %266 = vst [vmem:[%s243_s8] sm:$0xf] (%p52_p3), %v265_v0  ;;  %v271_v3 = vld [vmem:[%s248_s7 + $0x3c] sm:$0xf] (%p52_p3) }
  0x11   : > { %268 = vst [vmem:[%s243_s8 + $0x4] sm:$0xf] %v267_v1 }
  0x12   : > { %270 = vst [vmem:[%s243_s8 + $0x8] sm:$0xf] %v269_v2 }
  0x13   : > { %272 = vst [vmem:[%s243_s8 + $0xc] sm:$0xf] %v271_v3 }
  0x14 PF: > { %p715_p6 = scmp.ge.s32.totalorder %s864_s22, 1  ;;  %p315_p7 = scmp.lt.s32.totalorder %s864_s22, 6 }
  0x16   : > { %p316_p8 = pnand %p715_p6, %p315_p7 }
  0x17   : > { %s322_s9 = sand.u32 (!%p316_p8), 1, %s848_s18   ;;  %s717_s10 = sshll.u32 (!%p316_p8), %s856_s20, 4 }
  0x18   : > { %319 = sbr.rel (%p316_p8) target bundleno = 225 (0xe1), region = 77  ;;  %s944_s11 = sshll.u32 (!%p316_p8), %s322_s9, 4 }
  0x19   : > { %p376_p9 = scmp.lt.s32.totalorder (!%p316_p8), %s717_s10, 79  ;;  %s324_s16 = scalar_lea.vmem (!%p316_p8), [#allocation3], %s944_s11 }
  0x1a   : > { %p719_p10 = scmp.ne.s32.totalorder (!%p316_p8), %s856_s20, 0 }
  0x1d   : > { %s1024_s10 = smov (!%p376_p9, %s717_s10), 79  ;;  %411 = sbr.rel (%p719_p10) target bundleno = 39 (0x27), region = 85 }
  0x1e   : > { %s718_s12 = sshll.u32 %s1024_s10, 2 }
  0x1f   : > { %s949_s15 = scalar_lea.vmem %s1012_s1, %s718_s12 }
  0x22   : > { %v866_v4 = vmov 0.0  }
  0x23   : > { %412 = vst [vmem:[#allocation2 + $0x10] sm:$0xff] %v866_v4 }
  0x24   : > { %413 = vst [vmem:[#allocation2] sm:$0xff] %v866_v4 }
  0x25   : > { %414 = vst [vmem:[#allocation2 + $0x18] sm:$0xff] %v866_v4 }
  0x26   : > { %415 = vst [vmem:[#allocation2 + $0x8] sm:$0xff] %v866_v4 }
  0x27 PF: > { %v774_v5 = vld [vmem:[%s949_s15 + $0x38] sm:$0xff]  ;;  %v773_v6 = vld [vmem:[%s949_s15 + $0x30] sm:$0xff]  ;;  %v772_v7 = vld [vmem:[%s949_s15 + $0x28] sm:$0xff]  ;;  %p760_p11 = scmp.ne.s32.totalorder %s856_s20, 4 }
  0x28   : > { %500 = vmatpush.bf16.msra.mxu0 %v774_v5  ;;  %775 = vmatpush.bf16.msra.mxu1 %v774_v5  ;;  %v771_v8 = vld [vmem:[%s949_s15 + $0x20] sm:$0xff]  ;;  %v770_v9 = vld [vmem:[%s949_s15 + $0x18] sm:$0xff]  ;;  %v769_v10 = vld [vmem:[%s949_s15 + $0x10] sm:$0xff] }
  0x29   : > { %v768_v11 = vld [vmem:[%s949_s15 + $0x8] sm:$0xff]  ;;  %v767_v12 = vld [vmem:[%s949_s15] sm:$0xff] }
  0x2a   : > { %v765_v13 = vld [vmem:[%s324_s16] sm:$0xff]  ;;  %v766_v14 = vld [vmem:[%s324_s16 + $0x8] sm:$0xff] }
  0x2b   : > { %v416_v15 = vld [vmem:[#allocation2 + $0x10] sm:$0xff]  ;;  %v417_v21 = vld [vmem:[#allocation2] sm:$0xff] }
  0x2c   : > { %501 = vmatpush.bf16.msra.mxu0 %v773_v6  ;;  %776 = vmatpush.bf16.msra.mxu1 %v773_v6  ;;  %v418_v16 = vld [vmem:[#allocation2 + $0x18] sm:$0xff] }
  0x2d   : > { %v419_v22 = vld [vmem:[#allocation2 + $0x8] sm:$0xff] }
  0x30   : > { %502 = vmatpush.bf16.msra.mxu0 %v772_v7  ;;  %777 = vmatpush.bf16.msra.mxu1 %v772_v7 }
  0x34   : > { %503 = vmatpush.bf16.msra.mxu0 %v771_v8  ;;  %778 = vmatpush.bf16.msra.mxu1 %v771_v8 }
  0x38   : > { %504 = vmatpush.bf16.msra.mxu0 %v770_v9  ;;  %779 = vmatpush.bf16.msra.mxu1 %v770_v9 }
  0x3c   : > { %505 = vmatpush.bf16.msra.mxu0 %v769_v10  ;;  %780 = vmatpush.bf16.msra.mxu1 %v769_v10 }
  0x40   : > { %506 = vmatpush.bf16.msra.mxu0 %v768_v11  ;;  %781 = vmatpush.bf16.msra.mxu1 %v768_v11 }
  0x44   : > { %507 = vmatpush.bf16.msra.mxu0 %v767_v12  ;;  %782 = vmatpush.bf16.msra.mxu1 %v767_v12 }
  0x47   : > { %508 = vmatmul.bf16.vlgmr.msra.gmra.mxu0 %v765_v13  ;;  %513 = vmatmul.bf16.vlgmr.msra.gmra.mxu1 %v766_v14 }
  0xc4   : > { %v509_v17 = vpop.f32.mrf.mxu0  ;;  %v514_v18 = vpop.f32.mrf.mxu1 }
  0xc5   : > { %v519_v19 = vadd.f32 %v509_v17, %v416_v15  ;;  %v521_v20 = vadd.f32 %v514_v18, %v418_v16 }
  0xc7   : > { %523 = vst [vmem:[#allocation2 + $0x10] sm:$0xff] %v519_v19 }
  0xc8   : > { %525 = vst [vmem:[#allocation2 + $0x18] sm:$0xff] %v521_v20 }
  0xcc   : > { %v511_v23 = vpop.f32.mrf.mxu0  ;;  %v516_v24 = vpop.f32.mrf.mxu1  ;;  %530 = sbr.rel (%p760_p11) target bundleno = 225 (0xe1), region = 89 }
  0xcd   : > { %v520_v25 = vadd.f32 %v511_v23, %v417_v21  ;;  %v522_v26 = vadd.f32 %v516_v24, %v419_v22 }
  0xcf   : > { %524 = vst [vmem:[#allocation2] sm:$0xff] %v520_v25 }
  0xd0   : > { %526 = vst [vmem:[#allocation2 + $0x8] sm:$0xff] %v522_v26 }
  0xd1   : > { %v531_v27 = vld [vmem:[#allocation2 + $0x10] sm:$0xff]  ;;  %v824_v28 = vld [vmem:[%s1013_s2] ss:$0 sm:$0xff]  ;;  %v533_v32 = vld [vmem:[#allocation2 + $0x18] sm:$0xff] }
  0xd2   : > { %v825_v29 = vld [vmem:[%s1014_s3] ss:$0 sm:$0xff]  ;;  %v539_v30 = vmul.f32 %v824_v28, %v531_v27  ;;  %v541_v35 = vmul.f32 %v824_v28, %v533_v32  ;;  %v552_v38 = vld [vmem:[%s1015_s4 + $0x8] sm:$0xff]  ;;  %v553_v39 = vld [vmem:[%s1015_s4 + $0x10] sm:$0xff] }
  0xd3   : > { %v551_v33 = vld [vmem:[%s1015_s4] sm:$0xff]  ;;  %v554_v43 = vld [vmem:[%s1015_s4 + $0x18] sm:$0xff] }
  0xd4   : > { %v547_v37 = vadd.f32 %v825_v29, %v539_v30  ;;  %v549_v42 = vadd.f32 %v825_v29, %v541_v35 }
  0xd6   : > { %v532_v31 = vld [vmem:[#allocation2] sm:$0xff]  ;;  %v555_v44 = vadd.f32 %v551_v33, %v547_v37  ;;  %v557_v47 = vadd.f32 %v553_v39, %v549_v42 }
  0xd7   : > { %v540_v34 = vmul.f32 %v824_v28, %v532_v31  ;;  %v534_v36 = vld [vmem:[#allocation2 + $0x8] sm:$0xff] }
  0xd8   : > { %v542_v40 = vmul.f32 %v824_v28, %v534_v36  ;;  %v559_v48 = vmax.f32 %v555_v44, 0.0  ;;  %v561_v51 = vmax.f32 %v557_v47, 0.0 }
  0xd9   : > { %v548_v41 = vadd.f32 %v825_v29, %v540_v34 }
  0xda   : > { %v550_v45 = vadd.f32 %v825_v29, %v542_v40  ;;  %563 = vst [vmem:[%s1016_s5] sm:$0xff] %v559_v48 }
  0xdb   : > { %v556_v46 = vadd.f32 %v552_v38, %v548_v41  ;;  %565 = vst [vmem:[%s1016_s5 + $0x10] sm:$0xff] %v561_v51 }
  0xdc   : > { %v558_v49 = vadd.f32 %v554_v43, %v550_v45 }
  0xdd   : > { %v560_v50 = vmax.f32 %v556_v46, 0.0 }
  0xde   : > { %v562_v52 = vmax.f32 %v558_v49, 0.0 }
  0xdf   : > { %564 = vst [vmem:[%s1016_s5 + $0x8] sm:$0xff] %v560_v50 }
  0xe0   : > { %566 = vst [vmem:[%s1016_s5 + $0x18] sm:$0xff] %v562_v52 }
  0xe1 PF: > { %s15_s22 = sadd.s32 1, %s864_s22   ;;  %s1017_s18 = smov %s852_s19 }
  0xe2   : > { %p12_p12 = scmp.ge.s32.totalorder %s15_s22, 7   ;;  %s1018_s19 = smov %s932_s26 }
  0xe3   : > { %s1019_s20 = smov %s860_s21  ;;  %s1020_s21 = smov %s1022_s23 }
  0xe4   :  { %14 = sbr.rel (!%p12_p12) target bundleno = 3 (0x3), region = 136 }

// kernel: single_baseline_forward.29
= control target key start
LH: loop header
LB: loop body
LE: loop exit
PB: predicated region body
PF: predicated region fallthrough
CT: control target
= control target key end

     0   :  { %s646_s15 = smov 0   ;;  %s648_s16 = smov 0   ;;  %s695_s0 = inlined_call_operand.vmem [shape: bf16[8,640], index: 0, kind: input, shape index: {}]   ;;  %s696_s1 = inlined_call_operand.vmem [shape: bf16[640,128], index: 1, kind: input, shape index: {}]   ;;  %s697_s2 = inlined_call_operand.vmem [shape: f32[1,128], index: 2, kind: input, shape index: {}]   ;;  %s698_s3 = inlined_call_operand.vmem [shape: f32[1,128], index: 3, kind: input, shape index: {}]   ;;  %s699_s4 = inlined_call_operand.vmem [shape: f32[8,128], index: 4, kind: output, shape index: {}]  }
   0x1   :  { %s650_s17 = smov 0  }
   0x2 LB: > { %s26_s18 = sadd.s32 1, %s614_s16  ;;  %p520_p0 = scmp.ge.s32.totalorder %s618_s17, 1  ;;  %s618_s17 = sphi %s650_s17, %s14_s17   ;;  %s614_s16 = sphi %s648_s16, %s701_s16   ;;  %s610_s15 = sphi %s646_s15, %s700_s15  }
   0x3   : > { %p27_p1 = scmp.ge.s32.totalorder %s26_s18, 5  ;;  %p220_p2 = scmp.lt.s32.totalorder %s618_s17, 6 }
   0x5   : > { %s703_s18 = smov (%p27_p1, %s26_s18), 0  ;;  %p221_p3 = pnand %p520_p0, %p220_p2 }
   0x6   : > { %p267_p4 = scmp.lt.s32.totalorder (!%p221_p3), %s610_s15, 4  ;;  %s522_s19 = sshll.u32 (!%p221_p3), %s610_s15, 4 }
   0x7   : > { %224 = sbr.rel (%p221_p3) target bundleno = 195 (0xc3), region = 36  ;;  %p274_p5 = scmp.lt.s32.totalorder (!%p221_p3), %s522_s19, 79 }
   0x8   : > { %p524_p6 = scmp.ne.s32.totalorder (!%p221_p3), %s610_s15, 0 }
   0xc   : > { %s268_s20 = scalar_select %p267_p4, %s610_s15, 4 }
   0xd   : > { %s705_s19 = smov (!%p274_p5, %s522_s19), 79  ;;  %298 = sbr.rel (%p524_p6) target bundleno = 20 (0x14), region = 40 }
   0xe   : > { %s521_s21 = sshll.u32 %s268_s20, 2  ;;  %s523_s25 = sshll.u32 %s705_s19, 2 }
   0xf   : > { %s272_s24 = scalar_lea.vmem %s695_s0, %s521_s21  ;;  %s280_s28 = scalar_lea.vmem %s696_s1, %s523_s25 }
  0x12   : > { %v620_v0 = vmov 0.0  }
  0x13   : > { %299 = vst [vmem:[#allocation2] sm:$0xff] %v620_v0 }
  0x14 PF: > { %v568_v1 = vld [vmem:[%s280_s28 + $0x38] sm:$0xff]  ;;  %v567_v2 = vld [vmem:[%s280_s28 + $0x30] sm:$0xff]  ;;  %v566_v3 = vld [vmem:[%s280_s28 + $0x28] sm:$0xff]  ;;  %p557_p7 = scmp.ne.s32.totalorder %s610_s15, 4 }
  0x15   : > { %366 = vmatpush.bf16.msra.mxu0 %v568_v1  ;;  %v565_v4 = vld [vmem:[%s280_s28 + $0x20] sm:$0xff]  ;;  %v564_v5 = vld [vmem:[%s280_s28 + $0x18] sm:$0xff]  ;;  %v563_v6 = vld [vmem:[%s280_s28 + $0x10] sm:$0xff] }
  0x16   : > { %v562_v7 = vld [vmem:[%s280_s28 + $0x8] sm:$0xff]  ;;  %v561_v8 = vld [vmem:[%s280_s28] sm:$0xff] }
  0x17   : > { %v301_v9 = vld [vmem:[%s272_s24] sm:$0xf] }
  0x19   : > { %367 = vmatpush.bf16.msra.mxu0 %v567_v2 }
  0x1a   : > { %v300_v10 = vld [vmem:[#allocation2] sm:$0xff] }
  0x1d   : > { %368 = vmatpush.bf16.msra.mxu0 %v566_v3 }
  0x21   : > { %369 = vmatpush.bf16.msra.mxu0 %v565_v4 }
  0x25   : > { %370 = vmatpush.bf16.msra.mxu0 %v564_v5 }
  0x29   : > { %371 = vmatpush.bf16.msra.mxu0 %v563_v6 }
  0x2d   : > { %372 = vmatpush.bf16.msra.mxu0 %v562_v7 }
  0x31   : > { %373 = vmatpush.bf16.msra.mxu0 %v561_v8 }
  0x34   : > { %374 = vmatmul.bf16.vlgmr.msra.gmra.mxu0 %v301_v9 }
  0xb1   : > { %v375_v11 = vpop.f32.mrf.mxu0 }
  0xb2   : > { %v379_v12 = vadd.f32 %v375_v11, %v300_v10 }
  0xb4   : > { %380 = vst [vmem:[#allocation2] sm:$0xff] %v379_v12 }
  0xb5   : > { %384 = sbr.rel (%p557_p7) target bundleno = 195 (0xc3), region = 44 }
  0xb9   : > { %v377_v13 = vpop.f32.mrf.mxu0 }
  0xba   : > { %v594_v15 = vld [vmem:[%s697_s2] ss:$0 sm:$0xff] }
  0xbb   : > { %v385_v14 = vld [vmem:[#allocation2] sm:$0xff] }
  0xbc   : > { %v595_v16 = vld [vmem:[%s698_s3] ss:$0 sm:$0xff]  ;;  %v390_v17 = vmul.f32 %v594_v15, %v385_v14 }
  0xbe   : > { %v395_v18 = vadd.f32 %v595_v16, %v390_v17 }
  0xc0   : > { %v396_v19 = vmax.f32 %v395_v18, 0.0 }
  0xc2   : > { %397 = vst [vmem:[%s699_s4] sm:$0xff] %v396_v19 }
  0xc3 PF: > { %s14_s17 = sadd.s32 1, %s618_s17   ;;  %s700_s15 = smov %s614_s16 }
  0xc4   : > { %p11_p8 = scmp.ge.s32.totalorder %s14_s17, 7   ;;  %s701_s16 = smov %s703_s18 }
  0xc6   :  { %13 = sbr.rel (!%p11_p8) target bundleno = 2 (0x2), region = 83 }

// kernel: single_baseline_forward.28
= control target key start
LH: loop header
LB: loop body
LE: loop exit
PB: predicated region body
PF: predicated region fallthrough
CT: control target
= control target key end

     0   :  { %s225_s1 = inlined_call_operand.vmem [shape: bf16[128,128], index: 1, kind: input, shape index: {}]   ;;  %s226_s2 = inlined_call_operand.vmem [shape: f32[1,128], index: 2, kind: input, shape index: {}]   ;;  %s227_s3 = inlined_call_operand.vmem [shape: f32[1,128], index: 3, kind: input, shape index: {}]   ;;  %s228_s0 = inlined_call_operand.vmem [shape: bf16[8,128], index: 0, kind: input, shape index: {}]   ;;  %s229_s4 = inlined_call_operand.vmem [shape: f32[8,128], index: 4, kind: output, shape index: {}]  }
   0x1   :  { %v161_v0 = vld [vmem:[%s225_s1 + $0x38] sm:$0xff]  ;;  %v160_v1 = vld [vmem:[%s225_s1 + $0x30] sm:$0xff]  ;;  %v159_v2 = vld [vmem:[%s225_s1 + $0x28] sm:$0xff] }
   0x2   :  { %88 = vmatpush.bf16.msra.mxu0 %v161_v0  ;;  %v158_v3 = vld [vmem:[%s225_s1 + $0x20] sm:$0xff]  ;;  %v157_v4 = vld [vmem:[%s225_s1 + $0x18] sm:$0xff]  ;;  %v156_v5 = vld [vmem:[%s225_s1 + $0x10] sm:$0xff] }
   0x3   :  { %v155_v6 = vld [vmem:[%s225_s1 + $0x8] sm:$0xff]  ;;  %v154_v7 = vld [vmem:[%s225_s1] sm:$0xff] }
   0x4   :  { %v23_v8 = vld [vmem:[%s228_s0] sm:$0xf] }
   0x5   :  { %v162_v9 = vld [vmem:[%s226_s2] ss:$0 sm:$0xff] }
   0x6   :  { %89 = vmatpush.bf16.msra.mxu0 %v160_v1  ;;  %v163_v10 = vld [vmem:[%s227_s3] ss:$0 sm:$0xff] }
   0xa   :  { %90 = vmatpush.bf16.msra.mxu0 %v159_v2 }
   0xe   :  { %91 = vmatpush.bf16.msra.mxu0 %v158_v3 }
  0x12   :  { %92 = vmatpush.bf16.msra.mxu0 %v157_v4 }
  0x16   :  { %93 = vmatpush.bf16.msra.mxu0 %v156_v5 }
  0x1a   :  { %94 = vmatpush.bf16.msra.mxu0 %v155_v6 }
  0x1e   :  { %95 = vmatpush.bf16.msra.mxu0 %v154_v7 }
  0x21   :  { %96 = vmatmul.bf16.vlgmr.msra.gmra.mxu0 %v23_v8 }
  0x9e   :  { %v97_v11 = vpop.f32.mrf.mxu0 }
  0x9f   :  { %v111_v12 = vmul.f32 %v162_v9, %v97_v11 }
  0xa1   :  { %v116_v13 = vadd.f32 %v163_v10, %v111_v12 }
  0xa3   :  { %117 = vst [vmem:[%s229_s4] sm:$0xff] %v116_v13 }
  0xa6   :  { %v99_v14 = vpop.f32.mrf.mxu0 }

// kernel: single_baseline_forward.30
= control target key start
LH: loop header
LB: loop body
LE: loop exit
PB: predicated region body
PF: predicated region fallthrough
CT: control target
= control target key end

     0   :  { %s727_s18 = smov 0   ;;  %s729_s19 = smov 0   ;;  %s779_s0 = inlined_call_operand.vmem [shape: bf16[8,1152], index: 0, kind: input, shape index: {}]   ;;  %s780_s1 = inlined_call_operand.vmem [shape: bf16[1152,128], index: 1, kind: input, shape index: {}]   ;;  %s781_s2 = inlined_call_operand.vmem [shape: f32[1,128], index: 2, kind: input, shape index: {}]   ;;  %s782_s3 = inlined_call_operand.vmem [shape: f32[1,128], index: 3, kind: input, shape index: {}]   ;;  %s783_s4 = inlined_call_operand.vmem [shape: f32[8,128], index: 4, kind: input, shape index: {}]   ;;  %s784_s5 = inlined_call_operand.vmem [shape: f32[8,128], index: 5, kind: output, shape index: {}]  }
   0x1   :  { %s731_s20 = smov 0  }
   0x2 LB: > { %s27_s21 = sadd.s32 1, %s690_s19  ;;  %p596_p0 = scmp.ge.s32.totalorder %s694_s20, 1  ;;  %s694_s20 = sphi %s731_s20, %s15_s20   ;;  %s690_s19 = sphi %s729_s19, %s786_s19   ;;  %s686_s18 = sphi %s727_s18, %s785_s18  }
   0x3   : > { %p28_p1 = scmp.ge.s32.totalorder %s27_s21, 9  ;;  %p259_p2 = scmp.lt.s32.totalorder %s694_s20, 10 }
   0x5   : > { %s788_s21 = smov (%p28_p1, %s27_s21), 0  ;;  %p260_p3 = pnand %p596_p0, %p259_p2 }
   0x6   : > { %p315_p4 = scmp.lt.s32.totalorder (!%p260_p3), %s686_s18, 8  ;;  %s598_s22 = sshll.u32 (!%p260_p3), %s686_s18, 4 }
   0x7   : > { %263 = sbr.rel (%p260_p3) target bundleno = 197 (0xc5), region = 40  ;;  %p322_p5 = scmp.lt.s32.totalorder (!%p260_p3), %s598_s22, 143 }
   0x8   : > { %p600_p6 = scmp.ne.s32.totalorder (!%p260_p3), %s686_s18, 0 }
   0xc   : > { %s316_s23 = scalar_select %p315_p4, %s686_s18, 8 }
   0xd   : > { %s790_s22 = smov (!%p322_p5, %s598_s22), 143  ;;  %353 = sbr.rel (%p600_p6) target bundleno = 20 (0x14), region = 44 }
   0xe   : > { %s597_s24 = sshll.u32 %s316_s23, 2  ;;  %s599_s28 = sshll.u32 %s790_s22, 2 }
   0xf   : > { %s320_s27 = scalar_lea.vmem %s779_s0, %s597_s24  ;;  %s328_s6 = scalar_lea.vmem %s780_s1, %s599_s28 }
  0x12   : > { %v696_v0 = vmov 0.0  }
  0x13   : > { %354 = vst [vmem:[#allocation2] sm:$0xff] %v696_v0 }
  0x14 PF: > { %v644_v1 = vld [vmem:[%s328_s6 + $0x38] sm:$0xff]  ;;  %v643_v2 = vld [vmem:[%s328_s6 + $0x30] sm:$0xff]  ;;  %v642_v3 = vld [vmem:[%s328_s6 + $0x28] sm:$0xff]  ;;  %p633_p7 = scmp.ne.s32.totalorder %s686_s18, 8 }
  0x15   : > { %421 = vmatpush.bf16.msra.mxu0 %v644_v1  ;;  %v641_v4 = vld [vmem:[%s328_s6 + $0x20] sm:$0xff]  ;;  %v640_v5 = vld [vmem:[%s328_s6 + $0x18] sm:$0xff]  ;;  %v639_v6 = vld [vmem:[%s328_s6 + $0x10] sm:$0xff] }
  0x16   : > { %v638_v7 = vld [vmem:[%s328_s6 + $0x8] sm:$0xff]  ;;  %v637_v8 = vld [vmem:[%s328_s6] sm:$0xff] }
  0x17   : > { %v356_v9 = vld [vmem:[%s320_s27] sm:$0xf] }
  0x19   : > { %422 = vmatpush.bf16.msra.mxu0 %v643_v2 }
  0x1a   : > { %v355_v10 = vld [vmem:[#allocation2] sm:$0xff] }
  0x1d   : > { %423 = vmatpush.bf16.msra.mxu0 %v642_v3 }
  0x21   : > { %424 = vmatpush.bf16.msra.mxu0 %v641_v4 }
  0x25   : > { %425 = vmatpush.bf16.msra.mxu0 %v640_v5 }
  0x29   : > { %426 = vmatpush.bf16.msra.mxu0 %v639_v6 }
  0x2d   : > { %427 = vmatpush.bf16.msra.mxu0 %v638_v7 }
  0x31   : > { %428 = vmatpush.bf16.msra.mxu0 %v637_v8 }
  0x34   : > { %429 = vmatmul.bf16.vlgmr.msra.gmra.mxu0 %v356_v9 }
  0xb1   : > { %v430_v11 = vpop.f32.mrf.mxu0 }
  0xb2   : > { %v434_v12 = vadd.f32 %v430_v11, %v355_v10 }
  0xb4   : > { %435 = vst [vmem:[#allocation2] sm:$0xff] %v434_v12 }
  0xb5   : > { %439 = sbr.rel (%p633_p7) target bundleno = 197 (0xc5), region = 48 }
  0xb9   : > { %v432_v13 = vpop.f32.mrf.mxu0 }
  0xba   : > { %v670_v15 = vld [vmem:[%s781_s2] ss:$0 sm:$0xff] }
  0xbb   : > { %v440_v14 = vld [vmem:[#allocation2] sm:$0xff] }
  0xbc   : > { %v671_v16 = vld [vmem:[%s782_s3] ss:$0 sm:$0xff]  ;;  %v445_v17 = vmul.f32 %v670_v15, %v440_v14 }
  0xbd   : > { %v451_v18 = vld [vmem:[%s783_s4] sm:$0xff] }
  0xbe   : > { %v450_v19 = vadd.f32 %v671_v16, %v445_v17 }
  0xc0   : > { %v452_v20 = vadd.f32 %v451_v18, %v450_v19 }
  0xc2   : > { %v453_v21 = vmax.f32 %v452_v20, 0.0 }
  0xc4   : > { %454 = vst [vmem:[%s784_s5] sm:$0xff] %v453_v21 }
  0xc5 PF: > { %s15_s20 = sadd.s32 1, %s694_s20   ;;  %s785_s18 = smov %s690_s19 }
  0xc6   : > { %p12_p8 = scmp.ge.s32.totalorder %s15_s20, 11   ;;  %s786_s19 = smov %s788_s21 }
  0xc8   :  { %14 = sbr.rel (!%p12_p8) target bundleno = 2 (0x2), region = 90 }

// kernel: single_baseline_forward.31
= control target key start
LH: loop header
LB: loop body
LE: loop exit
PB: predicated region body
PF: predicated region fallthrough
CT: control target
= control target key end

     0   :  { %s646_s15 = smov 0   ;;  %s648_s16 = smov 0   ;;  %s695_s0 = inlined_call_operand.vmem [shape: bf16[8,1152], index: 0, kind: input, shape index: {}]   ;;  %s696_s1 = inlined_call_operand.vmem [shape: bf16[1152,128], index: 1, kind: input, shape index: {}]   ;;  %s697_s2 = inlined_call_operand.vmem [shape: f32[1,128], index: 2, kind: input, shape index: {}]   ;;  %s698_s3 = inlined_call_operand.vmem [shape: f32[1,128], index: 3, kind: input, shape index: {}]   ;;  %s699_s4 = inlined_call_operand.vmem [shape: f32[8,128], index: 4, kind: output, shape index: {}]  }
   0x1   :  { %s650_s17 = smov 0  }
   0x2 LB: > { %s26_s18 = sadd.s32 1, %s614_s16  ;;  %p520_p0 = scmp.ge.s32.totalorder %s618_s17, 1  ;;  %s618_s17 = sphi %s650_s17, %s14_s17   ;;  %s614_s16 = sphi %s648_s16, %s701_s16   ;;  %s610_s15 = sphi %s646_s15, %s700_s15  }
   0x3   : > { %p27_p1 = scmp.ge.s32.totalorder %s26_s18, 9  ;;  %p220_p2 = scmp.lt.s32.totalorder %s618_s17, 10 }
   0x5   : > { %s703_s18 = smov (%p27_p1, %s26_s18), 0  ;;  %p221_p3 = pnand %p520_p0, %p220_p2 }
   0x6   : > { %p267_p4 = scmp.lt.s32.totalorder (!%p221_p3), %s610_s15, 8  ;;  %s522_s19 = sshll.u32 (!%p221_p3), %s610_s15, 4 }
   0x7   : > { %224 = sbr.rel (%p221_p3) target bundleno = 195 (0xc3), region = 36  ;;  %p274_p5 = scmp.lt.s32.totalorder (!%p221_p3), %s522_s19, 143 }
   0x8   : > { %p524_p6 = scmp.ne.s32.totalorder (!%p221_p3), %s610_s15, 0 }
   0xc   : > { %s268_s20 = scalar_select %p267_p4, %s610_s15, 8 }
   0xd   : > { %s705_s19 = smov (!%p274_p5, %s522_s19), 143  ;;  %298 = sbr.rel (%p524_p6) target bundleno = 20 (0x14), region = 40 }
   0xe   : > { %s521_s21 = sshll.u32 %s268_s20, 2  ;;  %s523_s25 = sshll.u32 %s705_s19, 2 }
   0xf   : > { %s272_s24 = scalar_lea.vmem %s695_s0, %s521_s21  ;;  %s280_s28 = scalar_lea.vmem %s696_s1, %s523_s25 }
  0x12   : > { %v620_v0 = vmov 0.0  }
  0x13   : > { %299 = vst [vmem:[#allocation2] sm:$0xff] %v620_v0 }
  0x14 PF: > { %v568_v1 = vld [vmem:[%s280_s28 + $0x38] sm:$0xff]  ;;  %v567_v2 = vld [vmem:[%s280_s28 + $0x30] sm:$0xff]  ;;  %v566_v3 = vld [vmem:[%s280_s28 + $0x28] sm:$0xff]  ;;  %p557_p7 = scmp.ne.s32.totalorder %s610_s15, 8 }
  0x15   : > { %366 = vmatpush.bf16.msra.mxu0 %v568_v1  ;;  %v565_v4 = vld [vmem:[%s280_s28 + $0x20] sm:$0xff]  ;;  %v564_v5 = vld [vmem:[%s280_s28 + $0x18] sm:$0xff]  ;;  %v563_v6 = vld [vmem:[%s280_s28 + $0x10] sm:$0xff] }
  0x16   : > { %v562_v7 = vld [vmem:[%s280_s28 + $0x8] sm:$0xff]  ;;  %v561_v8 = vld [vmem:[%s280_s28] sm:$0xff] }
  0x17   : > { %v301_v9 = vld [vmem:[%s272_s24] sm:$0xf] }
  0x19   : > { %367 = vmatpush.bf16.msra.mxu0 %v567_v2 }
  0x1a   : > { %v300_v10 = vld [vmem:[#allocation2] sm:$0xff] }
  0x1d   : > { %368 = vmatpush.bf16.msra.mxu0 %v566_v3 }
  0x21   : > { %369 = vmatpush.bf16.msra.mxu0 %v565_v4 }
  0x25   : > { %370 = vmatpush.bf16.msra.mxu0 %v564_v5 }
  0x29   : > { %371 = vmatpush.bf16.msra.mxu0 %v563_v6 }
  0x2d   : > { %372 = vmatpush.bf16.msra.mxu0 %v562_v7 }
  0x31   : > { %373 = vmatpush.bf16.msra.mxu0 %v561_v8 }
  0x34   : > { %374 = vmatmul.bf16.vlgmr.msra.gmra.mxu0 %v301_v9 }
  0xb1   : > { %v375_v11 = vpop.f32.mrf.mxu0 }
  0xb2   : > { %v379_v12 = vadd.f32 %v375_v11, %v300_v10 }
  0xb4   : > { %380 = vst [vmem:[#allocation2] sm:$0xff] %v379_v12 }
  0xb5   : > { %384 = sbr.rel (%p557_p7) target bundleno = 195 (0xc3), region = 44 }
  0xb9   : > { %v377_v13 = vpop.f32.mrf.mxu0 }
  0xba   : > { %v594_v15 = vld [vmem:[%s697_s2] ss:$0 sm:$0xff] }
  0xbb   : > { %v385_v14 = vld [vmem:[#allocation2] sm:$0xff] }
  0xbc   : > { %v595_v16 = vld [vmem:[%s698_s3] ss:$0 sm:$0xff]  ;;  %v390_v17 = vmul.f32 %v594_v15, %v385_v14 }
  0xbe   : > { %v395_v18 = vadd.f32 %v595_v16, %v390_v17 }
  0xc0   : > { %v396_v19 = vmax.f32 %v395_v18, 0.0 }
  0xc2   : > { %397 = vst [vmem:[%s699_s4] sm:$0xff] %v396_v19 }
  0xc3 PF: > { %s14_s17 = sadd.s32 1, %s618_s17   ;;  %s700_s15 = smov %s614_s16 }
  0xc4   : > { %p11_p8 = scmp.ge.s32.totalorder %s14_s17, 11   ;;  %s701_s16 = smov %s703_s18 }
  0xc6   :  { %13 = sbr.rel (!%p11_p8) target bundleno = 2 (0x2), region = 83 }

// kernel: single_baseline_forward.34
= control target key start
LH: loop header
LB: loop body
LE: loop exit
PB: predicated region body
PF: predicated region fallthrough
CT: control target
= control target key end

     0   :  { %s780_s15 = smov 0   ;;  %s782_s16 = smov 0   ;;  %s869_s0 = inlined_call_operand.vmem [shape: bf16[8,1152], index: 0, kind: input, shape index: {}]   ;;  %s870_s1 = inlined_call_operand.vmem [shape: bf16[1152,256], index: 1, kind: input, shape index: {}]   ;;  %s871_s2 = inlined_call_operand.vmem [shape: f32[1,256], index: 2, kind: input, shape index: {}]   ;;  %s872_s3 = inlined_call_operand.vmem [shape: f32[1,256], index: 3, kind: input, shape index: {}]   ;;  %s873_s4 = inlined_call_operand.vmem [shape: f32[8,256], index: 4, kind: output, shape index: {}]  }
   0x1   :  { %s784_s17 = smov 0  }
   0x2 LB: > { %s26_s18 = sadd.s32 1, %s748_s16  ;;  %p613_p0 = scmp.ge.s32.totalorder %s752_s17, 1  ;;  %s752_s17 = sphi %s784_s17, %s14_s17   ;;  %s748_s16 = sphi %s782_s16, %s875_s16   ;;  %s744_s15 = sphi %s780_s15, %s874_s15  }
   0x3   : > { %p27_p1 = scmp.ge.s32.totalorder %s26_s18, 9  ;;  %p227_p2 = scmp.lt.s32.totalorder %s752_s17, 10 }
   0x5   : > { %s877_s18 = smov (%p27_p1, %s26_s18), 0  ;;  %p228_p3 = pnand %p613_p0, %p227_p2 }
   0x6   : > { %p280_p4 = scmp.lt.s32.totalorder (!%p228_p3), %s744_s15, 8  ;;  %s615_s19 = sshll.u32 (!%p228_p3), %s744_s15, 4 }
   0x7   : > { %231 = sbr.rel (%p228_p3) target bundleno = 202 (0xca), region = 36  ;;  %p288_p5 = scmp.lt.s32.totalorder (!%p228_p3), %s615_s19, 143 }
   0x8   : > { %p618_p6 = scmp.ne.s32.totalorder (!%p228_p3), %s744_s15, 0 }
   0xc   : > { %s281_s20 = scalar_select %p280_p4, %s744_s15, 8 }
   0xd   : > { %s879_s19 = smov (!%p288_p5, %s615_s19), 143  ;;  %321 = sbr.rel (%p618_p6) target bundleno = 21 (0x15), region = 40 }
   0xe   : > { %s614_s21 = sshll.u32 %s281_s20, 2  ;;  %s688_s25 = sshll.u32 %s879_s19, 3 }
   0xf   : > { %s806_s24 = scalar_lea.vmem %s869_s0, %s614_s21  ;;  %s811_s28 = scalar_lea.vmem %s870_s1, %s688_s25 }
  0x12   : > { %v754_v0 = vmov 0.0  }
  0x13   : > { %322 = vst [vmem:[#allocation2] sm:$0xff] %v754_v0 }
  0x14   : > { %323 = vst [vmem:[#allocation2 + $0x8] sm:$0xff] %v754_v0 }
  0x15 PF: > { %v677_v1 = vld [vmem:[%s811_s28 + $0x70] sm:$0xf]  ;;  %v704_v2 = vld [vmem:[%s811_s28 + $0x74] sm:$0xf0]  ;;  %v703_v3 = vld [vmem:[%s811_s28 + $0x74] sm:$0xf] }
  0x16   : > { %v678_v4 = vor.u32 %v704_v2, %v677_v1  ;;  %v679_v5 = vld [vmem:[%s811_s28 + $0x78] sm:$0xf0]  ;;  %v669_v6 = vld [vmem:[%s811_s28 + $0x60] sm:$0xf]  ;;  %v702_v7 = vld [vmem:[%s811_s28 + $0x64] sm:$0xf0] }
  0x17   : > { %v682_v8 = vor.u32 %v703_v3, %v679_v5  ;;  %v701_v9 = vld [vmem:[%s811_s28 + $0x64] sm:$0xf]  ;;  %v671_v10 = vld [vmem:[%s811_s28 + $0x68] sm:$0xf0]  ;;  %v670_v11 = vor.u32 %v702_v7, %v669_v6  ;;  %v661_v13 = vld [vmem:[%s811_s28 + $0x50] sm:$0xf] }
  0x18   : > { %423 = vmatpush.bf16.msra.mxu0 %v678_v4  ;;  %v674_v12 = vor.u32 %v701_v9, %v671_v10  ;;  %v700_v14 = vld [vmem:[%s811_s28 + $0x54] sm:$0xf0]  ;;  %v699_v15 = vld [vmem:[%s811_s28 + $0x54] sm:$0xf]  ;;  %v663_v16 = vld [vmem:[%s811_s28 + $0x58] sm:$0xf0] }
  0x19   : > { %436 = vmatpush.bf16.msra.mxu1 %v682_v8  ;;  %v662_v17 = vor.u32 %v700_v14, %v661_v13  ;;  %v666_v18 = vor.u32 %v699_v15, %v663_v16  ;;  %v653_v19 = vld [vmem:[%s811_s28 + $0x40] sm:$0xf]  ;;  %v698_v20 = vld [vmem:[%s811_s28 + $0x44] sm:$0xf0]  ;;  %v697_v21 = vld [vmem:[%s811_s28 + $0x44] sm:$0xf] }
  0x1a   : > { %v655_v22 = vld [vmem:[%s811_s28 + $0x48] sm:$0xf0]  ;;  %v654_v23 = vor.u32 %v698_v20, %v653_v19  ;;  %v645_v25 = vld [vmem:[%s811_s28 + $0x30] sm:$0xf]  ;;  %v696_v26 = vld [vmem:[%s811_s28 + $0x34] sm:$0xf0] }
  0x1b   : > { %v658_v24 = vor.u32 %v697_v21, %v655_v22  ;;  %v695_v27 = vld [vmem:[%s811_s28 + $0x34] sm:$0xf]  ;;  %v647_v28 = vld [vmem:[%s811_s28 + $0x38] sm:$0xf0]  ;;  %v646_v29 = vor.u32 %v696_v26, %v645_v25  ;;  %v637_v31 = vld [vmem:[%s811_s28 + $0x20] sm:$0xf] }
  0x1c   : > { %424 = vmatpush.bf16.msra.mxu0 %v670_v11  ;;  %v650_v30 = vor.u32 %v695_v27, %v647_v28  ;;  %v694_v32 = vld [vmem:[%s811_s28 + $0x24] sm:$0xf0]  ;;  %v693_v33 = vld [vmem:[%s811_s28 + $0x24] sm:$0xf]  ;;  %v639_v34 = vld [vmem:[%s811_s28 + $0x28] sm:$0xf0] }
  0x1d   : > { %437 = vmatpush.bf16.msra.mxu1 %v674_v12  ;;  %v638_v35 = vor.u32 %v694_v32, %v637_v31  ;;  %v642_v36 = vor.u32 %v693_v33, %v639_v34  ;;  %v629_v37 = vld [vmem:[%s811_s28 + $0x10] sm:$0xf]  ;;  %v692_v38 = vld [vmem:[%s811_s28 + $0x14] sm:$0xf0]  ;;  %v691_v39 = vld [vmem:[%s811_s28 + $0x14] sm:$0xf] }
  0x1e   : > { %v631_v40 = vld [vmem:[%s811_s28 + $0x18] sm:$0xf0]  ;;  %v630_v41 = vor.u32 %v692_v38, %v629_v37  ;;  %v621_v43 = vld [vmem:[%s811_s28] sm:$0xf]  ;;  %v690_v44 = vld [vmem:[%s811_s28 + $0x4] sm:$0xf0] }
  0x1f   : > { %v634_v42 = vor.u32 %v691_v39, %v631_v40  ;;  %v689_v45 = vld [vmem:[%s811_s28 + $0x4] sm:$0xf]  ;;  %v623_v46 = vld [vmem:[%s811_s28 + $0x8] sm:$0xf0]  ;;  %v622_v47 = vor.u32 %v690_v44, %v621_v43  ;;  %v326_v49 = vld [vmem:[%s806_s24] sm:$0xf] }
  0x20   : > { %425 = vmatpush.bf16.msra.mxu0 %v662_v17  ;;  %v626_v48 = vor.u32 %v689_v45, %v623_v46  ;;  %v324_v50 = vld [vmem:[#allocation2] sm:$0xff]  ;;  %v325_v51 = vld [vmem:[#allocation2 + $0x8] sm:$0xff]  ;;  %p683_p7 = scmp.ne.s32.totalorder %s744_s15, 8 }
  0x21   : > { %438 = vmatpush.bf16.msra.mxu1 %v666_v18 }
  0x24   : > { %426 = vmatpush.bf16.msra.mxu0 %v654_v23 }
  0x25   : > { %439 = vmatpush.bf16.msra.mxu1 %v658_v24 }
  0x28   : > { %427 = vmatpush.bf16.msra.mxu0 %v646_v29 }
  0x29   : > { %440 = vmatpush.bf16.msra.mxu1 %v650_v30 }
  0x2c   : > { %428 = vmatpush.bf16.msra.mxu0 %v638_v35 }
  0x2d   : > { %441 = vmatpush.bf16.msra.mxu1 %v642_v36 }
  0x30   : > { %429 = vmatpush.bf16.msra.mxu0 %v630_v41 }
  0x31   : > { %442 = vmatpush.bf16.msra.mxu1 %v634_v42 }
  0x34   : > { %430 = vmatpush.bf16.msra.mxu0 %v622_v47 }
  0x35   : > { %443 = vmatpush.bf16.msra.mxu1 %v626_v48 }
  0x37   : > { %431 = vmatmul.bf16.vlgmr.msra.gmra.mxu0 %v326_v49 }
  0x38   : > { %444 = vmatmul.bf16.vlgmr.msra.gmra.mxu1 %v326_v49 }
  0xb4   : > { %v432_v52 = vpop.f32.mrf.mxu0 }
  0xb5   : > { %v449_v53 = vadd.f32 %v432_v52, %v324_v50  ;;  %v445_v54 = vpop.f32.mrf.mxu1 }
  0xb6   : > { %v450_v55 = vadd.f32 %v445_v54, %v325_v51 }
  0xb7   : > { %451 = vst [vmem:[#allocation2] sm:$0xff] %v449_v53 }
  0xb8   : > { %452 = vst [vmem:[#allocation2 + $0x8] sm:$0xff] %v450_v55 }
  0xb9   : > { %456 = sbr.rel (%p683_p7) target bundleno = 202 (0xca), region = 44 }
  0xbc   : > { %v434_v56 = vpop.f32.mrf.mxu0 }
  0xbd   : > { %v447_v57 = vpop.f32.mrf.mxu1 }
  0xbe   : > { %v457_v58 = vld [vmem:[#allocation2] sm:$0xff] }
  0xbf   : > { %v459_v59 = vld [vmem:[%s871_s2] sm:$0x3]  ;;  %v458_v63 = vld [vmem:[#allocation2 + $0x8] sm:$0xff] }
  0xc0   : > { %v467_v60 = vld [vmem:[%s872_s3] sm:$0x3]  ;;  %v461_v61 = vperm.slane %v459_v59, 0  ;;  %v462_v0 = vperm.slane %v459_v59, 1 }
  0xc1   : > { %v469_v62 = vperm.slane %v467_v60, 0  ;;  %v470_v1 = vperm.slane %v467_v60, 1 }
  0xc2   : > { %v465_v2 = vmul.f32 %v461_v61, %v457_v58  ;;  %v466_v3 = vmul.f32 %v462_v0, %v458_v63 }
  0xc4   : > { %v473_v4 = vadd.f32 %v469_v62, %v465_v2  ;;  %v474_v5 = vadd.f32 %v470_v1, %v466_v3 }
  0xc6   : > { %v475_v6 = vmax.f32 %v473_v4, 0.0  ;;  %v476_v7 = vmax.f32 %v474_v5, 0.0 }
  0xc8   : > { %477 = vst [vmem:[%s873_s4] sm:$0xff] %v475_v6 }
  0xc9   : > { %478 = vst [vmem:[%s873_s4 + $0x8] sm:$0xff] %v476_v7 }
  0xca PF: > { %s14_s17 = sadd.s32 1, %s752_s17   ;;  %s874_s15 = smov %s748_s16 }
  0xcb   : > { %p11_p8 = scmp.ge.s32.totalorder %s14_s17, 11   ;;  %s875_s16 = smov %s877_s18 }
  0xcd   :  { %13 = sbr.rel (!%p11_p8) target bundleno = 2 (0x2), region = 83 }

// kernel: single_baseline_forward.33
= control target key start
LH: loop header
LB: loop body
LE: loop exit
PB: predicated region body
PF: predicated region fallthrough
CT: control target
= control target key end

     0   :  { %s395_s1 = inlined_call_operand.vmem [shape: bf16[128,256], index: 1, kind: input, shape index: {}]   ;;  %s396_s0 = inlined_call_operand.vmem [shape: bf16[8,128], index: 0, kind: input, shape index: {}]   ;;  %s397_s2 = inlined_call_operand.vmem [shape: f32[1,256], index: 2, kind: input, shape index: {}]   ;;  %s398_s3 = inlined_call_operand.vmem [shape: f32[1,256], index: 3, kind: input, shape index: {}]   ;;  %s399_s4 = inlined_call_operand.vmem [shape: f32[8,256], index: 4, kind: output, shape index: {}]  }
   0x1   :  { %v237_v0 = vld [vmem:[%s395_s1 + $0x70] sm:$0xf]  ;;  %v258_v1 = vld [vmem:[%s395_s1 + $0x74] sm:$0xf0]  ;;  %v257_v2 = vld [vmem:[%s395_s1 + $0x74] sm:$0xf] }
   0x2   :  { %v238_v3 = vor.u32 %v258_v1, %v237_v0  ;;  %v239_v4 = vld [vmem:[%s395_s1 + $0x78] sm:$0xf0]  ;;  %v229_v5 = vld [vmem:[%s395_s1 + $0x60] sm:$0xf]  ;;  %v256_v6 = vld [vmem:[%s395_s1 + $0x64] sm:$0xf0] }
   0x3   :  { %v242_v7 = vor.u32 %v257_v2, %v239_v4  ;;  %v255_v8 = vld [vmem:[%s395_s1 + $0x64] sm:$0xf]  ;;  %v231_v9 = vld [vmem:[%s395_s1 + $0x68] sm:$0xf0]  ;;  %v230_v10 = vor.u32 %v256_v6, %v229_v5  ;;  %v221_v12 = vld [vmem:[%s395_s1 + $0x50] sm:$0xf] }
   0x4   :  { %122 = vmatpush.bf16.msra.mxu0 %v238_v3  ;;  %v234_v11 = vor.u32 %v255_v8, %v231_v9  ;;  %v254_v13 = vld [vmem:[%s395_s1 + $0x54] sm:$0xf0]  ;;  %v253_v14 = vld [vmem:[%s395_s1 + $0x54] sm:$0xf]  ;;  %v223_v15 = vld [vmem:[%s395_s1 + $0x58] sm:$0xf0] }
   0x5   :  { %135 = vmatpush.bf16.msra.mxu1 %v242_v7  ;;  %v222_v16 = vor.u32 %v254_v13, %v221_v12  ;;  %v226_v17 = vor.u32 %v253_v14, %v223_v15  ;;  %v213_v18 = vld [vmem:[%s395_s1 + $0x40] sm:$0xf]  ;;  %v252_v19 = vld [vmem:[%s395_s1 + $0x44] sm:$0xf0]  ;;  %v251_v20 = vld [vmem:[%s395_s1 + $0x44] sm:$0xf] }
   0x6   :  { %v215_v21 = vld [vmem:[%s395_s1 + $0x48] sm:$0xf0]  ;;  %v214_v22 = vor.u32 %v252_v19, %v213_v18  ;;  %v205_v24 = vld [vmem:[%s395_s1 + $0x30] sm:$0xf]  ;;  %v250_v25 = vld [vmem:[%s395_s1 + $0x34] sm:$0xf0] }
   0x7   :  { %v218_v23 = vor.u32 %v251_v20, %v215_v21  ;;  %v249_v26 = vld [vmem:[%s395_s1 + $0x34] sm:$0xf]  ;;  %v207_v27 = vld [vmem:[%s395_s1 + $0x38] sm:$0xf0]  ;;  %v206_v28 = vor.u32 %v250_v25, %v205_v24  ;;  %v197_v30 = vld [vmem:[%s395_s1 + $0x20] sm:$0xf] }
   0x8   :  { %123 = vmatpush.bf16.msra.mxu0 %v230_v10  ;;  %v210_v29 = vor.u32 %v249_v26, %v207_v27  ;;  %v248_v31 = vld [vmem:[%s395_s1 + $0x24] sm:$0xf0]  ;;  %v247_v32 = vld [vmem:[%s395_s1 + $0x24] sm:$0xf]  ;;  %v199_v33 = vld [vmem:[%s395_s1 + $0x28] sm:$0xf0] }
   0x9   :  { %136 = vmatpush.bf16.msra.mxu1 %v234_v11  ;;  %v198_v34 = vor.u32 %v248_v31, %v197_v30  ;;  %v202_v35 = vor.u32 %v247_v32, %v199_v33  ;;  %v189_v36 = vld [vmem:[%s395_s1 + $0x10] sm:$0xf]  ;;  %v246_v37 = vld [vmem:[%s395_s1 + $0x14] sm:$0xf0]  ;;  %v245_v38 = vld [vmem:[%s395_s1 + $0x14] sm:$0xf] }
   0xa   :  { %v191_v39 = vld [vmem:[%s395_s1 + $0x18] sm:$0xf0]  ;;  %v190_v40 = vor.u32 %v246_v37, %v189_v36  ;;  %v181_v42 = vld [vmem:[%s395_s1] sm:$0xf]  ;;  %v244_v43 = vld [vmem:[%s395_s1 + $0x4] sm:$0xf0] }
   0xb   :  { %v194_v41 = vor.u32 %v245_v38, %v191_v39  ;;  %v243_v44 = vld [vmem:[%s395_s1 + $0x4] sm:$0xf]  ;;  %v183_v45 = vld [vmem:[%s395_s1 + $0x8] sm:$0xf0]  ;;  %v182_v46 = vor.u32 %v244_v43, %v181_v42  ;;  %v25_v48 = vld [vmem:[%s396_s0] sm:$0xf] }
   0xc   :  { %124 = vmatpush.bf16.msra.mxu0 %v222_v16  ;;  %v186_v47 = vor.u32 %v243_v44, %v183_v45  ;;  %v157_v49 = vld [vmem:[%s397_s2] sm:$0x3] }
   0xd   :  { %137 = vmatpush.bf16.msra.mxu1 %v226_v17  ;;  %v165_v50 = vld [vmem:[%s398_s3] sm:$0x3]  ;;  %v159_v51 = vperm.slane %v157_v49, 0  ;;  %v160_v52 = vperm.slane %v157_v49, 1 }
   0xe   :  { %v167_v53 = vperm.slane %v165_v50, 0  ;;  %v168_v55 = vperm.slane %v165_v50, 1 }
  0x10   :  { %125 = vmatpush.bf16.msra.mxu0 %v214_v22 }
  0x11   :  { %138 = vmatpush.bf16.msra.mxu1 %v218_v23 }
  0x14   :  { %126 = vmatpush.bf16.msra.mxu0 %v206_v28 }
  0x15   :  { %139 = vmatpush.bf16.msra.mxu1 %v210_v29 }
  0x18   :  { %127 = vmatpush.bf16.msra.mxu0 %v198_v34 }
  0x19   :  { %140 = vmatpush.bf16.msra.mxu1 %v202_v35 }
  0x1c   :  { %128 = vmatpush.bf16.msra.mxu0 %v190_v40 }
  0x1d   :  { %141 = vmatpush.bf16.msra.mxu1 %v194_v41 }
  0x20   :  { %129 = vmatpush.bf16.msra.mxu0 %v182_v46 }
  0x21   :  { %142 = vmatpush.bf16.msra.mxu1 %v186_v47 }
  0x23   :  { %130 = vmatmul.bf16.vlgmr.msra.gmra.mxu0 %v25_v48 }
  0x24   :  { %143 = vmatmul.bf16.vlgmr.msra.gmra.mxu1 %v25_v48 }
  0xa0   :  { %v131_v54 = vpop.f32.mrf.mxu0 }
  0xa1   :  { %v163_v56 = vmul.f32 %v159_v51, %v131_v54  ;;  %v144_v57 = vpop.f32.mrf.mxu1 }
  0xa2   :  { %v164_v58 = vmul.f32 %v160_v52, %v144_v57 }
  0xa3   :  { %v171_v59 = vadd.f32 %v167_v53, %v163_v56 }
  0xa4   :  { %v172_v60 = vadd.f32 %v168_v55, %v164_v58 }
  0xa5   :  { %173 = vst [vmem:[%s399_s4] sm:$0xff] %v171_v59 }
  0xa6   :  { %174 = vst [vmem:[%s399_s4 + $0x8] sm:$0xff] %v172_v60 }
  0xa8   :  { %v133_v61 = vpop.f32.mrf.mxu0 }
  0xa9   :  { %v146_v62 = vpop.f32.mrf.mxu1 }

// kernel: single_baseline_forward.35
= control target key start
LH: loop header
LB: loop body
LE: loop exit
PB: predicated region body
PF: predicated region fallthrough
CT: control target
= control target key end

     0   :  { %s1089_s18 = smov 0   ;;  %s1091_s19 = smov 0   ;;  %s1215_s0 = inlined_call_operand.vmem [shape: bf16[8,2304], index: 0, kind: input, shape index: {}]   ;;  %s1216_s1 = inlined_call_operand.vmem [shape: bf16[2304,256], index: 1, kind: input, shape index: {}]   ;;  %s1217_s2 = inlined_call_operand.vmem [shape: f32[1,256], index: 2, kind: input, shape index: {}]   ;;  %s1218_s3 = inlined_call_operand.vmem [shape: f32[1,256], index: 3, kind: input, shape index: {}]   ;;  %s1219_s4 = inlined_call_operand.vmem [shape: f32[8,256], index: 4, kind: input, shape index: {}]   ;;  %s1220_s5 = inlined_call_operand.vmem [shape: f32[8,256], index: 5, kind: output, shape index: {}]  }
   0x1   :  { %s1093_s20 = smov 0  }
   0x2 LB: > { %s27_s21 = sadd.s32 1, %s1052_s19  ;;  %p836_p0 = scmp.ge.s32.totalorder %s1056_s20, 1  ;;  %s1056_s20 = sphi %s1093_s20, %s15_s20   ;;  %s1052_s19 = sphi %s1091_s19, %s1222_s19   ;;  %s1048_s18 = sphi %s1089_s18, %s1221_s18  }
   0x3   : > { %p28_p1 = scmp.ge.s32.totalorder %s27_s21, 9  ;;  %p271_p2 = scmp.lt.s32.totalorder %s1056_s20, 10 }
   0x5   : > { %s1224_s21 = smov (%p28_p1, %s27_s21), 0  ;;  %p272_p3 = pnand %p836_p0, %p271_p2 }
   0x6   : > { %s837_s22 = sshll.u32 (!%p272_p3), %s1048_s18, 1  ;;  %s839_s23 = sshll.u32 (!%p272_p3), %s1048_s18, 5 }
   0x7   : > { %275 = sbr.rel (%p272_p3) target bundleno = 213 (0xd5), region = 40  ;;  %p337_p4 = scmp.lt.s32.totalorder (!%p272_p3), %s837_s22, 17 }
   0x8   : > { %p346_p5 = scmp.lt.s32.totalorder (!%p272_p3), %s839_s23, 287  ;;  %p842_p6 = scmp.ne.s32.totalorder (!%p272_p3), %s1048_s18, 0 }
   0xc   : > { %s1226_s22 = smov (!%p337_p4, %s837_s22), 17  ;;  %s1228_s23 = smov (!%p346_p5, %s839_s23), 287 }
   0xd   : > { %s838_s24 = sshll.u32 %s1226_s22, 2  ;;  %s976_s28 = sshll.u32 %s1228_s23, 3 }
   0xe   : > { %s1114_s27 = scalar_lea.vmem %s1215_s0, %s838_s24  ;;  %s1119_s6 = scalar_lea.vmem %s1216_s1, %s976_s28 }
   0xf   : > { %389 = sbr.rel (%p842_p6) target bundleno = 23 (0x17), region = 44 }
  0x14   : > { %v1058_v0 = vmov 0.0  }
  0x15   : > { %390 = vst [vmem:[#allocation2] sm:$0xff] %v1058_v0 }
  0x16   : > { %391 = vst [vmem:[#allocation2 + $0x8] sm:$0xff] %v1058_v0 }
  0x17 PF: > { %v901_v1 = vld [vmem:[%s1119_s6 + $0x70] sm:$0xf]  ;;  %v992_v2 = vld [vmem:[%s1119_s6 + $0x74] sm:$0xf0]  ;;  %v991_v6 = vld [vmem:[%s1119_s6 + $0x74] sm:$0xf] }
  0x18   : > { %v965_v3 = vld [vmem:[%s1119_s6 + $0xf0] sm:$0xf]  ;;  %v902_v4 = vor.u32 %v992_v2, %v901_v1  ;;  %v1008_v5 = vld [vmem:[%s1119_s6 + $0xf4] sm:$0xf0]  ;;  %v903_v7 = vld [vmem:[%s1119_s6 + $0x78] sm:$0xf0] }
  0x19   : > { %v966_v8 = vor.u32 %v1008_v5, %v965_v3  ;;  %v906_v9 = vor.u32 %v991_v6, %v903_v7  ;;  %v1007_v10 = vld [vmem:[%s1119_s6 + $0xf4] sm:$0xf]  ;;  %v967_v11 = vld [vmem:[%s1119_s6 + $0xf8] sm:$0xf0]  ;;  %v893_v12 = vld [vmem:[%s1119_s6 + $0x60] sm:$0xf] }
  0x1a   : > { %594 = vmatpush.bf16.msra.mxu0 %v902_v4  ;;  %v970_v13 = vor.u32 %v1007_v10, %v967_v11  ;;  %v990_v14 = vld [vmem:[%s1119_s6 + $0x64] sm:$0xf0]  ;;  %v957_v15 = vld [vmem:[%s1119_s6 + $0xe0] sm:$0xf]  ;;  %v989_v19 = vld [vmem:[%s1119_s6 + $0x64] sm:$0xf] }
  0x1b   : > { %v1006_v16 = vld [vmem:[%s1119_s6 + $0xe4] sm:$0xf0]  ;;  %607 = vmatpush.bf16.msra.mxu1 %v966_v8  ;;  %620 = vmatpush.bf16.msra.mxu2 %v906_v9  ;;  %v894_v17 = vor.u32 %v990_v14, %v893_v12  ;;  %v895_v20 = vld [vmem:[%s1119_s6 + $0x68] sm:$0xf0]  ;;  %v1005_v21 = vld [vmem:[%s1119_s6 + $0xe4] sm:$0xf] }
  0x1c   : > { %v958_v18 = vor.u32 %v1006_v16, %v957_v15  ;;  %633 = vmatpush.bf16.msra.mxu3 %v970_v13  ;;  %v898_v22 = vor.u32 %v989_v19, %v895_v20  ;;  %v959_v23 = vld [vmem:[%s1119_s6 + $0xe8] sm:$0xf0]  ;;  %v885_v24 = vld [vmem:[%s1119_s6 + $0x50] sm:$0xf]  ;;  %v988_v25 = vld [vmem:[%s1119_s6 + $0x54] sm:$0xf0] }
  0x1d   : > { %v962_v26 = vor.u32 %v1005_v21, %v959_v23  ;;  %v949_v27 = vld [vmem:[%s1119_s6 + $0xd0] sm:$0xf]  ;;  %v1004_v28 = vld [vmem:[%s1119_s6 + $0xd4] sm:$0xf0]  ;;  %v987_v29 = vld [vmem:[%s1119_s6 + $0x54] sm:$0xf]  ;;  %v886_v30 = vor.u32 %v988_v25, %v885_v24 }
  0x1e   : > { %595 = vmatpush.bf16.msra.mxu0 %v894_v17  ;;  %v887_v31 = vld [vmem:[%s1119_s6 + $0x58] sm:$0xf0]  ;;  %v1003_v32 = vld [vmem:[%s1119_s6 + $0xd4] sm:$0xf]  ;;  %v950_v34 = vor.u32 %v1004_v28, %v949_v27  ;;  %v877_v36 = vld [vmem:[%s1119_s6 + $0x40] sm:$0xf] }
  0x1f   : > { %v951_v33 = vld [vmem:[%s1119_s6 + $0xd8] sm:$0xf0]  ;;  %608 = vmatpush.bf16.msra.mxu1 %v958_v18  ;;  %621 = vmatpush.bf16.msra.mxu2 %v898_v22  ;;  %v890_v35 = vor.u32 %v987_v29, %v887_v31  ;;  %v986_v37 = vld [vmem:[%s1119_s6 + $0x44] sm:$0xf0]  ;;  %v941_v38 = vld [vmem:[%s1119_s6 + $0xc0] sm:$0xf] }
  0x20   : > { %634 = vmatpush.bf16.msra.mxu3 %v962_v26  ;;  %v954_v39 = vor.u32 %v1003_v32, %v951_v33  ;;  %v1002_v40 = vld [vmem:[%s1119_s6 + $0xc4] sm:$0xf0]  ;;  %v985_v41 = vld [vmem:[%s1119_s6 + $0x44] sm:$0xf]  ;;  %v879_v42 = vld [vmem:[%s1119_s6 + $0x48] sm:$0xf0]  ;;  %v878_v45 = vor.u32 %v986_v37, %v877_v36 }
  0x21   : > { %v1001_v43 = vld [vmem:[%s1119_s6 + $0xc4] sm:$0xf]  ;;  %v943_v44 = vld [vmem:[%s1119_s6 + $0xc8] sm:$0xf0]  ;;  %v942_v46 = vor.u32 %v1002_v40, %v941_v38  ;;  %v882_v47 = vor.u32 %v985_v41, %v879_v42  ;;  %v869_v48 = vld [vmem:[%s1119_s6 + $0x30] sm:$0xf] }
  0x22   : > { %596 = vmatpush.bf16.msra.mxu0 %v886_v30  ;;  %v984_v49 = vld [vmem:[%s1119_s6 + $0x34] sm:$0xf0]  ;;  %v933_v50 = vld [vmem:[%s1119_s6 + $0xb0] sm:$0xf]  ;;  %v946_v51 = vor.u32 %v1001_v43, %v943_v44  ;;  %v983_v53 = vld [vmem:[%s1119_s6 + $0x34] sm:$0xf] }
  0x23   : > { %609 = vmatpush.bf16.msra.mxu1 %v950_v34  ;;  %622 = vmatpush.bf16.msra.mxu2 %v890_v35  ;;  %v1000_v52 = vld [vmem:[%s1119_s6 + $0xb4] sm:$0xf0]  ;;  %v871_v54 = vld [vmem:[%s1119_s6 + $0x38] sm:$0xf0]  ;;  %v999_v55 = vld [vmem:[%s1119_s6 + $0xb4] sm:$0xf]  ;;  %v870_v57 = vor.u32 %v984_v49, %v869_v48 }
  0x24   : > { %635 = vmatpush.bf16.msra.mxu3 %v954_v39  ;;  %v935_v56 = vld [vmem:[%s1119_s6 + $0xb8] sm:$0xf0]  ;;  %v934_v58 = vor.u32 %v1000_v52, %v933_v50  ;;  %v874_v59 = vor.u32 %v983_v53, %v871_v54  ;;  %v861_v60 = vld [vmem:[%s1119_s6 + $0x20] sm:$0xf]  ;;  %v982_v61 = vld [vmem:[%s1119_s6 + $0x24] sm:$0xf0] }
  0x25   : > { %v925_v62 = vld [vmem:[%s1119_s6 + $0xa0] sm:$0xf]  ;;  %v938_v63 = vor.u32 %v999_v55, %v935_v56  ;;  %v998_v0 = vld [vmem:[%s1119_s6 + $0xa4] sm:$0xf0]  ;;  %v981_v1 = vld [vmem:[%s1119_s6 + $0x24] sm:$0xf]  ;;  %v862_v5 = vor.u32 %v982_v61, %v861_v60 }
  0x26   : > { %597 = vmatpush.bf16.msra.mxu0 %v878_v45  ;;  %v863_v2 = vld [vmem:[%s1119_s6 + $0x28] sm:$0xf0]  ;;  %v997_v3 = vld [vmem:[%s1119_s6 + $0xa4] sm:$0xf]  ;;  %v926_v6 = vor.u32 %v998_v0, %v925_v62  ;;  %v853_v8 = vld [vmem:[%s1119_s6 + $0x10] sm:$0xf] }
  0x27   : > { %610 = vmatpush.bf16.msra.mxu1 %v942_v46  ;;  %623 = vmatpush.bf16.msra.mxu2 %v882_v47  ;;  %v927_v4 = vld [vmem:[%s1119_s6 + $0xa8] sm:$0xf0]  ;;  %v866_v7 = vor.u32 %v981_v1, %v863_v2  ;;  %v980_v9 = vld [vmem:[%s1119_s6 + $0x14] sm:$0xf0]  ;;  %v917_v10 = vld [vmem:[%s1119_s6 + $0x90] sm:$0xf] }
  0x28   : > { %636 = vmatpush.bf16.msra.mxu3 %v946_v51  ;;  %v930_v11 = vor.u32 %v997_v3, %v927_v4  ;;  %v996_v12 = vld [vmem:[%s1119_s6 + $0x94] sm:$0xf0]  ;;  %v979_v13 = vld [vmem:[%s1119_s6 + $0x14] sm:$0xf]  ;;  %v855_v14 = vld [vmem:[%s1119_s6 + $0x18] sm:$0xf0]  ;;  %v854_v17 = vor.u32 %v980_v9, %v853_v8 }
  0x29   : > { %v995_v15 = vld [vmem:[%s1119_s6 + $0x94] sm:$0xf]  ;;  %v919_v16 = vld [vmem:[%s1119_s6 + $0x98] sm:$0xf0]  ;;  %v394_v18 = vld [vmem:[%s1114_s27] sm:$0xff]  ;;  %v918_v19 = vor.u32 %v996_v12, %v917_v10  ;;  %v858_v20 = vor.u32 %v979_v13, %v855_v14  ;;  %p971_p7 = scmp.ne.s32.totalorder %s1048_s18, 8 }
  0x2a   : > { %598 = vmatpush.bf16.msra.mxu0 %v870_v57  ;;  %v845_v21 = vld [vmem:[%s1119_s6] sm:$0xf]  ;;  %v978_v22 = vld [vmem:[%s1119_s6 + $0x4] sm:$0xf0]  ;;  %v922_v24 = vor.u32 %v995_v15, %v919_v16  ;;  %v977_v26 = vld [vmem:[%s1119_s6 + $0x4] sm:$0xf]  ;;  %v428_v30 = vunpack.c.l.b16 %v394_v18  ;;  %v429_v32 = vunpack.c.h.b16 %v394_v18 }
  0x2b   : > { %611 = vmatpush.bf16.msra.mxu1 %v934_v58  ;;  %624 = vmatpush.bf16.msra.mxu2 %v874_v59  ;;  %v909_v23 = vld [vmem:[%s1119_s6 + $0x80] sm:$0xf]  ;;  %v994_v25 = vld [vmem:[%s1119_s6 + $0x84] sm:$0xf0]  ;;  %v847_v27 = vld [vmem:[%s1119_s6 + $0x8] sm:$0xf0]  ;;  %v846_v31 = vor.u32 %v978_v22, %v845_v21 }
  0x2c   : > { %637 = vmatpush.bf16.msra.mxu3 %v938_v63  ;;  %v993_v28 = vld [vmem:[%s1119_s6 + $0x84] sm:$0xf]  ;;  %v911_v29 = vld [vmem:[%s1119_s6 + $0x88] sm:$0xf0]  ;;  %v910_v33 = vor.u32 %v994_v25, %v909_v23  ;;  %v850_v34 = vor.u32 %v977_v26, %v847_v27  ;;  %v430_v36 = vpack.c.b16 %v428_v30, %v428_v30  ;;  %v431_v37 = vpack.c.b16 %v429_v32, %v429_v32 }
  0x2d   : > { %v914_v35 = vor.u32 %v993_v28, %v911_v29  ;;  %v392_v39 = vld [vmem:[#allocation2] sm:$0xff]  ;;  %v393_v44 = vld [vmem:[#allocation2 + $0x8] sm:$0xff] }
  0x2e   : > { %599 = vmatpush.bf16.msra.mxu0 %v862_v5 }
  0x2f   : > { %612 = vmatpush.bf16.msra.mxu1 %v926_v6  ;;  %625 = vmatpush.bf16.msra.mxu2 %v866_v7 }
  0x30   : > { %638 = vmatpush.bf16.msra.mxu3 %v930_v11 }
  0x32   : > { %600 = vmatpush.bf16.msra.mxu0 %v854_v17 }
  0x33   : > { %613 = vmatpush.bf16.msra.mxu1 %v918_v19  ;;  %626 = vmatpush.bf16.msra.mxu2 %v858_v20 }
  0x34   : > { %639 = vmatpush.bf16.msra.mxu3 %v922_v24 }
  0x36   : > { %601 = vmatpush.bf16.msra.mxu0 %v846_v31 }
  0x37   : > { %614 = vmatpush.bf16.msra.mxu1 %v910_v33  ;;  %627 = vmatpush.bf16.msra.mxu2 %v850_v34 }
  0x38   : > { %640 = vmatpush.bf16.msra.mxu3 %v914_v35 }
  0x39   : > { %602 = vmatmul.bf16.vlgmr.msra.gmra.mxu0 %v430_v36 }
  0x3a   : > { %615 = vmatmul.bf16.vlgmr.msra.gmra.mxu1 %v431_v37  ;;  %628 = vmatmul.bf16.vlgmr.msra.gmra.mxu2 %v430_v36 }
  0x3b   : > { %641 = vmatmul.bf16.vlgmr.msra.gmra.mxu3 %v431_v37 }
  0xb6   : > { %v603_v38 = vpop.f32.mrf.mxu0 }
  0xb7   : > { %v616_v40 = vpop.f32.mrf.mxu1 }
  0xb8   : > { %v617_v41 = vadd.f32 %v616_v40, %v603_v38 }
  0xba   : > { %v646_v42 = vadd.f32 %v617_v41, %v392_v39 }
  0xbc   : > { %648 = vst [vmem:[#allocation2] sm:$0xff] %v646_v42 }
  0xbd   : > { %v629_v43 = vpop.f32.mrf.mxu2 }
  0xbe   : > { %v642_v45 = vpop.f32.mrf.mxu3  ;;  %v605_v46 = vpop.f32.mrf.mxu0 }
  0xbf   : > { %v643_v47 = vadd.f32 %v642_v45, %v629_v43  ;;  %v618_v48 = vpop.f32.mrf.mxu1 }
  0xc1   : > { %v647_v49 = vadd.f32 %v643_v47, %v393_v44 }
  0xc2   : > { %653 = sbr.rel (%p971_p7) target bundleno = 213 (0xd5), region = 48 }
  0xc3   : > { %649 = vst [vmem:[#allocation2 + $0x8] sm:$0xff] %v647_v49 }
  0xc5   : > { %v631_v50 = vpop.f32.mrf.mxu2 }
  0xc6   : > { %v644_v51 = vpop.f32.mrf.mxu3 }
  0xc7   : > { %v654_v52 = vld [vmem:[#allocation2] sm:$0xff]  ;;  %v673_v63 = vld [vmem:[%s1219_s4 + $0x8] sm:$0xff] }
  0xc8   : > { %v656_v53 = vld [vmem:[%s1217_s2] sm:$0x3] }
  0xc9   : > { %v664_v54 = vld [vmem:[%s1218_s3] sm:$0x3]  ;;  %v658_v55 = vperm.slane %v656_v53, 0  ;;  %v659_v58 = vperm.slane %v656_v53, 1 }
  0xca   : > { %v666_v56 = vperm.slane %v664_v54, 0  ;;  %v655_v57 = vld [vmem:[#allocation2 + $0x8] sm:$0xff]  ;;  %v667_v59 = vperm.slane %v664_v54, 1  ;;  %v672_v62 = vld [vmem:[%s1219_s4] sm:$0xff] }
  0xcb   : > { %v662_v60 = vmul.f32 %v658_v55, %v654_v52  ;;  %v663_v61 = vmul.f32 %v659_v58, %v655_v57 }
  0xcd   : > { %v670_v0 = vadd.f32 %v666_v56, %v662_v60  ;;  %v671_v1 = vadd.f32 %v667_v59, %v663_v61 }
  0xcf   : > { %v674_v2 = vadd.f32 %v672_v62, %v670_v0  ;;  %v675_v3 = vadd.f32 %v673_v63, %v671_v1 }
  0xd1   : > { %v676_v4 = vmax.f32 %v674_v2, 0.0  ;;  %v677_v5 = vmax.f32 %v675_v3, 0.0 }
  0xd3   : > { %678 = vst [vmem:[%s1220_s5] sm:$0xff] %v676_v4 }
  0xd4   : > { %679 = vst [vmem:[%s1220_s5 + $0x8] sm:$0xff] %v677_v5 }
  0xd5 PF: > { %s15_s20 = sadd.s32 1, %s1056_s20   ;;  %s1221_s18 = smov %s1052_s19 }
  0xd6   : > { %p12_p8 = scmp.ge.s32.totalorder %s15_s20, 11   ;;  %s1222_s19 = smov %s1224_s21 }
  0xd8   :  { %14 = sbr.rel (!%p12_p8) target bundleno = 2 (0x2), region = 90 }

// kernel: single_baseline_forward.36
= control target key start
LH: loop header
LB: loop body
LE: loop exit
PB: predicated region body
PF: predicated region fallthrough
CT: control target
= control target key end

     0   :  { %s995_s15 = smov 0   ;;  %s997_s16 = smov 0   ;;  %s1115_s0 = inlined_call_operand.vmem [shape: bf16[8,2304], index: 0, kind: input, shape index: {}]   ;;  %s1116_s1 = inlined_call_operand.vmem [shape: bf16[2304,256], index: 1, kind: input, shape index: {}]   ;;  %s1117_s2 = inlined_call_operand.vmem [shape: f32[1,256], index: 2, kind: input, shape index: {}]   ;;  %s1118_s3 = inlined_call_operand.vmem [shape: f32[1,256], index: 3, kind: input, shape index: {}]   ;;  %s1119_s4 = inlined_call_operand.vmem [shape: f32[8,256], index: 4, kind: output, shape index: {}]  }
   0x1   :  { %s999_s17 = smov 0  }
   0x2 LB: > { %s26_s18 = sadd.s32 1, %s963_s16  ;;  %p747_p0 = scmp.ge.s32.totalorder %s967_s17, 1  ;;  %s967_s17 = sphi %s999_s17, %s14_s17   ;;  %s963_s16 = sphi %s997_s16, %s1121_s16   ;;  %s959_s15 = sphi %s995_s15, %s1120_s15  }
   0x3   : > { %p27_p1 = scmp.ge.s32.totalorder %s26_s18, 9  ;;  %p229_p2 = scmp.lt.s32.totalorder %s967_s17, 10 }
   0x5   : > { %s1123_s18 = smov (%p27_p1, %s26_s18), 0  ;;  %p230_p3 = pnand %p747_p0, %p229_p2 }
   0x6   : > { %s748_s19 = sshll.u32 (!%p230_p3), %s959_s15, 1  ;;  %s750_s20 = sshll.u32 (!%p230_p3), %s959_s15, 5 }
   0x7   : > { %233 = sbr.rel (%p230_p3) target bundleno = 211 (0xd3), region = 36  ;;  %p284_p4 = scmp.lt.s32.totalorder (!%p230_p3), %s748_s19, 17 }
   0x8   : > { %p293_p5 = scmp.lt.s32.totalorder (!%p230_p3), %s750_s20, 287  ;;  %p753_p6 = scmp.ne.s32.totalorder (!%p230_p3), %s959_s15, 0 }
   0xc   : > { %s1125_s19 = smov (!%p284_p4, %s748_s19), 17  ;;  %s1127_s20 = smov (!%p293_p5, %s750_s20), 287 }
   0xd   : > { %s749_s21 = sshll.u32 %s1125_s19, 2  ;;  %s887_s25 = sshll.u32 %s1127_s20, 3 }
   0xe   : > { %s1020_s24 = scalar_lea.vmem %s1115_s0, %s749_s21  ;;  %s1025_s28 = scalar_lea.vmem %s1116_s1, %s887_s25 }
   0xf   : > { %326 = sbr.rel (%p753_p6) target bundleno = 23 (0x17), region = 40 }
  0x14   : > { %v969_v0 = vmov 0.0  }
  0x15   : > { %327 = vst [vmem:[#allocation2] sm:$0xff] %v969_v0 }
  0x16   : > { %328 = vst [vmem:[#allocation2 + $0x8] sm:$0xff] %v969_v0 }
  0x17 PF: > { %v812_v1 = vld [vmem:[%s1025_s28 + $0x70] sm:$0xf]  ;;  %v903_v2 = vld [vmem:[%s1025_s28 + $0x74] sm:$0xf0]  ;;  %v902_v6 = vld [vmem:[%s1025_s28 + $0x74] sm:$0xf] }
  0x18   : > { %v876_v3 = vld [vmem:[%s1025_s28 + $0xf0] sm:$0xf]  ;;  %v813_v4 = vor.u32 %v903_v2, %v812_v1  ;;  %v919_v5 = vld [vmem:[%s1025_s28 + $0xf4] sm:$0xf0]  ;;  %v814_v7 = vld [vmem:[%s1025_s28 + $0x78] sm:$0xf0] }
  0x19   : > { %v877_v8 = vor.u32 %v919_v5, %v876_v3  ;;  %v817_v9 = vor.u32 %v902_v6, %v814_v7  ;;  %v918_v10 = vld [vmem:[%s1025_s28 + $0xf4] sm:$0xf]  ;;  %v878_v11 = vld [vmem:[%s1025_s28 + $0xf8] sm:$0xf0]  ;;  %v804_v12 = vld [vmem:[%s1025_s28 + $0x60] sm:$0xf] }
  0x1a   : > { %531 = vmatpush.bf16.msra.mxu0 %v813_v4  ;;  %v881_v13 = vor.u32 %v918_v10, %v878_v11  ;;  %v901_v14 = vld [vmem:[%s1025_s28 + $0x64] sm:$0xf0]  ;;  %v868_v15 = vld [vmem:[%s1025_s28 + $0xe0] sm:$0xf]  ;;  %v900_v19 = vld [vmem:[%s1025_s28 + $0x64] sm:$0xf] }
  0x1b   : > { %v917_v16 = vld [vmem:[%s1025_s28 + $0xe4] sm:$0xf0]  ;;  %544 = vmatpush.bf16.msra.mxu1 %v877_v8  ;;  %557 = vmatpush.bf16.msra.mxu2 %v817_v9  ;;  %v805_v17 = vor.u32 %v901_v14, %v804_v12  ;;  %v806_v20 = vld [vmem:[%s1025_s28 + $0x68] sm:$0xf0]  ;;  %v916_v21 = vld [vmem:[%s1025_s28 + $0xe4] sm:$0xf] }
  0x1c   : > { %v869_v18 = vor.u32 %v917_v16, %v868_v15  ;;  %570 = vmatpush.bf16.msra.mxu3 %v881_v13  ;;  %v809_v22 = vor.u32 %v900_v19, %v806_v20  ;;  %v870_v23 = vld [vmem:[%s1025_s28 + $0xe8] sm:$0xf0]  ;;  %v796_v24 = vld [vmem:[%s1025_s28 + $0x50] sm:$0xf]  ;;  %v899_v25 = vld [vmem:[%s1025_s28 + $0x54] sm:$0xf0] }
  0x1d   : > { %v873_v26 = vor.u32 %v916_v21, %v870_v23  ;;  %v860_v27 = vld [vmem:[%s1025_s28 + $0xd0] sm:$0xf]  ;;  %v915_v28 = vld [vmem:[%s1025_s28 + $0xd4] sm:$0xf0]  ;;  %v898_v29 = vld [vmem:[%s1025_s28 + $0x54] sm:$0xf]  ;;  %v797_v30 = vor.u32 %v899_v25, %v796_v24 }
  0x1e   : > { %532 = vmatpush.bf16.msra.mxu0 %v805_v17  ;;  %v798_v31 = vld [vmem:[%s1025_s28 + $0x58] sm:$0xf0]  ;;  %v914_v32 = vld [vmem:[%s1025_s28 + $0xd4] sm:$0xf]  ;;  %v861_v34 = vor.u32 %v915_v28, %v860_v27  ;;  %v788_v36 = vld [vmem:[%s1025_s28 + $0x40] sm:$0xf] }
  0x1f   : > { %v862_v33 = vld [vmem:[%s1025_s28 + $0xd8] sm:$0xf0]  ;;  %545 = vmatpush.bf16.msra.mxu1 %v869_v18  ;;  %558 = vmatpush.bf16.msra.mxu2 %v809_v22  ;;  %v801_v35 = vor.u32 %v898_v29, %v798_v31  ;;  %v897_v37 = vld [vmem:[%s1025_s28 + $0x44] sm:$0xf0]  ;;  %v852_v38 = vld [vmem:[%s1025_s28 + $0xc0] sm:$0xf] }
  0x20   : > { %571 = vmatpush.bf16.msra.mxu3 %v873_v26  ;;  %v865_v39 = vor.u32 %v914_v32, %v862_v33  ;;  %v913_v40 = vld [vmem:[%s1025_s28 + $0xc4] sm:$0xf0]  ;;  %v896_v41 = vld [vmem:[%s1025_s28 + $0x44] sm:$0xf]  ;;  %v790_v42 = vld [vmem:[%s1025_s28 + $0x48] sm:$0xf0]  ;;  %v789_v45 = vor.u32 %v897_v37, %v788_v36 }
  0x21   : > { %v912_v43 = vld [vmem:[%s1025_s28 + $0xc4] sm:$0xf]  ;;  %v854_v44 = vld [vmem:[%s1025_s28 + $0xc8] sm:$0xf0]  ;;  %v853_v46 = vor.u32 %v913_v40, %v852_v38  ;;  %v793_v47 = vor.u32 %v896_v41, %v790_v42  ;;  %v780_v48 = vld [vmem:[%s1025_s28 + $0x30] sm:$0xf] }
  0x22   : > { %533 = vmatpush.bf16.msra.mxu0 %v797_v30  ;;  %v895_v49 = vld [vmem:[%s1025_s28 + $0x34] sm:$0xf0]  ;;  %v844_v50 = vld [vmem:[%s1025_s28 + $0xb0] sm:$0xf]  ;;  %v857_v51 = vor.u32 %v912_v43, %v854_v44  ;;  %v894_v53 = vld [vmem:[%s1025_s28 + $0x34] sm:$0xf] }
  0x23   : > { %546 = vmatpush.bf16.msra.mxu1 %v861_v34  ;;  %559 = vmatpush.bf16.msra.mxu2 %v801_v35  ;;  %v911_v52 = vld [vmem:[%s1025_s28 + $0xb4] sm:$0xf0]  ;;  %v782_v54 = vld [vmem:[%s1025_s28 + $0x38] sm:$0xf0]  ;;  %v910_v55 = vld [vmem:[%s1025_s28 + $0xb4] sm:$0xf]  ;;  %v781_v57 = vor.u32 %v895_v49, %v780_v48 }
  0x24   : > { %572 = vmatpush.bf16.msra.mxu3 %v865_v39  ;;  %v846_v56 = vld [vmem:[%s1025_s28 + $0xb8] sm:$0xf0]  ;;  %v845_v58 = vor.u32 %v911_v52, %v844_v50  ;;  %v785_v59 = vor.u32 %v894_v53, %v782_v54  ;;  %v772_v60 = vld [vmem:[%s1025_s28 + $0x20] sm:$0xf]  ;;  %v893_v61 = vld [vmem:[%s1025_s28 + $0x24] sm:$0xf0] }
  0x25   : > { %v836_v62 = vld [vmem:[%s1025_s28 + $0xa0] sm:$0xf]  ;;  %v849_v63 = vor.u32 %v910_v55, %v846_v56  ;;  %v909_v0 = vld [vmem:[%s1025_s28 + $0xa4] sm:$0xf0]  ;;  %v892_v1 = vld [vmem:[%s1025_s28 + $0x24] sm:$0xf]  ;;  %v773_v5 = vor.u32 %v893_v61, %v772_v60 }
  0x26   : > { %534 = vmatpush.bf16.msra.mxu0 %v789_v45  ;;  %v774_v2 = vld [vmem:[%s1025_s28 + $0x28] sm:$0xf0]  ;;  %v908_v3 = vld [vmem:[%s1025_s28 + $0xa4] sm:$0xf]  ;;  %v837_v6 = vor.u32 %v909_v0, %v836_v62  ;;  %v764_v8 = vld [vmem:[%s1025_s28 + $0x10] sm:$0xf] }
  0x27   : > { %547 = vmatpush.bf16.msra.mxu1 %v853_v46  ;;  %560 = vmatpush.bf16.msra.mxu2 %v793_v47  ;;  %v838_v4 = vld [vmem:[%s1025_s28 + $0xa8] sm:$0xf0]  ;;  %v777_v7 = vor.u32 %v892_v1, %v774_v2  ;;  %v891_v9 = vld [vmem:[%s1025_s28 + $0x14] sm:$0xf0]  ;;  %v828_v10 = vld [vmem:[%s1025_s28 + $0x90] sm:$0xf] }
  0x28   : > { %573 = vmatpush.bf16.msra.mxu3 %v857_v51  ;;  %v841_v11 = vor.u32 %v908_v3, %v838_v4  ;;  %v907_v12 = vld [vmem:[%s1025_s28 + $0x94] sm:$0xf0]  ;;  %v890_v13 = vld [vmem:[%s1025_s28 + $0x14] sm:$0xf]  ;;  %v766_v14 = vld [vmem:[%s1025_s28 + $0x18] sm:$0xf0]  ;;  %v765_v17 = vor.u32 %v891_v9, %v764_v8 }
  0x29   : > { %v906_v15 = vld [vmem:[%s1025_s28 + $0x94] sm:$0xf]  ;;  %v830_v16 = vld [vmem:[%s1025_s28 + $0x98] sm:$0xf0]  ;;  %v331_v18 = vld [vmem:[%s1020_s24] sm:$0xff]  ;;  %v829_v19 = vor.u32 %v907_v12, %v828_v10  ;;  %v769_v20 = vor.u32 %v890_v13, %v766_v14  ;;  %p882_p7 = scmp.ne.s32.totalorder %s959_s15, 8 }
  0x2a   : > { %535 = vmatpush.bf16.msra.mxu0 %v781_v57  ;;  %v756_v21 = vld [vmem:[%s1025_s28] sm:$0xf]  ;;  %v889_v22 = vld [vmem:[%s1025_s28 + $0x4] sm:$0xf0]  ;;  %v833_v24 = vor.u32 %v906_v15, %v830_v16  ;;  %v888_v26 = vld [vmem:[%s1025_s28 + $0x4] sm:$0xf]  ;;  %v365_v30 = vunpack.c.l.b16 %v331_v18  ;;  %v366_v32 = vunpack.c.h.b16 %v331_v18 }
  0x2b   : > { %548 = vmatpush.bf16.msra.mxu1 %v845_v58  ;;  %561 = vmatpush.bf16.msra.mxu2 %v785_v59  ;;  %v820_v23 = vld [vmem:[%s1025_s28 + $0x80] sm:$0xf]  ;;  %v905_v25 = vld [vmem:[%s1025_s28 + $0x84] sm:$0xf0]  ;;  %v758_v27 = vld [vmem:[%s1025_s28 + $0x8] sm:$0xf0]  ;;  %v757_v31 = vor.u32 %v889_v22, %v756_v21 }
  0x2c   : > { %574 = vmatpush.bf16.msra.mxu3 %v849_v63  ;;  %v904_v28 = vld [vmem:[%s1025_s28 + $0x84] sm:$0xf]  ;;  %v822_v29 = vld [vmem:[%s1025_s28 + $0x88] sm:$0xf0]  ;;  %v821_v33 = vor.u32 %v905_v25, %v820_v23  ;;  %v761_v34 = vor.u32 %v888_v26, %v758_v27  ;;  %v367_v36 = vpack.c.b16 %v365_v30, %v365_v30  ;;  %v368_v37 = vpack.c.b16 %v366_v32, %v366_v32 }
  0x2d   : > { %v825_v35 = vor.u32 %v904_v28, %v822_v29  ;;  %v329_v39 = vld [vmem:[#allocation2] sm:$0xff]  ;;  %v330_v44 = vld [vmem:[#allocation2 + $0x8] sm:$0xff] }
  0x2e   : > { %536 = vmatpush.bf16.msra.mxu0 %v773_v5 }
  0x2f   : > { %549 = vmatpush.bf16.msra.mxu1 %v837_v6  ;;  %562 = vmatpush.bf16.msra.mxu2 %v777_v7 }
  0x30   : > { %575 = vmatpush.bf16.msra.mxu3 %v841_v11 }
  0x32   : > { %537 = vmatpush.bf16.msra.mxu0 %v765_v17 }
  0x33   : > { %550 = vmatpush.bf16.msra.mxu1 %v829_v19  ;;  %563 = vmatpush.bf16.msra.mxu2 %v769_v20 }
  0x34   : > { %576 = vmatpush.bf16.msra.mxu3 %v833_v24 }
  0x36   : > { %538 = vmatpush.bf16.msra.mxu0 %v757_v31 }
  0x37   : > { %551 = vmatpush.bf16.msra.mxu1 %v821_v33  ;;  %564 = vmatpush.bf16.msra.mxu2 %v761_v34 }
  0x38   : > { %577 = vmatpush.bf16.msra.mxu3 %v825_v35 }
  0x39   : > { %539 = vmatmul.bf16.vlgmr.msra.gmra.mxu0 %v367_v36 }
  0x3a   : > { %552 = vmatmul.bf16.vlgmr.msra.gmra.mxu1 %v368_v37  ;;  %565 = vmatmul.bf16.vlgmr.msra.gmra.mxu2 %v367_v36 }
  0x3b   : > { %578 = vmatmul.bf16.vlgmr.msra.gmra.mxu3 %v368_v37 }
  0xb6   : > { %v540_v38 = vpop.f32.mrf.mxu0 }
  0xb7   : > { %v553_v40 = vpop.f32.mrf.mxu1 }
  0xb8   : > { %v554_v41 = vadd.f32 %v553_v40, %v540_v38 }
  0xba   : > { %v583_v42 = vadd.f32 %v554_v41, %v329_v39 }
  0xbc   : > { %585 = vst [vmem:[#allocation2] sm:$0xff] %v583_v42 }
  0xbd   : > { %v566_v43 = vpop.f32.mrf.mxu2 }
  0xbe   : > { %v579_v45 = vpop.f32.mrf.mxu3  ;;  %v542_v46 = vpop.f32.mrf.mxu0 }
  0xbf   : > { %v580_v47 = vadd.f32 %v579_v45, %v566_v43  ;;  %v555_v48 = vpop.f32.mrf.mxu1 }
  0xc1   : > { %v584_v49 = vadd.f32 %v580_v47, %v330_v44 }
  0xc2   : > { %590 = sbr.rel (%p882_p7) target bundleno = 211 (0xd3), region = 44 }
  0xc3   : > { %586 = vst [vmem:[#allocation2 + $0x8] sm:$0xff] %v584_v49 }
  0xc5   : > { %v568_v50 = vpop.f32.mrf.mxu2 }
  0xc6   : > { %v581_v51 = vpop.f32.mrf.mxu3 }
  0xc7   : > { %v591_v52 = vld [vmem:[#allocation2] sm:$0xff] }
  0xc8   : > { %v593_v53 = vld [vmem:[%s1117_s2] sm:$0x3] }
  0xc9   : > { %v601_v54 = vld [vmem:[%s1118_s3] sm:$0x3]  ;;  %v595_v55 = vperm.slane %v593_v53, 0  ;;  %v596_v58 = vperm.slane %v593_v53, 1 }
  0xca   : > { %v603_v56 = vperm.slane %v601_v54, 0  ;;  %v592_v57 = vld [vmem:[#allocation2 + $0x8] sm:$0xff]  ;;  %v604_v59 = vperm.slane %v601_v54, 1 }
  0xcb   : > { %v599_v60 = vmul.f32 %v595_v55, %v591_v52  ;;  %v600_v61 = vmul.f32 %v596_v58, %v592_v57 }
  0xcd   : > { %v607_v62 = vadd.f32 %v603_v56, %v599_v60  ;;  %v608_v63 = vadd.f32 %v604_v59, %v600_v61 }
  0xcf   : > { %v609_v0 = vmax.f32 %v607_v62, 0.0  ;;  %v610_v1 = vmax.f32 %v608_v63, 0.0 }
  0xd1   : > { %611 = vst [vmem:[%s1119_s4] sm:$0xff] %v609_v0 }
  0xd2   : > { %612 = vst [vmem:[%s1119_s4 + $0x8] sm:$0xff] %v610_v1 }
  0xd3 PF: > { %s14_s17 = sadd.s32 1, %s967_s17   ;;  %s1120_s15 = smov %s963_s16 }
  0xd4   : > { %p11_p8 = scmp.ge.s32.totalorder %s14_s17, 11   ;;  %s1121_s16 = smov %s1123_s18 }
  0xd6   :  { %13 = sbr.rel (!%p11_p8) target bundleno = 2 (0x2), region = 83 }

// kernel: single_baseline_forward.39
= control target key start
LH: loop header
LB: loop body
LE: loop exit
PB: predicated region body
PF: predicated region fallthrough
CT: control target
= control target key end

     0   :  { %s1212_s15 = smov 0   ;;  %s1214_s16 = smov 0   ;;  %s1468_s0 = inlined_call_operand.vmem [shape: bf16[8,2304], index: 0, kind: input, shape index: {}]   ;;  %s1469_s1 = inlined_call_operand.vmem [shape: bf16[2304,512], index: 1, kind: input, shape index: {}]   ;;  %s1470_s2 = inlined_call_operand.vmem [shape: f32[1,512], index: 2, kind: input, shape index: {}]   ;;  %s1471_s3 = inlined_call_operand.vmem [shape: f32[1,512], index: 3, kind: input, shape index: {}]   ;;  %s1472_s4 = inlined_call_operand.vmem [shape: f32[8,512], index: 4, kind: output, shape index: {}]  }
   0x1   :  { %s1216_s17 = smov 0   ;;  %s1218_s18 = smov 0  }
   0x2   :  { %s1220_s19 = smov 0   ;;  %s1222_s20 = smov 0  }
   0x3   :  { %s1224_s21 = smov 0  }
   0x4 LB: > { %s26_s22 = sadd.s32 1, %s1176_s19  ;;  %s29_s23 = sadd.s32 1, %s1180_s20  ;;  %s1184_s21 = sphi %s1224_s21, %s14_s21   ;;  %s1180_s20 = sphi %s1222_s20, %s1478_s20   ;;  %s1176_s19 = sphi %s1220_s19, %s1477_s19   ;;  %s1172_s18 = sphi %s1218_s18, %s1476_s18   ;;  %s1168_s17 = sphi %s1216_s17, %s1475_s17   ;;  %s1164_s16 = sphi %s1214_s16, %s1474_s16   ;;  %s1160_s15 = sphi %s1212_s15, %s1473_s15  }
   0x5   : > { %p27_p0 = scmp.ge.s32.totalorder %s26_s22, 9  ;;  %p77_p1 = scmp.ne.s32.totalorder %s1164_s16, %s1160_s15 }
   0x6   : > { %p78_p2 = scmp.eq.s32.totalorder %s1184_s21, 0  ;;  %s70_s27 = sadd.s32 1, %s1164_s16 }
   0x7   : > { %s1480_s22 = smov (%p27_p0, %s26_s22), 0  ;;  %s1482_s23 = smov (!%p27_p0, %s29_s23), %s1180_s20 }
   0x8   : > { %p79_p3 = por %p78_p2, %p77_p1  ;;  %p31_p4 = scmp.ge.s32.totalorder %s1482_s23, 2 }
   0x9   : > { %s65_s24 = ssub.s32 %s1176_s19, %s1480_s22  ;;  %p894_p6 = scmp.ge.s32.totalorder %s1184_s21, 18 }
   0xa   : > { %s1484_s23 = smov (%p31_p4, %s1482_s23), 0 }
   0xb   : > { %s66_s25 = ssub.s32 %s1180_s20, %s1484_s23  ;;  %183 = sbr.rel (%p894_p6) target bundleno = 55 (0x37), region = 16 }
   0xc   : > { %s67_s26 = sor.u32 %s66_s25, %s65_s24 }
   0xd   : > { %p68_p5 = scmp.eq.s32.totalorder %s67_s26, 0 }
   0xf   : > { %s1263_s28 = scalar_select %p68_p5, %s1164_s16, %s70_s27  }
  0x10   : > { %199 = sbr.rel (!%p79_p3) target bundleno = 55 (0x37), region = 24  ;;  %s201_s29 = sand.u32 (%p79_p3), 1, %s1164_s16  }
  0x11   : > { %s897_s30 = sshll.u32 (%p79_p3), %s1180_s20, 1  ;;  %s895_s5 = sshll.u32 (%p79_p3), %s201_s29, 8 }
  0x12   : > { %s1040_s6 = sshll.u32 (%p79_p3), %s1176_s19, 7  ;;  %s1277_s12 = scalar_lea.vmem (%p79_p3), [#allocation3], %s895_s5 }
  0x13   : > { %s207_s7 = sadd.s32 (%p79_p3), %s1040_s6, %s897_s30 }
  0x14   : > { %s899_s8 = sshll.u32 (%p79_p3), %s207_s7, 2 }
  0x15   : > { %s1272_s11 = scalar_lea.vmem %s1469_s1, %s899_s8 }
  0x16   : > { %v300_v0 = vld [vmem:[%s1272_s11] sm:$0xff]  ;;  %v302_v1 = vld [vmem:[%s1272_s11 + $0x10] sm:$0xff] }
  0x17   : > { %v304_v2 = vld [vmem:[%s1272_s11 + $0x20] sm:$0xff]  ;;  %301 = vst [vmem:[%s1277_s12] sm:$0xff] %v300_v0  ;;  %v306_v3 = vld [vmem:[%s1272_s11 + $0x30] sm:$0xff] }
  0x18   : > { %303 = vst [vmem:[%s1277_s12 + $0x8] sm:$0xff] %v302_v1  ;;  %v308_v4 = vld [vmem:[%s1272_s11 + $0x40] sm:$0xff]  ;;  %v310_v5 = vld [vmem:[%s1272_s11 + $0x50] sm:$0xff] }
  0x19   : > { %305 = vst [vmem:[%s1277_s12 + $0x10] sm:$0xff] %v304_v2  ;;  %v312_v6 = vld [vmem:[%s1272_s11 + $0x60] sm:$0xff]  ;;  %v314_v7 = vld [vmem:[%s1272_s11 + $0x70] sm:$0xff] }
  0x1a   : > { %307 = vst [vmem:[%s1277_s12 + $0x18] sm:$0xff] %v306_v3  ;;  %v316_v8 = vld [vmem:[%s1272_s11 + $0x80] sm:$0xff]  ;;  %v318_v9 = vld [vmem:[%s1272_s11 + $0x90] sm:$0xff] }
  0x1b   : > { %309 = vst [vmem:[%s1277_s12 + $0x20] sm:$0xff] %v308_v4  ;;  %v320_v10 = vld [vmem:[%s1272_s11 + $0xa0] sm:$0xff]  ;;  %v322_v11 = vld [vmem:[%s1272_s11 + $0xb0] sm:$0xff] }
  0x1c   : > { %311 = vst [vmem:[%s1277_s12 + $0x28] sm:$0xff] %v310_v5  ;;  %v324_v12 = vld [vmem:[%s1272_s11 + $0xc0] sm:$0xff]  ;;  %v326_v13 = vld [vmem:[%s1272_s11 + $0xd0] sm:$0xff] }
  0x1d   : > { %313 = vst [vmem:[%s1277_s12 + $0x30] sm:$0xff] %v312_v6  ;;  %v328_v14 = vld [vmem:[%s1272_s11 + $0xe0] sm:$0xff]  ;;  %v330_v15 = vld [vmem:[%s1272_s11 + $0xf0] sm:$0xff] }
  0x1e   : > { %315 = vst [vmem:[%s1277_s12 + $0x38] sm:$0xff] %v314_v7  ;;  %v332_v16 = vld [vmem:[%s1272_s11 + $0x100] sm:$0xff]  ;;  %v334_v17 = vld [vmem:[%s1272_s11 + $0x110] sm:$0xff] }
  0x1f   : > { %317 = vst [vmem:[%s1277_s12 + $0x40] sm:$0xff] %v316_v8  ;;  %v336_v18 = vld [vmem:[%s1272_s11 + $0x120] sm:$0xff]  ;;  %v338_v19 = vld [vmem:[%s1272_s11 + $0x130] sm:$0xff] }
  0x20   : > { %319 = vst [vmem:[%s1277_s12 + $0x48] sm:$0xff] %v318_v9  ;;  %v340_v20 = vld [vmem:[%s1272_s11 + $0x140] sm:$0xff]  ;;  %v342_v21 = vld [vmem:[%s1272_s11 + $0x150] sm:$0xff] }
  0x21   : > { %321 = vst [vmem:[%s1277_s12 + $0x50] sm:$0xff] %v320_v10  ;;  %v344_v22 = vld [vmem:[%s1272_s11 + $0x160] sm:$0xff]  ;;  %v346_v23 = vld [vmem:[%s1272_s11 + $0x170] sm:$0xff] }
  0x22   : > { %323 = vst [vmem:[%s1277_s12 + $0x58] sm:$0xff] %v322_v11  ;;  %v348_v24 = vld [vmem:[%s1272_s11 + $0x180] sm:$0xff]  ;;  %v350_v25 = vld [vmem:[%s1272_s11 + $0x190] sm:$0xff] }
  0x23   : > { %325 = vst [vmem:[%s1277_s12 + $0x60] sm:$0xff] %v324_v12  ;;  %v352_v26 = vld [vmem:[%s1272_s11 + $0x1a0] sm:$0xff]  ;;  %v354_v27 = vld [vmem:[%s1272_s11 + $0x1b0] sm:$0xff] }
  0x24   : > { %327 = vst [vmem:[%s1277_s12 + $0x68] sm:$0xff] %v326_v13  ;;  %v356_v28 = vld [vmem:[%s1272_s11 + $0x1c0] sm:$0xff]  ;;  %v358_v29 = vld [vmem:[%s1272_s11 + $0x1d0] sm:$0xff] }
  0x25   : > { %329 = vst [vmem:[%s1277_s12 + $0x70] sm:$0xff] %v328_v14  ;;  %v360_v30 = vld [vmem:[%s1272_s11 + $0x1e0] sm:$0xff]  ;;  %v362_v31 = vld [vmem:[%s1272_s11 + $0x1f0] sm:$0xff] }
  0x26   : > { %331 = vst [vmem:[%s1277_s12 + $0x78] sm:$0xff] %v330_v15 }
  0x27   : > { %333 = vst [vmem:[%s1277_s12 + $0x80] sm:$0xff] %v332_v16 }
  0x28   : > { %335 = vst [vmem:[%s1277_s12 + $0x88] sm:$0xff] %v334_v17 }
  0x29   : > { %337 = vst [vmem:[%s1277_s12 + $0x90] sm:$0xff] %v336_v18 }
  0x2a   : > { %339 = vst [vmem:[%s1277_s12 + $0x98] sm:$0xff] %v338_v19 }
  0x2b   : > { %341 = vst [vmem:[%s1277_s12 + $0xa0] sm:$0xff] %v340_v20 }
  0x2c   : > { %343 = vst [vmem:[%s1277_s12 + $0xa8] sm:$0xff] %v342_v21 }
  0x2d   : > { %345 = vst [vmem:[%s1277_s12 + $0xb0] sm:$0xff] %v344_v22 }
  0x2e   : > { %347 = vst [vmem:[%s1277_s12 + $0xb8] sm:$0xff] %v346_v23 }
  0x2f   : > { %349 = vst [vmem:[%s1277_s12 + $0xc0] sm:$0xff] %v348_v24 }
  0x30   : > { %351 = vst [vmem:[%s1277_s12 + $0xc8] sm:$0xff] %v350_v25 }
  0x31   : > { %353 = vst [vmem:[%s1277_s12 + $0xd0] sm:$0xff] %v352_v26 }
  0x32   : > { %355 = vst [vmem:[%s1277_s12 + $0xd8] sm:$0xff] %v354_v27 }
  0x33   : > { %357 = vst [vmem:[%s1277_s12 + $0xe0] sm:$0xff] %v356_v28 }
  0x34   : > { %359 = vst [vmem:[%s1277_s12 + $0xe8] sm:$0xff] %v358_v29 }
  0x35   : > { %361 = vst [vmem:[%s1277_s12 + $0xf0] sm:$0xff] %v360_v30 }
  0x36   : > { %363 = vst [vmem:[%s1277_s12 + $0xf8] sm:$0xff] %v362_v31 }
  0x37 PF: > { %p900_p7 = scmp.ge.s32.totalorder %s1184_s21, 1  ;;  %p384_p8 = scmp.lt.s32.totalorder %s1184_s21, 19 }
  0x39   : > { %p385_p9 = pnand %p900_p7, %p384_p8 }
  0x3a   : > { %s391_s13 = sand.u32 (!%p385_p9), 1, %s1160_s15   ;;  %s902_s14 = sshll.u32 (!%p385_p9), %s1168_s17, 1 }
  0x3b   : > { %388 = sbr.rel (%p385_p9) target bundleno = 263 (0x107), region = 70  ;;  %s901_s24 = sshll.u32 (!%p385_p9), %s391_s13, 8 }
  0x3c   : > { %p440_p10 = scmp.lt.s32.totalorder (!%p385_p9), %s902_s14, 17  ;;  %s904_s25 = sshll.u32 (!%p385_p9), %s1172_s18, 1 }
  0x3d   : > { %p450_p11 = scmp.lt.s32.totalorder (!%p385_p9), %s904_s25, 3  ;;  %s1366_s13 = scalar_lea.vmem (!%p385_p9), [#allocation3], %s901_s24 }
  0x3e   : > { %p908_p12 = scmp.ne.s32.totalorder (!%p385_p9), %s1168_s17, 0 }
  0x40   : > { %s1486_s14 = smov (!%p440_p10, %s902_s14), 17  ;;  %s1488_s25 = smov (!%p450_p11, %s904_s25), 3 }
  0x41   : > { %s903_s26 = sshll.u32 %s1486_s14, 2  ;;  %s452_s15 = scalar_lea.vmem %s1470_s2, %s1488_s25 }
  0x42   : > { %s1348_s30 = scalar_lea.vmem %s1468_s0, %s903_s26  ;;  %s457_s18 = scalar_lea.vmem %s1471_s3, %s1488_s25 }
  0x43   : > { %s907_s9 = sshll.u32 %s1488_s25, 3  ;;  %472 = sbr.rel (%p908_p12) target bundleno = 75 (0x4b), region = 78 }
  0x44   : > { %s1364_s12 = scalar_lea.vmem %s1472_s4, %s907_s9 }
  0x48   : > { %v1186_v32 = vmov 0.0  }
  0x49   : > { %473 = vst [vmem:[#allocation2] sm:$0xff] %v1186_v32 }
  0x4a   : > { %474 = vst [vmem:[#allocation2 + $0x8] sm:$0xff] %v1186_v32 }
  0x4b PF: > { %v967_v33 = vld [vmem:[%s1366_s13 + $0x70] sm:$0xf]  ;;  %v1056_v34 = vld [vmem:[%s1366_s13 + $0x74] sm:$0xf0]  ;;  %v1055_v38 = vld [vmem:[%s1366_s13 + $0x74] sm:$0xf] }
  0x4c   : > { %v1031_v35 = vld [vmem:[%s1366_s13 + $0xf0] sm:$0xf]  ;;  %v968_v36 = vor.u32 %v1056_v34, %v967_v33  ;;  %v1072_v37 = vld [vmem:[%s1366_s13 + $0xf4] sm:$0xf0]  ;;  %v969_v39 = vld [vmem:[%s1366_s13 + $0x78] sm:$0xf0] }
  0x4d   : > { %v1032_v40 = vor.u32 %v1072_v37, %v1031_v35  ;;  %v972_v41 = vor.u32 %v1055_v38, %v969_v39  ;;  %v1071_v42 = vld [vmem:[%s1366_s13 + $0xf4] sm:$0xf]  ;;  %v1033_v43 = vld [vmem:[%s1366_s13 + $0xf8] sm:$0xf0]  ;;  %v959_v44 = vld [vmem:[%s1366_s13 + $0x60] sm:$0xf] }
  0x4e   : > { %677 = vmatpush.bf16.msra.mxu0 %v968_v36  ;;  %v1036_v45 = vor.u32 %v1071_v42, %v1033_v43  ;;  %v1054_v46 = vld [vmem:[%s1366_s13 + $0x64] sm:$0xf0]  ;;  %v1023_v47 = vld [vmem:[%s1366_s13 + $0xe0] sm:$0xf]  ;;  %v1053_v51 = vld [vmem:[%s1366_s13 + $0x64] sm:$0xf] }
  0x4f   : > { %v1070_v48 = vld [vmem:[%s1366_s13 + $0xe4] sm:$0xf0]  ;;  %690 = vmatpush.bf16.msra.mxu1 %v1032_v40  ;;  %703 = vmatpush.bf16.msra.mxu2 %v972_v41  ;;  %v960_v49 = vor.u32 %v1054_v46, %v959_v44  ;;  %v961_v52 = vld [vmem:[%s1366_s13 + $0x68] sm:$0xf0]  ;;  %v1069_v53 = vld [vmem:[%s1366_s13 + $0xe4] sm:$0xf] }
  0x50   : > { %v1024_v50 = vor.u32 %v1070_v48, %v1023_v47  ;;  %716 = vmatpush.bf16.msra.mxu3 %v1036_v45  ;;  %v964_v54 = vor.u32 %v1053_v51, %v961_v52  ;;  %v1025_v55 = vld [vmem:[%s1366_s13 + $0xe8] sm:$0xf0]  ;;  %v951_v56 = vld [vmem:[%s1366_s13 + $0x50] sm:$0xf]  ;;  %v1052_v57 = vld [vmem:[%s1366_s13 + $0x54] sm:$0xf0] }
  0x51   : > { %v1028_v58 = vor.u32 %v1069_v53, %v1025_v55  ;;  %v1015_v59 = vld [vmem:[%s1366_s13 + $0xd0] sm:$0xf]  ;;  %v1068_v60 = vld [vmem:[%s1366_s13 + $0xd4] sm:$0xf0]  ;;  %v1051_v61 = vld [vmem:[%s1366_s13 + $0x54] sm:$0xf]  ;;  %v952_v62 = vor.u32 %v1052_v57, %v951_v56 }
  0x52   : > { %678 = vmatpush.bf16.msra.mxu0 %v960_v49  ;;  %v953_v63 = vld [vmem:[%s1366_s13 + $0x58] sm:$0xf0]  ;;  %v1067_v0 = vld [vmem:[%s1366_s13 + $0xd4] sm:$0xf]  ;;  %v1016_v2 = vor.u32 %v1068_v60, %v1015_v59  ;;  %v943_v4 = vld [vmem:[%s1366_s13 + $0x40] sm:$0xf] }
  0x53   : > { %v1017_v1 = vld [vmem:[%s1366_s13 + $0xd8] sm:$0xf0]  ;;  %691 = vmatpush.bf16.msra.mxu1 %v1024_v50  ;;  %704 = vmatpush.bf16.msra.mxu2 %v964_v54  ;;  %v956_v3 = vor.u32 %v1051_v61, %v953_v63  ;;  %v1050_v5 = vld [vmem:[%s1366_s13 + $0x44] sm:$0xf0]  ;;  %v1007_v6 = vld [vmem:[%s1366_s13 + $0xc0] sm:$0xf] }
  0x54   : > { %717 = vmatpush.bf16.msra.mxu3 %v1028_v58  ;;  %v1020_v7 = vor.u32 %v1067_v0, %v1017_v1  ;;  %v1066_v8 = vld [vmem:[%s1366_s13 + $0xc4] sm:$0xf0]  ;;  %v1049_v9 = vld [vmem:[%s1366_s13 + $0x44] sm:$0xf]  ;;  %v945_v10 = vld [vmem:[%s1366_s13 + $0x48] sm:$0xf0]  ;;  %v944_v13 = vor.u32 %v1050_v5, %v943_v4 }
  0x55   : > { %v1065_v11 = vld [vmem:[%s1366_s13 + $0xc4] sm:$0xf]  ;;  %v1009_v12 = vld [vmem:[%s1366_s13 + $0xc8] sm:$0xf0]  ;;  %v1008_v14 = vor.u32 %v1066_v8, %v1007_v6  ;;  %v948_v15 = vor.u32 %v1049_v9, %v945_v10  ;;  %v935_v16 = vld [vmem:[%s1366_s13 + $0x30] sm:$0xf] }
  0x56   : > { %679 = vmatpush.bf16.msra.mxu0 %v952_v62  ;;  %v1048_v17 = vld [vmem:[%s1366_s13 + $0x34] sm:$0xf0]  ;;  %v999_v18 = vld [vmem:[%s1366_s13 + $0xb0] sm:$0xf]  ;;  %v1012_v19 = vor.u32 %v1065_v11, %v1009_v12  ;;  %v1047_v21 = vld [vmem:[%s1366_s13 + $0x34] sm:$0xf] }
  0x57   : > { %692 = vmatpush.bf16.msra.mxu1 %v1016_v2  ;;  %705 = vmatpush.bf16.msra.mxu2 %v956_v3  ;;  %v1064_v20 = vld [vmem:[%s1366_s13 + $0xb4] sm:$0xf0]  ;;  %v937_v22 = vld [vmem:[%s1366_s13 + $0x38] sm:$0xf0]  ;;  %v1063_v23 = vld [vmem:[%s1366_s13 + $0xb4] sm:$0xf]  ;;  %v936_v25 = vor.u32 %v1048_v17, %v935_v16 }
  0x58   : > { %718 = vmatpush.bf16.msra.mxu3 %v1020_v7  ;;  %v1001_v24 = vld [vmem:[%s1366_s13 + $0xb8] sm:$0xf0]  ;;  %v1000_v26 = vor.u32 %v1064_v20, %v999_v18  ;;  %v940_v27 = vor.u32 %v1047_v21, %v937_v22  ;;  %v927_v28 = vld [vmem:[%s1366_s13 + $0x20] sm:$0xf]  ;;  %v1046_v29 = vld [vmem:[%s1366_s13 + $0x24] sm:$0xf0] }
  0x59   : > { %v991_v30 = vld [vmem:[%s1366_s13 + $0xa0] sm:$0xf]  ;;  %v1004_v31 = vor.u32 %v1063_v23, %v1001_v24  ;;  %v1062_v32 = vld [vmem:[%s1366_s13 + $0xa4] sm:$0xf0]  ;;  %v1045_v33 = vld [vmem:[%s1366_s13 + $0x24] sm:$0xf]  ;;  %v928_v37 = vor.u32 %v1046_v29, %v927_v28 }
  0x5a   : > { %680 = vmatpush.bf16.msra.mxu0 %v944_v13  ;;  %v929_v34 = vld [vmem:[%s1366_s13 + $0x28] sm:$0xf0]  ;;  %v1061_v35 = vld [vmem:[%s1366_s13 + $0xa4] sm:$0xf]  ;;  %v992_v38 = vor.u32 %v1062_v32, %v991_v30  ;;  %v919_v40 = vld [vmem:[%s1366_s13 + $0x10] sm:$0xf] }
  0x5b   : > { %693 = vmatpush.bf16.msra.mxu1 %v1008_v14  ;;  %706 = vmatpush.bf16.msra.mxu2 %v948_v15  ;;  %v993_v36 = vld [vmem:[%s1366_s13 + $0xa8] sm:$0xf0]  ;;  %v932_v39 = vor.u32 %v1045_v33, %v929_v34  ;;  %v1044_v41 = vld [vmem:[%s1366_s13 + $0x14] sm:$0xf0]  ;;  %v983_v42 = vld [vmem:[%s1366_s13 + $0x90] sm:$0xf] }
  0x5c   : > { %719 = vmatpush.bf16.msra.mxu3 %v1012_v19  ;;  %v996_v43 = vor.u32 %v1061_v35, %v993_v36  ;;  %v1060_v44 = vld [vmem:[%s1366_s13 + $0x94] sm:$0xf0]  ;;  %v1043_v45 = vld [vmem:[%s1366_s13 + $0x14] sm:$0xf]  ;;  %v921_v46 = vld [vmem:[%s1366_s13 + $0x18] sm:$0xf0]  ;;  %v920_v49 = vor.u32 %v1044_v41, %v919_v40 }
  0x5d   : > { %v1059_v47 = vld [vmem:[%s1366_s13 + $0x94] sm:$0xf]  ;;  %v985_v48 = vld [vmem:[%s1366_s13 + $0x98] sm:$0xf0]  ;;  %v984_v51 = vor.u32 %v1060_v44, %v983_v42  ;;  %v924_v52 = vor.u32 %v1043_v45, %v921_v46  ;;  %v911_v53 = vld [vmem:[%s1366_s13] sm:$0xf] }
  0x5e   : > { %681 = vmatpush.bf16.msra.mxu0 %v936_v25  ;;  %v477_v50 = vld [vmem:[%s1348_s30] sm:$0xff]  ;;  %v1042_v54 = vld [vmem:[%s1366_s13 + $0x4] sm:$0xf0]  ;;  %v975_v55 = vld [vmem:[%s1366_s13 + $0x80] sm:$0xf]  ;;  %v988_v56 = vor.u32 %v1059_v47, %v985_v48  ;;  %p1037_p13 = scmp.ne.s32.totalorder %s1168_s17, 8 }
  0x5f   : > { %694 = vmatpush.bf16.msra.mxu1 %v1000_v26  ;;  %707 = vmatpush.bf16.msra.mxu2 %v940_v27  ;;  %v1058_v57 = vld [vmem:[%s1366_s13 + $0x84] sm:$0xf0]  ;;  %v1041_v58 = vld [vmem:[%s1366_s13 + $0x4] sm:$0xf]  ;;  %v913_v59 = vld [vmem:[%s1366_s13 + $0x8] sm:$0xf0]  ;;  %v511_v62 = vunpack.c.l.b16 %v477_v50  ;;  %v912_v63 = vor.u32 %v1042_v54, %v911_v53  ;;  %v512_v0 = vunpack.c.h.b16 %v477_v50 }
  0x60   : > { %720 = vmatpush.bf16.msra.mxu3 %v1004_v31  ;;  %v1057_v60 = vld [vmem:[%s1366_s13 + $0x84] sm:$0xf]  ;;  %v977_v61 = vld [vmem:[%s1366_s13 + $0x88] sm:$0xf0]  ;;  %v976_v1 = vor.u32 %v1058_v57, %v975_v55  ;;  %v916_v2 = vor.u32 %v1041_v58, %v913_v59  ;;  %v475_v7 = vld [vmem:[#allocation2] sm:$0xff] }
  0x61   : > { %v980_v3 = vor.u32 %v1057_v60, %v977_v61  ;;  %v513_v4 = vpack.c.b16 %v511_v62, %v511_v62  ;;  %v514_v5 = vpack.c.b16 %v512_v0, %v512_v0  ;;  %v476_v12 = vld [vmem:[#allocation2 + $0x8] sm:$0xff] }
  0x62   : > { %682 = vmatpush.bf16.msra.mxu0 %v928_v37 }
  0x63   : > { %695 = vmatpush.bf16.msra.mxu1 %v992_v38  ;;  %708 = vmatpush.bf16.msra.mxu2 %v932_v39 }
  0x64   : > { %721 = vmatpush.bf16.msra.mxu3 %v996_v43 }
  0x66   : > { %683 = vmatpush.bf16.msra.mxu0 %v920_v49 }
  0x67   : > { %696 = vmatpush.bf16.msra.mxu1 %v984_v51  ;;  %709 = vmatpush.bf16.msra.mxu2 %v924_v52 }
  0x68   : > { %722 = vmatpush.bf16.msra.mxu3 %v988_v56 }
  0x6a   : > { %684 = vmatpush.bf16.msra.mxu0 %v912_v63 }
  0x6b   : > { %697 = vmatpush.bf16.msra.mxu1 %v976_v1  ;;  %710 = vmatpush.bf16.msra.mxu2 %v916_v2 }
  0x6c   : > { %723 = vmatpush.bf16.msra.mxu3 %v980_v3 }
  0x6d   : > { %685 = vmatmul.bf16.vlgmr.msra.gmra.mxu0 %v513_v4 }
  0x6e   : > { %698 = vmatmul.bf16.vlgmr.msra.gmra.mxu1 %v514_v5  ;;  %711 = vmatmul.bf16.vlgmr.msra.gmra.mxu2 %v513_v4 }
  0x6f   : > { %724 = vmatmul.bf16.vlgmr.msra.gmra.mxu3 %v514_v5 }
  0xea   : > { %v686_v6 = vpop.f32.mrf.mxu0 }
  0xeb   : > { %v699_v8 = vpop.f32.mrf.mxu1 }
  0xec   : > { %v700_v9 = vadd.f32 %v699_v8, %v686_v6 }
  0xee   : > { %v729_v10 = vadd.f32 %v700_v9, %v475_v7 }
  0xf0   : > { %731 = vst [vmem:[#allocation2] sm:$0xff] %v729_v10 }
  0xf1   : > { %v712_v11 = vpop.f32.mrf.mxu2 }
  0xf2   : > { %v725_v13 = vpop.f32.mrf.mxu3  ;;  %v688_v14 = vpop.f32.mrf.mxu0 }
  0xf3   : > { %v726_v15 = vadd.f32 %v725_v13, %v712_v11  ;;  %v701_v16 = vpop.f32.mrf.mxu1 }
  0xf5   : > { %v730_v17 = vadd.f32 %v726_v15, %v476_v12 }
  0xf6   : > { %736 = sbr.rel (%p1037_p13) target bundleno = 263 (0x107), region = 82 }
  0xf7   : > { %732 = vst [vmem:[#allocation2 + $0x8] sm:$0xff] %v730_v17 }
  0xf9   : > { %v714_v18 = vpop.f32.mrf.mxu2 }
  0xfa   : > { %v727_v19 = vpop.f32.mrf.mxu3 }
  0xfb   : > { %v737_v20 = vld [vmem:[#allocation2] sm:$0xff] }
  0xfc   : > { %v739_v21 = vld [vmem:[%s452_s15] sm:$0x3] }
  0xfd   : > { %v747_v22 = vld [vmem:[%s457_s18] sm:$0x3]  ;;  %v741_v23 = vperm.slane %v739_v21, 0  ;;  %v742_v26 = vperm.slane %v739_v21, 1 }
  0xfe   : > { %v749_v24 = vperm.slane %v747_v22, 0  ;;  %v738_v25 = vld [vmem:[#allocation2 + $0x8] sm:$0xff]  ;;  %v750_v27 = vperm.slane %v747_v22, 1 }
  0xff   : > { %v745_v28 = vmul.f32 %v741_v23, %v737_v20  ;;  %v746_v29 = vmul.f32 %v742_v26, %v738_v25 }
 0x101   : > { %v753_v30 = vadd.f32 %v749_v24, %v745_v28  ;;  %v754_v31 = vadd.f32 %v750_v27, %v746_v29 }
 0x103   : > { %v755_v32 = vmax.f32 %v753_v30, 0.0  ;;  %v756_v33 = vmax.f32 %v754_v31, 0.0 }
 0x105   : > { %757 = vst [vmem:[%s1364_s12] sm:$0xff] %v755_v32 }
 0x106   : > { %758 = vst [vmem:[%s1364_s12 + $0x8] sm:$0xff] %v756_v33 }
 0x107 PF: > { %s14_s21 = sadd.s32 1, %s1184_s21   ;;  %s1473_s15 = smov %s1164_s16 }
 0x108   : > { %p11_p0 = scmp.ge.s32.totalorder %s14_s21, 20   ;;  %s1474_s16 = smov %s1263_s28 }
 0x109   : > { %s1475_s17 = smov %s1176_s19  ;;  %s1476_s18 = smov %s1180_s20 }
 0x10a   : > { %s1477_s19 = smov %s1480_s22  ;;  %s1478_s20 = smov %s1484_s23 }
 0x10b   :  { %13 = sbr.rel (!%p11_p0) target bundleno = 4 (0x4), region = 126 }

// kernel: single_baseline_forward.38
= control target key start
LH: loop header
LB: loop body
LE: loop exit
PB: predicated region body
PF: predicated region fallthrough
CT: control target
= control target key end

     0   :  { %s1170_s15 = smov 0   ;;  %s1172_s16 = smov 0   ;;  %s1378_s0 = inlined_call_operand.vmem [shape: bf16[8,256], index: 0, kind: input, shape index: {}]   ;;  %s1379_s1 = inlined_call_operand.vmem [shape: bf16[256,512], index: 1, kind: input, shape index: {}]   ;;  %s1380_s2 = inlined_call_operand.vmem [shape: f32[1,512], index: 2, kind: input, shape index: {}]   ;;  %s1381_s3 = inlined_call_operand.vmem [shape: f32[1,512], index: 3, kind: input, shape index: {}]   ;;  %s1382_s4 = inlined_call_operand.vmem [shape: f32[8,512], index: 4, kind: output, shape index: {}]  }
   0x1   :  { %s1174_s17 = smov 0   ;;  %s1176_s18 = smov 0  }
   0x2   :  { %s1178_s19 = smov 0  }
   0x3 LB: > { %s29_s20 = sadd.s32 1, %s1139_s18  ;;  %p77_p1 = scmp.ne.s32.totalorder %s1131_s16, %s1127_s15  ;;  %s1143_s19 = sphi %s1178_s19, %s14_s19   ;;  %s1139_s18 = sphi %s1176_s18, %s1386_s18   ;;  %s1135_s17 = sphi %s1174_s17, %s1385_s17   ;;  %s1131_s16 = sphi %s1172_s16, %s1384_s16   ;;  %s1127_s15 = sphi %s1170_s15, %s1383_s15  }
   0x4   : > { %p31_p0 = scmp.ge.s32.totalorder %s29_s20, 2  ;;  %p78_p2 = scmp.eq.s32.totalorder %s1143_s19, 0 }
   0x5   : > { %s70_s22 = sadd.s32 1, %s1131_s16  ;;  %p892_p5 = scmp.ge.s32.totalorder %s1143_s19, 2 }
   0x6   : > { %s1388_s20 = smov (%p31_p0, %s29_s20), 0  ;;  %p79_p3 = por %p78_p2, %p77_p1 }
   0x7   : > { %s66_s21 = ssub.s32 %s1139_s18, %s1388_s20  ;;  %196 = sbr.rel (%p892_p5) target bundleno = 48 (0x30), region = 20 }
   0x8   : > { %p68_p4 = scmp.eq.s32.totalorder %s66_s21, 0 }
   0xa   : > { %s1205_s23 = scalar_select %p68_p4, %s1131_s16, %s70_s22  }
   0xc   : > { %199 = sbr.rel (!%p79_p3) target bundleno = 48 (0x30), region = 24  ;;  %s201_s24 = sand.u32 (%p79_p3), 1, %s1131_s16  }
   0xd   : > { %s1032_s25 = sshll.u32 (%p79_p3), %s1139_s18, 3  ;;  %s893_s26 = sshll.u32 (%p79_p3), %s201_s24, 8 }
   0xe   : > { %s1213_s29 = scalar_lea.vmem (%p79_p3), %s1379_s1, %s1032_s25  ;;  %s1218_s30 = scalar_lea.vmem (%p79_p3), [#allocation3], %s893_s26 }
   0xf   : > { %v300_v0 = vld [vmem:[%s1213_s29] sm:$0xff] (%p79_p3)  ;;  %v302_v1 = vld [vmem:[%s1213_s29 + $0x10] sm:$0xff] (%p79_p3) }
  0x10   : > { %v304_v2 = vld [vmem:[%s1213_s29 + $0x20] sm:$0xff] (%p79_p3)  ;;  %301 = vst [vmem:[%s1218_s30] sm:$0xff] (%p79_p3), %v300_v0  ;;  %v306_v3 = vld [vmem:[%s1213_s29 + $0x30] sm:$0xff] (%p79_p3) }
  0x11   : > { %303 = vst [vmem:[%s1218_s30 + $0x8] sm:$0xff] %v302_v1  ;;  %v308_v4 = vld [vmem:[%s1213_s29 + $0x40] sm:$0xff]  ;;  %v310_v5 = vld [vmem:[%s1213_s29 + $0x50] sm:$0xff] }
  0x12   : > { %305 = vst [vmem:[%s1218_s30 + $0x10] sm:$0xff] %v304_v2  ;;  %v312_v6 = vld [vmem:[%s1213_s29 + $0x60] sm:$0xff]  ;;  %v314_v7 = vld [vmem:[%s1213_s29 + $0x70] sm:$0xff] }
  0x13   : > { %307 = vst [vmem:[%s1218_s30 + $0x18] sm:$0xff] %v306_v3  ;;  %v316_v8 = vld [vmem:[%s1213_s29 + $0x80] sm:$0xff]  ;;  %v318_v9 = vld [vmem:[%s1213_s29 + $0x90] sm:$0xff] }
  0x14   : > { %309 = vst [vmem:[%s1218_s30 + $0x20] sm:$0xff] %v308_v4  ;;  %v320_v10 = vld [vmem:[%s1213_s29 + $0xa0] sm:$0xff]  ;;  %v322_v11 = vld [vmem:[%s1213_s29 + $0xb0] sm:$0xff] }
  0x15   : > { %311 = vst [vmem:[%s1218_s30 + $0x28] sm:$0xff] %v310_v5  ;;  %v324_v12 = vld [vmem:[%s1213_s29 + $0xc0] sm:$0xff]  ;;  %v326_v13 = vld [vmem:[%s1213_s29 + $0xd0] sm:$0xff] }
  0x16   : > { %313 = vst [vmem:[%s1218_s30 + $0x30] sm:$0xff] %v312_v6  ;;  %v328_v14 = vld [vmem:[%s1213_s29 + $0xe0] sm:$0xff]  ;;  %v330_v15 = vld [vmem:[%s1213_s29 + $0xf0] sm:$0xff] }
  0x17   : > { %315 = vst [vmem:[%s1218_s30 + $0x38] sm:$0xff] %v314_v7  ;;  %v332_v16 = vld [vmem:[%s1213_s29 + $0x100] sm:$0xff]  ;;  %v334_v17 = vld [vmem:[%s1213_s29 + $0x110] sm:$0xff] }
  0x18   : > { %317 = vst [vmem:[%s1218_s30 + $0x40] sm:$0xff] %v316_v8  ;;  %v336_v18 = vld [vmem:[%s1213_s29 + $0x120] sm:$0xff]  ;;  %v338_v19 = vld [vmem:[%s1213_s29 + $0x130] sm:$0xff] }
  0x19   : > { %319 = vst [vmem:[%s1218_s30 + $0x48] sm:$0xff] %v318_v9  ;;  %v340_v20 = vld [vmem:[%s1213_s29 + $0x140] sm:$0xff]  ;;  %v342_v21 = vld [vmem:[%s1213_s29 + $0x150] sm:$0xff] }
  0x1a   : > { %321 = vst [vmem:[%s1218_s30 + $0x50] sm:$0xff] %v320_v10  ;;  %v344_v22 = vld [vmem:[%s1213_s29 + $0x160] sm:$0xff]  ;;  %v346_v23 = vld [vmem:[%s1213_s29 + $0x170] sm:$0xff] }
  0x1b   : > { %323 = vst [vmem:[%s1218_s30 + $0x58] sm:$0xff] %v322_v11  ;;  %v348_v24 = vld [vmem:[%s1213_s29 + $0x180] sm:$0xff]  ;;  %v350_v25 = vld [vmem:[%s1213_s29 + $0x190] sm:$0xff] }
  0x1c   : > { %325 = vst [vmem:[%s1218_s30 + $0x60] sm:$0xff] %v324_v12  ;;  %v352_v26 = vld [vmem:[%s1213_s29 + $0x1a0] sm:$0xff]  ;;  %v354_v27 = vld [vmem:[%s1213_s29 + $0x1b0] sm:$0xff] }
  0x1d   : > { %327 = vst [vmem:[%s1218_s30 + $0x68] sm:$0xff] %v326_v13  ;;  %v356_v28 = vld [vmem:[%s1213_s29 + $0x1c0] sm:$0xff]  ;;  %v358_v29 = vld [vmem:[%s1213_s29 + $0x1d0] sm:$0xff] }
  0x1e   : > { %329 = vst [vmem:[%s1218_s30 + $0x70] sm:$0xff] %v328_v14  ;;  %v360_v30 = vld [vmem:[%s1213_s29 + $0x1e0] sm:$0xff]  ;;  %v362_v31 = vld [vmem:[%s1213_s29 + $0x1f0] sm:$0xff] }
  0x1f   : > { %331 = vst [vmem:[%s1218_s30 + $0x78] sm:$0xff] %v330_v15 }
  0x20   : > { %333 = vst [vmem:[%s1218_s30 + $0x80] sm:$0xff] %v332_v16 }
  0x21   : > { %335 = vst [vmem:[%s1218_s30 + $0x88] sm:$0xff] %v334_v17 }
  0x22   : > { %337 = vst [vmem:[%s1218_s30 + $0x90] sm:$0xff] %v336_v18 }
  0x23   : > { %339 = vst [vmem:[%s1218_s30 + $0x98] sm:$0xff] %v338_v19 }
  0x24   : > { %341 = vst [vmem:[%s1218_s30 + $0xa0] sm:$0xff] %v340_v20 }
  0x25   : > { %343 = vst [vmem:[%s1218_s30 + $0xa8] sm:$0xff] %v342_v21 }
  0x26   : > { %345 = vst [vmem:[%s1218_s30 + $0xb0] sm:$0xff] %v344_v22 }
  0x27   : > { %347 = vst [vmem:[%s1218_s30 + $0xb8] sm:$0xff] %v346_v23 }
  0x28   : > { %349 = vst [vmem:[%s1218_s30 + $0xc0] sm:$0xff] %v348_v24 }
  0x29   : > { %351 = vst [vmem:[%s1218_s30 + $0xc8] sm:$0xff] %v350_v25 }
  0x2a   : > { %353 = vst [vmem:[%s1218_s30 + $0xd0] sm:$0xff] %v352_v26 }
  0x2b   : > { %355 = vst [vmem:[%s1218_s30 + $0xd8] sm:$0xff] %v354_v27 }
  0x2c   : > { %357 = vst [vmem:[%s1218_s30 + $0xe0] sm:$0xff] %v356_v28 }
  0x2d   : > { %359 = vst [vmem:[%s1218_s30 + $0xe8] sm:$0xff] %v358_v29 }
  0x2e   : > { %361 = vst [vmem:[%s1218_s30 + $0xf0] sm:$0xff] %v360_v30 }
  0x2f   : > { %363 = vst [vmem:[%s1218_s30 + $0xf8] sm:$0xff] %v362_v31 }
  0x30 PF: > { %p896_p6 = scmp.ge.s32.totalorder %s1143_s19, 1  ;;  %p384_p7 = scmp.lt.s32.totalorder %s1143_s19, 3 }
  0x32   : > { %p385_p8 = pnand %p896_p6, %p384_p7 }
  0x33   : > { %s391_s5 = sand.u32 (!%p385_p8), 1, %s1127_s15   ;;  %s898_s10 = sshll.u32 (!%p385_p8), %s1135_s17, 1 }
  0x34   : > { %388 = sbr.rel (%p385_p8) target bundleno = 233 (0xe9), region = 70  ;;  %s897_s6 = sshll.u32 (!%p385_p8), %s391_s5, 8 }
  0x35   : > { %s1284_s7 = scalar_lea.vmem (!%p385_p8), [#allocation3], %s897_s6  ;;  %p450_p9 = scmp.lt.s32.totalorder (!%p385_p8), %s898_s10, 3 }
  0x39   : > { %v960_v32 = vld [vmem:[%s1284_s7 + $0x70] sm:$0xf]  ;;  %v1048_v33 = vld [vmem:[%s1284_s7 + $0x74] sm:$0xf0]  ;;  %v1047_v37 = vld [vmem:[%s1284_s7 + $0x74] sm:$0xf] }
  0x3a   : > { %v1024_v34 = vld [vmem:[%s1284_s7 + $0xf0] sm:$0xf]  ;;  %v961_v35 = vor.u32 %v1048_v33, %v960_v32  ;;  %v1064_v36 = vld [vmem:[%s1284_s7 + $0xf4] sm:$0xf0]  ;;  %v962_v38 = vld [vmem:[%s1284_s7 + $0x78] sm:$0xf0] }
  0x3b   : > { %v1025_v39 = vor.u32 %v1064_v36, %v1024_v34  ;;  %v965_v40 = vor.u32 %v1047_v37, %v962_v38  ;;  %v1063_v41 = vld [vmem:[%s1284_s7 + $0xf4] sm:$0xf]  ;;  %v1026_v42 = vld [vmem:[%s1284_s7 + $0xf8] sm:$0xf0]  ;;  %v952_v43 = vld [vmem:[%s1284_s7 + $0x60] sm:$0xf] }
  0x3c   : > { %677 = vmatpush.bf16.msra.mxu0 %v961_v35  ;;  %v1029_v44 = vor.u32 %v1063_v41, %v1026_v42  ;;  %v1046_v45 = vld [vmem:[%s1284_s7 + $0x64] sm:$0xf0]  ;;  %v1016_v46 = vld [vmem:[%s1284_s7 + $0xe0] sm:$0xf]  ;;  %v1045_v50 = vld [vmem:[%s1284_s7 + $0x64] sm:$0xf] }
  0x3d   : > { %v1062_v47 = vld [vmem:[%s1284_s7 + $0xe4] sm:$0xf0]  ;;  %690 = vmatpush.bf16.msra.mxu1 %v1025_v39  ;;  %703 = vmatpush.bf16.msra.mxu2 %v965_v40  ;;  %v953_v48 = vor.u32 %v1046_v45, %v952_v43  ;;  %v954_v51 = vld [vmem:[%s1284_s7 + $0x68] sm:$0xf0]  ;;  %v1061_v52 = vld [vmem:[%s1284_s7 + $0xe4] sm:$0xf] }
  0x3e   : > { %v1017_v49 = vor.u32 %v1062_v47, %v1016_v46  ;;  %716 = vmatpush.bf16.msra.mxu3 %v1029_v44  ;;  %v957_v53 = vor.u32 %v1045_v50, %v954_v51  ;;  %v1018_v54 = vld [vmem:[%s1284_s7 + $0xe8] sm:$0xf0]  ;;  %v944_v55 = vld [vmem:[%s1284_s7 + $0x50] sm:$0xf]  ;;  %v1044_v56 = vld [vmem:[%s1284_s7 + $0x54] sm:$0xf0] }
  0x3f   : > { %v1021_v57 = vor.u32 %v1061_v52, %v1018_v54  ;;  %v1008_v58 = vld [vmem:[%s1284_s7 + $0xd0] sm:$0xf]  ;;  %v1060_v59 = vld [vmem:[%s1284_s7 + $0xd4] sm:$0xf0]  ;;  %v1043_v60 = vld [vmem:[%s1284_s7 + $0x54] sm:$0xf]  ;;  %v945_v61 = vor.u32 %v1044_v56, %v944_v55 }
  0x40   : > { %678 = vmatpush.bf16.msra.mxu0 %v953_v48  ;;  %v946_v62 = vld [vmem:[%s1284_s7 + $0x58] sm:$0xf0]  ;;  %v1059_v63 = vld [vmem:[%s1284_s7 + $0xd4] sm:$0xf]  ;;  %v1009_v1 = vor.u32 %v1060_v59, %v1008_v58  ;;  %v936_v3 = vld [vmem:[%s1284_s7 + $0x40] sm:$0xf] }
  0x41   : > { %v1010_v0 = vld [vmem:[%s1284_s7 + $0xd8] sm:$0xf0]  ;;  %691 = vmatpush.bf16.msra.mxu1 %v1017_v49  ;;  %704 = vmatpush.bf16.msra.mxu2 %v957_v53  ;;  %v949_v2 = vor.u32 %v1043_v60, %v946_v62  ;;  %v1042_v4 = vld [vmem:[%s1284_s7 + $0x44] sm:$0xf0]  ;;  %v1000_v5 = vld [vmem:[%s1284_s7 + $0xc0] sm:$0xf] }
  0x42   : > { %717 = vmatpush.bf16.msra.mxu3 %v1021_v57  ;;  %v1013_v6 = vor.u32 %v1059_v63, %v1010_v0  ;;  %v1058_v7 = vld [vmem:[%s1284_s7 + $0xc4] sm:$0xf0]  ;;  %v1041_v8 = vld [vmem:[%s1284_s7 + $0x44] sm:$0xf]  ;;  %v938_v9 = vld [vmem:[%s1284_s7 + $0x48] sm:$0xf0]  ;;  %v937_v12 = vor.u32 %v1042_v4, %v936_v3 }
  0x43   : > { %v1057_v10 = vld [vmem:[%s1284_s7 + $0xc4] sm:$0xf]  ;;  %v1002_v11 = vld [vmem:[%s1284_s7 + $0xc8] sm:$0xf0]  ;;  %v1001_v13 = vor.u32 %v1058_v7, %v1000_v5  ;;  %v941_v14 = vor.u32 %v1041_v8, %v938_v9  ;;  %v928_v15 = vld [vmem:[%s1284_s7 + $0x30] sm:$0xf] }
  0x44   : > { %679 = vmatpush.bf16.msra.mxu0 %v945_v61  ;;  %v1040_v16 = vld [vmem:[%s1284_s7 + $0x34] sm:$0xf0]  ;;  %v992_v17 = vld [vmem:[%s1284_s7 + $0xb0] sm:$0xf]  ;;  %v1005_v18 = vor.u32 %v1057_v10, %v1002_v11  ;;  %v1039_v20 = vld [vmem:[%s1284_s7 + $0x34] sm:$0xf] }
  0x45   : > { %692 = vmatpush.bf16.msra.mxu1 %v1009_v1  ;;  %705 = vmatpush.bf16.msra.mxu2 %v949_v2  ;;  %v1056_v19 = vld [vmem:[%s1284_s7 + $0xb4] sm:$0xf0]  ;;  %v930_v21 = vld [vmem:[%s1284_s7 + $0x38] sm:$0xf0]  ;;  %v1055_v22 = vld [vmem:[%s1284_s7 + $0xb4] sm:$0xf]  ;;  %v929_v24 = vor.u32 %v1040_v16, %v928_v15 }
  0x46   : > { %718 = vmatpush.bf16.msra.mxu3 %v1013_v6  ;;  %v994_v23 = vld [vmem:[%s1284_s7 + $0xb8] sm:$0xf0]  ;;  %v993_v25 = vor.u32 %v1056_v19, %v992_v17  ;;  %v933_v26 = vor.u32 %v1039_v20, %v930_v21  ;;  %v920_v27 = vld [vmem:[%s1284_s7 + $0x20] sm:$0xf]  ;;  %v1038_v28 = vld [vmem:[%s1284_s7 + $0x24] sm:$0xf0] }
  0x47   : > { %v984_v29 = vld [vmem:[%s1284_s7 + $0xa0] sm:$0xf]  ;;  %v997_v30 = vor.u32 %v1055_v22, %v994_v23  ;;  %v1054_v31 = vld [vmem:[%s1284_s7 + $0xa4] sm:$0xf0]  ;;  %v1037_v32 = vld [vmem:[%s1284_s7 + $0x24] sm:$0xf]  ;;  %v921_v36 = vor.u32 %v1038_v28, %v920_v27 }
  0x48   : > { %680 = vmatpush.bf16.msra.mxu0 %v937_v12  ;;  %v922_v33 = vld [vmem:[%s1284_s7 + $0x28] sm:$0xf0]  ;;  %v1053_v34 = vld [vmem:[%s1284_s7 + $0xa4] sm:$0xf]  ;;  %v985_v37 = vor.u32 %v1054_v31, %v984_v29  ;;  %v912_v39 = vld [vmem:[%s1284_s7 + $0x10] sm:$0xf] }
  0x49   : > { %693 = vmatpush.bf16.msra.mxu1 %v1001_v13  ;;  %706 = vmatpush.bf16.msra.mxu2 %v941_v14  ;;  %v986_v35 = vld [vmem:[%s1284_s7 + $0xa8] sm:$0xf0]  ;;  %v925_v38 = vor.u32 %v1037_v32, %v922_v33  ;;  %v1036_v40 = vld [vmem:[%s1284_s7 + $0x14] sm:$0xf0]  ;;  %v976_v41 = vld [vmem:[%s1284_s7 + $0x90] sm:$0xf] }
  0x4a   : > { %719 = vmatpush.bf16.msra.mxu3 %v1005_v18  ;;  %v989_v42 = vor.u32 %v1053_v34, %v986_v35  ;;  %v1052_v43 = vld [vmem:[%s1284_s7 + $0x94] sm:$0xf0]  ;;  %v1035_v44 = vld [vmem:[%s1284_s7 + $0x14] sm:$0xf]  ;;  %v914_v45 = vld [vmem:[%s1284_s7 + $0x18] sm:$0xf0]  ;;  %v913_v48 = vor.u32 %v1036_v40, %v912_v39 }
  0x4b   : > { %v1051_v46 = vld [vmem:[%s1284_s7 + $0x94] sm:$0xf]  ;;  %v978_v47 = vld [vmem:[%s1284_s7 + $0x98] sm:$0xf0]  ;;  %v477_v49 = vld [vmem:[%s1378_s0] sm:$0xff]  ;;  %v977_v50 = vor.u32 %v1052_v43, %v976_v41  ;;  %v917_v51 = vor.u32 %v1035_v44, %v914_v45  ;;  %s1390_s10 = smov (!%p450_p9, %s898_s10), 3 }
  0x4c   : > { %681 = vmatpush.bf16.msra.mxu0 %v929_v24  ;;  %v904_v52 = vld [vmem:[%s1284_s7] sm:$0xf]  ;;  %v1034_v53 = vld [vmem:[%s1284_s7 + $0x4] sm:$0xf0]  ;;  %v981_v55 = vor.u32 %v1051_v46, %v978_v47  ;;  %v1033_v57 = vld [vmem:[%s1284_s7 + $0x4] sm:$0xf]  ;;  %v511_v61 = vunpack.c.l.b16 %v477_v49  ;;  %v512_v63 = vunpack.c.h.b16 %v477_v49  ;;  %s452_s13 = scalar_lea.vmem %s1380_s2, %s1390_s10  ;;  %s457_s21 = scalar_lea.vmem %s1381_s3, %s1390_s10 }
  0x4d   : > { %694 = vmatpush.bf16.msra.mxu1 %v993_v25  ;;  %707 = vmatpush.bf16.msra.mxu2 %v933_v26  ;;  %v968_v54 = vld [vmem:[%s1284_s7 + $0x80] sm:$0xf]  ;;  %v1050_v56 = vld [vmem:[%s1284_s7 + $0x84] sm:$0xf0]  ;;  %v906_v58 = vld [vmem:[%s1284_s7 + $0x8] sm:$0xf0]  ;;  %v905_v62 = vor.u32 %v1034_v53, %v904_v52 }
  0x4e   : > { %720 = vmatpush.bf16.msra.mxu3 %v997_v30  ;;  %v1049_v59 = vld [vmem:[%s1284_s7 + $0x84] sm:$0xf]  ;;  %v970_v60 = vld [vmem:[%s1284_s7 + $0x88] sm:$0xf0]  ;;  %v969_v0 = vor.u32 %v1050_v56, %v968_v54  ;;  %v909_v1 = vor.u32 %v1033_v57, %v906_v58  ;;  %v513_v3 = vpack.c.b16 %v511_v61, %v511_v61  ;;  %v514_v4 = vpack.c.b16 %v512_v63, %v512_v63  ;;  %v738_v5 = vld [vmem:[%s452_s13] sm:$0x3] }
  0x4f   : > { %v973_v2 = vor.u32 %v1049_v59, %v970_v60  ;;  %v746_v6 = vld [vmem:[%s457_s21] sm:$0x3]  ;;  %v740_v8 = vperm.slane %v738_v5, 0  ;;  %s901_s22 = sshll.u32 %s1390_s10, 3  ;;  %v741_v15 = vperm.slane %v738_v5, 1 }
  0x50   : > { %682 = vmatpush.bf16.msra.mxu0 %v921_v36  ;;  %v748_v11 = vperm.slane %v746_v6, 0  ;;  %s467_s25 = scalar_lea.vmem %s1382_s4, %s901_s22  ;;  %v749_v19 = vperm.slane %v746_v6, 1 }
  0x51   : > { %695 = vmatpush.bf16.msra.mxu1 %v985_v37  ;;  %708 = vmatpush.bf16.msra.mxu2 %v925_v38 }
  0x52   : > { %721 = vmatpush.bf16.msra.mxu3 %v989_v42 }
  0x54   : > { %683 = vmatpush.bf16.msra.mxu0 %v913_v48 }
  0x55   : > { %696 = vmatpush.bf16.msra.mxu1 %v977_v50  ;;  %709 = vmatpush.bf16.msra.mxu2 %v917_v51 }
  0x56   : > { %722 = vmatpush.bf16.msra.mxu3 %v981_v55 }
  0x58   : > { %684 = vmatpush.bf16.msra.mxu0 %v905_v62 }
  0x59   : > { %697 = vmatpush.bf16.msra.mxu1 %v969_v0  ;;  %710 = vmatpush.bf16.msra.mxu2 %v909_v1 }
  0x5a   : > { %723 = vmatpush.bf16.msra.mxu3 %v973_v2 }
  0x5b   : > { %685 = vmatmul.bf16.vlgmr.msra.gmra.mxu0 %v513_v3 }
  0x5c   : > { %698 = vmatmul.bf16.vlgmr.msra.gmra.mxu1 %v514_v4  ;;  %711 = vmatmul.bf16.vlgmr.msra.gmra.mxu2 %v513_v3 }
  0x5d   : > { %724 = vmatmul.bf16.vlgmr.msra.gmra.mxu3 %v514_v4 }
  0xd8   : > { %v686_v7 = vpop.f32.mrf.mxu0 }
  0xd9   : > { %v699_v9 = vpop.f32.mrf.mxu1 }
  0xda   : > { %v700_v10 = vadd.f32 %v699_v9, %v686_v7 }
  0xdc   : > { %v744_v12 = vmul.f32 %v740_v8, %v700_v10 }
  0xde   : > { %v752_v13 = vadd.f32 %v748_v11, %v744_v12 }
  0xdf   : > { %v712_v14 = vpop.f32.mrf.mxu2 }
  0xe0   : > { %754 = vst [vmem:[%s467_s25] sm:$0xff] %v752_v13  ;;  %v725_v16 = vpop.f32.mrf.mxu3  ;;  %v688_v17 = vpop.f32.mrf.mxu0 }
  0xe1   : > { %v726_v18 = vadd.f32 %v725_v16, %v712_v14  ;;  %v701_v20 = vpop.f32.mrf.mxu1 }
  0xe3   : > { %v745_v21 = vmul.f32 %v741_v15, %v726_v18 }
  0xe5   : > { %v753_v22 = vadd.f32 %v749_v19, %v745_v21 }
  0xe7   : > { %755 = vst [vmem:[%s467_s25 + $0x8] sm:$0xff] %v753_v22  ;;  %v714_v23 = vpop.f32.mrf.mxu2 }
  0xe8   : > { %v727_v24 = vpop.f32.mrf.mxu3 }
  0xe9 PF: > { %s14_s19 = sadd.s32 1, %s1143_s19   ;;  %s1383_s15 = smov %s1131_s16 }
  0xea   : > { %p11_p10 = scmp.ge.s32.totalorder %s14_s19, 4   ;;  %s1384_s16 = smov %s1205_s23 }
  0xeb   : > { %s1385_s17 = smov %s1139_s18  ;;  %s1386_s18 = smov %s1388_s20 }
  0xec   :  { %13 = sbr.rel (!%p11_p10) target bundleno = 3 (0x3), region = 126 }

// kernel: single_baseline_forward.40
= control target key start
LH: loop header
LB: loop body
LE: loop exit
PB: predicated region body
PF: predicated region fallthrough
CT: control target
= control target key end

     0   :  { %s1844_s18 = smov 0   ;;  %s1846_s19 = smov 0   ;;  %s2252_s0 = inlined_call_operand.vmem [shape: bf16[8,4608], index: 0, kind: input, shape index: {}]   ;;  %s2253_s1 = inlined_call_operand.vmem [shape: bf16[4608,512], index: 1, kind: input, shape index: {}]   ;;  %s2254_s2 = inlined_call_operand.vmem [shape: f32[1,512], index: 2, kind: input, shape index: {}]   ;;  %s2255_s3 = inlined_call_operand.vmem [shape: f32[1,512], index: 3, kind: input, shape index: {}]   ;;  %s2256_s4 = inlined_call_operand.vmem [shape: f32[8,512], index: 4, kind: input, shape index: {}]   ;;  %s2257_s5 = inlined_call_operand.vmem [shape: f32[8,512], index: 5, kind: output, shape index: {}]  }
   0x1   :  { %s1848_s20 = smov 0   ;;  %s1850_s21 = smov 0  }
   0x2   :  { %s1852_s22 = smov 0   ;;  %s1854_s23 = smov 0  }
   0x3   :  { %s1856_s24 = smov 0  }
   0x4 LB: > { %s27_s25 = sadd.s32 1, %s1803_s22  ;;  %s30_s26 = sadd.s32 1, %s1807_s23  ;;  %s1811_s24 = sphi %s1856_s24, %s15_s24   ;;  %s1807_s23 = sphi %s1854_s23, %s2263_s23   ;;  %s1803_s22 = sphi %s1852_s22, %s2262_s22   ;;  %s1799_s21 = sphi %s1850_s21, %s2261_s21   ;;  %s1795_s20 = sphi %s1848_s20, %s2260_s20   ;;  %s1791_s19 = sphi %s1846_s19, %s2259_s19   ;;  %s1787_s18 = sphi %s1844_s18, %s2258_s18  }
   0x5   : > { %p28_p0 = scmp.ge.s32.totalorder %s27_s25, 9  ;;  %p78_p1 = scmp.ne.s32.totalorder %s1791_s19, %s1787_s18 }
   0x6   : > { %p79_p2 = scmp.eq.s32.totalorder %s1811_s24, 0  ;;  %s71_s30 = sadd.s32 1, %s1791_s19 }
   0x7   : > { %s2265_s25 = smov (%p28_p0, %s27_s25), 0  ;;  %s2267_s26 = smov (!%p28_p0, %s30_s26), %s1807_s23 }
   0x8   : > { %p80_p3 = por %p79_p2, %p78_p1  ;;  %p32_p4 = scmp.ge.s32.totalorder %s2267_s26, 2 }
   0x9   : > { %s66_s27 = ssub.s32 %s1803_s22, %s2265_s25  ;;  %p1359_p6 = scmp.ge.s32.totalorder %s1811_s24, 18 }
   0xa   : > { %s2269_s26 = smov (%p32_p4, %s2267_s26), 0 }
   0xb   : > { %s67_s28 = ssub.s32 %s1807_s23, %s2269_s26  ;;  %212 = sbr.rel (%p1359_p6) target bundleno = 87 (0x57), region = 16 }
   0xc   : > { %s68_s29 = sor.u32 %s67_s28, %s66_s27 }
   0xd   : > { %p69_p5 = scmp.eq.s32.totalorder %s68_s29, 0 }
   0xf   : > { %s1895_s6 = scalar_select %p69_p5, %s1791_s19, %s71_s30  }
  0x10   : > { %228 = sbr.rel (!%p80_p3) target bundleno = 87 (0x57), region = 24  ;;  %s230_s7 = sand.u32 (%p80_p3), 1, %s1791_s19  }
  0x11   : > { %s1362_s8 = sshll.u32 (%p80_p3), %s1807_s23, 1  ;;  %s1360_s9 = sshll.u32 (%p80_p3), %s230_s7, 9 }
  0x12   : > { %s1635_s10 = sshll.u32 (%p80_p3), %s1803_s22, 8  ;;  %s1909_s16 = scalar_lea.vmem (%p80_p3), [#allocation3], %s1360_s9 }
  0x13   : > { %s236_s11 = sadd.s32 (%p80_p3), %s1635_s10, %s1362_s8 }
  0x14   : > { %s1364_s12 = sshll.u32 (%p80_p3), %s236_s11, 2 }
  0x15   : > { %s1904_s15 = scalar_lea.vmem %s2253_s1, %s1364_s12 }
  0x16   : > { %v393_v0 = vld [vmem:[%s1904_s15] sm:$0xff]  ;;  %v395_v1 = vld [vmem:[%s1904_s15 + $0x10] sm:$0xff] }
  0x17   : > { %v397_v2 = vld [vmem:[%s1904_s15 + $0x20] sm:$0xff]  ;;  %394 = vst [vmem:[%s1909_s16] sm:$0xff] %v393_v0  ;;  %v399_v3 = vld [vmem:[%s1904_s15 + $0x30] sm:$0xff] }
  0x18   : > { %396 = vst [vmem:[%s1909_s16 + $0x8] sm:$0xff] %v395_v1  ;;  %v401_v4 = vld [vmem:[%s1904_s15 + $0x40] sm:$0xff]  ;;  %v403_v5 = vld [vmem:[%s1904_s15 + $0x50] sm:$0xff] }
  0x19   : > { %398 = vst [vmem:[%s1909_s16 + $0x10] sm:$0xff] %v397_v2  ;;  %v405_v6 = vld [vmem:[%s1904_s15 + $0x60] sm:$0xff]  ;;  %v407_v7 = vld [vmem:[%s1904_s15 + $0x70] sm:$0xff] }
  0x1a   : > { %400 = vst [vmem:[%s1909_s16 + $0x18] sm:$0xff] %v399_v3  ;;  %v409_v8 = vld [vmem:[%s1904_s15 + $0x80] sm:$0xff]  ;;  %v411_v9 = vld [vmem:[%s1904_s15 + $0x90] sm:$0xff] }
  0x1b   : > { %402 = vst [vmem:[%s1909_s16 + $0x20] sm:$0xff] %v401_v4  ;;  %v413_v10 = vld [vmem:[%s1904_s15 + $0xa0] sm:$0xff]  ;;  %v415_v11 = vld [vmem:[%s1904_s15 + $0xb0] sm:$0xff] }
  0x1c   : > { %404 = vst [vmem:[%s1909_s16 + $0x28] sm:$0xff] %v403_v5  ;;  %v417_v12 = vld [vmem:[%s1904_s15 + $0xc0] sm:$0xff]  ;;  %v419_v13 = vld [vmem:[%s1904_s15 + $0xd0] sm:$0xff] }
  0x1d   : > { %406 = vst [vmem:[%s1909_s16 + $0x30] sm:$0xff] %v405_v6  ;;  %v421_v14 = vld [vmem:[%s1904_s15 + $0xe0] sm:$0xff]  ;;  %v423_v15 = vld [vmem:[%s1904_s15 + $0xf0] sm:$0xff] }
  0x1e   : > { %408 = vst [vmem:[%s1909_s16 + $0x38] sm:$0xff] %v407_v7  ;;  %v425_v16 = vld [vmem:[%s1904_s15 + $0x100] sm:$0xff]  ;;  %v427_v17 = vld [vmem:[%s1904_s15 + $0x110] sm:$0xff] }
  0x1f   : > { %410 = vst [vmem:[%s1909_s16 + $0x40] sm:$0xff] %v409_v8  ;;  %v429_v18 = vld [vmem:[%s1904_s15 + $0x120] sm:$0xff]  ;;  %v431_v19 = vld [vmem:[%s1904_s15 + $0x130] sm:$0xff] }
  0x20   : > { %412 = vst [vmem:[%s1909_s16 + $0x48] sm:$0xff] %v411_v9  ;;  %v433_v20 = vld [vmem:[%s1904_s15 + $0x140] sm:$0xff]  ;;  %v435_v21 = vld [vmem:[%s1904_s15 + $0x150] sm:$0xff] }
  0x21   : > { %414 = vst [vmem:[%s1909_s16 + $0x50] sm:$0xff] %v413_v10  ;;  %v437_v22 = vld [vmem:[%s1904_s15 + $0x160] sm:$0xff]  ;;  %v439_v23 = vld [vmem:[%s1904_s15 + $0x170] sm:$0xff] }
  0x22   : > { %416 = vst [vmem:[%s1909_s16 + $0x58] sm:$0xff] %v415_v11  ;;  %v441_v24 = vld [vmem:[%s1904_s15 + $0x180] sm:$0xff]  ;;  %v443_v25 = vld [vmem:[%s1904_s15 + $0x190] sm:$0xff] }
  0x23   : > { %418 = vst [vmem:[%s1909_s16 + $0x60] sm:$0xff] %v417_v12  ;;  %v445_v26 = vld [vmem:[%s1904_s15 + $0x1a0] sm:$0xff]  ;;  %v447_v27 = vld [vmem:[%s1904_s15 + $0x1b0] sm:$0xff] }
  0x24   : > { %420 = vst [vmem:[%s1909_s16 + $0x68] sm:$0xff] %v419_v13  ;;  %v449_v28 = vld [vmem:[%s1904_s15 + $0x1c0] sm:$0xff]  ;;  %v451_v29 = vld [vmem:[%s1904_s15 + $0x1d0] sm:$0xff] }
  0x25   : > { %422 = vst [vmem:[%s1909_s16 + $0x70] sm:$0xff] %v421_v14  ;;  %v453_v30 = vld [vmem:[%s1904_s15 + $0x1e0] sm:$0xff]  ;;  %v455_v31 = vld [vmem:[%s1904_s15 + $0x1f0] sm:$0xff] }
  0x26   : > { %424 = vst [vmem:[%s1909_s16 + $0x78] sm:$0xff] %v423_v15  ;;  %v457_v32 = vld [vmem:[%s1904_s15 + $0x200] sm:$0xff]  ;;  %v459_v33 = vld [vmem:[%s1904_s15 + $0x210] sm:$0xff] }
  0x27   : > { %426 = vst [vmem:[%s1909_s16 + $0x80] sm:$0xff] %v425_v16  ;;  %v461_v34 = vld [vmem:[%s1904_s15 + $0x220] sm:$0xff]  ;;  %v463_v35 = vld [vmem:[%s1904_s15 + $0x230] sm:$0xff] }
  0x28   : > { %428 = vst [vmem:[%s1909_s16 + $0x88] sm:$0xff] %v427_v17  ;;  %v465_v36 = vld [vmem:[%s1904_s15 + $0x240] sm:$0xff]  ;;  %v467_v37 = vld [vmem:[%s1904_s15 + $0x250] sm:$0xff] }
  0x29   : > { %430 = vst [vmem:[%s1909_s16 + $0x90] sm:$0xff] %v429_v18  ;;  %v469_v38 = vld [vmem:[%s1904_s15 + $0x260] sm:$0xff]  ;;  %v471_v39 = vld [vmem:[%s1904_s15 + $0x270] sm:$0xff] }
  0x2a   : > { %432 = vst [vmem:[%s1909_s16 + $0x98] sm:$0xff] %v431_v19  ;;  %v473_v40 = vld [vmem:[%s1904_s15 + $0x280] sm:$0xff]  ;;  %v475_v41 = vld [vmem:[%s1904_s15 + $0x290] sm:$0xff] }
  0x2b   : > { %434 = vst [vmem:[%s1909_s16 + $0xa0] sm:$0xff] %v433_v20  ;;  %v477_v42 = vld [vmem:[%s1904_s15 + $0x2a0] sm:$0xff]  ;;  %v479_v43 = vld [vmem:[%s1904_s15 + $0x2b0] sm:$0xff] }
  0x2c   : > { %436 = vst [vmem:[%s1909_s16 + $0xa8] sm:$0xff] %v435_v21  ;;  %v481_v44 = vld [vmem:[%s1904_s15 + $0x2c0] sm:$0xff]  ;;  %v483_v45 = vld [vmem:[%s1904_s15 + $0x2d0] sm:$0xff] }
  0x2d   : > { %438 = vst [vmem:[%s1909_s16 + $0xb0] sm:$0xff] %v437_v22  ;;  %v485_v46 = vld [vmem:[%s1904_s15 + $0x2e0] sm:$0xff]  ;;  %v487_v47 = vld [vmem:[%s1904_s15 + $0x2f0] sm:$0xff] }
  0x2e   : > { %440 = vst [vmem:[%s1909_s16 + $0xb8] sm:$0xff] %v439_v23  ;;  %v489_v48 = vld [vmem:[%s1904_s15 + $0x300] sm:$0xff]  ;;  %v491_v49 = vld [vmem:[%s1904_s15 + $0x310] sm:$0xff] }
  0x2f   : > { %442 = vst [vmem:[%s1909_s16 + $0xc0] sm:$0xff] %v441_v24  ;;  %v493_v50 = vld [vmem:[%s1904_s15 + $0x320] sm:$0xff]  ;;  %v495_v51 = vld [vmem:[%s1904_s15 + $0x330] sm:$0xff] }
  0x30   : > { %444 = vst [vmem:[%s1909_s16 + $0xc8] sm:$0xff] %v443_v25  ;;  %v497_v52 = vld [vmem:[%s1904_s15 + $0x340] sm:$0xff]  ;;  %v499_v53 = vld [vmem:[%s1904_s15 + $0x350] sm:$0xff] }
  0x31   : > { %446 = vst [vmem:[%s1909_s16 + $0xd0] sm:$0xff] %v445_v26  ;;  %v501_v54 = vld [vmem:[%s1904_s15 + $0x360] sm:$0xff]  ;;  %v503_v55 = vld [vmem:[%s1904_s15 + $0x370] sm:$0xff] }
  0x32   : > { %448 = vst [vmem:[%s1909_s16 + $0xd8] sm:$0xff] %v447_v27  ;;  %v505_v56 = vld [vmem:[%s1904_s15 + $0x380] sm:$0xff]  ;;  %v507_v57 = vld [vmem:[%s1904_s15 + $0x390] sm:$0xff] }
  0x33   : > { %450 = vst [vmem:[%s1909_s16 + $0xe0] sm:$0xff] %v449_v28  ;;  %v509_v58 = vld [vmem:[%s1904_s15 + $0x3a0] sm:$0xff]  ;;  %v511_v59 = vld [vmem:[%s1904_s15 + $0x3b0] sm:$0xff] }
  0x34   : > { %452 = vst [vmem:[%s1909_s16 + $0xe8] sm:$0xff] %v451_v29  ;;  %v513_v60 = vld [vmem:[%s1904_s15 + $0x3c0] sm:$0xff]  ;;  %v515_v61 = vld [vmem:[%s1904_s15 + $0x3d0] sm:$0xff] }
  0x35   : > { %454 = vst [vmem:[%s1909_s16 + $0xf0] sm:$0xff] %v453_v30  ;;  %v517_v62 = vld [vmem:[%s1904_s15 + $0x3e0] sm:$0xff]  ;;  %v519_v63 = vld [vmem:[%s1904_s15 + $0x3f0] sm:$0xff] }
  0x36   : > { %456 = vst [vmem:[%s1909_s16 + $0xf8] sm:$0xff] %v455_v31 }
  0x37   : > { %458 = vst [vmem:[%s1909_s16 + $0x100] sm:$0xff] %v457_v32 }
  0x38   : > { %460 = vst [vmem:[%s1909_s16 + $0x108] sm:$0xff] %v459_v33 }
  0x39   : > { %462 = vst [vmem:[%s1909_s16 + $0x110] sm:$0xff] %v461_v34 }
  0x3a   : > { %464 = vst [vmem:[%s1909_s16 + $0x118] sm:$0xff] %v463_v35 }
  0x3b   : > { %466 = vst [vmem:[%s1909_s16 + $0x120] sm:$0xff] %v465_v36 }
  0x3c   : > { %468 = vst [vmem:[%s1909_s16 + $0x128] sm:$0xff] %v467_v37 }
  0x3d   : > { %470 = vst [vmem:[%s1909_s16 + $0x130] sm:$0xff] %v469_v38 }
  0x3e   : > { %472 = vst [vmem:[%s1909_s16 + $0x138] sm:$0xff] %v471_v39 }
  0x3f   : > { %474 = vst [vmem:[%s1909_s16 + $0x140] sm:$0xff] %v473_v40 }
  0x40   : > { %476 = vst [vmem:[%s1909_s16 + $0x148] sm:$0xff] %v475_v41 }
  0x41   : > { %478 = vst [vmem:[%s1909_s16 + $0x150] sm:$0xff] %v477_v42 }
  0x42   : > { %480 = vst [vmem:[%s1909_s16 + $0x158] sm:$0xff] %v479_v43 }
  0x43   : > { %482 = vst [vmem:[%s1909_s16 + $0x160] sm:$0xff] %v481_v44 }
  0x44   : > { %484 = vst [vmem:[%s1909_s16 + $0x168] sm:$0xff] %v483_v45 }
  0x45   : > { %486 = vst [vmem:[%s1909_s16 + $0x170] sm:$0xff] %v485_v46 }
  0x46   : > { %488 = vst [vmem:[%s1909_s16 + $0x178] sm:$0xff] %v487_v47 }
  0x47   : > { %490 = vst [vmem:[%s1909_s16 + $0x180] sm:$0xff] %v489_v48 }
  0x48   : > { %492 = vst [vmem:[%s1909_s16 + $0x188] sm:$0xff] %v491_v49 }
  0x49   : > { %494 = vst [vmem:[%s1909_s16 + $0x190] sm:$0xff] %v493_v50 }
  0x4a   : > { %496 = vst [vmem:[%s1909_s16 + $0x198] sm:$0xff] %v495_v51 }
  0x4b   : > { %498 = vst [vmem:[%s1909_s16 + $0x1a0] sm:$0xff] %v497_v52 }
  0x4c   : > { %500 = vst [vmem:[%s1909_s16 + $0x1a8] sm:$0xff] %v499_v53 }
  0x4d   : > { %502 = vst [vmem:[%s1909_s16 + $0x1b0] sm:$0xff] %v501_v54 }
  0x4e   : > { %504 = vst [vmem:[%s1909_s16 + $0x1b8] sm:$0xff] %v503_v55 }
  0x4f   : > { %506 = vst [vmem:[%s1909_s16 + $0x1c0] sm:$0xff] %v505_v56 }
  0x50   : > { %508 = vst [vmem:[%s1909_s16 + $0x1c8] sm:$0xff] %v507_v57 }
  0x51   : > { %510 = vst [vmem:[%s1909_s16 + $0x1d0] sm:$0xff] %v509_v58 }
  0x52   : > { %512 = vst [vmem:[%s1909_s16 + $0x1d8] sm:$0xff] %v511_v59 }
  0x53   : > { %514 = vst [vmem:[%s1909_s16 + $0x1e0] sm:$0xff] %v513_v60 }
  0x54   : > { %516 = vst [vmem:[%s1909_s16 + $0x1e8] sm:$0xff] %v515_v61 }
  0x55   : > { %518 = vst [vmem:[%s1909_s16 + $0x1f0] sm:$0xff] %v517_v62 }
  0x56   : > { %520 = vst [vmem:[%s1909_s16 + $0x1f8] sm:$0xff] %v519_v63 }
  0x57 PF: > { %p1365_p7 = scmp.ge.s32.totalorder %s1811_s24, 1  ;;  %p554_p8 = scmp.lt.s32.totalorder %s1811_s24, 19 }
  0x59   : > { %p555_p9 = pnand %p1365_p7, %p554_p8 }
  0x5a   : > { %s561_s17 = sand.u32 (!%p555_p9), 1, %s1787_s18   ;;  %s1367_s27 = sshll.u32 (!%p555_p9), %s1795_s20, 2 }
  0x5b   : > { %558 = sbr.rel (%p555_p9) target bundleno = 330 (0x14a), region = 74  ;;  %s1366_s28 = sshll.u32 (!%p555_p9), %s561_s17, 9 }
  0x5c   : > { %p621_p10 = scmp.lt.s32.totalorder (!%p555_p9), %s1367_s27, 35  ;;  %s1369_s29 = sshll.u32 (!%p555_p9), %s1799_s21, 1 }
  0x5d   : > { %p631_p11 = scmp.lt.s32.totalorder (!%p555_p9), %s1369_s29, 3  ;;  %s2067_s8 = scalar_lea.vmem (!%p555_p9), [#allocation3], %s1366_s28 }
  0x5e   : > { %p1375_p12 = scmp.ne.s32.totalorder (!%p555_p9), %s1795_s20, 0 }
  0x60   : > { %s2271_s27 = smov (!%p621_p10, %s1367_s27), 35  ;;  %s2273_s29 = smov (!%p631_p11, %s1369_s29), 3 }
  0x61   : > { %s1368_s30 = sshll.u32 %s2271_s27, 2  ;;  %s633_s18 = scalar_lea.vmem %s2254_s2, %s2273_s29 }
  0x62   : > { %s2044_s9 = scalar_lea.vmem %s2252_s0, %s1368_s30  ;;  %s638_s21 = scalar_lea.vmem %s2255_s3, %s2273_s29 }
  0x63   : > { %s1372_s14 = sshll.u32 %s2273_s29, 3  ;;  %663 = sbr.rel (%p1375_p12) target bundleno = 107 (0x6b), region = 82 }
  0x64   : > { %s2060_s17 = scalar_lea.vmem %s2256_s4, %s1372_s14  ;;  %s2065_s7 = scalar_lea.vmem %s2257_s5, %s1372_s14 }
  0x68   : > { %v1813_v0 = vmov 0.0  }
  0x69   : > { %664 = vst [vmem:[#allocation2] sm:$0xff] %v1813_v0 }
  0x6a   : > { %665 = vst [vmem:[#allocation2 + $0x8] sm:$0xff] %v1813_v0 }
  0x6b PF: > { %v1434_v1 = vld [vmem:[%s2067_s8 + $0x70] sm:$0xf]  ;;  %v1651_v2 = vld [vmem:[%s2067_s8 + $0x74] sm:$0xf0]  ;;  %v1426_v12 = vld [vmem:[%s2067_s8 + $0x60] sm:$0xf] }
  0x6c   : > { %v1498_v3 = vld [vmem:[%s2067_s8 + $0xf0] sm:$0xf]  ;;  %v1435_v4 = vor.u32 %v1651_v2, %v1434_v1  ;;  %v1667_v5 = vld [vmem:[%s2067_s8 + $0xf4] sm:$0xf0]  ;;  %v1649_v14 = vld [vmem:[%s2067_s8 + $0x64] sm:$0xf0] }
  0x6d   : > { %v1562_v6 = vld [vmem:[%s2067_s8 + $0x170] sm:$0xf]  ;;  %v1683_v7 = vld [vmem:[%s2067_s8 + $0x174] sm:$0xf0]  ;;  %v1499_v8 = vor.u32 %v1667_v5, %v1498_v3  ;;  %v1490_v15 = vld [vmem:[%s2067_s8 + $0xe0] sm:$0xf]  ;;  %v1427_v17 = vor.u32 %v1649_v14, %v1426_v12 }
  0x6e   : > { %v1563_v9 = vor.u32 %v1683_v7, %v1562_v6  ;;  %v1626_v10 = vld [vmem:[%s2067_s8 + $0x1f0] sm:$0xf]  ;;  %v1699_v11 = vld [vmem:[%s2067_s8 + $0x1f4] sm:$0xf0]  ;;  %1068 = vmatpush.bf16.msra.mxu0 %v1435_v4  ;;  %v1665_v16 = vld [vmem:[%s2067_s8 + $0xe4] sm:$0xf0] }
  0x6f   : > { %v1627_v13 = vor.u32 %v1699_v11, %v1626_v10  ;;  %1081 = vmatpush.bf16.msra.mxu1 %v1499_v8  ;;  %v1491_v18 = vor.u32 %v1665_v16, %v1490_v15  ;;  %v1554_v19 = vld [vmem:[%s2067_s8 + $0x160] sm:$0xf]  ;;  %v1681_v20 = vld [vmem:[%s2067_s8 + $0x164] sm:$0xf0]  ;;  %v1418_v24 = vld [vmem:[%s2067_s8 + $0x50] sm:$0xf] }
  0x70   : > { %1094 = vmatpush.bf16.msra.mxu2 %v1563_v9  ;;  %v1618_v21 = vld [vmem:[%s2067_s8 + $0x1e0] sm:$0xf]  ;;  %v1555_v22 = vor.u32 %v1681_v20, %v1554_v19  ;;  %v1697_v23 = vld [vmem:[%s2067_s8 + $0x1e4] sm:$0xf0]  ;;  %v1647_v25 = vld [vmem:[%s2067_s8 + $0x54] sm:$0xf0] }
  0x71   : > { %1107 = vmatpush.bf16.msra.mxu3 %v1627_v13  ;;  %v1619_v26 = vor.u32 %v1697_v23, %v1618_v21  ;;  %v1482_v27 = vld [vmem:[%s2067_s8 + $0xd0] sm:$0xf]  ;;  %v1663_v28 = vld [vmem:[%s2067_s8 + $0xd4] sm:$0xf0]  ;;  %v1419_v30 = vor.u32 %v1647_v25, %v1418_v24  ;;  %v1410_v36 = vld [vmem:[%s2067_s8 + $0x40] sm:$0xf] }
  0x72   : > { %v1546_v29 = vld [vmem:[%s2067_s8 + $0x150] sm:$0xf]  ;;  %1069 = vmatpush.bf16.msra.mxu0 %v1427_v17  ;;  %v1679_v31 = vld [vmem:[%s2067_s8 + $0x154] sm:$0xf0]  ;;  %v1483_v34 = vor.u32 %v1663_v28, %v1482_v27  ;;  %v1645_v37 = vld [vmem:[%s2067_s8 + $0x44] sm:$0xf0] }
  0x73   : > { %v1610_v32 = vld [vmem:[%s2067_s8 + $0x1d0] sm:$0xf]  ;;  %v1695_v33 = vld [vmem:[%s2067_s8 + $0x1d4] sm:$0xf0]  ;;  %1082 = vmatpush.bf16.msra.mxu1 %v1491_v18  ;;  %v1547_v35 = vor.u32 %v1679_v31, %v1546_v29  ;;  %v1474_v38 = vld [vmem:[%s2067_s8 + $0xc0] sm:$0xf]  ;;  %v1411_v45 = vor.u32 %v1645_v37, %v1410_v36 }
  0x74   : > { %1095 = vmatpush.bf16.msra.mxu2 %v1555_v22  ;;  %v1611_v39 = vor.u32 %v1695_v33, %v1610_v32  ;;  %v1661_v40 = vld [vmem:[%s2067_s8 + $0xc4] sm:$0xf0]  ;;  %v1538_v41 = vld [vmem:[%s2067_s8 + $0x140] sm:$0xf]  ;;  %v1402_v48 = vld [vmem:[%s2067_s8 + $0x30] sm:$0xf] }
  0x75   : > { %1108 = vmatpush.bf16.msra.mxu3 %v1619_v26  ;;  %v1677_v42 = vld [vmem:[%s2067_s8 + $0x144] sm:$0xf0]  ;;  %v1602_v43 = vld [vmem:[%s2067_s8 + $0x1c0] sm:$0xf]  ;;  %v1475_v46 = vor.u32 %v1661_v40, %v1474_v38  ;;  %v1643_v49 = vld [vmem:[%s2067_s8 + $0x34] sm:$0xf0] }
  0x76   : > { %v1693_v44 = vld [vmem:[%s2067_s8 + $0x1c4] sm:$0xf0]  ;;  %1070 = vmatpush.bf16.msra.mxu0 %v1419_v30  ;;  %v1539_v47 = vor.u32 %v1677_v42, %v1538_v41  ;;  %v1466_v50 = vld [vmem:[%s2067_s8 + $0xb0] sm:$0xf]  ;;  %v1659_v52 = vld [vmem:[%s2067_s8 + $0xb4] sm:$0xf0]  ;;  %v1403_v57 = vor.u32 %v1643_v49, %v1402_v48 }
  0x77   : > { %1083 = vmatpush.bf16.msra.mxu1 %v1483_v34  ;;  %v1603_v51 = vor.u32 %v1693_v44, %v1602_v43  ;;  %v1530_v53 = vld [vmem:[%s2067_s8 + $0x130] sm:$0xf]  ;;  %v1675_v54 = vld [vmem:[%s2067_s8 + $0x134] sm:$0xf0]  ;;  %v1467_v58 = vor.u32 %v1659_v52, %v1466_v50  ;;  %v1394_v60 = vld [vmem:[%s2067_s8 + $0x20] sm:$0xf] }
  0x78   : > { %1096 = vmatpush.bf16.msra.mxu2 %v1547_v35  ;;  %v1594_v55 = vld [vmem:[%s2067_s8 + $0x1b0] sm:$0xf]  ;;  %v1691_v56 = vld [vmem:[%s2067_s8 + $0x1b4] sm:$0xf0]  ;;  %v1531_v59 = vor.u32 %v1675_v54, %v1530_v53  ;;  %v1641_v61 = vld [vmem:[%s2067_s8 + $0x24] sm:$0xf0] }
  0x79   : > { %1109 = vmatpush.bf16.msra.mxu3 %v1611_v39  ;;  %v1458_v62 = vld [vmem:[%s2067_s8 + $0xa0] sm:$0xf]  ;;  %v1595_v63 = vor.u32 %v1691_v56, %v1594_v55  ;;  %v1657_v0 = vld [vmem:[%s2067_s8 + $0xa4] sm:$0xf0]  ;;  %v1395_v5 = vor.u32 %v1641_v61, %v1394_v60  ;;  %v1386_v8 = vld [vmem:[%s2067_s8 + $0x10] sm:$0xf] }
  0x7a   : > { %1071 = vmatpush.bf16.msra.mxu0 %v1411_v45  ;;  %v1522_v1 = vld [vmem:[%s2067_s8 + $0x120] sm:$0xf]  ;;  %v1673_v2 = vld [vmem:[%s2067_s8 + $0x124] sm:$0xf0]  ;;  %v1459_v6 = vor.u32 %v1657_v0, %v1458_v62  ;;  %v1639_v9 = vld [vmem:[%s2067_s8 + $0x14] sm:$0xf0] }
  0x7b   : > { %1084 = vmatpush.bf16.msra.mxu1 %v1475_v46  ;;  %v1586_v3 = vld [vmem:[%s2067_s8 + $0x1a0] sm:$0xf]  ;;  %v1689_v4 = vld [vmem:[%s2067_s8 + $0x1a4] sm:$0xf0]  ;;  %v1523_v7 = vor.u32 %v1673_v2, %v1522_v1  ;;  %v1450_v10 = vld [vmem:[%s2067_s8 + $0x90] sm:$0xf]  ;;  %v1387_v17 = vor.u32 %v1639_v9, %v1386_v8 }
  0x7c   : > { %1097 = vmatpush.bf16.msra.mxu2 %v1539_v47  ;;  %v1587_v11 = vor.u32 %v1689_v4, %v1586_v3  ;;  %v1655_v12 = vld [vmem:[%s2067_s8 + $0x94] sm:$0xf0]  ;;  %v1514_v13 = vld [vmem:[%s2067_s8 + $0x110] sm:$0xf]  ;;  %v1378_v18 = vld [vmem:[%s2067_s8] sm:$0xf] }
  0x7d   : > { %1110 = vmatpush.bf16.msra.mxu3 %v1603_v51  ;;  %v1671_v14 = vld [vmem:[%s2067_s8 + $0x114] sm:$0xf0]  ;;  %v1578_v15 = vld [vmem:[%s2067_s8 + $0x190] sm:$0xf]  ;;  %v1637_v19 = vld [vmem:[%s2067_s8 + $0x4] sm:$0xf0]  ;;  %v1451_v21 = vor.u32 %v1655_v12, %v1450_v10 }
  0x7e   : > { %1072 = vmatpush.bf16.msra.mxu0 %v1403_v57  ;;  %v1687_v16 = vld [vmem:[%s2067_s8 + $0x194] sm:$0xf0]  ;;  %v1442_v20 = vld [vmem:[%s2067_s8 + $0x80] sm:$0xf]  ;;  %v1515_v22 = vor.u32 %v1671_v14, %v1514_v13  ;;  %v1653_v23 = vld [vmem:[%s2067_s8 + $0x84] sm:$0xf0]  ;;  %v1379_v33 = vor.u32 %v1637_v19, %v1378_v18 }
  0x7f   : > { %1085 = vmatpush.bf16.msra.mxu1 %v1467_v58  ;;  %v1506_v24 = vld [vmem:[%s2067_s8 + $0x100] sm:$0xf]  ;;  %v1669_v25 = vld [vmem:[%s2067_s8 + $0x104] sm:$0xf0]  ;;  %v1579_v26 = vor.u32 %v1687_v16, %v1578_v15  ;;  %v1650_v29 = vld [vmem:[%s2067_s8 + $0x74] sm:$0xf]  ;;  %v1443_v38 = vor.u32 %v1653_v23, %v1442_v20 }
  0x80   : > { %1098 = vmatpush.bf16.msra.mxu2 %v1531_v59  ;;  %v1570_v27 = vld [vmem:[%s2067_s8 + $0x180] sm:$0xf]  ;;  %v1685_v28 = vld [vmem:[%s2067_s8 + $0x184] sm:$0xf0]  ;;  %v1436_v30 = vld [vmem:[%s2067_s8 + $0x78] sm:$0xf0]  ;;  %v1507_v39 = vor.u32 %v1669_v25, %v1506_v24 }
  0x81   : > { %1111 = vmatpush.bf16.msra.mxu3 %v1595_v63  ;;  %v1666_v31 = vld [vmem:[%s2067_s8 + $0xf4] sm:$0xf]  ;;  %v669_v32 = vld [vmem:[%s2044_s9 + $0x8] sm:$0xff]  ;;  %v1571_v43 = vor.u32 %v1685_v28, %v1570_v27  ;;  %v1439_v44 = vor.u32 %v1650_v29, %v1436_v30  ;;  %v1648_v48 = vld [vmem:[%s2067_s8 + $0x64] sm:$0xf]  ;;  %p1632_p13 = scmp.ne.s32.totalorder %s1795_s20, 8 }
  0x82   : > { %1073 = vmatpush.bf16.msra.mxu0 %v1395_v5  ;;  %v1500_v34 = vld [vmem:[%s2067_s8 + $0xf8] sm:$0xf0]  ;;  %v1682_v35 = vld [vmem:[%s2067_s8 + $0x174] sm:$0xf]  ;;  %v738_v37 = vunpack.c.l.b16 %v669_v32  ;;  %v739_v42 = vunpack.c.h.b16 %v669_v32  ;;  %v1428_v49 = vld [vmem:[%s2067_s8 + $0x68] sm:$0xf0] }
  0x83   : > { %1086 = vmatpush.bf16.msra.mxu1 %v1459_v6  ;;  %v1564_v36 = vld [vmem:[%s2067_s8 + $0x178] sm:$0xf0]  ;;  %v1698_v40 = vld [vmem:[%s2067_s8 + $0x1f4] sm:$0xf]  ;;  %v1503_v46 = vor.u32 %v1666_v31, %v1500_v34  ;;  %v1664_v50 = vld [vmem:[%s2067_s8 + $0xe4] sm:$0xf]  ;;  %v1431_v62 = vor.u32 %v1648_v48, %v1428_v49 }
  0x84   : > { %1099 = vmatpush.bf16.msra.mxu2 %v1523_v7  ;;  %v1628_v41 = vld [vmem:[%s2067_s8 + $0x1f8] sm:$0xf0]  ;;  %v668_v45 = vld [vmem:[%s2044_s9] sm:$0xff]  ;;  %v1567_v47 = vor.u32 %v1682_v35, %v1564_v36  ;;  %v1492_v54 = vld [vmem:[%s2067_s8 + $0xe8] sm:$0xf0]  ;;  %v2150_v57 = vpack.c.b16 %v738_v37, %v738_v37  ;;  %v2154_v60 = vpack.c.b16 %v739_v42, %v739_v42 }
  0x85   : > { %1112 = vmatpush.bf16.msra.mxu3 %v1587_v11  ;;  %v736_v51 = vunpack.c.l.b16 %v668_v45  ;;  %v737_v52 = vunpack.c.h.b16 %v668_v45  ;;  %v1631_v53 = vor.u32 %v1698_v40, %v1628_v41  ;;  %v1680_v55 = vld [vmem:[%s2067_s8 + $0x164] sm:$0xf]  ;;  %v1556_v56 = vld [vmem:[%s2067_s8 + $0x168] sm:$0xf0]  ;;  %v1495_v0 = vor.u32 %v1664_v50, %v1492_v54  ;;  %v1646_v2 = vld [vmem:[%s2067_s8 + $0x54] sm:$0xf] }
  0x86   : > { %1074 = vmatpush.bf16.msra.mxu0 %v1387_v17  ;;  %v1696_v58 = vld [vmem:[%s2067_s8 + $0x1e4] sm:$0xf]  ;;  %v1620_v59 = vld [vmem:[%s2067_s8 + $0x1e8] sm:$0xf0]  ;;  %v1559_v1 = vor.u32 %v1680_v55, %v1556_v56  ;;  %v1420_v3 = vld [vmem:[%s2067_s8 + $0x58] sm:$0xf0] }
  0x87   : > { %1087 = vmatpush.bf16.msra.mxu1 %v1451_v21  ;;  %v2156_v61 = vpack.c.b16 %v736_v51, %v736_v51  ;;  %v2158_v63 = vpack.c.b16 %v737_v52, %v737_v52  ;;  %v1662_v4 = vld [vmem:[%s2067_s8 + $0xd4] sm:$0xf]  ;;  %v1623_v5 = vor.u32 %v1696_v58, %v1620_v59  ;;  %v1484_v6 = vld [vmem:[%s2067_s8 + $0xd8] sm:$0xf0]  ;;  %v1423_v11 = vor.u32 %v1646_v2, %v1420_v3  ;;  %v1644_v14 = vld [vmem:[%s2067_s8 + $0x44] sm:$0xf] }
  0x88   : > { %1100 = vmatpush.bf16.msra.mxu2 %v1515_v22  ;;  %v1678_v7 = vld [vmem:[%s2067_s8 + $0x154] sm:$0xf]  ;;  %v1548_v8 = vld [vmem:[%s2067_s8 + $0x158] sm:$0xf0]  ;;  %v1487_v12 = vor.u32 %v1662_v4, %v1484_v6  ;;  %v1412_v15 = vld [vmem:[%s2067_s8 + $0x48] sm:$0xf0] }
  0x89   : > { %1113 = vmatpush.bf16.msra.mxu3 %v1579_v26  ;;  %v1694_v9 = vld [vmem:[%s2067_s8 + $0x1d4] sm:$0xf]  ;;  %v1612_v10 = vld [vmem:[%s2067_s8 + $0x1d8] sm:$0xf0]  ;;  %v1551_v13 = vor.u32 %v1678_v7, %v1548_v8  ;;  %v1660_v16 = vld [vmem:[%s2067_s8 + $0xc4] sm:$0xf]  ;;  %v1415_v23 = vor.u32 %v1644_v14, %v1412_v15 }
  0x8a   : > { %1075 = vmatpush.bf16.msra.mxu0 %v1379_v33  ;;  %v1615_v17 = vor.u32 %v1694_v9, %v1612_v10  ;;  %v1476_v18 = vld [vmem:[%s2067_s8 + $0xc8] sm:$0xf0]  ;;  %v1676_v19 = vld [vmem:[%s2067_s8 + $0x144] sm:$0xf]  ;;  %v1642_v26 = vld [vmem:[%s2067_s8 + $0x34] sm:$0xf] }
  0x8b   : > { %1088 = vmatpush.bf16.msra.mxu1 %v1443_v38  ;;  %v1540_v20 = vld [vmem:[%s2067_s8 + $0x148] sm:$0xf0]  ;;  %v1692_v21 = vld [vmem:[%s2067_s8 + $0x1c4] sm:$0xf]  ;;  %v1479_v24 = vor.u32 %v1660_v16, %v1476_v18  ;;  %v1404_v27 = vld [vmem:[%s2067_s8 + $0x38] sm:$0xf0] }
  0x8c   : > { %1101 = vmatpush.bf16.msra.mxu2 %v1507_v39  ;;  %v1604_v22 = vld [vmem:[%s2067_s8 + $0x1c8] sm:$0xf0]  ;;  %v1543_v25 = vor.u32 %v1676_v19, %v1540_v20  ;;  %v1658_v28 = vld [vmem:[%s2067_s8 + $0xb4] sm:$0xf]  ;;  %v1468_v30 = vld [vmem:[%s2067_s8 + $0xb8] sm:$0xf0]  ;;  %v1407_v35 = vor.u32 %v1642_v26, %v1404_v27 }
  0x8d   : > { %1114 = vmatpush.bf16.msra.mxu3 %v1571_v43  ;;  %1076 = vmatmul.bf16.vlgmr.msra.gmra.mxu0 %v2156_v61  ;;  %v1607_v29 = vor.u32 %v1692_v21, %v1604_v22  ;;  %v1674_v31 = vld [vmem:[%s2067_s8 + $0x134] sm:$0xf]  ;;  %v1532_v32 = vld [vmem:[%s2067_s8 + $0x138] sm:$0xf0]  ;;  %v1471_v36 = vor.u32 %v1658_v28, %v1468_v30  ;;  %v1640_v38 = vld [vmem:[%s2067_s8 + $0x24] sm:$0xf] }
  0x8e   : > { %1120 = vmatpush.bf16.msrb.mxu0 %v1439_v44  ;;  %1089 = vmatmul.bf16.vlgmr.msra.gmra.mxu1 %v2158_v63  ;;  %v1690_v33 = vld [vmem:[%s2067_s8 + $0x1b4] sm:$0xf]  ;;  %v1596_v34 = vld [vmem:[%s2067_s8 + $0x1b8] sm:$0xf0]  ;;  %v1535_v37 = vor.u32 %v1674_v31, %v1532_v32  ;;  %v1396_v39 = vld [vmem:[%s2067_s8 + $0x28] sm:$0xf0] }
  0x8f   : > { %1133 = vmatpush.bf16.msrb.mxu1 %v1503_v46  ;;  %1102 = vmatmul.bf16.vlgmr.msra.gmra.mxu2 %v2150_v57  ;;  %v1656_v40 = vld [vmem:[%s2067_s8 + $0xa4] sm:$0xf]  ;;  %v1599_v41 = vor.u32 %v1690_v33, %v1596_v34  ;;  %v1460_v42 = vld [vmem:[%s2067_s8 + $0xa8] sm:$0xf0]  ;;  %v1638_v50 = vld [vmem:[%s2067_s8 + $0x14] sm:$0xf] }
  0x90   : > { %1146 = vmatpush.bf16.msrb.mxu2 %v1567_v47  ;;  %1115 = vmatmul.bf16.vlgmr.msra.gmra.mxu3 %v2154_v60  ;;  %v1672_v43 = vld [vmem:[%s2067_s8 + $0x124] sm:$0xf]  ;;  %v1524_v44 = vld [vmem:[%s2067_s8 + $0x128] sm:$0xf0]  ;;  %v1399_v47 = vor.u32 %v1640_v38, %v1396_v39  ;;  %v1463_v48 = vor.u32 %v1656_v40, %v1460_v42  ;;  %v1388_v51 = vld [vmem:[%s2067_s8 + $0x18] sm:$0xf0] }
  0x91   : > { %1159 = vmatpush.bf16.msrb.mxu3 %v1631_v53  ;;  %v1688_v45 = vld [vmem:[%s2067_s8 + $0x1a4] sm:$0xf]  ;;  %v1588_v46 = vld [vmem:[%s2067_s8 + $0x1a8] sm:$0xf0]  ;;  %v1527_v49 = vor.u32 %v1672_v43, %v1524_v44  ;;  %v1654_v52 = vld [vmem:[%s2067_s8 + $0x94] sm:$0xf] }
  0x92   : > { %1121 = vmatpush.bf16.msrb.mxu0 %v1431_v62  ;;  %v1591_v53 = vor.u32 %v1688_v45, %v1588_v46  ;;  %v1452_v54 = vld [vmem:[%s2067_s8 + $0x98] sm:$0xf0]  ;;  %v1670_v55 = vld [vmem:[%s2067_s8 + $0x114] sm:$0xf]  ;;  %v1391_v62 = vor.u32 %v1638_v50, %v1388_v51  ;;  %v1636_v2 = vld [vmem:[%s2067_s8 + $0x4] sm:$0xf] }
  0x93   : > { %1134 = vmatpush.bf16.msrb.mxu1 %v1495_v0  ;;  %v1516_v56 = vld [vmem:[%s2067_s8 + $0x118] sm:$0xf0]  ;;  %v1686_v58 = vld [vmem:[%s2067_s8 + $0x194] sm:$0xf]  ;;  %v1455_v0 = vor.u32 %v1654_v52, %v1452_v54  ;;  %v1380_v3 = vld [vmem:[%s2067_s8 + $0x8] sm:$0xf0] }
  0x94   : > { %1147 = vmatpush.bf16.msrb.mxu2 %v1559_v1  ;;  %v1580_v59 = vld [vmem:[%s2067_s8 + $0x198] sm:$0xf0]  ;;  %v1519_v1 = vor.u32 %v1670_v55, %v1516_v56  ;;  %v1652_v4 = vld [vmem:[%s2067_s8 + $0x84] sm:$0xf]  ;;  %v1444_v6 = vld [vmem:[%s2067_s8 + $0x88] sm:$0xf0] }
  0x95   : > { %1160 = vmatpush.bf16.msrb.mxu3 %v1623_v5  ;;  %v1583_v5 = vor.u32 %v1686_v58, %v1580_v59  ;;  %v1668_v7 = vld [vmem:[%s2067_s8 + $0x104] sm:$0xf]  ;;  %v1508_v8 = vld [vmem:[%s2067_s8 + $0x108] sm:$0xf0]  ;;  %v666_v21 = vld [vmem:[#allocation2] sm:$0xff] }
  0x96   : > { %1122 = vmatpush.bf16.msrb.mxu0 %v1423_v11  ;;  %v1684_v9 = vld [vmem:[%s2067_s8 + $0x184] sm:$0xf]  ;;  %v1572_v10 = vld [vmem:[%s2067_s8 + $0x188] sm:$0xf0]  ;;  %v1383_v11 = vor.u32 %v1636_v2, %v1380_v3  ;;  %v667_v31 = vld [vmem:[#allocation2 + $0x8] sm:$0xff] }
  0x97   : > { %1135 = vmatpush.bf16.msrb.mxu1 %v1487_v12  ;;  %v1447_v12 = vor.u32 %v1652_v4, %v1444_v6  ;;  %v1575_v14 = vor.u32 %v1684_v9, %v1572_v10 }
  0x98   : > { %1148 = vmatpush.bf16.msrb.mxu2 %v1551_v13  ;;  %v1511_v13 = vor.u32 %v1668_v7, %v1508_v8 }
  0x99   : > { %1161 = vmatpush.bf16.msrb.mxu3 %v1615_v17 }
  0x9a   : > { %1123 = vmatpush.bf16.msrb.mxu0 %v1415_v23 }
  0x9b   : > { %1136 = vmatpush.bf16.msrb.mxu1 %v1479_v24 }
  0x9c   : > { %1149 = vmatpush.bf16.msrb.mxu2 %v1543_v25 }
  0x9d   : > { %1162 = vmatpush.bf16.msrb.mxu3 %v1607_v29 }
  0x9e   : > { %1124 = vmatpush.bf16.msrb.mxu0 %v1407_v35 }
  0x9f   : > { %1137 = vmatpush.bf16.msrb.mxu1 %v1471_v36 }
  0xa0   : > { %1150 = vmatpush.bf16.msrb.mxu2 %v1535_v37 }
  0xa1   : > { %1163 = vmatpush.bf16.msrb.mxu3 %v1599_v41 }
  0xa2   : > { %1125 = vmatpush.bf16.msrb.mxu0 %v1399_v47 }
  0xa3   : > { %1138 = vmatpush.bf16.msrb.mxu1 %v1463_v48 }
  0xa4   : > { %1151 = vmatpush.bf16.msrb.mxu2 %v1527_v49 }
  0xa5   : > { %1164 = vmatpush.bf16.msrb.mxu3 %v1591_v53 }
  0xa6   : > { %1126 = vmatpush.bf16.msrb.mxu0 %v1391_v62 }
  0xa7   : > { %1139 = vmatpush.bf16.msrb.mxu1 %v1455_v0 }
  0xa8   : > { %1152 = vmatpush.bf16.msrb.mxu2 %v1519_v1 }
  0xa9   : > { %1165 = vmatpush.bf16.msrb.mxu3 %v1583_v5 }
  0xaa   : > { %1127 = vmatpush.bf16.msrb.mxu0 %v1383_v11 }
  0xab   : > { %1140 = vmatpush.bf16.msrb.mxu1 %v1447_v12 }
  0xac   : > { %1153 = vmatpush.bf16.msrb.mxu2 %v1511_v13 }
  0xad   : > { %1166 = vmatpush.bf16.msrb.mxu3 %v1575_v14  ;;  %1128 = vmatmul.bf16.vlgmr.msrb.gmra.mxu0 %v2156_v61 }
  0xae   : > { %1141 = vmatmul.bf16.vlgmr.msrb.gmra.mxu1 %v2158_v63 }
  0xaf   : > { %1154 = vmatmul.bf16.vlgmr.msrb.gmra.mxu2 %v2150_v57 }
  0xb0   : > { %1167 = vmatmul.bf16.vlgmr.msrb.gmra.mxu3 %v2154_v60 }
 0x10a   : > { %v1077_v15 = vpop.f32.mrf.mxu0 }
 0x10b   : > { %v1090_v16 = vpop.f32.mrf.mxu1 }
 0x10c   : > { %v1091_v17 = vadd.f32 %v1090_v16, %v1077_v15 }
 0x112   : > { %v1103_v18 = vpop.f32.mrf.mxu2  ;;  %v1079_v23 = vpop.f32.mrf.mxu0 }
 0x113   : > { %v1104_v19 = vadd.f32 %v1103_v18, %v1091_v17  ;;  %v1116_v20 = vpop.f32.mrf.mxu3  ;;  %v1092_v24 = vpop.f32.mrf.mxu1 }
 0x115   : > { %v1117_v22 = vadd.f32 %v1116_v20, %v1104_v19 }
 0x117   : > { %v1172_v25 = vadd.f32 %v1117_v22, %v666_v21 }
 0x119   : > { %1174 = vst [vmem:[#allocation2] sm:$0xff] %v1172_v25 }
 0x11a   : > { %v1105_v26 = vpop.f32.mrf.mxu2 }
 0x11b   : > { %v1118_v61 = vpop.f32.mrf.mxu3 }
 0x12a   : > { %v1129_v27 = vpop.f32.mrf.mxu0 }
 0x12b   : > { %v1142_v63 = vpop.f32.mrf.mxu1 }
 0x12c   : > { %v1143_v28 = vadd.f32 %v1142_v63, %v1129_v27 }
 0x132   : > { %v1155_v57 = vpop.f32.mrf.mxu2  ;;  %v1131_v30 = vpop.f32.mrf.mxu0 }
 0x133   : > { %v1156_v29 = vadd.f32 %v1155_v57, %v1143_v28  ;;  %v1168_v60 = vpop.f32.mrf.mxu3  ;;  %v1144_v32 = vpop.f32.mrf.mxu1 }
 0x135   : > { %v1169_v33 = vadd.f32 %v1168_v60, %v1156_v29 }
 0x137   : > { %v1173_v34 = vadd.f32 %v1169_v33, %v667_v31  ;;  %1179 = sbr.rel (%p1632_p13) target bundleno = 330 (0x14a), region = 86 }
 0x139   : > { %1175 = vst [vmem:[#allocation2 + $0x8] sm:$0xff] %v1173_v34 }
 0x13a   : > { %v1157_v35 = vpop.f32.mrf.mxu2 }
 0x13b   : > { %v1170_v36 = vpop.f32.mrf.mxu3 }
 0x13c   : > { %v1180_v37 = vld [vmem:[#allocation2] sm:$0xff]  ;;  %v1199_v48 = vld [vmem:[%s2060_s17 + $0x8] sm:$0xff] }
 0x13d   : > { %v1182_v38 = vld [vmem:[%s633_s18] sm:$0x3] }
 0x13e   : > { %v1190_v39 = vld [vmem:[%s638_s21] sm:$0x3]  ;;  %v1184_v40 = vperm.slane %v1182_v38, 0  ;;  %v1185_v43 = vperm.slane %v1182_v38, 1 }
 0x13f   : > { %v1192_v41 = vperm.slane %v1190_v39, 0  ;;  %v1193_v44 = vperm.slane %v1190_v39, 1  ;;  %v1198_v47 = vld [vmem:[%s2060_s17] sm:$0xff] }
 0x140   : > { %v1181_v42 = vld [vmem:[#allocation2 + $0x8] sm:$0xff]  ;;  %v1188_v45 = vmul.f32 %v1184_v40, %v1180_v37 }
 0x141   : > { %v1189_v46 = vmul.f32 %v1185_v43, %v1181_v42 }
 0x142   : > { %v1196_v49 = vadd.f32 %v1192_v41, %v1188_v45 }
 0x143   : > { %v1197_v50 = vadd.f32 %v1193_v44, %v1189_v46 }
 0x144   : > { %v1200_v51 = vadd.f32 %v1198_v47, %v1196_v49 }
 0x145   : > { %v1201_v52 = vadd.f32 %v1199_v48, %v1197_v50 }
 0x146   : > { %v1202_v53 = vmax.f32 %v1200_v51, 0.0 }
 0x147   : > { %v1203_v54 = vmax.f32 %v1201_v52, 0.0 }
 0x148   : > { %1204 = vst [vmem:[%s2065_s7] sm:$0xff] %v1202_v53 }
 0x149   : > { %1205 = vst [vmem:[%s2065_s7 + $0x8] sm:$0xff] %v1203_v54 }
 0x14a PF: > { %s15_s24 = sadd.s32 1, %s1811_s24   ;;  %s2258_s18 = smov %s1791_s19 }
 0x14b   : > { %p12_p0 = scmp.ge.s32.totalorder %s15_s24, 20   ;;  %s2259_s19 = smov %s1895_s6 }
 0x14c   : > { %s2260_s20 = smov %s1803_s22  ;;  %s2261_s21 = smov %s1807_s23 }
 0x14d   : > { %s2262_s22 = smov %s2265_s25  ;;  %s2263_s23 = smov %s2269_s26 }
 0x14e   :  { %14 = sbr.rel (!%p12_p0) target bundleno = 4 (0x4), region = 133 }

// kernel: single_baseline_forward.41
= control target key start
LH: loop header
LB: loop body
LE: loop exit
PB: predicated region body
PF: predicated region fallthrough
CT: control target
= control target key end

     0   :  { %s1752_s15 = smov 0   ;;  %s1754_s16 = smov 0   ;;  %s2153_s0 = inlined_call_operand.vmem [shape: bf16[8,4608], index: 0, kind: input, shape index: {}]   ;;  %s2154_s1 = inlined_call_operand.vmem [shape: bf16[4608,512], index: 1, kind: input, shape index: {}]   ;;  %s2155_s2 = inlined_call_operand.vmem [shape: f32[1,512], index: 2, kind: input, shape index: {}]   ;;  %s2156_s3 = inlined_call_operand.vmem [shape: f32[1,512], index: 3, kind: input, shape index: {}]   ;;  %s2157_s4 = inlined_call_operand.vmem [shape: f32[8,512], index: 4, kind: output, shape index: {}]  }
   0x1   :  { %s1756_s17 = smov 0   ;;  %s1758_s18 = smov 0  }
   0x2   :  { %s1760_s19 = smov 0   ;;  %s1762_s20 = smov 0  }
   0x3   :  { %s1764_s21 = smov 0  }
   0x4 LB: > { %s26_s22 = sadd.s32 1, %s1716_s19  ;;  %s29_s23 = sadd.s32 1, %s1720_s20  ;;  %s1724_s21 = sphi %s1764_s21, %s14_s21   ;;  %s1720_s20 = sphi %s1762_s20, %s2163_s20   ;;  %s1716_s19 = sphi %s1760_s19, %s2162_s19   ;;  %s1712_s18 = sphi %s1758_s18, %s2161_s18   ;;  %s1708_s17 = sphi %s1756_s17, %s2160_s17   ;;  %s1704_s16 = sphi %s1754_s16, %s2159_s16   ;;  %s1700_s15 = sphi %s1752_s15, %s2158_s15  }
   0x5   : > { %p27_p0 = scmp.ge.s32.totalorder %s26_s22, 9  ;;  %p77_p1 = scmp.ne.s32.totalorder %s1704_s16, %s1700_s15 }
   0x6   : > { %p78_p2 = scmp.eq.s32.totalorder %s1724_s21, 0  ;;  %s70_s27 = sadd.s32 1, %s1704_s16 }
   0x7   : > { %s2165_s22 = smov (%p27_p0, %s26_s22), 0  ;;  %s2167_s23 = smov (!%p27_p0, %s29_s23), %s1720_s20 }
   0x8   : > { %p79_p3 = por %p78_p2, %p77_p1  ;;  %p31_p4 = scmp.ge.s32.totalorder %s2167_s23, 2 }
   0x9   : > { %s65_s24 = ssub.s32 %s1716_s19, %s2165_s22  ;;  %p1274_p6 = scmp.ge.s32.totalorder %s1724_s21, 18 }
   0xa   : > { %s2169_s23 = smov (%p31_p4, %s2167_s23), 0 }
   0xb   : > { %s66_s25 = ssub.s32 %s1720_s20, %s2169_s23  ;;  %183 = sbr.rel (%p1274_p6) target bundleno = 87 (0x57), region = 16 }
   0xc   : > { %s67_s26 = sor.u32 %s66_s25, %s65_s24 }
   0xd   : > { %p68_p5 = scmp.eq.s32.totalorder %s67_s26, 0 }
   0xf   : > { %s1803_s28 = scalar_select %p68_p5, %s1704_s16, %s70_s27  }
  0x10   : > { %199 = sbr.rel (!%p79_p3) target bundleno = 87 (0x57), region = 24  ;;  %s201_s29 = sand.u32 (%p79_p3), 1, %s1704_s16  }
  0x11   : > { %s1277_s30 = sshll.u32 (%p79_p3), %s1720_s20, 1  ;;  %s1275_s5 = sshll.u32 (%p79_p3), %s201_s29, 9 }
  0x12   : > { %s1548_s6 = sshll.u32 (%p79_p3), %s1716_s19, 8  ;;  %s1817_s12 = scalar_lea.vmem (%p79_p3), [#allocation3], %s1275_s5 }
  0x13   : > { %s207_s7 = sadd.s32 (%p79_p3), %s1548_s6, %s1277_s30 }
  0x14   : > { %s1279_s8 = sshll.u32 (%p79_p3), %s207_s7, 2 }
  0x15   : > { %s1812_s11 = scalar_lea.vmem %s2154_s1, %s1279_s8 }
  0x16   : > { %v364_v0 = vld [vmem:[%s1812_s11] sm:$0xff]  ;;  %v366_v1 = vld [vmem:[%s1812_s11 + $0x10] sm:$0xff] }
  0x17   : > { %v368_v2 = vld [vmem:[%s1812_s11 + $0x20] sm:$0xff]  ;;  %365 = vst [vmem:[%s1817_s12] sm:$0xff] %v364_v0  ;;  %v370_v3 = vld [vmem:[%s1812_s11 + $0x30] sm:$0xff] }
  0x18   : > { %367 = vst [vmem:[%s1817_s12 + $0x8] sm:$0xff] %v366_v1  ;;  %v372_v4 = vld [vmem:[%s1812_s11 + $0x40] sm:$0xff]  ;;  %v374_v5 = vld [vmem:[%s1812_s11 + $0x50] sm:$0xff] }
  0x19   : > { %369 = vst [vmem:[%s1817_s12 + $0x10] sm:$0xff] %v368_v2  ;;  %v376_v6 = vld [vmem:[%s1812_s11 + $0x60] sm:$0xff]  ;;  %v378_v7 = vld [vmem:[%s1812_s11 + $0x70] sm:$0xff] }
  0x1a   : > { %371 = vst [vmem:[%s1817_s12 + $0x18] sm:$0xff] %v370_v3  ;;  %v380_v8 = vld [vmem:[%s1812_s11 + $0x80] sm:$0xff]  ;;  %v382_v9 = vld [vmem:[%s1812_s11 + $0x90] sm:$0xff] }
  0x1b   : > { %373 = vst [vmem:[%s1817_s12 + $0x20] sm:$0xff] %v372_v4  ;;  %v384_v10 = vld [vmem:[%s1812_s11 + $0xa0] sm:$0xff]  ;;  %v386_v11 = vld [vmem:[%s1812_s11 + $0xb0] sm:$0xff] }
  0x1c   : > { %375 = vst [vmem:[%s1817_s12 + $0x28] sm:$0xff] %v374_v5  ;;  %v388_v12 = vld [vmem:[%s1812_s11 + $0xc0] sm:$0xff]  ;;  %v390_v13 = vld [vmem:[%s1812_s11 + $0xd0] sm:$0xff] }
  0x1d   : > { %377 = vst [vmem:[%s1817_s12 + $0x30] sm:$0xff] %v376_v6  ;;  %v392_v14 = vld [vmem:[%s1812_s11 + $0xe0] sm:$0xff]  ;;  %v394_v15 = vld [vmem:[%s1812_s11 + $0xf0] sm:$0xff] }
  0x1e   : > { %379 = vst [vmem:[%s1817_s12 + $0x38] sm:$0xff] %v378_v7  ;;  %v396_v16 = vld [vmem:[%s1812_s11 + $0x100] sm:$0xff]  ;;  %v398_v17 = vld [vmem:[%s1812_s11 + $0x110] sm:$0xff] }
  0x1f   : > { %381 = vst [vmem:[%s1817_s12 + $0x40] sm:$0xff] %v380_v8  ;;  %v400_v18 = vld [vmem:[%s1812_s11 + $0x120] sm:$0xff]  ;;  %v402_v19 = vld [vmem:[%s1812_s11 + $0x130] sm:$0xff] }
  0x20   : > { %383 = vst [vmem:[%s1817_s12 + $0x48] sm:$0xff] %v382_v9  ;;  %v404_v20 = vld [vmem:[%s1812_s11 + $0x140] sm:$0xff]  ;;  %v406_v21 = vld [vmem:[%s1812_s11 + $0x150] sm:$0xff] }
  0x21   : > { %385 = vst [vmem:[%s1817_s12 + $0x50] sm:$0xff] %v384_v10  ;;  %v408_v22 = vld [vmem:[%s1812_s11 + $0x160] sm:$0xff]  ;;  %v410_v23 = vld [vmem:[%s1812_s11 + $0x170] sm:$0xff] }
  0x22   : > { %387 = vst [vmem:[%s1817_s12 + $0x58] sm:$0xff] %v386_v11  ;;  %v412_v24 = vld [vmem:[%s1812_s11 + $0x180] sm:$0xff]  ;;  %v414_v25 = vld [vmem:[%s1812_s11 + $0x190] sm:$0xff] }
  0x23   : > { %389 = vst [vmem:[%s1817_s12 + $0x60] sm:$0xff] %v388_v12  ;;  %v416_v26 = vld [vmem:[%s1812_s11 + $0x1a0] sm:$0xff]  ;;  %v418_v27 = vld [vmem:[%s1812_s11 + $0x1b0] sm:$0xff] }
  0x24   : > { %391 = vst [vmem:[%s1817_s12 + $0x68] sm:$0xff] %v390_v13  ;;  %v420_v28 = vld [vmem:[%s1812_s11 + $0x1c0] sm:$0xff]  ;;  %v422_v29 = vld [vmem:[%s1812_s11 + $0x1d0] sm:$0xff] }
  0x25   : > { %393 = vst [vmem:[%s1817_s12 + $0x70] sm:$0xff] %v392_v14  ;;  %v424_v30 = vld [vmem:[%s1812_s11 + $0x1e0] sm:$0xff]  ;;  %v426_v31 = vld [vmem:[%s1812_s11 + $0x1f0] sm:$0xff] }
  0x26   : > { %395 = vst [vmem:[%s1817_s12 + $0x78] sm:$0xff] %v394_v15  ;;  %v428_v32 = vld [vmem:[%s1812_s11 + $0x200] sm:$0xff]  ;;  %v430_v33 = vld [vmem:[%s1812_s11 + $0x210] sm:$0xff] }
  0x27   : > { %397 = vst [vmem:[%s1817_s12 + $0x80] sm:$0xff] %v396_v16  ;;  %v432_v34 = vld [vmem:[%s1812_s11 + $0x220] sm:$0xff]  ;;  %v434_v35 = vld [vmem:[%s1812_s11 + $0x230] sm:$0xff] }
  0x28   : > { %399 = vst [vmem:[%s1817_s12 + $0x88] sm:$0xff] %v398_v17  ;;  %v436_v36 = vld [vmem:[%s1812_s11 + $0x240] sm:$0xff]  ;;  %v438_v37 = vld [vmem:[%s1812_s11 + $0x250] sm:$0xff] }
  0x29   : > { %401 = vst [vmem:[%s1817_s12 + $0x90] sm:$0xff] %v400_v18  ;;  %v440_v38 = vld [vmem:[%s1812_s11 + $0x260] sm:$0xff]  ;;  %v442_v39 = vld [vmem:[%s1812_s11 + $0x270] sm:$0xff] }
  0x2a   : > { %403 = vst [vmem:[%s1817_s12 + $0x98] sm:$0xff] %v402_v19  ;;  %v444_v40 = vld [vmem:[%s1812_s11 + $0x280] sm:$0xff]  ;;  %v446_v41 = vld [vmem:[%s1812_s11 + $0x290] sm:$0xff] }
  0x2b   : > { %405 = vst [vmem:[%s1817_s12 + $0xa0] sm:$0xff] %v404_v20  ;;  %v448_v42 = vld [vmem:[%s1812_s11 + $0x2a0] sm:$0xff]  ;;  %v450_v43 = vld [vmem:[%s1812_s11 + $0x2b0] sm:$0xff] }
  0x2c   : > { %407 = vst [vmem:[%s1817_s12 + $0xa8] sm:$0xff] %v406_v21  ;;  %v452_v44 = vld [vmem:[%s1812_s11 + $0x2c0] sm:$0xff]  ;;  %v454_v45 = vld [vmem:[%s1812_s11 + $0x2d0] sm:$0xff] }
  0x2d   : > { %409 = vst [vmem:[%s1817_s12 + $0xb0] sm:$0xff] %v408_v22  ;;  %v456_v46 = vld [vmem:[%s1812_s11 + $0x2e0] sm:$0xff]  ;;  %v458_v47 = vld [vmem:[%s1812_s11 + $0x2f0] sm:$0xff] }
  0x2e   : > { %411 = vst [vmem:[%s1817_s12 + $0xb8] sm:$0xff] %v410_v23  ;;  %v460_v48 = vld [vmem:[%s1812_s11 + $0x300] sm:$0xff]  ;;  %v462_v49 = vld [vmem:[%s1812_s11 + $0x310] sm:$0xff] }
  0x2f   : > { %413 = vst [vmem:[%s1817_s12 + $0xc0] sm:$0xff] %v412_v24  ;;  %v464_v50 = vld [vmem:[%s1812_s11 + $0x320] sm:$0xff]  ;;  %v466_v51 = vld [vmem:[%s1812_s11 + $0x330] sm:$0xff] }
  0x30   : > { %415 = vst [vmem:[%s1817_s12 + $0xc8] sm:$0xff] %v414_v25  ;;  %v468_v52 = vld [vmem:[%s1812_s11 + $0x340] sm:$0xff]  ;;  %v470_v53 = vld [vmem:[%s1812_s11 + $0x350] sm:$0xff] }
  0x31   : > { %417 = vst [vmem:[%s1817_s12 + $0xd0] sm:$0xff] %v416_v26  ;;  %v472_v54 = vld [vmem:[%s1812_s11 + $0x360] sm:$0xff]  ;;  %v474_v55 = vld [vmem:[%s1812_s11 + $0x370] sm:$0xff] }
  0x32   : > { %419 = vst [vmem:[%s1817_s12 + $0xd8] sm:$0xff] %v418_v27  ;;  %v476_v56 = vld [vmem:[%s1812_s11 + $0x380] sm:$0xff]  ;;  %v478_v57 = vld [vmem:[%s1812_s11 + $0x390] sm:$0xff] }
  0x33   : > { %421 = vst [vmem:[%s1817_s12 + $0xe0] sm:$0xff] %v420_v28  ;;  %v480_v58 = vld [vmem:[%s1812_s11 + $0x3a0] sm:$0xff]  ;;  %v482_v59 = vld [vmem:[%s1812_s11 + $0x3b0] sm:$0xff] }
  0x34   : > { %423 = vst [vmem:[%s1817_s12 + $0xe8] sm:$0xff] %v422_v29  ;;  %v484_v60 = vld [vmem:[%s1812_s11 + $0x3c0] sm:$0xff]  ;;  %v486_v61 = vld [vmem:[%s1812_s11 + $0x3d0] sm:$0xff] }
  0x35   : > { %425 = vst [vmem:[%s1817_s12 + $0xf0] sm:$0xff] %v424_v30  ;;  %v488_v62 = vld [vmem:[%s1812_s11 + $0x3e0] sm:$0xff]  ;;  %v490_v63 = vld [vmem:[%s1812_s11 + $0x3f0] sm:$0xff] }
  0x36   : > { %427 = vst [vmem:[%s1817_s12 + $0xf8] sm:$0xff] %v426_v31 }
  0x37   : > { %429 = vst [vmem:[%s1817_s12 + $0x100] sm:$0xff] %v428_v32 }
  0x38   : > { %431 = vst [vmem:[%s1817_s12 + $0x108] sm:$0xff] %v430_v33 }
  0x39   : > { %433 = vst [vmem:[%s1817_s12 + $0x110] sm:$0xff] %v432_v34 }
  0x3a   : > { %435 = vst [vmem:[%s1817_s12 + $0x118] sm:$0xff] %v434_v35 }
  0x3b   : > { %437 = vst [vmem:[%s1817_s12 + $0x120] sm:$0xff] %v436_v36 }
  0x3c   : > { %439 = vst [vmem:[%s1817_s12 + $0x128] sm:$0xff] %v438_v37 }
  0x3d   : > { %441 = vst [vmem:[%s1817_s12 + $0x130] sm:$0xff] %v440_v38 }
  0x3e   : > { %443 = vst [vmem:[%s1817_s12 + $0x138] sm:$0xff] %v442_v39 }
  0x3f   : > { %445 = vst [vmem:[%s1817_s12 + $0x140] sm:$0xff] %v444_v40 }
  0x40   : > { %447 = vst [vmem:[%s1817_s12 + $0x148] sm:$0xff] %v446_v41 }
  0x41   : > { %449 = vst [vmem:[%s1817_s12 + $0x150] sm:$0xff] %v448_v42 }
  0x42   : > { %451 = vst [vmem:[%s1817_s12 + $0x158] sm:$0xff] %v450_v43 }
  0x43   : > { %453 = vst [vmem:[%s1817_s12 + $0x160] sm:$0xff] %v452_v44 }
  0x44   : > { %455 = vst [vmem:[%s1817_s12 + $0x168] sm:$0xff] %v454_v45 }
  0x45   : > { %457 = vst [vmem:[%s1817_s12 + $0x170] sm:$0xff] %v456_v46 }
  0x46   : > { %459 = vst [vmem:[%s1817_s12 + $0x178] sm:$0xff] %v458_v47 }
  0x47   : > { %461 = vst [vmem:[%s1817_s12 + $0x180] sm:$0xff] %v460_v48 }
  0x48   : > { %463 = vst [vmem:[%s1817_s12 + $0x188] sm:$0xff] %v462_v49 }
  0x49   : > { %465 = vst [vmem:[%s1817_s12 + $0x190] sm:$0xff] %v464_v50 }
  0x4a   : > { %467 = vst [vmem:[%s1817_s12 + $0x198] sm:$0xff] %v466_v51 }
  0x4b   : > { %469 = vst [vmem:[%s1817_s12 + $0x1a0] sm:$0xff] %v468_v52 }
  0x4c   : > { %471 = vst [vmem:[%s1817_s12 + $0x1a8] sm:$0xff] %v470_v53 }
  0x4d   : > { %473 = vst [vmem:[%s1817_s12 + $0x1b0] sm:$0xff] %v472_v54 }
  0x4e   : > { %475 = vst [vmem:[%s1817_s12 + $0x1b8] sm:$0xff] %v474_v55 }
  0x4f   : > { %477 = vst [vmem:[%s1817_s12 + $0x1c0] sm:$0xff] %v476_v56 }
  0x50   : > { %479 = vst [vmem:[%s1817_s12 + $0x1c8] sm:$0xff] %v478_v57 }
  0x51   : > { %481 = vst [vmem:[%s1817_s12 + $0x1d0] sm:$0xff] %v480_v58 }
  0x52   : > { %483 = vst [vmem:[%s1817_s12 + $0x1d8] sm:$0xff] %v482_v59 }
  0x53   : > { %485 = vst [vmem:[%s1817_s12 + $0x1e0] sm:$0xff] %v484_v60 }
  0x54   : > { %487 = vst [vmem:[%s1817_s12 + $0x1e8] sm:$0xff] %v486_v61 }
  0x55   : > { %489 = vst [vmem:[%s1817_s12 + $0x1f0] sm:$0xff] %v488_v62 }
  0x56   : > { %491 = vst [vmem:[%s1817_s12 + $0x1f8] sm:$0xff] %v490_v63 }
  0x57 PF: > { %p1280_p7 = scmp.ge.s32.totalorder %s1724_s21, 1  ;;  %p512_p8 = scmp.lt.s32.totalorder %s1724_s21, 19 }
  0x59   : > { %p513_p9 = pnand %p1280_p7, %p512_p8 }
  0x5a   : > { %s519_s13 = sand.u32 (!%p513_p9), 1, %s1700_s15   ;;  %s1282_s14 = sshll.u32 (!%p513_p9), %s1708_s17, 2 }
  0x5b   : > { %516 = sbr.rel (%p513_p9) target bundleno = 328 (0x148), region = 70  ;;  %s1281_s24 = sshll.u32 (!%p513_p9), %s519_s13, 9 }
  0x5c   : > { %p568_p10 = scmp.lt.s32.totalorder (!%p513_p9), %s1282_s14, 35  ;;  %s1284_s25 = sshll.u32 (!%p513_p9), %s1712_s18, 1 }
  0x5d   : > { %p578_p11 = scmp.lt.s32.totalorder (!%p513_p9), %s1284_s25, 3  ;;  %s1970_s13 = scalar_lea.vmem (!%p513_p9), [#allocation3], %s1281_s24 }
  0x5e   : > { %p1288_p12 = scmp.ne.s32.totalorder (!%p513_p9), %s1708_s17, 0 }
  0x60   : > { %s2171_s14 = smov (!%p568_p10, %s1282_s14), 35  ;;  %s2173_s25 = smov (!%p578_p11, %s1284_s25), 3 }
  0x61   : > { %s1283_s26 = sshll.u32 %s2171_s14, 2  ;;  %s580_s15 = scalar_lea.vmem %s2155_s2, %s2173_s25 }
  0x62   : > { %s1952_s30 = scalar_lea.vmem %s2153_s0, %s1283_s26  ;;  %s585_s18 = scalar_lea.vmem %s2156_s3, %s2173_s25 }
  0x63   : > { %s1287_s9 = sshll.u32 %s2173_s25, 3  ;;  %600 = sbr.rel (%p1288_p12) target bundleno = 107 (0x6b), region = 78 }
  0x64   : > { %s1968_s12 = scalar_lea.vmem %s2157_s4, %s1287_s9 }
  0x68   : > { %v1726_v0 = vmov 0.0  }
  0x69   : > { %601 = vst [vmem:[#allocation2] sm:$0xff] %v1726_v0 }
  0x6a   : > { %602 = vst [vmem:[#allocation2 + $0x8] sm:$0xff] %v1726_v0 }
  0x6b PF: > { %v1347_v1 = vld [vmem:[%s1970_s13 + $0x70] sm:$0xf]  ;;  %v1564_v2 = vld [vmem:[%s1970_s13 + $0x74] sm:$0xf0]  ;;  %v1339_v12 = vld [vmem:[%s1970_s13 + $0x60] sm:$0xf] }
  0x6c   : > { %v1411_v3 = vld [vmem:[%s1970_s13 + $0xf0] sm:$0xf]  ;;  %v1348_v4 = vor.u32 %v1564_v2, %v1347_v1  ;;  %v1580_v5 = vld [vmem:[%s1970_s13 + $0xf4] sm:$0xf0]  ;;  %v1562_v14 = vld [vmem:[%s1970_s13 + $0x64] sm:$0xf0] }
  0x6d   : > { %v1475_v6 = vld [vmem:[%s1970_s13 + $0x170] sm:$0xf]  ;;  %v1596_v7 = vld [vmem:[%s1970_s13 + $0x174] sm:$0xf0]  ;;  %v1412_v8 = vor.u32 %v1580_v5, %v1411_v3  ;;  %v1403_v15 = vld [vmem:[%s1970_s13 + $0xe0] sm:$0xf]  ;;  %v1340_v17 = vor.u32 %v1562_v14, %v1339_v12 }
  0x6e   : > { %v1476_v9 = vor.u32 %v1596_v7, %v1475_v6  ;;  %v1539_v10 = vld [vmem:[%s1970_s13 + $0x1f0] sm:$0xf]  ;;  %v1612_v11 = vld [vmem:[%s1970_s13 + $0x1f4] sm:$0xf0]  ;;  %1005 = vmatpush.bf16.msra.mxu0 %v1348_v4  ;;  %v1578_v16 = vld [vmem:[%s1970_s13 + $0xe4] sm:$0xf0] }
  0x6f   : > { %v1540_v13 = vor.u32 %v1612_v11, %v1539_v10  ;;  %1018 = vmatpush.bf16.msra.mxu1 %v1412_v8  ;;  %v1404_v18 = vor.u32 %v1578_v16, %v1403_v15  ;;  %v1467_v19 = vld [vmem:[%s1970_s13 + $0x160] sm:$0xf]  ;;  %v1594_v20 = vld [vmem:[%s1970_s13 + $0x164] sm:$0xf0]  ;;  %v1331_v24 = vld [vmem:[%s1970_s13 + $0x50] sm:$0xf] }
  0x70   : > { %1031 = vmatpush.bf16.msra.mxu2 %v1476_v9  ;;  %v1531_v21 = vld [vmem:[%s1970_s13 + $0x1e0] sm:$0xf]  ;;  %v1468_v22 = vor.u32 %v1594_v20, %v1467_v19  ;;  %v1610_v23 = vld [vmem:[%s1970_s13 + $0x1e4] sm:$0xf0]  ;;  %v1560_v25 = vld [vmem:[%s1970_s13 + $0x54] sm:$0xf0] }
  0x71   : > { %1044 = vmatpush.bf16.msra.mxu3 %v1540_v13  ;;  %v1532_v26 = vor.u32 %v1610_v23, %v1531_v21  ;;  %v1395_v27 = vld [vmem:[%s1970_s13 + $0xd0] sm:$0xf]  ;;  %v1576_v28 = vld [vmem:[%s1970_s13 + $0xd4] sm:$0xf0]  ;;  %v1332_v30 = vor.u32 %v1560_v25, %v1331_v24  ;;  %v1323_v36 = vld [vmem:[%s1970_s13 + $0x40] sm:$0xf] }
  0x72   : > { %v1459_v29 = vld [vmem:[%s1970_s13 + $0x150] sm:$0xf]  ;;  %1006 = vmatpush.bf16.msra.mxu0 %v1340_v17  ;;  %v1592_v31 = vld [vmem:[%s1970_s13 + $0x154] sm:$0xf0]  ;;  %v1396_v34 = vor.u32 %v1576_v28, %v1395_v27  ;;  %v1558_v37 = vld [vmem:[%s1970_s13 + $0x44] sm:$0xf0] }
  0x73   : > { %v1523_v32 = vld [vmem:[%s1970_s13 + $0x1d0] sm:$0xf]  ;;  %v1608_v33 = vld [vmem:[%s1970_s13 + $0x1d4] sm:$0xf0]  ;;  %1019 = vmatpush.bf16.msra.mxu1 %v1404_v18  ;;  %v1460_v35 = vor.u32 %v1592_v31, %v1459_v29  ;;  %v1387_v38 = vld [vmem:[%s1970_s13 + $0xc0] sm:$0xf]  ;;  %v1324_v45 = vor.u32 %v1558_v37, %v1323_v36 }
  0x74   : > { %1032 = vmatpush.bf16.msra.mxu2 %v1468_v22  ;;  %v1524_v39 = vor.u32 %v1608_v33, %v1523_v32  ;;  %v1574_v40 = vld [vmem:[%s1970_s13 + $0xc4] sm:$0xf0]  ;;  %v1451_v41 = vld [vmem:[%s1970_s13 + $0x140] sm:$0xf]  ;;  %v1315_v48 = vld [vmem:[%s1970_s13 + $0x30] sm:$0xf] }
  0x75   : > { %1045 = vmatpush.bf16.msra.mxu3 %v1532_v26  ;;  %v1590_v42 = vld [vmem:[%s1970_s13 + $0x144] sm:$0xf0]  ;;  %v1515_v43 = vld [vmem:[%s1970_s13 + $0x1c0] sm:$0xf]  ;;  %v1388_v46 = vor.u32 %v1574_v40, %v1387_v38  ;;  %v1556_v49 = vld [vmem:[%s1970_s13 + $0x34] sm:$0xf0] }
  0x76   : > { %v1606_v44 = vld [vmem:[%s1970_s13 + $0x1c4] sm:$0xf0]  ;;  %1007 = vmatpush.bf16.msra.mxu0 %v1332_v30  ;;  %v1452_v47 = vor.u32 %v1590_v42, %v1451_v41  ;;  %v1379_v50 = vld [vmem:[%s1970_s13 + $0xb0] sm:$0xf]  ;;  %v1572_v52 = vld [vmem:[%s1970_s13 + $0xb4] sm:$0xf0]  ;;  %v1316_v57 = vor.u32 %v1556_v49, %v1315_v48 }
  0x77   : > { %1020 = vmatpush.bf16.msra.mxu1 %v1396_v34  ;;  %v1516_v51 = vor.u32 %v1606_v44, %v1515_v43  ;;  %v1443_v53 = vld [vmem:[%s1970_s13 + $0x130] sm:$0xf]  ;;  %v1588_v54 = vld [vmem:[%s1970_s13 + $0x134] sm:$0xf0]  ;;  %v1380_v58 = vor.u32 %v1572_v52, %v1379_v50  ;;  %v1307_v60 = vld [vmem:[%s1970_s13 + $0x20] sm:$0xf] }
  0x78   : > { %1033 = vmatpush.bf16.msra.mxu2 %v1460_v35  ;;  %v1507_v55 = vld [vmem:[%s1970_s13 + $0x1b0] sm:$0xf]  ;;  %v1604_v56 = vld [vmem:[%s1970_s13 + $0x1b4] sm:$0xf0]  ;;  %v1444_v59 = vor.u32 %v1588_v54, %v1443_v53  ;;  %v1554_v61 = vld [vmem:[%s1970_s13 + $0x24] sm:$0xf0] }
  0x79   : > { %1046 = vmatpush.bf16.msra.mxu3 %v1524_v39  ;;  %v1371_v62 = vld [vmem:[%s1970_s13 + $0xa0] sm:$0xf]  ;;  %v1508_v63 = vor.u32 %v1604_v56, %v1507_v55  ;;  %v1570_v0 = vld [vmem:[%s1970_s13 + $0xa4] sm:$0xf0]  ;;  %v1308_v5 = vor.u32 %v1554_v61, %v1307_v60  ;;  %v1299_v8 = vld [vmem:[%s1970_s13 + $0x10] sm:$0xf] }
  0x7a   : > { %1008 = vmatpush.bf16.msra.mxu0 %v1324_v45  ;;  %v1435_v1 = vld [vmem:[%s1970_s13 + $0x120] sm:$0xf]  ;;  %v1586_v2 = vld [vmem:[%s1970_s13 + $0x124] sm:$0xf0]  ;;  %v1372_v6 = vor.u32 %v1570_v0, %v1371_v62  ;;  %v1552_v9 = vld [vmem:[%s1970_s13 + $0x14] sm:$0xf0] }
  0x7b   : > { %1021 = vmatpush.bf16.msra.mxu1 %v1388_v46  ;;  %v1499_v3 = vld [vmem:[%s1970_s13 + $0x1a0] sm:$0xf]  ;;  %v1602_v4 = vld [vmem:[%s1970_s13 + $0x1a4] sm:$0xf0]  ;;  %v1436_v7 = vor.u32 %v1586_v2, %v1435_v1  ;;  %v1363_v10 = vld [vmem:[%s1970_s13 + $0x90] sm:$0xf]  ;;  %v1300_v17 = vor.u32 %v1552_v9, %v1299_v8 }
  0x7c   : > { %1034 = vmatpush.bf16.msra.mxu2 %v1452_v47  ;;  %v1500_v11 = vor.u32 %v1602_v4, %v1499_v3  ;;  %v1568_v12 = vld [vmem:[%s1970_s13 + $0x94] sm:$0xf0]  ;;  %v1427_v13 = vld [vmem:[%s1970_s13 + $0x110] sm:$0xf]  ;;  %v1291_v18 = vld [vmem:[%s1970_s13] sm:$0xf] }
  0x7d   : > { %1047 = vmatpush.bf16.msra.mxu3 %v1516_v51  ;;  %v1584_v14 = vld [vmem:[%s1970_s13 + $0x114] sm:$0xf0]  ;;  %v1491_v15 = vld [vmem:[%s1970_s13 + $0x190] sm:$0xf]  ;;  %v1550_v19 = vld [vmem:[%s1970_s13 + $0x4] sm:$0xf0]  ;;  %v1364_v21 = vor.u32 %v1568_v12, %v1363_v10 }
  0x7e   : > { %1009 = vmatpush.bf16.msra.mxu0 %v1316_v57  ;;  %v1600_v16 = vld [vmem:[%s1970_s13 + $0x194] sm:$0xf0]  ;;  %v1355_v20 = vld [vmem:[%s1970_s13 + $0x80] sm:$0xf]  ;;  %v1428_v22 = vor.u32 %v1584_v14, %v1427_v13  ;;  %v1566_v23 = vld [vmem:[%s1970_s13 + $0x84] sm:$0xf0]  ;;  %v1292_v33 = vor.u32 %v1550_v19, %v1291_v18 }
  0x7f   : > { %1022 = vmatpush.bf16.msra.mxu1 %v1380_v58  ;;  %v1419_v24 = vld [vmem:[%s1970_s13 + $0x100] sm:$0xf]  ;;  %v1582_v25 = vld [vmem:[%s1970_s13 + $0x104] sm:$0xf0]  ;;  %v1492_v26 = vor.u32 %v1600_v16, %v1491_v15  ;;  %v1563_v29 = vld [vmem:[%s1970_s13 + $0x74] sm:$0xf]  ;;  %v1356_v38 = vor.u32 %v1566_v23, %v1355_v20 }
  0x80   : > { %1035 = vmatpush.bf16.msra.mxu2 %v1444_v59  ;;  %v1483_v27 = vld [vmem:[%s1970_s13 + $0x180] sm:$0xf]  ;;  %v1598_v28 = vld [vmem:[%s1970_s13 + $0x184] sm:$0xf0]  ;;  %v1349_v30 = vld [vmem:[%s1970_s13 + $0x78] sm:$0xf0]  ;;  %v1420_v39 = vor.u32 %v1582_v25, %v1419_v24 }
  0x81   : > { %1048 = vmatpush.bf16.msra.mxu3 %v1508_v63  ;;  %v1579_v31 = vld [vmem:[%s1970_s13 + $0xf4] sm:$0xf]  ;;  %v606_v32 = vld [vmem:[%s1952_s30 + $0x8] sm:$0xff]  ;;  %v1484_v43 = vor.u32 %v1598_v28, %v1483_v27  ;;  %v1352_v44 = vor.u32 %v1563_v29, %v1349_v30  ;;  %v1561_v48 = vld [vmem:[%s1970_s13 + $0x64] sm:$0xf]  ;;  %p1545_p13 = scmp.ne.s32.totalorder %s1708_s17, 8 }
  0x82   : > { %1010 = vmatpush.bf16.msra.mxu0 %v1308_v5  ;;  %v1413_v34 = vld [vmem:[%s1970_s13 + $0xf8] sm:$0xf0]  ;;  %v1595_v35 = vld [vmem:[%s1970_s13 + $0x174] sm:$0xf]  ;;  %v675_v37 = vunpack.c.l.b16 %v606_v32  ;;  %v676_v42 = vunpack.c.h.b16 %v606_v32  ;;  %v1341_v49 = vld [vmem:[%s1970_s13 + $0x68] sm:$0xf0] }
  0x83   : > { %1023 = vmatpush.bf16.msra.mxu1 %v1372_v6  ;;  %v1477_v36 = vld [vmem:[%s1970_s13 + $0x178] sm:$0xf0]  ;;  %v1611_v40 = vld [vmem:[%s1970_s13 + $0x1f4] sm:$0xf]  ;;  %v1416_v46 = vor.u32 %v1579_v31, %v1413_v34  ;;  %v1577_v50 = vld [vmem:[%s1970_s13 + $0xe4] sm:$0xf]  ;;  %v1344_v62 = vor.u32 %v1561_v48, %v1341_v49 }
  0x84   : > { %1036 = vmatpush.bf16.msra.mxu2 %v1436_v7  ;;  %v1541_v41 = vld [vmem:[%s1970_s13 + $0x1f8] sm:$0xf0]  ;;  %v605_v45 = vld [vmem:[%s1952_s30] sm:$0xff]  ;;  %v1480_v47 = vor.u32 %v1595_v35, %v1477_v36  ;;  %v1405_v54 = vld [vmem:[%s1970_s13 + $0xe8] sm:$0xf0]  ;;  %v2053_v57 = vpack.c.b16 %v675_v37, %v675_v37  ;;  %v2057_v60 = vpack.c.b16 %v676_v42, %v676_v42 }
  0x85   : > { %1049 = vmatpush.bf16.msra.mxu3 %v1500_v11  ;;  %v673_v51 = vunpack.c.l.b16 %v605_v45  ;;  %v674_v52 = vunpack.c.h.b16 %v605_v45  ;;  %v1544_v53 = vor.u32 %v1611_v40, %v1541_v41  ;;  %v1593_v55 = vld [vmem:[%s1970_s13 + $0x164] sm:$0xf]  ;;  %v1469_v56 = vld [vmem:[%s1970_s13 + $0x168] sm:$0xf0]  ;;  %v1408_v0 = vor.u32 %v1577_v50, %v1405_v54  ;;  %v1559_v2 = vld [vmem:[%s1970_s13 + $0x54] sm:$0xf] }
  0x86   : > { %1011 = vmatpush.bf16.msra.mxu0 %v1300_v17  ;;  %v1609_v58 = vld [vmem:[%s1970_s13 + $0x1e4] sm:$0xf]  ;;  %v1533_v59 = vld [vmem:[%s1970_s13 + $0x1e8] sm:$0xf0]  ;;  %v1472_v1 = vor.u32 %v1593_v55, %v1469_v56  ;;  %v1333_v3 = vld [vmem:[%s1970_s13 + $0x58] sm:$0xf0] }
  0x87   : > { %1024 = vmatpush.bf16.msra.mxu1 %v1364_v21  ;;  %v2059_v61 = vpack.c.b16 %v673_v51, %v673_v51  ;;  %v2061_v63 = vpack.c.b16 %v674_v52, %v674_v52  ;;  %v1575_v4 = vld [vmem:[%s1970_s13 + $0xd4] sm:$0xf]  ;;  %v1536_v5 = vor.u32 %v1609_v58, %v1533_v59  ;;  %v1397_v6 = vld [vmem:[%s1970_s13 + $0xd8] sm:$0xf0]  ;;  %v1336_v11 = vor.u32 %v1559_v2, %v1333_v3  ;;  %v1557_v14 = vld [vmem:[%s1970_s13 + $0x44] sm:$0xf] }
  0x88   : > { %1037 = vmatpush.bf16.msra.mxu2 %v1428_v22  ;;  %v1591_v7 = vld [vmem:[%s1970_s13 + $0x154] sm:$0xf]  ;;  %v1461_v8 = vld [vmem:[%s1970_s13 + $0x158] sm:$0xf0]  ;;  %v1400_v12 = vor.u32 %v1575_v4, %v1397_v6  ;;  %v1325_v15 = vld [vmem:[%s1970_s13 + $0x48] sm:$0xf0] }
  0x89   : > { %1050 = vmatpush.bf16.msra.mxu3 %v1492_v26  ;;  %v1607_v9 = vld [vmem:[%s1970_s13 + $0x1d4] sm:$0xf]  ;;  %v1525_v10 = vld [vmem:[%s1970_s13 + $0x1d8] sm:$0xf0]  ;;  %v1464_v13 = vor.u32 %v1591_v7, %v1461_v8  ;;  %v1573_v16 = vld [vmem:[%s1970_s13 + $0xc4] sm:$0xf]  ;;  %v1328_v23 = vor.u32 %v1557_v14, %v1325_v15 }
  0x8a   : > { %1012 = vmatpush.bf16.msra.mxu0 %v1292_v33  ;;  %v1528_v17 = vor.u32 %v1607_v9, %v1525_v10  ;;  %v1389_v18 = vld [vmem:[%s1970_s13 + $0xc8] sm:$0xf0]  ;;  %v1589_v19 = vld [vmem:[%s1970_s13 + $0x144] sm:$0xf]  ;;  %v1555_v26 = vld [vmem:[%s1970_s13 + $0x34] sm:$0xf] }
  0x8b   : > { %1025 = vmatpush.bf16.msra.mxu1 %v1356_v38  ;;  %v1453_v20 = vld [vmem:[%s1970_s13 + $0x148] sm:$0xf0]  ;;  %v1605_v21 = vld [vmem:[%s1970_s13 + $0x1c4] sm:$0xf]  ;;  %v1392_v24 = vor.u32 %v1573_v16, %v1389_v18  ;;  %v1317_v27 = vld [vmem:[%s1970_s13 + $0x38] sm:$0xf0] }
  0x8c   : > { %1038 = vmatpush.bf16.msra.mxu2 %v1420_v39  ;;  %v1517_v22 = vld [vmem:[%s1970_s13 + $0x1c8] sm:$0xf0]  ;;  %v1456_v25 = vor.u32 %v1589_v19, %v1453_v20  ;;  %v1571_v28 = vld [vmem:[%s1970_s13 + $0xb4] sm:$0xf]  ;;  %v1381_v30 = vld [vmem:[%s1970_s13 + $0xb8] sm:$0xf0]  ;;  %v1320_v35 = vor.u32 %v1555_v26, %v1317_v27 }
  0x8d   : > { %1051 = vmatpush.bf16.msra.mxu3 %v1484_v43  ;;  %1013 = vmatmul.bf16.vlgmr.msra.gmra.mxu0 %v2059_v61  ;;  %v1520_v29 = vor.u32 %v1605_v21, %v1517_v22  ;;  %v1587_v31 = vld [vmem:[%s1970_s13 + $0x134] sm:$0xf]  ;;  %v1445_v32 = vld [vmem:[%s1970_s13 + $0x138] sm:$0xf0]  ;;  %v1384_v36 = vor.u32 %v1571_v28, %v1381_v30  ;;  %v1553_v38 = vld [vmem:[%s1970_s13 + $0x24] sm:$0xf] }
  0x8e   : > { %1057 = vmatpush.bf16.msrb.mxu0 %v1352_v44  ;;  %1026 = vmatmul.bf16.vlgmr.msra.gmra.mxu1 %v2061_v63  ;;  %v1603_v33 = vld [vmem:[%s1970_s13 + $0x1b4] sm:$0xf]  ;;  %v1509_v34 = vld [vmem:[%s1970_s13 + $0x1b8] sm:$0xf0]  ;;  %v1448_v37 = vor.u32 %v1587_v31, %v1445_v32  ;;  %v1309_v39 = vld [vmem:[%s1970_s13 + $0x28] sm:$0xf0] }
  0x8f   : > { %1070 = vmatpush.bf16.msrb.mxu1 %v1416_v46  ;;  %1039 = vmatmul.bf16.vlgmr.msra.gmra.mxu2 %v2053_v57  ;;  %v1569_v40 = vld [vmem:[%s1970_s13 + $0xa4] sm:$0xf]  ;;  %v1512_v41 = vor.u32 %v1603_v33, %v1509_v34  ;;  %v1373_v42 = vld [vmem:[%s1970_s13 + $0xa8] sm:$0xf0]  ;;  %v1551_v50 = vld [vmem:[%s1970_s13 + $0x14] sm:$0xf] }
  0x90   : > { %1083 = vmatpush.bf16.msrb.mxu2 %v1480_v47  ;;  %1052 = vmatmul.bf16.vlgmr.msra.gmra.mxu3 %v2057_v60  ;;  %v1585_v43 = vld [vmem:[%s1970_s13 + $0x124] sm:$0xf]  ;;  %v1437_v44 = vld [vmem:[%s1970_s13 + $0x128] sm:$0xf0]  ;;  %v1312_v47 = vor.u32 %v1553_v38, %v1309_v39  ;;  %v1376_v48 = vor.u32 %v1569_v40, %v1373_v42  ;;  %v1301_v51 = vld [vmem:[%s1970_s13 + $0x18] sm:$0xf0] }
  0x91   : > { %1096 = vmatpush.bf16.msrb.mxu3 %v1544_v53  ;;  %v1601_v45 = vld [vmem:[%s1970_s13 + $0x1a4] sm:$0xf]  ;;  %v1501_v46 = vld [vmem:[%s1970_s13 + $0x1a8] sm:$0xf0]  ;;  %v1440_v49 = vor.u32 %v1585_v43, %v1437_v44  ;;  %v1567_v52 = vld [vmem:[%s1970_s13 + $0x94] sm:$0xf] }
  0x92   : > { %1058 = vmatpush.bf16.msrb.mxu0 %v1344_v62  ;;  %v1504_v53 = vor.u32 %v1601_v45, %v1501_v46  ;;  %v1365_v54 = vld [vmem:[%s1970_s13 + $0x98] sm:$0xf0]  ;;  %v1583_v55 = vld [vmem:[%s1970_s13 + $0x114] sm:$0xf]  ;;  %v1304_v62 = vor.u32 %v1551_v50, %v1301_v51  ;;  %v1549_v2 = vld [vmem:[%s1970_s13 + $0x4] sm:$0xf] }
  0x93   : > { %1071 = vmatpush.bf16.msrb.mxu1 %v1408_v0  ;;  %v1429_v56 = vld [vmem:[%s1970_s13 + $0x118] sm:$0xf0]  ;;  %v1599_v58 = vld [vmem:[%s1970_s13 + $0x194] sm:$0xf]  ;;  %v1368_v0 = vor.u32 %v1567_v52, %v1365_v54  ;;  %v1293_v3 = vld [vmem:[%s1970_s13 + $0x8] sm:$0xf0] }
  0x94   : > { %1084 = vmatpush.bf16.msrb.mxu2 %v1472_v1  ;;  %v1493_v59 = vld [vmem:[%s1970_s13 + $0x198] sm:$0xf0]  ;;  %v1432_v1 = vor.u32 %v1583_v55, %v1429_v56  ;;  %v1565_v4 = vld [vmem:[%s1970_s13 + $0x84] sm:$0xf]  ;;  %v1357_v6 = vld [vmem:[%s1970_s13 + $0x88] sm:$0xf0] }
  0x95   : > { %1097 = vmatpush.bf16.msrb.mxu3 %v1536_v5  ;;  %v1496_v5 = vor.u32 %v1599_v58, %v1493_v59  ;;  %v1581_v7 = vld [vmem:[%s1970_s13 + $0x104] sm:$0xf]  ;;  %v1421_v8 = vld [vmem:[%s1970_s13 + $0x108] sm:$0xf0]  ;;  %v603_v21 = vld [vmem:[#allocation2] sm:$0xff] }
  0x96   : > { %1059 = vmatpush.bf16.msrb.mxu0 %v1336_v11  ;;  %v1597_v9 = vld [vmem:[%s1970_s13 + $0x184] sm:$0xf]  ;;  %v1485_v10 = vld [vmem:[%s1970_s13 + $0x188] sm:$0xf0]  ;;  %v1296_v11 = vor.u32 %v1549_v2, %v1293_v3  ;;  %v604_v31 = vld [vmem:[#allocation2 + $0x8] sm:$0xff] }
  0x97   : > { %1072 = vmatpush.bf16.msrb.mxu1 %v1400_v12  ;;  %v1360_v12 = vor.u32 %v1565_v4, %v1357_v6  ;;  %v1488_v14 = vor.u32 %v1597_v9, %v1485_v10 }
  0x98   : > { %1085 = vmatpush.bf16.msrb.mxu2 %v1464_v13  ;;  %v1424_v13 = vor.u32 %v1581_v7, %v1421_v8 }
  0x99   : > { %1098 = vmatpush.bf16.msrb.mxu3 %v1528_v17 }
  0x9a   : > { %1060 = vmatpush.bf16.msrb.mxu0 %v1328_v23 }
  0x9b   : > { %1073 = vmatpush.bf16.msrb.mxu1 %v1392_v24 }
  0x9c   : > { %1086 = vmatpush.bf16.msrb.mxu2 %v1456_v25 }
  0x9d   : > { %1099 = vmatpush.bf16.msrb.mxu3 %v1520_v29 }
  0x9e   : > { %1061 = vmatpush.bf16.msrb.mxu0 %v1320_v35 }
  0x9f   : > { %1074 = vmatpush.bf16.msrb.mxu1 %v1384_v36 }
  0xa0   : > { %1087 = vmatpush.bf16.msrb.mxu2 %v1448_v37 }
  0xa1   : > { %1100 = vmatpush.bf16.msrb.mxu3 %v1512_v41 }
  0xa2   : > { %1062 = vmatpush.bf16.msrb.mxu0 %v1312_v47 }
  0xa3   : > { %1075 = vmatpush.bf16.msrb.mxu1 %v1376_v48 }
  0xa4   : > { %1088 = vmatpush.bf16.msrb.mxu2 %v1440_v49 }
  0xa5   : > { %1101 = vmatpush.bf16.msrb.mxu3 %v1504_v53 }
  0xa6   : > { %1063 = vmatpush.bf16.msrb.mxu0 %v1304_v62 }
  0xa7   : > { %1076 = vmatpush.bf16.msrb.mxu1 %v1368_v0 }
  0xa8   : > { %1089 = vmatpush.bf16.msrb.mxu2 %v1432_v1 }
  0xa9   : > { %1102 = vmatpush.bf16.msrb.mxu3 %v1496_v5 }
  0xaa   : > { %1064 = vmatpush.bf16.msrb.mxu0 %v1296_v11 }
  0xab   : > { %1077 = vmatpush.bf16.msrb.mxu1 %v1360_v12 }
  0xac   : > { %1090 = vmatpush.bf16.msrb.mxu2 %v1424_v13 }
  0xad   : > { %1103 = vmatpush.bf16.msrb.mxu3 %v1488_v14  ;;  %1065 = vmatmul.bf16.vlgmr.msrb.gmra.mxu0 %v2059_v61 }
  0xae   : > { %1078 = vmatmul.bf16.vlgmr.msrb.gmra.mxu1 %v2061_v63 }
  0xaf   : > { %1091 = vmatmul.bf16.vlgmr.msrb.gmra.mxu2 %v2053_v57 }
  0xb0   : > { %1104 = vmatmul.bf16.vlgmr.msrb.gmra.mxu3 %v2057_v60 }
 0x10a   : > { %v1014_v15 = vpop.f32.mrf.mxu0 }
 0x10b   : > { %v1027_v16 = vpop.f32.mrf.mxu1 }
 0x10c   : > { %v1028_v17 = vadd.f32 %v1027_v16, %v1014_v15 }
 0x112   : > { %v1040_v18 = vpop.f32.mrf.mxu2  ;;  %v1016_v23 = vpop.f32.mrf.mxu0 }
 0x113   : > { %v1041_v19 = vadd.f32 %v1040_v18, %v1028_v17  ;;  %v1053_v20 = vpop.f32.mrf.mxu3  ;;  %v1029_v24 = vpop.f32.mrf.mxu1 }
 0x115   : > { %v1054_v22 = vadd.f32 %v1053_v20, %v1041_v19 }
 0x117   : > { %v1109_v25 = vadd.f32 %v1054_v22, %v603_v21 }
 0x119   : > { %1111 = vst [vmem:[#allocation2] sm:$0xff] %v1109_v25 }
 0x11a   : > { %v1042_v26 = vpop.f32.mrf.mxu2 }
 0x11b   : > { %v1055_v61 = vpop.f32.mrf.mxu3 }
 0x12a   : > { %v1066_v27 = vpop.f32.mrf.mxu0 }
 0x12b   : > { %v1079_v63 = vpop.f32.mrf.mxu1 }
 0x12c   : > { %v1080_v28 = vadd.f32 %v1079_v63, %v1066_v27 }
 0x132   : > { %v1092_v57 = vpop.f32.mrf.mxu2  ;;  %v1068_v30 = vpop.f32.mrf.mxu0 }
 0x133   : > { %v1093_v29 = vadd.f32 %v1092_v57, %v1080_v28  ;;  %v1105_v60 = vpop.f32.mrf.mxu3  ;;  %v1081_v32 = vpop.f32.mrf.mxu1 }
 0x135   : > { %v1106_v33 = vadd.f32 %v1105_v60, %v1093_v29 }
 0x137   : > { %v1110_v34 = vadd.f32 %v1106_v33, %v604_v31  ;;  %1116 = sbr.rel (%p1545_p13) target bundleno = 328 (0x148), region = 82 }
 0x139   : > { %1112 = vst [vmem:[#allocation2 + $0x8] sm:$0xff] %v1110_v34 }
 0x13a   : > { %v1094_v35 = vpop.f32.mrf.mxu2 }
 0x13b   : > { %v1107_v36 = vpop.f32.mrf.mxu3 }
 0x13c   : > { %v1117_v37 = vld [vmem:[#allocation2] sm:$0xff] }
 0x13d   : > { %v1119_v38 = vld [vmem:[%s580_s15] sm:$0x3] }
 0x13e   : > { %v1127_v39 = vld [vmem:[%s585_s18] sm:$0x3]  ;;  %v1121_v40 = vperm.slane %v1119_v38, 0  ;;  %v1122_v43 = vperm.slane %v1119_v38, 1 }
 0x13f   : > { %v1129_v41 = vperm.slane %v1127_v39, 0  ;;  %v1130_v44 = vperm.slane %v1127_v39, 1 }
 0x140   : > { %v1118_v42 = vld [vmem:[#allocation2 + $0x8] sm:$0xff]  ;;  %v1125_v45 = vmul.f32 %v1121_v40, %v1117_v37 }
 0x141   : > { %v1126_v46 = vmul.f32 %v1122_v43, %v1118_v42 }
 0x142   : > { %v1133_v47 = vadd.f32 %v1129_v41, %v1125_v45 }
 0x143   : > { %v1134_v48 = vadd.f32 %v1130_v44, %v1126_v46 }
 0x144   : > { %v1135_v49 = vmax.f32 %v1133_v47, 0.0 }
 0x145   : > { %v1136_v50 = vmax.f32 %v1134_v48, 0.0 }
 0x146   : > { %1137 = vst [vmem:[%s1968_s12] sm:$0xff] %v1135_v49 }
 0x147   : > { %1138 = vst [vmem:[%s1968_s12 + $0x8] sm:$0xff] %v1136_v50 }
 0x148 PF: > { %s14_s21 = sadd.s32 1, %s1724_s21   ;;  %s2158_s15 = smov %s1704_s16 }
 0x149   : > { %p11_p0 = scmp.ge.s32.totalorder %s14_s21, 20   ;;  %s2159_s16 = smov %s1803_s28 }
 0x14a   : > { %s2160_s17 = smov %s1716_s19  ;;  %s2161_s18 = smov %s1720_s20 }
 0x14b   : > { %s2162_s19 = smov %s2165_s22  ;;  %s2163_s20 = smov %s2169_s23 }
 0x14c   :  { %13 = sbr.rel (!%p11_p0) target bundleno = 4 (0x4), region = 126 }

// kernel: single_baseline_forward.43
= control target key start
LH: loop header
LB: loop body
LE: loop exit
PB: predicated region body
PF: predicated region fallthrough
CT: control target
= control target key end

     0   :  { %vm129_vm0 = vcmask 1041409   ;;  %s687_s1 = inlined_call_operand.vmem [shape: bf16[512,128], index: 1, kind: input, shape index: {}]   ;;  %s688_s0 = inlined_call_operand.vmem [shape: f32[2,1,512], index: 0, kind: input, shape index: {}]   ;;  %s689_s2 = inlined_call_operand.vmem [shape: f32[1,128], index: 2, kind: input, shape index: {}]   ;;  %s690_s3 = inlined_call_operand.vmem [shape: f32[2,128], index: 3, kind: output, shape index: {}]  }
   0x1   :  { %v529_v0 = vld [vmem:[%s687_s1 + $0x38] sm:$0xff]  ;;  %v528_v4 = vld [vmem:[%s687_s1 + $0x30] sm:$0xff]  ;;  %v527_v8 = vld [vmem:[%s687_s1 + $0x28] sm:$0xff] }
   0x2   :  { %v537_v1 = vld [vmem:[%s687_s1 + $0x78] sm:$0xff]  ;;  %337 = vmatpush.bf16.msra.mxu0 %v529_v0  ;;  %v536_v5 = vld [vmem:[%s687_s1 + $0x70] sm:$0xff]  ;;  %v535_v9 = vld [vmem:[%s687_s1 + $0x68] sm:$0xff] }
   0x3   :  { %v545_v2 = vld [vmem:[%s687_s1 + $0xb8] sm:$0xff]  ;;  %350 = vmatpush.bf16.msra.mxu1 %v537_v1  ;;  %v544_v6 = vld [vmem:[%s687_s1 + $0xb0] sm:$0xff]  ;;  %v543_v10 = vld [vmem:[%s687_s1 + $0xa8] sm:$0xff] }
   0x4   :  { %v553_v3 = vld [vmem:[%s687_s1 + $0xf8] sm:$0xff]  ;;  %363 = vmatpush.bf16.msra.mxu2 %v545_v2  ;;  %v552_v7 = vld [vmem:[%s687_s1 + $0xf0] sm:$0xff]  ;;  %v551_v11 = vld [vmem:[%s687_s1 + $0xe8] sm:$0xff] }
   0x5   :  { %376 = vmatpush.bf16.msra.mxu3 %v553_v3  ;;  %v526_v12 = vld [vmem:[%s687_s1 + $0x20] sm:$0xff]  ;;  %v525_v22 = vld [vmem:[%s687_s1 + $0x18] sm:$0xff]  ;;  %v524_v34 = vld [vmem:[%s687_s1 + $0x10] sm:$0xff] }
   0x6   :  { %338 = vmatpush.bf16.msra.mxu0 %v528_v4  ;;  %v534_v13 = vld [vmem:[%s687_s1 + $0x60] sm:$0xff]  ;;  %v533_v23 = vld [vmem:[%s687_s1 + $0x58] sm:$0xff]  ;;  %v532_v35 = vld [vmem:[%s687_s1 + $0x50] sm:$0xff] }
   0x7   :  { %351 = vmatpush.bf16.msra.mxu1 %v536_v5  ;;  %v542_v14 = vld [vmem:[%s687_s1 + $0xa0] sm:$0xff]  ;;  %v541_v28 = vld [vmem:[%s687_s1 + $0x98] sm:$0xff]  ;;  %v540_v40 = vld [vmem:[%s687_s1 + $0x90] sm:$0xff] }
   0x8   :  { %364 = vmatpush.bf16.msra.mxu2 %v544_v6  ;;  %v550_v15 = vld [vmem:[%s687_s1 + $0xe0] sm:$0xff]  ;;  %v549_v29 = vld [vmem:[%s687_s1 + $0xd8] sm:$0xff]  ;;  %v548_v41 = vld [vmem:[%s687_s1 + $0xd0] sm:$0xff] }
   0x9   :  { %377 = vmatpush.bf16.msra.mxu3 %v552_v7  ;;  %v14_v16 = vld [vmem:[%s688_s0] sm:$0xf]  ;;  %v15_v17 = vld [vmem:[%s688_s0 + $0x4] sm:$0xf]  ;;  %v523_v46 = vld [vmem:[%s687_s1 + $0x8] sm:$0xff] }
   0xa   :  { %339 = vmatpush.bf16.msra.mxu0 %v527_v8  ;;  %v24_v18 = vperm.slane %v15_v17, 0  ;;  %v25_v19 = vperm.slane %v15_v17, 1  ;;  %v26_v20 = vperm.slane %v15_v17, 2  ;;  %v27_v21 = vperm.slane %v15_v17, 3  ;;  %v531_v47 = vld [vmem:[%s687_s1 + $0x48] sm:$0xff]  ;;  %v522_v58 = vld [vmem:[%s687_s1] sm:$0xff] }
   0xb   :  { %352 = vmatpush.bf16.msra.mxu1 %v535_v9  ;;  %v20_v24 = vperm.slane %v14_v16, 0  ;;  %v21_v26 = vperm.slane %v14_v16, 1  ;;  %v22_v30 = vperm.slane %v14_v16, 2  ;;  %v23_v32 = vperm.slane %v14_v16, 3  ;;  %v539_v52 = vld [vmem:[%s687_s1 + $0x88] sm:$0xff]  ;;  %v530_v59 = vld [vmem:[%s687_s1 + $0x40] sm:$0xff] }
   0xc   :  { %365 = vmatpush.bf16.msra.mxu2 %v543_v10  ;;  %v40_v25 = vpack.c.bf16 %v24_v18, %v24_v18  ;;  %v41_v27 = vpack.c.bf16 %v25_v19, %v25_v19  ;;  %v42_v31 = vpack.c.bf16 %v26_v20, %v26_v20  ;;  %v43_v33 = vpack.c.bf16 %v27_v21, %v27_v21  ;;  %v547_v53 = vld [vmem:[%s687_s1 + $0xc8] sm:$0xff]  ;;  %v538_v62 = vld [vmem:[%s687_s1 + $0x80] sm:$0xff] }
   0xd   :  { %378 = vmatpush.bf16.msra.mxu3 %v551_v11  ;;  %v36_v36 = vpack.c.bf16 %v20_v24, %v20_v24  ;;  %v37_v38 = vpack.c.bf16 %v21_v26, %v21_v26  ;;  %v38_v42 = vpack.c.bf16 %v22_v30, %v22_v30  ;;  %v39_v44 = vpack.c.bf16 %v23_v32, %v23_v32  ;;  %v546_v63 = vld [vmem:[%s687_s1 + $0xc0] sm:$0xff] }
   0xe   :  { %340 = vmatpush.bf16.msra.mxu0 %v526_v12  ;;  %v124_v37 = vunpack.c.l.b16 %v40_v25  ;;  %v125_v39 = vunpack.c.l.b16 %v41_v27  ;;  %v126_v43 = vunpack.c.l.b16 %v42_v31  ;;  %v127_v45 = vunpack.c.l.b16 %v43_v33  ;;  %v554_v6 = vld [vmem:[%s689_s2] ss:$0 sm:$0xff] }
   0xf   :  { %353 = vmatpush.bf16.msra.mxu1 %v534_v13  ;;  %v120_v48 = vunpack.c.l.b16 %v36_v36  ;;  %v121_v50 = vunpack.c.l.b16 %v37_v38  ;;  %v122_v54 = vunpack.c.l.b16 %v38_v42  ;;  %v123_v56 = vunpack.c.l.b16 %v39_v44 }
  0x10   :  { %366 = vmatpush.bf16.msra.mxu2 %v542_v14  ;;  %v128_v49 = vrot.slane %v124_v37, 7  ;;  %v131_v51 = vrot.slane %v125_v39, 7  ;;  %v133_v55 = vrot.slane %v126_v43, 7  ;;  %v135_v57 = vrot.slane %v127_v45, 7 }
  0x11   :  { %379 = vmatpush.bf16.msra.mxu3 %v550_v15 }
  0x12   :  { %341 = vmatpush.bf16.msra.mxu0 %v525_v22  ;;  %v130_v60 = vsel %vm129_vm0, %v128_v49, %v120_v48  ;;  %v132_v61 = vsel %vm129_vm0, %v131_v51, %v121_v50  ;;  %v134_v0 = vsel %vm129_vm0, %v133_v55, %v122_v54  ;;  %v136_v1 = vsel %vm129_vm0, %v135_v57, %v123_v56 }
  0x13   :  { %354 = vmatpush.bf16.msra.mxu1 %v533_v23  ;;  %v137_v2 = vpack.c.b16 %v130_v60, %v130_v60  ;;  %v138_v3 = vpack.c.b16 %v132_v61, %v132_v61  ;;  %v139_v4 = vpack.c.b16 %v134_v0, %v134_v0  ;;  %v140_v5 = vpack.c.b16 %v136_v1, %v136_v1 }
  0x14   :  { %367 = vmatpush.bf16.msra.mxu2 %v541_v28 }
  0x15   :  { %380 = vmatpush.bf16.msra.mxu3 %v549_v29 }
  0x16   :  { %342 = vmatpush.bf16.msra.mxu0 %v524_v34 }
  0x17   :  { %355 = vmatpush.bf16.msra.mxu1 %v532_v35 }
  0x18   :  { %368 = vmatpush.bf16.msra.mxu2 %v540_v40 }
  0x19   :  { %381 = vmatpush.bf16.msra.mxu3 %v548_v41 }
  0x1a   :  { %343 = vmatpush.bf16.msra.mxu0 %v523_v46 }
  0x1b   :  { %356 = vmatpush.bf16.msra.mxu1 %v531_v47 }
  0x1c   :  { %369 = vmatpush.bf16.msra.mxu2 %v539_v52 }
  0x1d   :  { %382 = vmatpush.bf16.msra.mxu3 %v547_v53 }
  0x1e   :  { %344 = vmatpush.bf16.msra.mxu0 %v522_v58 }
  0x1f   :  { %357 = vmatpush.bf16.msra.mxu1 %v530_v59 }
  0x20   :  { %370 = vmatpush.bf16.msra.mxu2 %v538_v62 }
  0x21   :  { %383 = vmatpush.bf16.msra.mxu3 %v546_v63  ;;  %345 = vmatmul.bf16.vlgmr.msra.gmra.mxu0 %v137_v2 }
  0x22   :  { %358 = vmatmul.bf16.vlgmr.msra.gmra.mxu1 %v138_v3 }
  0x23   :  { %371 = vmatmul.bf16.vlgmr.msra.gmra.mxu2 %v139_v4 }
  0x24   :  { %384 = vmatmul.bf16.vlgmr.msra.gmra.mxu3 %v140_v5 }
  0x9e   :  { %v346_v7 = vpop.f32.mrf.mxu0 }
  0x9f   :  { %v359_v8 = vpop.f32.mrf.mxu1  ;;  %v347_v9 = vadd.f32 %v554_v6, %v346_v7 }
  0xa1   :  { %v360_v10 = vadd.f32 %v359_v8, %v347_v9 }
  0xa6   :  { %v372_v11 = vpop.f32.mrf.mxu2  ;;  %v348_v14 = vpop.f32.mrf.mxu0 }
  0xa7   :  { %v385_v12 = vpop.f32.mrf.mxu3  ;;  %v373_v13 = vadd.f32 %v372_v11, %v360_v10  ;;  %v361_v15 = vpop.f32.mrf.mxu1 }
  0xa9   :  { %v386_v16 = vadd.f32 %v385_v12, %v373_v13 }
  0xab   :  { %389 = vst [vmem:[%s690_s3] sm:$0x3] %v386_v16 }
  0xae   :  { %v374_v17 = vpop.f32.mrf.mxu2 }
  0xaf   :  { %v387_v18 = vpop.f32.mrf.mxu3 }

</bundles_post_ra>
